<compile_context>
chip_gen: v7x
topology: tpu7x:2x2x1
jax: 0.10.0
libtpu: 0.0.40
codegen_flags: <defaults>
</compile_context>

<pallas_src>
import functools

import jax
import jax.numpy as jnp
from jax.experimental import pallas as pl
from jax.experimental.pallas import tpu as pltpu


def _round_up(x, m):
    return ((x + m - 1) // m) * m


def _pick_tm(M, cap=512):
    t = cap
    while t > 8 and M % t:
        t //= 2
    return t


# ----------------------------------------------------------------------------
# Pallas kernels
# ----------------------------------------------------------------------------

def _mm_stats_kernel(a_ref, b_ref, o_ref, st_ref):
    """out = A @ B (bf16 MXU, f32 acc); also emits per-block channel sum/sumsq."""
    acc = jnp.dot(a_ref[...], b_ref[...], preferred_element_type=jnp.float32)
    o_ref[...] = acc.astype(o_ref.dtype)
    s = jnp.sum(acc, axis=0, keepdims=True)
    q = jnp.sum(acc * acc, axis=0, keepdims=True)
    row = jax.lax.broadcasted_iota(jnp.int32, st_ref.shape, 0)
    st_ref[...] = jnp.where(row == 0, s, jnp.where(row == 1, q, 0.0))


def _mm_bias_tanh_kernel(a_ref, b_ref, bias_ref, o_ref):
    """out = tanh(A @ B + bias) — final layer, bias+activation fused."""
    acc = jnp.dot(a_ref[...], b_ref[...], preferred_element_type=jnp.float32)
    o_ref[...] = jnp.tanh(acc + bias_ref[...]).astype(o_ref.dtype)


def _affine_kernel(x_ref, scale_ref, shift_ref, o_ref, *, relu):
    """BN apply (+ optional ReLU): y = x*scale + shift."""
    y = x_ref[...].astype(jnp.float32) * scale_ref[...] + shift_ref[...]
    if relu:
        y = jnp.maximum(y, 0.0)
    o_ref[...] = y.astype(o_ref.dtype)


def _affine_residual_kernel(x_ref, scale_ref, shift_ref, r_ref, o_ref):
    """BN apply + residual add (ResnetBlock tail): y = x*scale + shift + res."""
    y = (x_ref[...].astype(jnp.float32) * scale_ref[...] + shift_ref[...]
         + r_ref[...].astype(jnp.float32))
    o_ref[...] = y.astype(o_ref.dtype)


# ----------------------------------------------------------------------------
# Pallas wrappers
# ----------------------------------------------------------------------------

def pallas_matmul_stats(a, b, *, out_dtype=jnp.bfloat16, tm_cap=512):
    """(M, K) @ (K, N) -> (M, Np) out_dtype plus per-channel sum / sumsq (f32)."""
    M, K = a.shape
    K2, N = b.shape
    assert K == K2 and M % 8 == 0
    Kp, Np = _round_up(K, 128), _round_up(N, 128)
    tm, tn = _pick_tm(M, tm_cap), 128
    gm, gn = M // tm, Np // tn

    a_p = a.astype(jnp.bfloat16)
    if Kp != K:
        a_p = jnp.pad(a_p, ((0, 0), (0, Kp - K)))
    b_p = jnp.pad(b.astype(jnp.bfloat16), ((0, Kp - K), (0, Np - N)))

    out, st = pl.pallas_call(
        _mm_stats_kernel,
        out_shape=(jax.ShapeDtypeStruct((M, Np), out_dtype),
                   jax.ShapeDtypeStruct((gm * 8, Np), jnp.float32)),
        grid_spec=pltpu.PrefetchScalarGridSpec(
            num_scalar_prefetch=0,
            grid=(gm, gn),
            in_specs=[pl.BlockSpec((tm, Kp), lambda i, j: (i, 0)),
                      pl.BlockSpec((Kp, tn), lambda i, j: (0, j))],
            out_specs=(pl.BlockSpec((tm, tn), lambda i, j: (i, j)),
                       pl.BlockSpec((8, tn), lambda i, j: (i, j)))),
        compiler_params=pltpu.CompilerParams(
            dimension_semantics=("parallel", "parallel")),
    )(a_p, b_p)

    st = st.reshape(gm, 8, Np)
    return out, st[:, 0, :].sum(axis=0), st[:, 1, :].sum(axis=0)


def pallas_matmul_bias_tanh(a, b, bias, *, out_dtype=jnp.float32, tm_cap=512):
    M, K = a.shape
    K2, N = b.shape
    assert K == K2 and M % 8 == 0
    Kp, Np = _round_up(K, 128), _round_up(N, 128)
    tm, tn = _pick_tm(M, tm_cap), 128
    gm, gn = M // tm, Np // tn

    a_p = a.astype(jnp.bfloat16)
    if Kp != K:
        a_p = jnp.pad(a_p, ((0, 0), (0, Kp - K)))
    b_p = jnp.pad(b.astype(jnp.bfloat16), ((0, Kp - K), (0, Np - N)))
    bias_p = jnp.pad(bias.astype(jnp.float32), (0, Np - N)).reshape(1, Np)

    return pl.pallas_call(
        _mm_bias_tanh_kernel,
        out_shape=jax.ShapeDtypeStruct((M, Np), out_dtype),
        grid_spec=pltpu.PrefetchScalarGridSpec(
            num_scalar_prefetch=0,
            grid=(gm, gn),
            in_specs=[pl.BlockSpec((tm, Kp), lambda i, j: (i, 0)),
                      pl.BlockSpec((Kp, tn), lambda i, j: (0, j)),
                      pl.BlockSpec((1, tn), lambda i, j: (0, j))],
            out_specs=pl.BlockSpec((tm, tn), lambda i, j: (i, j))),
        compiler_params=pltpu.CompilerParams(
            dimension_semantics=("parallel", "parallel")),
    )(a_p, b_p, bias_p)


def pallas_affine(x, scale, shift, *, residual=None, relu=False,
                  out_dtype=jnp.bfloat16, tm_cap=512):
    """y = x*scale + shift [+ residual] [relu], tiled lane-dense (M, Np)."""
    M, Np = x.shape
    assert M % 8 == 0 and Np % 128 == 0
    tm, tn = _pick_tm(M, tm_cap), 128
    gm, gn = M // tm, Np // tn
    scale2 = scale.astype(jnp.float32).reshape(1, Np)
    shift2 = shift.astype(jnp.float32).reshape(1, Np)

    blk_spec = pl.BlockSpec((tm, tn), lambda i, j: (i, j))
    vec_spec = pl.BlockSpec((1, tn), lambda i, j: (0, j))
    if residual is None:
        kernel = functools.partial(_affine_kernel, relu=relu)
        in_specs = [blk_spec, vec_spec, vec_spec]
        args = (x, scale2, shift2)
    else:
        assert not relu
        kernel = _affine_residual_kernel
        in_specs = [blk_spec, vec_spec, vec_spec, blk_spec]
        args = (x, scale2, shift2, residual)

    return pl.pallas_call(
        kernel,
        out_shape=jax.ShapeDtypeStruct((M, Np), out_dtype),
        grid_spec=pltpu.PrefetchScalarGridSpec(
            num_scalar_prefetch=0, grid=(gm, gn),
            in_specs=in_specs, out_specs=blk_spec),
        compiler_params=pltpu.CompilerParams(
            dimension_semantics=("parallel", "parallel")),
    )(*args)


# ----------------------------------------------------------------------------
# Plain-JAX glue: im2col gathers, weight reshapes, BN scale/shift
# ----------------------------------------------------------------------------

def _to5d(slab, dims):
    N, D, H, W, C = dims
    return slab[:, :C].reshape(N, D, H, W, C)


def im2col_stride1(x5d, k, pad, pad_mode):
    """k^3 stride-1 conv patches, channels-last. Returns (N*D*H*W, k^3*C)."""
    N, D, H, W, C = x5d.shape
    xp = jnp.pad(x5d, ((0, 0), (pad, pad), (pad, pad), (pad, pad), (0, 0)),
                 mode=pad_mode)
    cols = []
    for kd in range(k):
        for kh in range(k):
            for kw in range(k):
                cols.append(xp[:, kd:kd + D, kh:kh + H, kw:kw + W, :])
    a = jnp.concatenate(cols, axis=-1)
    return a.reshape(N * D * H * W, k * k * k * C)


def im2col_stride2(x5d):
    """3x3x3 stride-2 pad-1(zeros) conv patches; output spatial = D//2."""
    N, D, H, W, C = x5d.shape
    Do, Ho, Wo = D // 2, H // 2, W // 2
    xp = jnp.pad(x5d, ((0, 0), (1, 1), (1, 1), (1, 1), (0, 0)))
    cols = []
    for kd in range(3):
        for kh in range(3):
            for kw in range(3):
                cols.append(xp[:, kd:kd + D:2, kh:kh + H:2, kw:kw + W:2, :])
    a = jnp.concatenate(cols, axis=-1)
    return a.reshape(N * Do * Ho * Wo, 27 * C), (N, Do, Ho, Wo)


def im2col_subpixel(x5d):
    """2x2x2 window (right zero-pad 1) for the subpixel transposed conv."""
    N, D, H, W, C = x5d.shape
    xp = jnp.pad(x5d, ((0, 0), (0, 1), (0, 1), (0, 1), (0, 0)))
    cols = []
    for td in range(2):
        for th in range(2):
            for tw in range(2):
                cols.append(xp[:, td:td + D, th:th + H, tw:tw + W, :])
    a = jnp.concatenate(cols, axis=-1)
    return a.reshape(N * D * H * W, 8 * C)


def conv_weight_matrix(w):
    """Conv3d weight (Cout, Cin, k, k, k) -> (k^3*Cin, Cout), tap-major rows."""
    Cout, Cin, k = w.shape[0], w.shape[1], w.shape[2]
    return jnp.transpose(w, (2, 3, 4, 1, 0)).reshape(k * k * k * Cin, Cout)


def conv_transpose_weight_matrix(w):
    """ConvTranspose3d weight (Cin, Cout, 3,3,3) -> (8*Cin, 8*Cout) subpixel
    matrix; rows ordered (2x2x2 tap, cin), columns ordered (phase, cout).
    Phase r in {0,1}^3 of the 2x-upsampled grid; out[2m+r] = sum_t x[m+t]*w[sel(r,t)]."""
    Cin, Cout = w.shape[0], w.shape[1]
    sel = ((1, -1), (2, 0))  # sel[r][t] -> kernel index, -1 = no contribution
    Wm = jnp.zeros((8, Cin, 8, Cout), jnp.float32)
    for rd in range(2):
        for rh in range(2):
            for rw in range(2):
                phase = (rd * 2 + rh) * 2 + rw
                for td in range(2):
                    for th in range(2):
                        for tw in range(2):
                            kd, kh, kw = sel[rd][td], sel[rh][th], sel[rw][tw]
                            if kd < 0 or kh < 0 or kw < 0:
                                continue
                            tap = (td * 2 + th) * 2 + tw
                            Wm = Wm.at[tap, :, phase, :].set(w[:, :, kd, kh, kw])
    return Wm.reshape(8 * Cin, 8 * Cout)


def _bn_scale_shift(sums, sqs, count, gamma, beta, eps):
    mean = sums / count
    var = sqs / count - mean * mean          # biased variance (PyTorch BN)
    inv = jax.lax.rsqrt(var + eps)
    scale = gamma * inv
    shift = beta - mean * scale
    return scale, shift


# ----------------------------------------------------------------------------
# Layers
# ----------------------------------------------------------------------------

def conv3d_bn(x5d, w, gamma, beta, *, stride=1, pad=1, pad_mode="edge",
              relu=True, residual=None, eps=1e-5):
    """Conv3d(bias=False) + BatchNorm3d(batch stats) [+ ReLU] [+ residual add]."""
    N, D, H, W, C = x5d.shape
    Cout, Cin, k = w.shape[0], w.shape[1], w.shape[2]
    assert Cin == C
    if stride == 1:
        A = im2col_stride1(x5d, k, pad, pad_mode)
        odims = (N, D, H, W)
    else:
        A, odims = im2col_stride2(x5d)
    M = A.shape[0]
    out, sums, sqs = pallas_matmul_stats(A, conv_weight_matrix(w))
    Np = out.shape[1]
    scale, shift = _bn_scale_shift(sums[:Cout], sqs[:Cout], float(M),
                                   gamma, beta, eps)
    scale = jnp.pad(scale, (0, Np - Cout))
    shift = jnp.pad(shift, (0, Np - Cout))
    slab = pallas_affine(out, scale, shift, residual=residual, relu=relu)
    return slab, (*odims, Cout)


def conv_transpose3d_bn_relu(x5d, w, gamma, beta, *, eps=1e-5):
    """ConvTranspose3d(k=3,s=2,p=1,op=1,bias=False) + BN + ReLU (subpixel form)."""
    N, D, H, W, C = x5d.shape
    Cin, Cout = w.shape[0], w.shape[1]
    assert Cin == C
    A = im2col_subpixel(x5d)                            # (M, 8*Cin)
    M = A.shape[0]
    out, sums, sqs = pallas_matmul_stats(A, conv_transpose_weight_matrix(w))
    Np = out.shape[1]
    ncol = 8 * Cout
    s_c = sums[:ncol].reshape(8, Cout).sum(axis=0)      # stats per channel over phases
    q_c = sqs[:ncol].reshape(8, Cout).sum(axis=0)
    scale, shift = _bn_scale_shift(s_c, q_c, float(8 * M), gamma, beta, eps)
    scale = jnp.pad(jnp.tile(scale, 8), (0, Np - ncol))
    shift = jnp.pad(jnp.tile(shift, 8), (0, Np - ncol))
    y = pallas_affine(out, scale, shift, relu=True)     # normalize pre-interleave
    y = y[:, :ncol].reshape(N, D, H, W, 2, 2, 2, Cout)
    y = jnp.transpose(y, (0, 1, 4, 2, 5, 3, 6, 7))
    return y.reshape(N, 2 * D, 2 * H, 2 * W, Cout)


def final_conv7_tanh(x5d, w, bias):
    """ReplicationPad3d(3) + Conv3d(k=7, bias=True) + Tanh (bias+tanh fused)."""
    N, D, H, W, C = x5d.shape
    Cout = w.shape[0]
    A = im2col_stride1(x5d, 7, 3, "edge")
    out = pallas_matmul_bias_tanh(A, conv_weight_matrix(w), bias)
    return out[:, :Cout].reshape(N, D, H, W, Cout)


# ----------------------------------------------------------------------------
# ResnetGenerator: parameters + forward
# ----------------------------------------------------------------------------

def build_resnet_generator_params(key, input_nc, output_nc, ngf, n_blocks):
    keys = iter(list(jax.random.split(key, 64)))

    def w(shape, std=0.02):
        return std * jax.random.normal(next(keys), shape, jnp.float32)

    p = {}
    # ReplicationPad3d(3) + Conv3d(input_nc, ngf, 7, bias=False) + BN + ReLU
    p["w_in"] = w((ngf, input_nc, 7, 7, 7))
    p["g_in"] = jnp.ones((ngf,), jnp.float32)
    p["b_in"] = jnp.zeros((ngf,), jnp.float32)
    # 2 downsampling convs
    for i in range(2):
        cin, cout = ngf * (2 ** i), ngf * (2 ** i) * 2
        p[f"w_down{i}"] = w((cout, cin, 3, 3, 3))
        p[f"g_down{i}"] = jnp.ones((cout,), jnp.float32)
        p[f"b_down{i}"] = jnp.zeros((cout,), jnp.float32)
    # n_blocks ResnetBlocks at ngf*4
    cmid = ngf * 4
    p["blocks"] = []
    for _ in range(n_blocks):
        p["blocks"].append({
            "w1": w((cmid, cmid, 3, 3, 3)),
            "g1": jnp.ones((cmid,), jnp.float32), "b1": jnp.zeros((cmid,), jnp.float32),
            "w2": w((cmid, cmid, 3, 3, 3)),
            "g2": jnp.ones((cmid,), jnp.float32), "b2": jnp.zeros((cmid,), jnp.float32)})
    # 2 upsampling transposed convs
    for i in range(2):
        cin = ngf * (2 ** (2 - i))
        cout = cin // 2
        p[f"w_up{i}"] = w((cin, cout, 3, 3, 3))     # (Cin, Cout, k, k, k)
        p[f"g_up{i}"] = jnp.ones((cout,), jnp.float32)
        p[f"b_up{i}"] = jnp.zeros((cout,), jnp.float32)
    # final conv (bias=True)
    p["w_out"] = w((output_nc, ngf, 7, 7, 7))
    p["b_out"] = w((output_nc,), std=0.01)
    return p


def resnet_generator_forward(params, x_ncdhw):
    # NCDHW -> NDHWC (once), bf16 activations for the MXU.
    x = jnp.transpose(x_ncdhw, (0, 2, 3, 4, 1)).astype(jnp.bfloat16)

    # ReplicationPad3d(3) + Conv3d(k=7, bias=False) + BN + ReLU
    slab, dims = conv3d_bn(x, params["w_in"], params["g_in"], params["b_in"],
                           pad=3, pad_mode="edge", relu=True)

    # two downsampling Conv3d(k=3, s=2, p=1, bias=False) + BN + ReLU
    for i in range(2):
        slab, dims = conv3d_bn(_to5d(slab, dims), params[f"w_down{i}"],
                               params[f"g_down{i}"], params[f"b_down{i}"],
                               stride=2, relu=True)

    # ResnetBlocks: ReplicationPad3d(1) (3D port of padding_type='reflect'),
    # conv+BN+ReLU, ReplicationPad3d(1), conv+BN, + skip.  use_dropout=False.
    for blk in params["blocks"]:
        x5d = _to5d(slab, dims)
        t_slab, _ = conv3d_bn(x5d, blk["w1"], blk["g1"], blk["b1"],
                              pad=1, pad_mode="edge", relu=True)
        slab, _ = conv3d_bn(_to5d(t_slab, dims), blk["w2"], blk["g2"], blk["b2"],
                            pad=1, pad_mode="edge", relu=False, residual=slab)

    # two upsampling ConvTranspose3d(k=3, s=2, p=1, op=1, bias=False) + BN + ReLU
    x5d = _to5d(slab, dims)
    for i in range(2):
        x5d = conv_transpose3d_bn_relu(x5d, params[f"w_up{i}"],
                                       params[f"g_up{i}"], params[f"b_up{i}"])

    # ReplicationPad3d(3) + Conv3d(k=7, bias=True) + Tanh
    out5d = final_conv7_tanh(x5d, params["w_out"], params["b_out"])
    return jnp.transpose(out5d, (0, 4, 1, 2, 3)).astype(jnp.float32)


# ----------------------------------------------------------------------------
# Main
# ----------------------------------------------------------------------------

if __name__ == "__main__":
    key = jax.random.PRNGKey(0)
    pkey, xkey = jax.random.split(key)

    # Small shapes consistent with the module: 2 downsamplings need spatial % 4 == 0.
    input_nc, output_nc, ngf, n_blocks = 1, 1, 8, 2
    params = build_resnet_generator_params(pkey, input_nc, output_nc, ngf, n_blocks)

    x = jax.random.normal(xkey, (1, input_nc, 16, 16, 16), jnp.float32)

    fwd = jax.jit(lambda inp: resnet_generator_forward(params, inp))
    out = jax.block_until_ready(fwd(x))

    assert out.shape == (1, output_nc, 16, 16, 16), out.shape
    assert bool(jnp.all(jnp.isfinite(out)))
    print("KERNEL_OK")
</pallas_src>

<mosaic_0001>
module attributes {stable_mosaic.version = 11 : i64} {
  func.func @_mm_stats_kernel(%arg0: i32, %arg1: i32, %arg2: memref<512x384xbf16, #tpu.memory_space<vmem>>, %arg3: memref<384x128xbf16, #tpu.memory_space<vmem>>, %arg4: memref<512x128xbf16, #tpu.memory_space<vmem>>, %arg5: memref<8x128xf32, #tpu.memory_space<vmem>>) attributes {dimension_semantics = [#tpu.dimension_semantics<parallel>, #tpu.dimension_semantics<parallel>], iteration_bounds = array<i64: 8, 1>, scalar_prefetch = 0 : i64, scratch_operands = 0 : i64, tpu.core_type = #tpu.core_type<tc>, window_params = [{transform_indices = @transform_0, window_bounds = array<i64: 512, 384>}, {transform_indices = @transform_1, window_bounds = array<i64: 384, 128>}, {transform_indices = @transform_2, window_bounds = array<i64: 512, 128>}, {transform_indices = @transform_3, window_bounds = array<i64: 8, 128>}]} {
    %c0 = arith.constant 0 : index
    %c0_0 = arith.constant 0 : index
    %0 = vector.load %arg2[%c0, %c0_0] : memref<512x384xbf16, #tpu.memory_space<vmem>>, vector<512x384xbf16>
    %c0_1 = arith.constant 0 : index
    %c0_2 = arith.constant 0 : index
    %1 = vector.load %arg3[%c0_1, %c0_2] : memref<384x128xbf16, #tpu.memory_space<vmem>>, vector<384x128xbf16>
    %cst = arith.constant dense<0.000000e+00> : vector<512x128xf32>
    %2 = tpu.matmul %0, %1, %cst {dimension_numbers = #tpu.dot_dimension_numbers<[1], [0], [0], [1], [0, 0, 1, 1], [], []>} : vector<512x384xbf16>, vector<384x128xbf16>, vector<512x128xf32> -> vector<512x128xf32>
    %3 = arith.truncf %2 : vector<512x128xf32> to vector<512x128xbf16>
    %c0_3 = arith.constant 0 : index
    %c0_4 = arith.constant 0 : index
    %4 = vector.load %arg4[%c0_3, %c0_4] : memref<512x128xbf16, #tpu.memory_space<vmem>>, vector<512x128xbf16>
    tpu.vector_store %arg4[%c0_3, %c0_4], %3 {strides = array<i32>} : memref<512x128xbf16, #tpu.memory_space<vmem>>, vector<512x128xbf16>,
    %cst_5 = arith.constant dense<0.000000e+00> : vector<128xf32>
    %5 = vector.multi_reduction <add>, %2, %cst_5 [0] : vector<512x128xf32> to vector<128xf32>
    %6 = vector.shape_cast %5 : vector<128xf32> to vector<1x128xf32>
    %7 = arith.mulf %2, %2 : vector<512x128xf32>
    %cst_6 = arith.constant dense<0.000000e+00> : vector<128xf32>
    %8 = vector.multi_reduction <add>, %7, %cst_6 [0] : vector<512x128xf32> to vector<128xf32>
    %9 = vector.shape_cast %8 : vector<128xf32> to vector<1x128xf32>
    %10 = tpu.iota {dimensions = array<i32: 0>} : vector<8x128xi32>
    %c0_i32 = arith.constant 0 : i32
    %11 = vector.broadcast %c0_i32 : i32 to vector<8x128xi32>
    %12 = arith.cmpi eq, %10, %11 : vector<8x128xi32>
    %c1_i32 = arith.constant 1 : i32
    %13 = vector.broadcast %c1_i32 : i32 to vector<8x128xi32>
    %14 = arith.cmpi eq, %10, %13 : vector<8x128xi32>
    %cst_7 = arith.constant 0.000000e+00 : f32
    %15 = vector.shape_cast %9 : vector<1x128xf32> to vector<1x128xf32>
    %16 = vector.broadcast %15 : vector<1x128xf32> to vector<8x128xf32>
    %17 = vector.broadcast %cst_7 : f32 to vector<8x128xf32>
    %18 = arith.select %14, %16, %17 : vector<8x128xi1>, vector<8x128xf32>
    %19 = vector.shape_cast %6 : vector<1x128xf32> to vector<1x128xf32>
    %20 = vector.broadcast %19 : vector<1x128xf32> to vector<8x128xf32>
    %21 = arith.select %12, %20, %18 : vector<8x128xi1>, vector<8x128xf32>
    %c0_8 = arith.constant 0 : index
    %c0_9 = arith.constant 0 : index
    %22 = vector.load %arg5[%c0_8, %c0_9] : memref<8x128xf32, #tpu.memory_space<vmem>>, vector<8x128xf32>
    tpu.vector_store %arg5[%c0_8, %c0_9], %21 {strides = array<i32>} : memref<8x128xf32, #tpu.memory_space<vmem>>, vector<8x128xf32>,
    return
  }
  func.func @transform_0(%arg0: i32, %arg1: i32) -> (i32, i32) {
    %c0_i32 = arith.constant 0 : i32
    %c0_i32_0 = arith.constant 0 : i32
    return %arg0, %c0_i32 : i32, i32
  }
  func.func @transform_1(%arg0: i32, %arg1: i32) -> (i32, i32) {
    %c0_i32 = arith.constant 0 : i32
    %c0_i32_0 = arith.constant 0 : i32
    return %c0_i32, %arg1 : i32, i32
  }
  func.func @transform_2(%arg0: i32, %arg1: i32) -> (i32, i32) {
    %c0_i32 = arith.constant 0 : i32
    return %arg0, %arg1 : i32, i32
  }
  func.func @transform_3(%arg0: i32, %arg1: i32) -> (i32, i32) {
    %c0_i32 = arith.constant 0 : i32
    return %arg0, %arg1 : i32, i32
  }
}

module attributes {stable_mosaic.version = 11 : i64} {
  func.func @_affine_kernel(%arg0: i32, %arg1: i32, %arg2: memref<512x128xbf16, #tpu.memory_space<vmem>>, %arg3: memref<1x128xf32, #tpu.memory_space<vmem>>, %arg4: memref<1x128xf32, #tpu.memory_space<vmem>>, %arg5: memref<512x128xbf16, #tpu.memory_space<vmem>>) attributes {dimension_semantics = [#tpu.dimension_semantics<parallel>, #tpu.dimension_semantics<parallel>], iteration_bounds = array<i64: 8, 1>, scalar_prefetch = 0 : i64, scratch_operands = 0 : i64, tpu.core_type = #tpu.core_type<tc>, window_params = [{transform_indices = @transform_0, window_bounds = array<i64: 512, 128>}, {transform_indices = @transform_1, window_bounds = array<i64: 1, 128>}, {transform_indices = @transform_2, window_bounds = array<i64: 1, 128>}, {transform_indices = @transform_3, window_bounds = array<i64: 512, 128>}]} {
    %c0 = arith.constant 0 : index
    %c0_0 = arith.constant 0 : index
    %0 = vector.load %arg2[%c0, %c0_0] : memref<512x128xbf16, #tpu.memory_space<vmem>>, vector<512x128xbf16>
    %1 = arith.extf %0 : vector<512x128xbf16> to vector<512x128xf32>
    %c0_1 = arith.constant 0 : index
    %c0_2 = arith.constant 0 : index
    %2 = vector.load %arg3[%c0_1, %c0_2] : memref<1x128xf32, #tpu.memory_space<vmem>>, vector<1x128xf32>
    %3 = vector.broadcast %2 : vector<1x128xf32> to vector<512x128xf32>
    %4 = arith.mulf %1, %3 : vector<512x128xf32>
    %c0_3 = arith.constant 0 : index
    %c0_4 = arith.constant 0 : index
    %5 = vector.load %arg4[%c0_3, %c0_4] : memref<1x128xf32, #tpu.memory_space<vmem>>, vector<1x128xf32>
    %6 = vector.broadcast %5 : vector<1x128xf32> to vector<512x128xf32>
    %7 = arith.addf %4, %6 : vector<512x128xf32>
    %cst = arith.constant 0.000000e+00 : f32
    %8 = vector.broadcast %cst : f32 to vector<512x128xf32>
    %9 = arith.maximumf %7, %8 : vector<512x128xf32>
    %10 = arith.truncf %9 : vector<512x128xf32> to vector<512x128xbf16>
    %c0_5 = arith.constant 0 : index
    %c0_6 = arith.constant 0 : index
    %11 = vector.load %arg5[%c0_5, %c0_6] : memref<512x128xbf16, #tpu.memory_space<vmem>>, vector<512x128xbf16>
    tpu.vector_store %arg5[%c0_5, %c0_6], %10 {strides = array<i32>} : memref<512x128xbf16, #tpu.memory_space<vmem>>, vector<512x128xbf16>,
    return
  }
  func.func @transform_0(%arg0: i32, %arg1: i32) -> (i32, i32) {
    %c0_i32 = arith.constant 0 : i32
    return %arg0, %arg1 : i32, i32
  }
  func.func @transform_1(%arg0: i32, %arg1: i32) -> (i32, i32) {
    %c0_i32 = arith.constant 0 : i32
    %c0_i32_0 = arith.constant 0 : i32
    return %c0_i32, %arg1 : i32, i32
  }
  func.func @transform_2(%arg0: i32, %arg1: i32) -> (i32, i32) {
    %c0_i32 = arith.constant 0 : i32
    %c0_i32_0 = arith.constant 0 : i32
    return %c0_i32, %arg1 : i32, i32
  }
  func.func @transform_3(%arg0: i32, %arg1: i32) -> (i32, i32) {
    %c0_i32 = arith.constant 0 : i32
    return %arg0, %arg1 : i32, i32
  }
}

module attributes {stable_mosaic.version = 11 : i64} {
  func.func @_mm_stats_kernel(%arg0: i32, %arg1: i32, %arg2: memref<512x256xbf16, #tpu.memory_space<vmem>>, %arg3: memref<256x128xbf16, #tpu.memory_space<vmem>>, %arg4: memref<512x128xbf16, #tpu.memory_space<vmem>>, %arg5: memref<8x128xf32, #tpu.memory_space<vmem>>) attributes {dimension_semantics = [#tpu.dimension_semantics<parallel>, #tpu.dimension_semantics<parallel>], iteration_bounds = array<i64: 1, 1>, scalar_prefetch = 0 : i64, scratch_operands = 0 : i64, tpu.core_type = #tpu.core_type<tc>, window_params = [{transform_indices = @transform_0, window_bounds = array<i64: 512, 256>}, {transform_indices = @transform_1, window_bounds = array<i64: 256, 128>}, {transform_indices = @transform_2, window_bounds = array<i64: 512, 128>}, {transform_indices = @transform_3, window_bounds = array<i64: 8, 128>}]} {
    %c0 = arith.constant 0 : index
    %c0_0 = arith.constant 0 : index
    %0 = vector.load %arg2[%c0, %c0_0] : memref<512x256xbf16, #tpu.memory_space<vmem>>, vector<512x256xbf16>
    %c0_1 = arith.constant 0 : index
    %c0_2 = arith.constant 0 : index
    %1 = vector.load %arg3[%c0_1, %c0_2] : memref<256x128xbf16, #tpu.memory_space<vmem>>, vector<256x128xbf16>
    %cst = arith.constant dense<0.000000e+00> : vector<512x128xf32>
    %2 = tpu.matmul %0, %1, %cst {dimension_numbers = #tpu.dot_dimension_numbers<[1], [0], [0], [1], [0, 0, 1, 1], [], []>} : vector<512x256xbf16>, vector<256x128xbf16>, vector<512x128xf32> -> vector<512x128xf32>
    %3 = arith.truncf %2 : vector<512x128xf32> to vector<512x128xbf16>
    %c0_3 = arith.constant 0 : index
    %c0_4 = arith.constant 0 : index
    %4 = vector.load %arg4[%c0_3, %c0_4] : memref<512x128xbf16, #tpu.memory_space<vmem>>, vector<512x128xbf16>
    tpu.vector_store %arg4[%c0_3, %c0_4], %3 {strides = array<i32>} : memref<512x128xbf16, #tpu.memory_space<vmem>>, vector<512x128xbf16>,
    %cst_5 = arith.constant dense<0.000000e+00> : vector<128xf32>
    %5 = vector.multi_reduction <add>, %2, %cst_5 [0] : vector<512x128xf32> to vector<128xf32>
    %6 = vector.shape_cast %5 : vector<128xf32> to vector<1x128xf32>
    %7 = arith.mulf %2, %2 : vector<512x128xf32>
    %cst_6 = arith.constant dense<0.000000e+00> : vector<128xf32>
    %8 = vector.multi_reduction <add>, %7, %cst_6 [0] : vector<512x128xf32> to vector<128xf32>
    %9 = vector.shape_cast %8 : vector<128xf32> to vector<1x128xf32>
    %10 = tpu.iota {dimensions = array<i32: 0>} : vector<8x128xi32>
    %c0_i32 = arith.constant 0 : i32
    %11 = vector.broadcast %c0_i32 : i32 to vector<8x128xi32>
    %12 = arith.cmpi eq, %10, %11 : vector<8x128xi32>
    %c1_i32 = arith.constant 1 : i32
    %13 = vector.broadcast %c1_i32 : i32 to vector<8x128xi32>
    %14 = arith.cmpi eq, %10, %13 : vector<8x128xi32>
    %cst_7 = arith.constant 0.000000e+00 : f32
    %15 = vector.shape_cast %9 : vector<1x128xf32> to vector<1x128xf32>
    %16 = vector.broadcast %15 : vector<1x128xf32> to vector<8x128xf32>
    %17 = vector.broadcast %cst_7 : f32 to vector<8x128xf32>
    %18 = arith.select %14, %16, %17 : vector<8x128xi1>, vector<8x128xf32>
    %19 = vector.shape_cast %6 : vector<1x128xf32> to vector<1x128xf32>
    %20 = vector.broadcast %19 : vector<1x128xf32> to vector<8x128xf32>
    %21 = arith.select %12, %20, %18 : vector<8x128xi1>, vector<8x128xf32>
    %c0_8 = arith.constant 0 : index
    %c0_9 = arith.constant 0 : index
    %22 = vector.load %arg5[%c0_8, %c0_9] : memref<8x128xf32, #tpu.memory_space<vmem>>, vector<8x128xf32>
    tpu.vector_store %arg5[%c0_8, %c0_9], %21 {strides = array<i32>} : memref<8x128xf32, #tpu.memory_space<vmem>>, vector<8x128xf32>,
    return
  }
  func.func @transform_0(%arg0: i32, %arg1: i32) -> (i32, i32) {
    %c0_i32 = arith.constant 0 : i32
    %c0_i32_0 = arith.constant 0 : i32
    return %arg0, %c0_i32 : i32, i32
  }
  func.func @transform_1(%arg0: i32, %arg1: i32) -> (i32, i32) {
    %c0_i32 = arith.constant 0 : i32
    %c0_i32_0 = arith.constant 0 : i32
    return %c0_i32, %arg1 : i32, i32
  }
  func.func @transform_2(%arg0: i32, %arg1: i32) -> (i32, i32) {
    %c0_i32 = arith.constant 0 : i32
    return %arg0, %arg1 : i32, i32
  }
  func.func @transform_3(%arg0: i32, %arg1: i32) -> (i32, i32) {
    %c0_i32 = arith.constant 0 : i32
    return %arg0, %arg1 : i32, i32
  }
}

module attributes {stable_mosaic.version = 11 : i64} {
  func.func @_affine_kernel(%arg0: i32, %arg1: i32, %arg2: memref<512x128xbf16, #tpu.memory_space<vmem>>, %arg3: memref<1x128xf32, #tpu.memory_space<vmem>>, %arg4: memref<1x128xf32, #tpu.memory_space<vmem>>, %arg5: memref<512x128xbf16, #tpu.memory_space<vmem>>) attributes {dimension_semantics = [#tpu.dimension_semantics<parallel>, #tpu.dimension_semantics<parallel>], iteration_bounds = array<i64: 1, 1>, scalar_prefetch = 0 : i64, scratch_operands = 0 : i64, tpu.core_type = #tpu.core_type<tc>, window_params = [{transform_indices = @transform_0, window_bounds = array<i64: 512, 128>}, {transform_indices = @transform_1, window_bounds = array<i64: 1, 128>}, {transform_indices = @transform_2, window_bounds = array<i64: 1, 128>}, {transform_indices = @transform_3, window_bounds = array<i64: 512, 128>}]} {
    %c0 = arith.constant 0 : index
    %c0_0 = arith.constant 0 : index
    %0 = vector.load %arg2[%c0, %c0_0] : memref<512x128xbf16, #tpu.memory_space<vmem>>, vector<512x128xbf16>
    %1 = arith.extf %0 : vector<512x128xbf16> to vector<512x128xf32>
    %c0_1 = arith.constant 0 : index
    %c0_2 = arith.constant 0 : index
    %2 = vector.load %arg3[%c0_1, %c0_2] : memref<1x128xf32, #tpu.memory_space<vmem>>, vector<1x128xf32>
    %3 = vector.broadcast %2 : vector<1x128xf32> to vector<512x128xf32>
    %4 = arith.mulf %1, %3 : vector<512x128xf32>
    %c0_3 = arith.constant 0 : index
    %c0_4 = arith.constant 0 : index
    %5 = vector.load %arg4[%c0_3, %c0_4] : memref<1x128xf32, #tpu.memory_space<vmem>>, vector<1x128xf32>
    %6 = vector.broadcast %5 : vector<1x128xf32> to vector<512x128xf32>
    %7 = arith.addf %4, %6 : vector<512x128xf32>
    %cst = arith.constant 0.000000e+00 : f32
    %8 = vector.broadcast %cst : f32 to vector<512x128xf32>
    %9 = arith.maximumf %7, %8 : vector<512x128xf32>
    %10 = arith.truncf %9 : vector<512x128xf32> to vector<512x128xbf16>
    %c0_5 = arith.constant 0 : index
    %c0_6 = arith.constant 0 : index
    %11 = vector.load %arg5[%c0_5, %c0_6] : memref<512x128xbf16, #tpu.memory_space<vmem>>, vector<512x128xbf16>
    tpu.vector_store %arg5[%c0_5, %c0_6], %10 {strides = array<i32>} : memref<512x128xbf16, #tpu.memory_space<vmem>>, vector<512x128xbf16>,
    return
  }
  func.func @transform_0(%arg0: i32, %arg1: i32) -> (i32, i32) {
    %c0_i32 = arith.constant 0 : i32
    return %arg0, %arg1 : i32, i32
  }
  func.func @transform_1(%arg0: i32, %arg1: i32) -> (i32, i32) {
    %c0_i32 = arith.constant 0 : i32
    %c0_i32_0 = arith.constant 0 : i32
    return %c0_i32, %arg1 : i32, i32
  }
  func.func @transform_2(%arg0: i32, %arg1: i32) -> (i32, i32) {
    %c0_i32 = arith.constant 0 : i32
    %c0_i32_0 = arith.constant 0 : i32
    return %c0_i32, %arg1 : i32, i32
  }
  func.func @transform_3(%arg0: i32, %arg1: i32) -> (i32, i32) {
    %c0_i32 = arith.constant 0 : i32
    return %arg0, %arg1 : i32, i32
  }
}

module attributes {stable_mosaic.version = 11 : i64} {
  func.func @_affine_kernel(%arg0: i32, %arg1: i32, %arg2: memref<64x128xbf16, #tpu.memory_space<vmem>>, %arg3: memref<1x128xf32, #tpu.memory_space<vmem>>, %arg4: memref<1x128xf32, #tpu.memory_space<vmem>>, %arg5: memref<64x128xbf16, #tpu.memory_space<vmem>>) attributes {dimension_semantics = [#tpu.dimension_semantics<parallel>, #tpu.dimension_semantics<parallel>], iteration_bounds = array<i64: 1, 1>, scalar_prefetch = 0 : i64, scratch_operands = 0 : i64, tpu.core_type = #tpu.core_type<tc>, window_params = [{transform_indices = @transform_0, window_bounds = array<i64: 64, 128>}, {transform_indices = @transform_1, window_bounds = array<i64: 1, 128>}, {transform_indices = @transform_2, window_bounds = array<i64: 1, 128>}, {transform_indices = @transform_3, window_bounds = array<i64: 64, 128>}]} {
    %c0 = arith.constant 0 : index
    %c0_0 = arith.constant 0 : index
    %0 = vector.load %arg2[%c0, %c0_0] : memref<64x128xbf16, #tpu.memory_space<vmem>>, vector<64x128xbf16>
    %1 = arith.extf %0 : vector<64x128xbf16> to vector<64x128xf32>
    %c0_1 = arith.constant 0 : index
    %c0_2 = arith.constant 0 : index
    %2 = vector.load %arg3[%c0_1, %c0_2] : memref<1x128xf32, #tpu.memory_space<vmem>>, vector<1x128xf32>
    %3 = vector.broadcast %2 : vector<1x128xf32> to vector<64x128xf32>
    %4 = arith.mulf %1, %3 : vector<64x128xf32>
    %c0_3 = arith.constant 0 : index
    %c0_4 = arith.constant 0 : index
    %5 = vector.load %arg4[%c0_3, %c0_4] : memref<1x128xf32, #tpu.memory_space<vmem>>, vector<1x128xf32>
    %6 = vector.broadcast %5 : vector<1x128xf32> to vector<64x128xf32>
    %7 = arith.addf %4, %6 : vector<64x128xf32>
    %cst = arith.constant 0.000000e+00 : f32
    %8 = vector.broadcast %cst : f32 to vector<64x128xf32>
    %9 = arith.maximumf %7, %8 : vector<64x128xf32>
    %10 = arith.truncf %9 : vector<64x128xf32> to vector<64x128xbf16>
    %c0_5 = arith.constant 0 : index
    %c0_6 = arith.constant 0 : index
    %11 = vector.load %arg5[%c0_5, %c0_6] : memref<64x128xbf16, #tpu.memory_space<vmem>>, vector<64x128xbf16>
    tpu.vector_store %arg5[%c0_5, %c0_6], %10 {strides = array<i32>} : memref<64x128xbf16, #tpu.memory_space<vmem>>, vector<64x128xbf16>,
    return
  }
  func.func @transform_0(%arg0: i32, %arg1: i32) -> (i32, i32) {
    %c0_i32 = arith.constant 0 : i32
    return %arg0, %arg1 : i32, i32
  }
  func.func @transform_1(%arg0: i32, %arg1: i32) -> (i32, i32) {
    %c0_i32 = arith.constant 0 : i32
    %c0_i32_0 = arith.constant 0 : i32
    return %c0_i32, %arg1 : i32, i32
  }
  func.func @transform_2(%arg0: i32, %arg1: i32) -> (i32, i32) {
    %c0_i32 = arith.constant 0 : i32
    %c0_i32_0 = arith.constant 0 : i32
    return %c0_i32, %arg1 : i32, i32
  }
  func.func @transform_3(%arg0: i32, %arg1: i32) -> (i32, i32) {
    %c0_i32 = arith.constant 0 : i32
    return %arg0, %arg1 : i32, i32
  }
}

module attributes {stable_mosaic.version = 11 : i64} {
  func.func @_mm_stats_kernel(%arg0: i32, %arg1: i32, %arg2: memref<64x512xbf16, #tpu.memory_space<vmem>>, %arg3: memref<512x128xbf16, #tpu.memory_space<vmem>>, %arg4: memref<64x128xbf16, #tpu.memory_space<vmem>>, %arg5: memref<8x128xf32, #tpu.memory_space<vmem>>) attributes {dimension_semantics = [#tpu.dimension_semantics<parallel>, #tpu.dimension_semantics<parallel>], iteration_bounds = array<i64: 1, 1>, scalar_prefetch = 0 : i64, scratch_operands = 0 : i64, tpu.core_type = #tpu.core_type<tc>, window_params = [{transform_indices = @transform_0, window_bounds = array<i64: 64, 512>}, {transform_indices = @transform_1, window_bounds = array<i64: 512, 128>}, {transform_indices = @transform_2, window_bounds = array<i64: 64, 128>}, {transform_indices = @transform_3, window_bounds = array<i64: 8, 128>}]} {
    %c0 = arith.constant 0 : index
    %c0_0 = arith.constant 0 : index
    %0 = vector.load %arg2[%c0, %c0_0] : memref<64x512xbf16, #tpu.memory_space<vmem>>, vector<64x512xbf16>
    %c0_1 = arith.constant 0 : index
    %c0_2 = arith.constant 0 : index
    %1 = vector.load %arg3[%c0_1, %c0_2] : memref<512x128xbf16, #tpu.memory_space<vmem>>, vector<512x128xbf16>
    %cst = arith.constant dense<0.000000e+00> : vector<64x128xf32>
    %2 = tpu.matmul %0, %1, %cst {dimension_numbers = #tpu.dot_dimension_numbers<[1], [0], [0], [1], [0, 0, 1, 1], [], []>} : vector<64x512xbf16>, vector<512x128xbf16>, vector<64x128xf32> -> vector<64x128xf32>
    %3 = arith.truncf %2 : vector<64x128xf32> to vector<64x128xbf16>
    %c0_3 = arith.constant 0 : index
    %c0_4 = arith.constant 0 : index
    %4 = vector.load %arg4[%c0_3, %c0_4] : memref<64x128xbf16, #tpu.memory_space<vmem>>, vector<64x128xbf16>
    tpu.vector_store %arg4[%c0_3, %c0_4], %3 {strides = array<i32>} : memref<64x128xbf16, #tpu.memory_space<vmem>>, vector<64x128xbf16>,
    %cst_5 = arith.constant dense<0.000000e+00> : vector<128xf32>
    %5 = vector.multi_reduction <add>, %2, %cst_5 [0] : vector<64x128xf32> to vector<128xf32>
    %6 = vector.shape_cast %5 : vector<128xf32> to vector<1x128xf32>
    %7 = arith.mulf %2, %2 : vector<64x128xf32>
    %cst_6 = arith.constant dense<0.000000e+00> : vector<128xf32>
    %8 = vector.multi_reduction <add>, %7, %cst_6 [0] : vector<64x128xf32> to vector<128xf32>
    %9 = vector.shape_cast %8 : vector<128xf32> to vector<1x128xf32>
    %10 = tpu.iota {dimensions = array<i32: 0>} : vector<8x128xi32>
    %c0_i32 = arith.constant 0 : i32
    %11 = vector.broadcast %c0_i32 : i32 to vector<8x128xi32>
    %12 = arith.cmpi eq, %10, %11 : vector<8x128xi32>
    %c1_i32 = arith.constant 1 : i32
    %13 = vector.broadcast %c1_i32 : i32 to vector<8x128xi32>
    %14 = arith.cmpi eq, %10, %13 : vector<8x128xi32>
    %cst_7 = arith.constant 0.000000e+00 : f32
    %15 = vector.shape_cast %9 : vector<1x128xf32> to vector<1x128xf32>
    %16 = vector.broadcast %15 : vector<1x128xf32> to vector<8x128xf32>
    %17 = vector.broadcast %cst_7 : f32 to vector<8x128xf32>
    %18 = arith.select %14, %16, %17 : vector<8x128xi1>, vector<8x128xf32>
    %19 = vector.shape_cast %6 : vector<1x128xf32> to vector<1x128xf32>
    %20 = vector.broadcast %19 : vector<1x128xf32> to vector<8x128xf32>
    %21 = arith.select %12, %20, %18 : vector<8x128xi1>, vector<8x128xf32>
    %c0_8 = arith.constant 0 : index
    %c0_9 = arith.constant 0 : index
    %22 = vector.load %arg5[%c0_8, %c0_9] : memref<8x128xf32, #tpu.memory_space<vmem>>, vector<8x128xf32>
    tpu.vector_store %arg5[%c0_8, %c0_9], %21 {strides = array<i32>} : memref<8x128xf32, #tpu.memory_space<vmem>>, vector<8x128xf32>,
    return
  }
  func.func @transform_0(%arg0: i32, %arg1: i32) -> (i32, i32) {
    %c0_i32 = arith.constant 0 : i32
    %c0_i32_0 = arith.constant 0 : i32
    return %arg0, %c0_i32 : i32, i32
  }
  func.func @transform_1(%arg0: i32, %arg1: i32) -> (i32, i32) {
    %c0_i32 = arith.constant 0 : i32
    %c0_i32_0 = arith.constant 0 : i32
    return %c0_i32, %arg1 : i32, i32
  }
  func.func @transform_2(%arg0: i32, %arg1: i32) -> (i32, i32) {
    %c0_i32 = arith.constant 0 : i32
    return %arg0, %arg1 : i32, i32
  }
  func.func @transform_3(%arg0: i32, %arg1: i32) -> (i32, i32) {
    %c0_i32 = arith.constant 0 : i32
    return %arg0, %arg1 : i32, i32
  }
}

module attributes {stable_mosaic.version = 11 : i64} {
  func.func @_affine_residual_kernel(%arg0: i32, %arg1: i32, %arg2: memref<64x128xbf16, #tpu.memory_space<vmem>>, %arg3: memref<1x128xf32, #tpu.memory_space<vmem>>, %arg4: memref<1x128xf32, #tpu.memory_space<vmem>>, %arg5: memref<64x128xbf16, #tpu.memory_space<vmem>>, %arg6: memref<64x128xbf16, #tpu.memory_space<vmem>>) attributes {dimension_semantics = [#tpu.dimension_semantics<parallel>, #tpu.dimension_semantics<parallel>], iteration_bounds = array<i64: 1, 1>, scalar_prefetch = 0 : i64, scratch_operands = 0 : i64, tpu.core_type = #tpu.core_type<tc>, window_params = [{transform_indices = @transform_0, window_bounds = array<i64: 64, 128>}, {transform_indices = @transform_1, window_bounds = array<i64: 1, 128>}, {transform_indices = @transform_2, window_bounds = array<i64: 1, 128>}, {transform_indices = @transform_3, window_bounds = array<i64: 64, 128>}, {transform_indices = @transform_4, window_bounds = array<i64: 64, 128>}]} {
    %c0 = arith.constant 0 : index
    %c0_0 = arith.constant 0 : index
    %0 = vector.load %arg2[%c0, %c0_0] : memref<64x128xbf16, #tpu.memory_space<vmem>>, vector<64x128xbf16>
    %1 = arith.extf %0 : vector<64x128xbf16> to vector<64x128xf32>
    %c0_1 = arith.constant 0 : index
    %c0_2 = arith.constant 0 : index
    %2 = vector.load %arg3[%c0_1, %c0_2] : memref<1x128xf32, #tpu.memory_space<vmem>>, vector<1x128xf32>
    %3 = vector.broadcast %2 : vector<1x128xf32> to vector<64x128xf32>
    %4 = arith.mulf %1, %3 : vector<64x128xf32>
    %c0_3 = arith.constant 0 : index
    %c0_4 = arith.constant 0 : index
    %5 = vector.load %arg4[%c0_3, %c0_4] : memref<1x128xf32, #tpu.memory_space<vmem>>, vector<1x128xf32>
    %6 = vector.broadcast %5 : vector<1x128xf32> to vector<64x128xf32>
    %7 = arith.addf %4, %6 : vector<64x128xf32>
    %c0_5 = arith.constant 0 : index
    %c0_6 = arith.constant 0 : index
    %8 = vector.load %arg5[%c0_5, %c0_6] : memref<64x128xbf16, #tpu.memory_space<vmem>>, vector<64x128xbf16>
    %9 = arith.extf %8 : vector<64x128xbf16> to vector<64x128xf32>
    %10 = arith.addf %7, %9 : vector<64x128xf32>
    %11 = arith.truncf %10 : vector<64x128xf32> to vector<64x128xbf16>
    %c0_7 = arith.constant 0 : index
    %c0_8 = arith.constant 0 : index
    %12 = vector.load %arg6[%c0_7, %c0_8] : memref<64x128xbf16, #tpu.memory_space<vmem>>, vector<64x128xbf16>
    tpu.vector_store %arg6[%c0_7, %c0_8], %11 {strides = array<i32>} : memref<64x128xbf16, #tpu.memory_space<vmem>>, vector<64x128xbf16>,
    return
  }
  func.func @transform_0(%arg0: i32, %arg1: i32) -> (i32, i32) {
    %c0_i32 = arith.constant 0 : i32
    return %arg0, %arg1 : i32, i32
  }
  func.func @transform_1(%arg0: i32, %arg1: i32) -> (i32, i32) {
    %c0_i32 = arith.constant 0 : i32
    %c0_i32_0 = arith.constant 0 : i32
    return %c0_i32, %arg1 : i32, i32
  }
  func.func @transform_2(%arg0: i32, %arg1: i32) -> (i32, i32) {
    %c0_i32 = arith.constant 0 : i32
    %c0_i32_0 = arith.constant 0 : i32
    return %c0_i32, %arg1 : i32, i32
  }
  func.func @transform_3(%arg0: i32, %arg1: i32) -> (i32, i32) {
    %c0_i32 = arith.constant 0 : i32
    return %arg0, %arg1 : i32, i32
  }
  func.func @transform_4(%arg0: i32, %arg1: i32) -> (i32, i32) {
    %c0_i32 = arith.constant 0 : i32
    return %arg0, %arg1 : i32, i32
  }
}

module attributes {stable_mosaic.version = 11 : i64} {
  func.func @_mm_stats_kernel(%arg0: i32, %arg1: i32, %arg2: memref<64x896xbf16, #tpu.memory_space<vmem>>, %arg3: memref<896x128xbf16, #tpu.memory_space<vmem>>, %arg4: memref<64x128xbf16, #tpu.memory_space<vmem>>, %arg5: memref<8x128xf32, #tpu.memory_space<vmem>>) attributes {dimension_semantics = [#tpu.dimension_semantics<parallel>, #tpu.dimension_semantics<parallel>], iteration_bounds = array<i64: 1, 1>, scalar_prefetch = 0 : i64, scratch_operands = 0 : i64, tpu.core_type = #tpu.core_type<tc>, window_params = [{transform_indices = @transform_0, window_bounds = array<i64: 64, 896>}, {transform_indices = @transform_1, window_bounds = array<i64: 896, 128>}, {transform_indices = @transform_2, window_bounds = array<i64: 64, 128>}, {transform_indices = @transform_3, window_bounds = array<i64: 8, 128>}]} {
    %c0 = arith.constant 0 : index
    %c0_0 = arith.constant 0 : index
    %0 = vector.load %arg2[%c0, %c0_0] : memref<64x896xbf16, #tpu.memory_space<vmem>>, vector<64x896xbf16>
    %c0_1 = arith.constant 0 : index
    %c0_2 = arith.constant 0 : index
    %1 = vector.load %arg3[%c0_1, %c0_2] : memref<896x128xbf16, #tpu.memory_space<vmem>>, vector<896x128xbf16>
    %cst = arith.constant dense<0.000000e+00> : vector<64x128xf32>
    %2 = tpu.matmul %0, %1, %cst {dimension_numbers = #tpu.dot_dimension_numbers<[1], [0], [0], [1], [0, 0, 1, 1], [], []>} : vector<64x896xbf16>, vector<896x128xbf16>, vector<64x128xf32> -> vector<64x128xf32>
    %3 = arith.truncf %2 : vector<64x128xf32> to vector<64x128xbf16>
    %c0_3 = arith.constant 0 : index
    %c0_4 = arith.constant 0 : index
    %4 = vector.load %arg4[%c0_3, %c0_4] : memref<64x128xbf16, #tpu.memory_space<vmem>>, vector<64x128xbf16>
    tpu.vector_store %arg4[%c0_3, %c0_4], %3 {strides = array<i32>} : memref<64x128xbf16, #tpu.memory_space<vmem>>, vector<64x128xbf16>,
    %cst_5 = arith.constant dense<0.000000e+00> : vector<128xf32>
    %5 = vector.multi_reduction <add>, %2, %cst_5 [0] : vector<64x128xf32> to vector<128xf32>
    %6 = vector.shape_cast %5 : vector<128xf32> to vector<1x128xf32>
    %7 = arith.mulf %2, %2 : vector<64x128xf32>
    %cst_6 = arith.constant dense<0.000000e+00> : vector<128xf32>
    %8 = vector.multi_reduction <add>, %7, %cst_6 [0] : vector<64x128xf32> to vector<128xf32>
    %9 = vector.shape_cast %8 : vector<128xf32> to vector<1x128xf32>
    %10 = tpu.iota {dimensions = array<i32: 0>} : vector<8x128xi32>
    %c0_i32 = arith.constant 0 : i32
    %11 = vector.broadcast %c0_i32 : i32 to vector<8x128xi32>
    %12 = arith.cmpi eq, %10, %11 : vector<8x128xi32>
    %c1_i32 = arith.constant 1 : i32
    %13 = vector.broadcast %c1_i32 : i32 to vector<8x128xi32>
    %14 = arith.cmpi eq, %10, %13 : vector<8x128xi32>
    %cst_7 = arith.constant 0.000000e+00 : f32
    %15 = vector.shape_cast %9 : vector<1x128xf32> to vector<1x128xf32>
    %16 = vector.broadcast %15 : vector<1x128xf32> to vector<8x128xf32>
    %17 = vector.broadcast %cst_7 : f32 to vector<8x128xf32>
    %18 = arith.select %14, %16, %17 : vector<8x128xi1>, vector<8x128xf32>
    %19 = vector.shape_cast %6 : vector<1x128xf32> to vector<1x128xf32>
    %20 = vector.broadcast %19 : vector<1x128xf32> to vector<8x128xf32>
    %21 = arith.select %12, %20, %18 : vector<8x128xi1>, vector<8x128xf32>
    %c0_8 = arith.constant 0 : index
    %c0_9 = arith.constant 0 : index
    %22 = vector.load %arg5[%c0_8, %c0_9] : memref<8x128xf32, #tpu.memory_space<vmem>>, vector<8x128xf32>
    tpu.vector_store %arg5[%c0_8, %c0_9], %21 {strides = array<i32>} : memref<8x128xf32, #tpu.memory_space<vmem>>, vector<8x128xf32>,
    return
  }
  func.func @transform_0(%arg0: i32, %arg1: i32) -> (i32, i32) {
    %c0_i32 = arith.constant 0 : i32
    %c0_i32_0 = arith.constant 0 : i32
    return %arg0, %c0_i32 : i32, i32
  }
  func.func @transform_1(%arg0: i32, %arg1: i32) -> (i32, i32) {
    %c0_i32 = arith.constant 0 : i32
    %c0_i32_0 = arith.constant 0 : i32
    return %c0_i32, %arg1 : i32, i32
  }
  func.func @transform_2(%arg0: i32, %arg1: i32) -> (i32, i32) {
    %c0_i32 = arith.constant 0 : i32
    return %arg0, %arg1 : i32, i32
  }
  func.func @transform_3(%arg0: i32, %arg1: i32) -> (i32, i32) {
    %c0_i32 = arith.constant 0 : i32
    return %arg0, %arg1 : i32, i32
  }
}

module attributes {stable_mosaic.version = 11 : i64} {
  func.func @_mm_stats_kernel(%arg0: i32, %arg1: i32, %arg2: memref<64x256xbf16, #tpu.memory_space<vmem>>, %arg3: memref<256x128xbf16, #tpu.memory_space<vmem>>, %arg4: memref<64x128xbf16, #tpu.memory_space<vmem>>, %arg5: memref<8x128xf32, #tpu.memory_space<vmem>>) attributes {dimension_semantics = [#tpu.dimension_semantics<parallel>, #tpu.dimension_semantics<parallel>], iteration_bounds = array<i64: 1, 1>, scalar_prefetch = 0 : i64, scratch_operands = 0 : i64, tpu.core_type = #tpu.core_type<tc>, window_params = [{transform_indices = @transform_0, window_bounds = array<i64: 64, 256>}, {transform_indices = @transform_1, window_bounds = array<i64: 256, 128>}, {transform_indices = @transform_2, window_bounds = array<i64: 64, 128>}, {transform_indices = @transform_3, window_bounds = array<i64: 8, 128>}]} {
    %c0 = arith.constant 0 : index
    %c0_0 = arith.constant 0 : index
    %0 = vector.load %arg2[%c0, %c0_0] : memref<64x256xbf16, #tpu.memory_space<vmem>>, vector<64x256xbf16>
    %c0_1 = arith.constant 0 : index
    %c0_2 = arith.constant 0 : index
    %1 = vector.load %arg3[%c0_1, %c0_2] : memref<256x128xbf16, #tpu.memory_space<vmem>>, vector<256x128xbf16>
    %cst = arith.constant dense<0.000000e+00> : vector<64x128xf32>
    %2 = tpu.matmul %0, %1, %cst {dimension_numbers = #tpu.dot_dimension_numbers<[1], [0], [0], [1], [0, 0, 1, 1], [], []>} : vector<64x256xbf16>, vector<256x128xbf16>, vector<64x128xf32> -> vector<64x128xf32>
    %3 = arith.truncf %2 : vector<64x128xf32> to vector<64x128xbf16>
    %c0_3 = arith.constant 0 : index
    %c0_4 = arith.constant 0 : index
    %4 = vector.load %arg4[%c0_3, %c0_4] : memref<64x128xbf16, #tpu.memory_space<vmem>>, vector<64x128xbf16>
    tpu.vector_store %arg4[%c0_3, %c0_4], %3 {strides = array<i32>} : memref<64x128xbf16, #tpu.memory_space<vmem>>, vector<64x128xbf16>,
    %cst_5 = arith.constant dense<0.000000e+00> : vector<128xf32>
    %5 = vector.multi_reduction <add>, %2, %cst_5 [0] : vector<64x128xf32> to vector<128xf32>
    %6 = vector.shape_cast %5 : vector<128xf32> to vector<1x128xf32>
    %7 = arith.mulf %2, %2 : vector<64x128xf32>
    %cst_6 = arith.constant dense<0.000000e+00> : vector<128xf32>
    %8 = vector.multi_reduction <add>, %7, %cst_6 [0] : vector<64x128xf32> to vector<128xf32>
    %9 = vector.shape_cast %8 : vector<128xf32> to vector<1x128xf32>
    %10 = tpu.iota {dimensions = array<i32: 0>} : vector<8x128xi32>
    %c0_i32 = arith.constant 0 : i32
    %11 = vector.broadcast %c0_i32 : i32 to vector<8x128xi32>
    %12 = arith.cmpi eq, %10, %11 : vector<8x128xi32>
    %c1_i32 = arith.constant 1 : i32
    %13 = vector.broadcast %c1_i32 : i32 to vector<8x128xi32>
    %14 = arith.cmpi eq, %10, %13 : vector<8x128xi32>
    %cst_7 = arith.constant 0.000000e+00 : f32
    %15 = vector.shape_cast %9 : vector<1x128xf32> to vector<1x128xf32>
    %16 = vector.broadcast %15 : vector<1x128xf32> to vector<8x128xf32>
    %17 = vector.broadcast %cst_7 : f32 to vector<8x128xf32>
    %18 = arith.select %14, %16, %17 : vector<8x128xi1>, vector<8x128xf32>
    %19 = vector.shape_cast %6 : vector<1x128xf32> to vector<1x128xf32>
    %20 = vector.broadcast %19 : vector<1x128xf32> to vector<8x128xf32>
    %21 = arith.select %12, %20, %18 : vector<8x128xi1>, vector<8x128xf32>
    %c0_8 = arith.constant 0 : index
    %c0_9 = arith.constant 0 : index
    %22 = vector.load %arg5[%c0_8, %c0_9] : memref<8x128xf32, #tpu.memory_space<vmem>>, vector<8x128xf32>
    tpu.vector_store %arg5[%c0_8, %c0_9], %21 {strides = array<i32>} : memref<8x128xf32, #tpu.memory_space<vmem>>, vector<8x128xf32>,
    return
  }
  func.func @transform_0(%arg0: i32, %arg1: i32) -> (i32, i32) {
    %c0_i32 = arith.constant 0 : i32
    %c0_i32_0 = arith.constant 0 : i32
    return %arg0, %c0_i32 : i32, i32
  }
  func.func @transform_1(%arg0: i32, %arg1: i32) -> (i32, i32) {
    %c0_i32 = arith.constant 0 : i32
    %c0_i32_0 = arith.constant 0 : i32
    return %c0_i32, %arg1 : i32, i32
  }
  func.func @transform_2(%arg0: i32, %arg1: i32) -> (i32, i32) {
    %c0_i32 = arith.constant 0 : i32
    return %arg0, %arg1 : i32, i32
  }
  func.func @transform_3(%arg0: i32, %arg1: i32) -> (i32, i32) {
    %c0_i32 = arith.constant 0 : i32
    return %arg0, %arg1 : i32, i32
  }
}

module attributes {stable_mosaic.version = 11 : i64} {
  func.func @_mm_stats_kernel(%arg0: i32, %arg1: i32, %arg2: memref<512x128xbf16, #tpu.memory_space<vmem>>, %arg3: memref<128x128xbf16, #tpu.memory_space<vmem>>, %arg4: memref<512x128xbf16, #tpu.memory_space<vmem>>, %arg5: memref<8x128xf32, #tpu.memory_space<vmem>>) attributes {dimension_semantics = [#tpu.dimension_semantics<parallel>, #tpu.dimension_semantics<parallel>], iteration_bounds = array<i64: 1, 1>, scalar_prefetch = 0 : i64, scratch_operands = 0 : i64, tpu.core_type = #tpu.core_type<tc>, window_params = [{transform_indices = @transform_0, window_bounds = array<i64: 512, 128>}, {transform_indices = @transform_1, window_bounds = array<i64: 128, 128>}, {transform_indices = @transform_2, window_bounds = array<i64: 512, 128>}, {transform_indices = @transform_3, window_bounds = array<i64: 8, 128>}]} {
    %c0 = arith.constant 0 : index
    %c0_0 = arith.constant 0 : index
    %0 = vector.load %arg2[%c0, %c0_0] : memref<512x128xbf16, #tpu.memory_space<vmem>>, vector<512x128xbf16>
    %c0_1 = arith.constant 0 : index
    %c0_2 = arith.constant 0 : index
    %1 = vector.load %arg3[%c0_1, %c0_2] : memref<128x128xbf16, #tpu.memory_space<vmem>>, vector<128x128xbf16>
    %cst = arith.constant dense<0.000000e+00> : vector<512x128xf32>
    %2 = tpu.matmul %0, %1, %cst {dimension_numbers = #tpu.dot_dimension_numbers<[1], [0], [0], [1], [0, 0, 1, 1], [], []>} : vector<512x128xbf16>, vector<128x128xbf16>, vector<512x128xf32> -> vector<512x128xf32>
    %3 = arith.truncf %2 : vector<512x128xf32> to vector<512x128xbf16>
    %c0_3 = arith.constant 0 : index
    %c0_4 = arith.constant 0 : index
    %4 = vector.load %arg4[%c0_3, %c0_4] : memref<512x128xbf16, #tpu.memory_space<vmem>>, vector<512x128xbf16>
    tpu.vector_store %arg4[%c0_3, %c0_4], %3 {strides = array<i32>} : memref<512x128xbf16, #tpu.memory_space<vmem>>, vector<512x128xbf16>,
    %cst_5 = arith.constant dense<0.000000e+00> : vector<128xf32>
    %5 = vector.multi_reduction <add>, %2, %cst_5 [0] : vector<512x128xf32> to vector<128xf32>
    %6 = vector.shape_cast %5 : vector<128xf32> to vector<1x128xf32>
    %7 = arith.mulf %2, %2 : vector<512x128xf32>
    %cst_6 = arith.constant dense<0.000000e+00> : vector<128xf32>
    %8 = vector.multi_reduction <add>, %7, %cst_6 [0] : vector<512x128xf32> to vector<128xf32>
    %9 = vector.shape_cast %8 : vector<128xf32> to vector<1x128xf32>
    %10 = tpu.iota {dimensions = array<i32: 0>} : vector<8x128xi32>
    %c0_i32 = arith.constant 0 : i32
    %11 = vector.broadcast %c0_i32 : i32 to vector<8x128xi32>
    %12 = arith.cmpi eq, %10, %11 : vector<8x128xi32>
    %c1_i32 = arith.constant 1 : i32
    %13 = vector.broadcast %c1_i32 : i32 to vector<8x128xi32>
    %14 = arith.cmpi eq, %10, %13 : vector<8x128xi32>
    %cst_7 = arith.constant 0.000000e+00 : f32
    %15 = vector.shape_cast %9 : vector<1x128xf32> to vector<1x128xf32>
    %16 = vector.broadcast %15 : vector<1x128xf32> to vector<8x128xf32>
    %17 = vector.broadcast %cst_7 : f32 to vector<8x128xf32>
    %18 = arith.select %14, %16, %17 : vector<8x128xi1>, vector<8x128xf32>
    %19 = vector.shape_cast %6 : vector<1x128xf32> to vector<1x128xf32>
    %20 = vector.broadcast %19 : vector<1x128xf32> to vector<8x128xf32>
    %21 = arith.select %12, %20, %18 : vector<8x128xi1>, vector<8x128xf32>
    %c0_8 = arith.constant 0 : index
    %c0_9 = arith.constant 0 : index
    %22 = vector.load %arg5[%c0_8, %c0_9] : memref<8x128xf32, #tpu.memory_space<vmem>>, vector<8x128xf32>
    tpu.vector_store %arg5[%c0_8, %c0_9], %21 {strides = array<i32>} : memref<8x128xf32, #tpu.memory_space<vmem>>, vector<8x128xf32>,
    return
  }
  func.func @transform_0(%arg0: i32, %arg1: i32) -> (i32, i32) {
    %c0_i32 = arith.constant 0 : i32
    %c0_i32_0 = arith.constant 0 : i32
    return %arg0, %c0_i32 : i32, i32
  }
  func.func @transform_1(%arg0: i32, %arg1: i32) -> (i32, i32) {
    %c0_i32 = arith.constant 0 : i32
    %c0_i32_0 = arith.constant 0 : i32
    return %c0_i32, %arg1 : i32, i32
  }
  func.func @transform_2(%arg0: i32, %arg1: i32) -> (i32, i32) {
    %c0_i32 = arith.constant 0 : i32
    return %arg0, %arg1 : i32, i32
  }
  func.func @transform_3(%arg0: i32, %arg1: i32) -> (i32, i32) {
    %c0_i32 = arith.constant 0 : i32
    return %arg0, %arg1 : i32, i32
  }
}

module attributes {stable_mosaic.version = 11 : i64} {
  func.func @_mm_bias_tanh_kernel(%arg0: i32, %arg1: i32, %arg2: memref<512x2816xbf16, #tpu.memory_space<vmem>>, %arg3: memref<2816x128xbf16, #tpu.memory_space<vmem>>, %arg4: memref<1x128xf32, #tpu.memory_space<vmem>>, %arg5: memref<512x128xf32, #tpu.memory_space<vmem>>) attributes {dimension_semantics = [#tpu.dimension_semantics<parallel>, #tpu.dimension_semantics<parallel>], iteration_bounds = array<i64: 8, 1>, scalar_prefetch = 0 : i64, scratch_operands = 0 : i64, tpu.core_type = #tpu.core_type<tc>, window_params = [{transform_indices = @transform_0, window_bounds = array<i64: 512, 2816>}, {transform_indices = @transform_1, window_bounds = array<i64: 2816, 128>}, {transform_indices = @transform_2, window_bounds = array<i64: 1, 128>}, {transform_indices = @transform_3, window_bounds = array<i64: 512, 128>}]} {
    %c0 = arith.constant 0 : index
    %c0_0 = arith.constant 0 : index
    %0 = vector.load %arg2[%c0, %c0_0] : memref<512x2816xbf16, #tpu.memory_space<vmem>>, vector<512x2816xbf16>
    %c0_1 = arith.constant 0 : index
    %c0_2 = arith.constant 0 : index
    %1 = vector.load %arg3[%c0_1, %c0_2] : memref<2816x128xbf16, #tpu.memory_space<vmem>>, vector<2816x128xbf16>
    %cst = arith.constant dense<0.000000e+00> : vector<512x128xf32>
    %2 = tpu.matmul %0, %1, %cst {dimension_numbers = #tpu.dot_dimension_numbers<[1], [0], [0], [1], [0, 0, 1, 1], [], []>} : vector<512x2816xbf16>, vector<2816x128xbf16>, vector<512x128xf32> -> vector<512x128xf32>
    %c0_3 = arith.constant 0 : index
    %c0_4 = arith.constant 0 : index
    %3 = vector.load %arg4[%c0_3, %c0_4] : memref<1x128xf32, #tpu.memory_space<vmem>>, vector<1x128xf32>
    %4 = vector.broadcast %3 : vector<1x128xf32> to vector<512x128xf32>
    %5 = arith.addf %2, %4 : vector<512x128xf32>
    %6 = math.tanh %5 : vector<512x128xf32>
    %c0_5 = arith.constant 0 : index
    %c0_6 = arith.constant 0 : index
    %7 = vector.load %arg5[%c0_5, %c0_6] : memref<512x128xf32, #tpu.memory_space<vmem>>, vector<512x128xf32>
    tpu.vector_store %arg5[%c0_5, %c0_6], %6 {strides = array<i32>} : memref<512x128xf32, #tpu.memory_space<vmem>>, vector<512x128xf32>,
    return
  }
  func.func @transform_0(%arg0: i32, %arg1: i32) -> (i32, i32) {
    %c0_i32 = arith.constant 0 : i32
    %c0_i32_0 = arith.constant 0 : i32
    return %arg0, %c0_i32 : i32, i32
  }
  func.func @transform_1(%arg0: i32, %arg1: i32) -> (i32, i32) {
    %c0_i32 = arith.constant 0 : i32
    %c0_i32_0 = arith.constant 0 : i32
    return %c0_i32, %arg1 : i32, i32
  }
  func.func @transform_2(%arg0: i32, %arg1: i32) -> (i32, i32) {
    %c0_i32 = arith.constant 0 : i32
    %c0_i32_0 = arith.constant 0 : i32
    return %c0_i32, %arg1 : i32, i32
  }
  func.func @transform_3(%arg0: i32, %arg1: i32) -> (i32, i32) {
    %c0_i32 = arith.constant 0 : i32
    return %arg0, %arg1 : i32, i32
  }
}

</mosaic_0001>

<bundles_post_ra>
// kernel: _lambda_.19
= control target key start
LH: loop header
LB: loop body
LE: loop exit
PB: predicated region body
PF: predicated region fallthrough
CT: control target
= control target key end

     0   :  { %s3131_s12 = smov 0   ;;  %s3133_s13 = smov 0   ;;  %s3622_s0 = inlined_call_operand.vmem [shape: bf16[4096,384], index: 0, kind: input, shape index: {}]   ;;  %s3623_s1 = inlined_call_operand.vmem [shape: bf16[384,128], index: 1, kind: input, shape index: {}]   ;;  %s3624_s2 = inlined_call_operand.vmem [shape: bf16[4096,128], index: 2, kind: output, shape index: {0}]   ;;  %s3625_s3 = inlined_call_operand.vmem [shape: f32[64,128], index: 3, kind: output, shape index: {1}]  }
   0x1   :  { %s3135_s14 = smov 0  }
   0x2 LB: > { %s26_s15 = sadd.s32 1, %s3104_s13  ;;  %p2309_p0 = scmp.ge.s32.totalorder %s3108_s14, 1  ;;  %s3108_s14 = sphi %s3135_s14, %s14_s14   ;;  %s3104_s13 = sphi %s3133_s13, %s3627_s13   ;;  %s3100_s12 = sphi %s3131_s12, %s3626_s12  }
   0x3   : > { %p28_p1 = scmp.ge.s32.totalorder %s26_s15, 8  ;;  %p167_p2 = scmp.lt.s32.totalorder %s3108_s14, 9 }
   0x5   : > { %s3629_s15 = smov (%p28_p1, %s26_s15), 0  ;;  %p168_p3 = pnand %p2309_p0, %p167_p2 }
   0x6   : > { %v2934_v0 = vld [vmem:[%s3623_s1] sm:$0xff] (!%p168_p3)   ;;  %v3110_v1 = vmov (!%p168_p3), 0   ;;  %s2310_s18 = sshll.u32 (!%p168_p3), %s3100_s12, 6  ;;  %v2935_v2 = vld [vmem:[%s3623_s1 + $0x8] sm:$0xff] (!%p168_p3)   ;;  %v2936_v3 = vld [vmem:[%s3623_s1 + $0x10] sm:$0xff] (!%p168_p3)   ;;  %p226_p5 = scmp.lt.s32.totalorder (!%p168_p3), %s3100_s12, 7 }
   0x7   : > { %171 = sbr.rel (%p168_p3) target bundleno = 522 (0x20a), region = 28  ;;  %1066 = vmatprep.subr.bf16.mxu0 (!%p168_p3), %v3110_v1  ;;  %2876 = vmatprep.subr.bf16.mxu1 (!%p168_p3), %v3110_v1  ;;  %p207_p4 = scmp.lt.s32.totalorder (!%p168_p3), %s2310_s18, 511  ;;  %v2937_v4 = vld [vmem:[%s3623_s1 + $0x18] sm:$0xff] (!%p168_p3)   ;;  %v2938_v5 = vld [vmem:[%s3623_s1 + $0x20] sm:$0xff] (!%p168_p3)   ;;  %v2939_v7 = vld [vmem:[%s3623_s1 + $0x28] sm:$0xff] (!%p168_p3)  }
   0x8   : > { %1067 = vmatpush1.bf16.msra.mxu0 (!%p168_p3), %v2934_v0  ;;  %2892 = vmatpush1.bf16.msra.mxu1 (!%p168_p3), %v2934_v0  ;;  %v2940_v9 = vld [vmem:[%s3623_s1 + $0x30] sm:$0xff] (!%p168_p3)   ;;  %v2941_v10 = vld [vmem:[%s3623_s1 + $0x38] sm:$0xff] (!%p168_p3)   ;;  %v2942_v11 = vld [vmem:[%s3623_s1 + $0x40] sm:$0xff] (!%p168_p3)  }
   0x9   : > { %1068 = vmatprep.subr.bf16.mxu0 (!%p168_p3), %v3110_v1  ;;  %2877 = vmatprep.subr.bf16.mxu1 (!%p168_p3), %v3110_v1  ;;  %v2943_v12 = vld [vmem:[%s3623_s1 + $0x48] sm:$0xff] (!%p168_p3)   ;;  %v2944_v13 = vld [vmem:[%s3623_s1 + $0x50] sm:$0xff] (!%p168_p3)   ;;  %v2945_v14 = vld [vmem:[%s3623_s1 + $0x58] sm:$0xff] (!%p168_p3)  }
   0xa   : > { %v2946_v15 = vld [vmem:[%s3623_s1 + $0x60] sm:$0xff] (!%p168_p3)   ;;  %v2947_v16 = vld [vmem:[%s3623_s1 + $0x68] sm:$0xff] (!%p168_p3)   ;;  %v2948_v17 = vld [vmem:[%s3623_s1 + $0x70] sm:$0xff] (!%p168_p3)  }
   0xb   : > { %v2949_v18 = vld [vmem:[%s3623_s1 + $0x78] sm:$0xff] (!%p168_p3)   ;;  %v2974_v19 = vld [vmem:[%s3623_s1 + $0x80] sm:$0xff] (!%p168_p3)   ;;  %v2981_v24 = vld [vmem:[%s3623_s1 + $0x88] sm:$0xff] (!%p168_p3)  }
   0xc   : > { %1069 = vmatpush1.bf16.msra.mxu0 (!%p168_p3), %v2935_v2  ;;  %2893 = vmatpush1.bf16.msra.mxu1 (!%p168_p3), %v2935_v2  ;;  %v2988_v26 = vld [vmem:[%s3623_s1 + $0x90] sm:$0xff] (!%p168_p3)   ;;  %v2989_v30 = vld [vmem:[%s3623_s1 + $0x98] sm:$0xff] (!%p168_p3)   ;;  %v2996_v32 = vld [vmem:[%s3623_s1 + $0xa0] sm:$0xff] (!%p168_p3)  }
   0xd   : > { %1070 = vmatprep.subr.bf16.mxu0 (!%p168_p3), %v3110_v1  ;;  %2878 = vmatprep.subr.bf16.mxu1 (!%p168_p3), %v3110_v1  ;;  %v2997_v36 = vld [vmem:[%s3623_s1 + $0xa8] sm:$0xff] (!%p168_p3)   ;;  %v3004_v41 = vld [vmem:[%s3623_s1 + $0xb0] sm:$0xff] (!%p168_p3)   ;;  %v3005_v42 = vld [vmem:[%s3623_s1 + $0xb8] sm:$0xff] (!%p168_p3)  }
   0xe   : > { %s3631_s18 = smov (!%p207_p4, %s2310_s18), 511  ;;  %s3633_s12 = smov (!%p226_p5, %s3100_s12), 7 }
   0xf   : > { %s2908_s25 = smul.u32 12, %s3631_s18 }
  0x10   : > { %1071 = vmatpush1.bf16.msra.mxu0 %v2936_v3  ;;  %2894 = vmatpush1.bf16.msra.mxu1 %v2936_v3 }
  0x11   : > { %1072 = vmatprep.subr.bf16.mxu0 %v3110_v1  ;;  %2879 = vmatprep.subr.bf16.mxu1 %v3110_v1  ;;  %s3181_s30 = scalar_lea.vmem %s3622_s0, %s2908_s25 }
  0x12   : > { %v2952_v6 = vld [vmem:[%s3181_s30 + $0x4] ss:$12 sps:$4 sm:$0xff]   ;;  %v2950_v20 = vld [vmem:[%s3181_s30] ss:$12 sps:$4 sm:$0xff]   ;;  %v2956_v22 = vld [vmem:[%s3181_s30 + $0x1c] ss:$12 sps:$4 sm:$0xff]  }
  0x13   : > { %v2955_v8 = vld [vmem:[%s3181_s30 + $0x244] ss:$12 sps:$4 sm:$0xff]   ;;  %1098 = vmatprep.mubr.bf16.mxu0 %v2952_v6  ;;  %v2953_v21 = vld [vmem:[%s3181_s30 + $0x240] ss:$12 sps:$4 sm:$0xff]   ;;  %v2958_v23 = vld [vmem:[%s3181_s30 + $0x25c] ss:$12 sps:$4 sm:$0xff]  }
  0x14   : > { %1073 = vmatpush1.bf16.msra.mxu0 %v2937_v4  ;;  %2895 = vmatpush1.bf16.msra.mxu1 %v2937_v4  ;;  %v2960_v25 = vld [vmem:[%s3181_s30 + $0x18] ss:$12 sps:$4 sm:$0xff]   ;;  %v2962_v28 = vld [vmem:[%s3181_s30 + $0x34] ss:$12 sps:$4 sm:$0xff]   ;;  %v2966_v31 = vld [vmem:[%s3181_s30 + $0x30] ss:$12 sps:$4 sm:$0xff]  }
  0x15   : > { %1074 = vmatprep.subr.bf16.mxu0 %v3110_v1  ;;  %2880 = vmatprep.subr.bf16.mxu1 %v3110_v1  ;;  %v2961_v27 = vld [vmem:[%s3181_s30 + $0x258] ss:$12 sps:$4 sm:$0xff]   ;;  %v2964_v29 = vld [vmem:[%s3181_s30 + $0x274] ss:$12 sps:$4 sm:$0xff]   ;;  %v2967_v33 = vld [vmem:[%s3181_s30 + $0x270] ss:$12 sps:$4 sm:$0xff]  }
  0x16   : > { %1290 = vmatprep.mubr.bf16.mxu1 %v2955_v8  ;;  %v2968_v34 = vld [vmem:[%s3181_s30 + $0x4c] ss:$12 sps:$4 sm:$0xff]   ;;  %v2972_v37 = vld [vmem:[%s3181_s30 + $0x48] ss:$12 sps:$4 sm:$0xff]   ;;  %v2975_v39 = vld [vmem:[%s3181_s30 + $0x64] ss:$12 sps:$4 sm:$0xff]  }
  0x17   : > { %v2970_v35 = vld [vmem:[%s3181_s30 + $0x28c] ss:$12 sps:$4 sm:$0xff]   ;;  %v2973_v38 = vld [vmem:[%s3181_s30 + $0x288] ss:$12 sps:$4 sm:$0xff]   ;;  %v2977_v40 = vld [vmem:[%s3181_s30 + $0x2a4] ss:$12 sps:$4 sm:$0xff]  }
  0x18   : > { %1075 = vmatpush1.bf16.msra.mxu0 %v2938_v5  ;;  %2896 = vmatpush1.bf16.msra.mxu1 %v2938_v5  ;;  %v2979_v43 = vld [vmem:[%s3181_s30 + $0x60] ss:$12 sps:$4 sm:$0xff]   ;;  %v2982_v45 = vld [vmem:[%s3181_s30 + $0x7c] ss:$12 sps:$4 sm:$0xff]   ;;  %v2986_v47 = vld [vmem:[%s3181_s30 + $0x78] ss:$12 sps:$4 sm:$0xff]  }
  0x19   : > { %1076 = vmatprep.subr.bf16.mxu0 %v3110_v1  ;;  %2881 = vmatprep.subr.bf16.mxu1 %v3110_v1  ;;  %v2980_v44 = vld [vmem:[%s3181_s30 + $0x2a0] ss:$12 sps:$4 sm:$0xff]   ;;  %v2984_v46 = vld [vmem:[%s3181_s30 + $0x2bc] ss:$12 sps:$4 sm:$0xff]   ;;  %v2987_v48 = vld [vmem:[%s3181_s30 + $0x2b8] ss:$12 sps:$4 sm:$0xff]  }
  0x1a   : > { %v2990_v49 = vld [vmem:[%s3181_s30 + $0x94] ss:$12 sps:$4 sm:$0xff]   ;;  %v2994_v51 = vld [vmem:[%s3181_s30 + $0x90] ss:$12 sps:$4 sm:$0xff]   ;;  %v2998_v53 = vld [vmem:[%s3181_s30 + $0xac] ss:$12 sps:$4 sm:$0xff]  }
  0x1b   : > { %v2992_v50 = vld [vmem:[%s3181_s30 + $0x2d4] ss:$12 sps:$4 sm:$0xff]   ;;  %v2995_v52 = vld [vmem:[%s3181_s30 + $0x2d0] ss:$12 sps:$4 sm:$0xff]   ;;  %v3000_v54 = vld [vmem:[%s3181_s30 + $0x2ec] ss:$12 sps:$4 sm:$0xff]  }
  0x1c   : > { %1077 = vmatpush1.bf16.msra.mxu0 %v2939_v7  ;;  %2897 = vmatpush1.bf16.msra.mxu1 %v2939_v7  ;;  %v3002_v55 = vld [vmem:[%s3181_s30 + $0xa8] ss:$12 sps:$4 sm:$0xff]   ;;  %v3006_v57 = vld [vmem:[%s3181_s30 + $0xc4] ss:$12 sps:$4 sm:$0xff]   ;;  %v3009_v59 = vld [vmem:[%s3181_s30 + $0xc0] ss:$12 sps:$4 sm:$0xff]  }
  0x1d   : > { %1078 = vmatprep.subr.bf16.mxu0 %v3110_v1  ;;  %2882 = vmatprep.subr.bf16.mxu1 %v3110_v1  ;;  %v3003_v56 = vld [vmem:[%s3181_s30 + $0x2e8] ss:$12 sps:$4 sm:$0xff]   ;;  %v3010_v60 = vld [vmem:[%s3181_s30 + $0x20] ss:$12 sps:$4 sm:$0xff]   ;;  %v3013_v62 = vld [vmem:[%s3181_s30 + $0x38] ss:$12 sps:$4 sm:$0xff]  }
  0x1e   : > { %v3008_v58 = vld [vmem:[%s3181_s30 + $0x8] ss:$12 sps:$4 sm:$0xff]   ;;  %v3014_v63 = vld [vmem:[%s3181_s30 + $0xd8] ss:$12 sps:$4 sm:$0xff]   ;;  %v3015_v0 = vld [vmem:[%s3181_s30 + $0x50] ss:$12 sps:$4 sm:$0xff]  }
  0x1f   : > { %v3011_v61 = vld [vmem:[%s3181_s30 + $0xdc] ss:$12 sps:$4 sm:$0xff]   ;;  %v3020_v4 = vld [vmem:[%s3181_s30 + $0x80] ss:$12 sps:$4 sm:$0xff]   ;;  %v3023_v6 = vld [vmem:[%s3181_s30 + $0x98] ss:$12 sps:$4 sm:$0xff]  }
  0x20   : > { %1079 = vmatpush1.bf16.msra.mxu0 %v2940_v9  ;;  %2898 = vmatpush1.bf16.msra.mxu1 %v2940_v9  ;;  %v3018_v2 = vld [vmem:[%s3181_s30 + $0x68] ss:$12 sps:$4 sm:$0xff]   ;;  %v3019_v3 = vld [vmem:[%s3181_s30 + $0xf0] ss:$12 sps:$4 sm:$0xff]   ;;  %v3021_v5 = vld [vmem:[%s3181_s30 + $0x10c] ss:$12 sps:$4 sm:$0xff]  }
  0x21   : > { %1080 = vmatprep.subr.bf16.mxu0 %v3110_v1  ;;  %2883 = vmatprep.subr.bf16.mxu1 %v3110_v1  ;;  %v3024_v7 = vld [vmem:[%s3181_s30 + $0x108] ss:$12 sps:$4 sm:$0xff]   ;;  %v3025_v8 = vld [vmem:[%s3181_s30 + $0xb0] ss:$12 sps:$4 sm:$0xff]  }
  0x22   : > { %v3026_v9 = vld [vmem:[%s3181_s30 + $0x124] ss:$12 sps:$4 sm:$0xff]  }
  0x24   : > { %1081 = vmatpush1.bf16.msra.mxu0 %v2941_v10  ;;  %2899 = vmatpush1.bf16.msra.mxu1 %v2941_v10  ;;  %v3028_v10 = vld [vmem:[%s3181_s30 + $0xc8] ss:$12 sps:$4 sm:$0xff]  }
  0x25   : > { %1082 = vmatprep.subr.bf16.mxu0 %v3110_v1  ;;  %2884 = vmatprep.subr.bf16.mxu1 %v3110_v1 }
  0x28   : > { %1083 = vmatpush1.bf16.msra.mxu0 %v2942_v11  ;;  %2900 = vmatpush1.bf16.msra.mxu1 %v2942_v11  ;;  %v3029_v11 = vld [vmem:[%s3181_s30 + $0x120] ss:$12 sps:$4 sm:$0xff]  }
  0x29   : > { %1084 = vmatprep.subr.bf16.mxu0 %v3110_v1  ;;  %2885 = vmatprep.subr.bf16.mxu1 %v3110_v1 }
  0x2c   : > { %1085 = vmatpush1.bf16.msra.mxu0 %v2943_v12  ;;  %2901 = vmatpush1.bf16.msra.mxu1 %v2943_v12  ;;  %v3030_v12 = vld [vmem:[%s3181_s30 + $0xe0] ss:$12 sps:$4 sm:$0xff]  }
  0x2d   : > { %1086 = vmatprep.subr.bf16.mxu0 %v3110_v1  ;;  %2886 = vmatprep.subr.bf16.mxu1 %v3110_v1 }
  0x30   : > { %1087 = vmatpush1.bf16.msra.mxu0 %v2944_v13  ;;  %2902 = vmatpush1.bf16.msra.mxu1 %v2944_v13  ;;  %v3031_v13 = vld [vmem:[%s3181_s30 + $0x13c] ss:$12 sps:$4 sm:$0xff]  }
  0x31   : > { %1088 = vmatprep.subr.bf16.mxu0 %v3110_v1  ;;  %2887 = vmatprep.subr.bf16.mxu1 %v3110_v1 }
  0x34   : > { %1089 = vmatpush1.bf16.msra.mxu0 %v2945_v14  ;;  %2903 = vmatpush1.bf16.msra.mxu1 %v2945_v14  ;;  %v3033_v14 = vld [vmem:[%s3181_s30 + $0xf8] ss:$12 sps:$4 sm:$0xff]  }
  0x35   : > { %1090 = vmatprep.subr.bf16.mxu0 %v3110_v1  ;;  %2888 = vmatprep.subr.bf16.mxu1 %v3110_v1 }
  0x38   : > { %1091 = vmatpush1.bf16.msra.mxu0 %v2946_v15  ;;  %2904 = vmatpush1.bf16.msra.mxu1 %v2946_v15  ;;  %v3034_v15 = vld [vmem:[%s3181_s30 + $0x138] ss:$12 sps:$4 sm:$0xff]  }
  0x39   : > { %1092 = vmatprep.subr.bf16.mxu0 %v3110_v1  ;;  %2889 = vmatprep.subr.bf16.mxu1 %v3110_v1 }
  0x3c   : > { %1093 = vmatpush1.bf16.msra.mxu0 %v2947_v16  ;;  %2905 = vmatpush1.bf16.msra.mxu1 %v2947_v16  ;;  %v3035_v16 = vld [vmem:[%s3181_s30 + $0x110] ss:$12 sps:$4 sm:$0xff]  }
  0x3d   : > { %1094 = vmatprep.subr.bf16.mxu0 %v3110_v1  ;;  %2890 = vmatprep.subr.bf16.mxu1 %v3110_v1 }
  0x40   : > { %1095 = vmatpush1.bf16.msra.mxu0 %v2948_v17  ;;  %2906 = vmatpush1.bf16.msra.mxu1 %v2948_v17  ;;  %v3036_v17 = vld [vmem:[%s3181_s30 + $0x154] ss:$12 sps:$4 sm:$0xff]  }
  0x41   : > { %1096 = vmatprep.subr.bf16.mxu0 %v3110_v1  ;;  %2891 = vmatprep.subr.bf16.mxu1 %v3110_v1  ;;  %v3016_v1 = vld [vmem:[%s3181_s30 + $0xf4] ss:$12 sps:$4 sm:$0xff]  }
  0x44   : > { %1097 = vmatpush1.bf16.msra.mxu0 %v2949_v18  ;;  %2907 = vmatpush1.bf16.msra.mxu1 %v2949_v18  ;;  %v3038_v18 = vld [vmem:[%s3181_s30 + $0x128] ss:$12 sps:$4 sm:$0xff]  }
  0x45   : > { %2796 = vmatprep.subr.bf16.mxu1 %v2974_v19 }
  0x47   : > { %1099 = vmatmul.mubr.bf16.vlgmr.msra.gmra.mrb[0].mxu0 %v2950_v20  ;;  %1291 = vmatmul.mubr.bf16.vlgmr.msra.gmra.mrb[0].mxu1 %v2953_v21  ;;  %v3040_v20 = vld [vmem:[%s3181_s30 + $0x140] ss:$12 sps:$4 sm:$0xff]  }
  0x48   : > { %1106 = vmatprep.mubr.bf16.mxu0 %v2956_v22  ;;  %1298 = vmatprep.mubr.bf16.mxu1 %v2958_v23  ;;  %v3041_v21 = vld [vmem:[%s3181_s30 + $0x16c] ss:$12 sps:$4 sm:$0xff]   ;;  %v3044_v23 = vld [vmem:[%s3181_s30 + $0x168] ss:$12 sps:$4 sm:$0xff]  }
  0x49   : > { %2797 = vmatpush3.bf16.msra.mxu1 %v2974_v19  ;;  %v3039_v19 = vld [vmem:[%s3181_s30 + $0x150] ss:$12 sps:$4 sm:$0xff]   ;;  %v3043_v22 = vld [vmem:[%s3181_s30 + $0x158] ss:$12 sps:$4 sm:$0xff]  }
  0x4a   : > { %2798 = vmatprep.subr.bf16.mxu1 %v2981_v24 }
  0x4d   : > { %2799 = vmatpush3.bf16.msra.mxu1 %v2981_v24  ;;  %v3045_v24 = vld [vmem:[%s3181_s30 + $0x170] ss:$12 sps:$4 sm:$0xff]  }
  0x4e   : > { %2800 = vmatprep.subr.bf16.mxu1 %v2988_v26 }
  0x4f   : > { %1107 = vmatmul.mubr.bf16.gmra.mrb[4].mxu0 %v2960_v25  ;;  %1299 = vmatmul.mubr.bf16.gmra.mrb[4].mxu1 %v2961_v27  ;;  %v3046_v25 = vld [vmem:[%s3181_s30 + $0x184] ss:$12 sps:$4 sm:$0xff]   ;;  %v3049_v27 = vld [vmem:[%s3181_s30 + $0x180] ss:$12 sps:$4 sm:$0xff]  }
  0x50   : > { %1114 = vmatprep.mubr.bf16.mxu0 %v2962_v28  ;;  %1306 = vmatprep.mubr.bf16.mxu1 %v2964_v29  ;;  %v3050_v28 = vld [vmem:[%s3181_s30 + $0x1a0] ss:$12 sps:$4 sm:$0xff]   ;;  %v3051_v29 = vld [vmem:[%s3181_s30 + $0x19c] ss:$12 sps:$4 sm:$0xff]  }
  0x51   : > { %2801 = vmatpush3.bf16.msra.mxu1 %v2988_v26  ;;  %v3048_v26 = vld [vmem:[%s3181_s30 + $0x188] ss:$12 sps:$4 sm:$0xff]  }
  0x52   : > { %2802 = vmatprep.subr.bf16.mxu1 %v2989_v30 }
  0x55   : > { %2803 = vmatpush3.bf16.msra.mxu1 %v2989_v30  ;;  %v3053_v30 = vld [vmem:[%s3181_s30 + $0x1b8] ss:$12 sps:$4 sm:$0xff]  }
  0x56   : > { %2804 = vmatprep.subr.bf16.mxu1 %v2996_v32 }
  0x57   : > { %1115 = vmatmul.mubr.bf16.gmra.mrb[8].mxu0 %v2966_v31  ;;  %1307 = vmatmul.mubr.bf16.gmra.mrb[8].mxu1 %v2967_v33  ;;  %v3054_v31 = vld [vmem:[%s3181_s30 + $0x198] ss:$12 sps:$4 sm:$0xff]   ;;  %v3056_v33 = vld [vmem:[%s3181_s30 + $0x1b4] ss:$12 sps:$4 sm:$0xff]  }
  0x58   : > { %1122 = vmatprep.mubr.bf16.mxu0 %v2968_v34  ;;  %1314 = vmatprep.mubr.bf16.mxu1 %v2970_v35  ;;  %v3058_v34 = vld [vmem:[%s3181_s30 + $0x1e8] ss:$12 sps:$4 sm:$0xff]   ;;  %v3059_v35 = vld [vmem:[%s3181_s30 + $0x1b0] ss:$12 sps:$4 sm:$0xff]  }
  0x59   : > { %2805 = vmatpush3.bf16.msra.mxu1 %v2996_v32  ;;  %v3055_v32 = vld [vmem:[%s3181_s30 + $0x1d0] ss:$12 sps:$4 sm:$0xff]  }
  0x5a   : > { %2806 = vmatprep.subr.bf16.mxu1 %v2997_v36 }
  0x5d   : > { %2807 = vmatpush3.bf16.msra.mxu1 %v2997_v36  ;;  %v3060_v36 = vld [vmem:[%s3181_s30 + $0x200] ss:$12 sps:$4 sm:$0xff]  }
  0x5e   : > { %2808 = vmatprep.subr.bf16.mxu1 %v3004_v41 }
  0x5f   : > { %1123 = vmatmul.mubr.bf16.gmra.mrb[12].mxu0 %v2972_v37  ;;  %1315 = vmatmul.mubr.bf16.gmra.mrb[12].mxu1 %v2973_v38  ;;  %v3061_v37 = vld [vmem:[%s3181_s30 + $0x1cc] ss:$12 sps:$4 sm:$0xff]  }
  0x60   : > { %1130 = vmatprep.mubr.bf16.mxu0 %v2975_v39  ;;  %1322 = vmatprep.mubr.bf16.mxu1 %v2977_v40  ;;  %v3063_v38 = vld [vmem:[%s3181_s30 + $0x218] ss:$12 sps:$4 sm:$0xff]   ;;  %v3064_v39 = vld [vmem:[%s3181_s30 + $0x1c8] ss:$12 sps:$4 sm:$0xff]   ;;  %v3065_v40 = vld [vmem:[%s3181_s30 + $0x230] ss:$12 sps:$4 sm:$0xff]  }
  0x61   : > { %2809 = vmatpush3.bf16.msra.mxu1 %v3004_v41  ;;  %v3066_v41 = vld [vmem:[%s3181_s30 + $0x1e4] ss:$12 sps:$4 sm:$0xff]  }
  0x62   : > { %2810 = vmatprep.subr.bf16.mxu1 %v3005_v42 }
  0x65   : > { %2811 = vmatpush3.bf16.msra.mxu1 %v3005_v42  ;;  %v3068_v42 = vld [vmem:[%s3181_s30 + $0x248] ss:$12 sps:$4 sm:$0xff]  }
  0x67   : > { %1131 = vmatmul.mubr.bf16.gmra.mrb[16].mxu0 %v2979_v43  ;;  %1323 = vmatmul.mubr.bf16.gmra.mrb[16].mxu1 %v2980_v44  ;;  %v3069_v43 = vld [vmem:[%s3181_s30 + $0x1e0] ss:$12 sps:$4 sm:$0xff]  }
  0x68   : > { %1138 = vmatprep.mubr.bf16.mxu0 %v2982_v45  ;;  %1330 = vmatprep.mubr.bf16.mxu1 %v2984_v46  ;;  %v3070_v44 = vld [vmem:[%s3181_s30 + $0x260] ss:$12 sps:$4 sm:$0xff]   ;;  %v3071_v45 = vld [vmem:[%s3181_s30 + $0x1fc] ss:$12 sps:$4 sm:$0xff]   ;;  %v3073_v46 = vld [vmem:[%s3181_s30 + $0x278] ss:$12 sps:$4 sm:$0xff]  }
  0x6f   : > { %1139 = vmatmul.mubr.bf16.gmra.mrb[20].mxu0 %v2986_v47  ;;  %1331 = vmatmul.mubr.bf16.gmra.mrb[20].mxu1 %v2987_v48  ;;  %v3074_v47 = vld [vmem:[%s3181_s30 + $0x1f8] ss:$12 sps:$4 sm:$0xff]   ;;  %v3075_v48 = vld [vmem:[%s3181_s30 + $0x290] ss:$12 sps:$4 sm:$0xff]  }
  0x70   : > { %1146 = vmatprep.mubr.bf16.mxu0 %v2990_v49  ;;  %1338 = vmatprep.mubr.bf16.mxu1 %v2992_v50  ;;  %v3076_v49 = vld [vmem:[%s3181_s30 + $0x214] ss:$12 sps:$4 sm:$0xff]  }
  0x71   : > { %v3078_v50 = vld [vmem:[%s3181_s30 + $0x2a8] ss:$12 sps:$4 sm:$0xff]  }
  0x77   : > { %1147 = vmatmul.mubr.bf16.gmra.mrb[24].mxu0 %v2994_v51  ;;  %1339 = vmatmul.mubr.bf16.gmra.mrb[24].mxu1 %v2995_v52  ;;  %v3079_v51 = vld [vmem:[%s3181_s30 + $0x210] ss:$12 sps:$4 sm:$0xff]   ;;  %v3080_v52 = vld [vmem:[%s3181_s30 + $0x2c0] ss:$12 sps:$4 sm:$0xff]  }
  0x78   : > { %1154 = vmatprep.mubr.bf16.mxu0 %v2998_v53  ;;  %1346 = vmatprep.mubr.bf16.mxu1 %v3000_v54  ;;  %v3081_v53 = vld [vmem:[%s3181_s30 + $0x22c] ss:$12 sps:$4 sm:$0xff]  }
  0x79   : > { %v3083_v54 = vld [vmem:[%s3181_s30 + $0x2d8] ss:$12 sps:$4 sm:$0xff]  }
  0x7f   : > { %1155 = vmatmul.mubr.bf16.gmra.mrb[28].mxu0 %v3002_v55  ;;  %1347 = vmatmul.mubr.bf16.gmra.mrb[28].mxu1 %v3003_v56  ;;  %v3084_v55 = vld [vmem:[%s3181_s30 + $0x228] ss:$12 sps:$4 sm:$0xff]   ;;  %v3085_v56 = vld [vmem:[%s3181_s30 + $0x2f0] ss:$12 sps:$4 sm:$0xff]   ;;  %s2313_s30 = sshll.u32 %s3631_s18, 2  ;;  %s2314_s18 = sshll.u32 %s3633_s12, 3 }
  0x80   : > { %1162 = vmatprep.mubr.bf16.mxu0 %v3006_v57  ;;  %2812 = vmatprep.mubr.bf16.mxu1 %v3008_v58  ;;  %s3429_s28 = scalar_lea.vmem %s3624_s2, %s2313_s30  ;;  %s232_s5 = scalar_lea.vmem %s3625_s3, %s2314_s18 }
  0x87   : > { %1163 = vmatmul.mubr.bf16.gmra.mrb[32].mxu0 %v3009_v59  ;;  %2813 = vmatmul.mubr.bf16.vlgmr.msra.gmra.mrb[32].mxu1 %v3010_v60 }
  0x88   : > { %1170 = vmatprep.mubr.bf16.mxu0 %v3011_v61  ;;  %2816 = vmatprep.mubr.bf16.mxu1 %v3013_v62 }
  0x8f   : > { %1171 = vmatmul.mubr.bf16.gmra.mrb[36].mxu0 %v3014_v63  ;;  %2817 = vmatmul.mubr.bf16.gmra.mrb[36].mxu1 %v3015_v0 }
  0x90   : > { %1178 = vmatprep.mubr.bf16.mxu0 %v3016_v1  ;;  %2820 = vmatprep.mubr.bf16.mxu1 %v3018_v2 }
  0x97   : > { %1179 = vmatmul.mubr.bf16.gmra.mrb[40].mxu0 %v3019_v3  ;;  %2821 = vmatmul.mubr.bf16.gmra.mrb[40].mxu1 %v3020_v4 }
  0x98   : > { %1186 = vmatprep.mubr.bf16.mxu0 %v3021_v5  ;;  %2824 = vmatprep.mubr.bf16.mxu1 %v3023_v6 }
  0x9f   : > { %1187 = vmatmul.mubr.bf16.gmra.mrb[44].mxu0 %v3024_v7  ;;  %2825 = vmatmul.mubr.bf16.gmra.mrb[44].mxu1 %v3025_v8 }
  0xa0   : > { %1194 = vmatprep.mubr.bf16.mxu0 %v3026_v9  ;;  %2828 = vmatprep.mubr.bf16.mxu1 %v3028_v10 }
  0xa7   : > { %1195 = vmatmul.mubr.bf16.gmra.mrb[48].mxu0 %v3029_v11  ;;  %2829 = vmatmul.mubr.bf16.gmra.mrb[48].mxu1 %v3030_v12 }
  0xa8   : > { %1202 = vmatprep.mubr.bf16.mxu0 %v3031_v13  ;;  %2832 = vmatprep.mubr.bf16.mxu1 %v3033_v14 }
  0xaf   : > { %1203 = vmatmul.mubr.bf16.gmra.mrb[52].mxu0 %v3034_v15  ;;  %2833 = vmatmul.mubr.bf16.gmra.mrb[52].mxu1 %v3035_v16 }
  0xb0   : > { %1210 = vmatprep.mubr.bf16.mxu0 %v3036_v17  ;;  %2836 = vmatprep.mubr.bf16.mxu1 %v3038_v18 }
  0xb7   : > { %1211 = vmatmul.mubr.bf16.gmra.mrb[56].mxu0 %v3039_v19  ;;  %2837 = vmatmul.mubr.bf16.gmra.mrb[56].mxu1 %v3040_v20 }
  0xb8   : > { %1218 = vmatprep.mubr.bf16.mxu0 %v3041_v21  ;;  %2840 = vmatprep.mubr.bf16.mxu1 %v3043_v22 }
  0xbf   : > { %1219 = vmatmul.mubr.bf16.gmra.mrb[60].mxu0 %v3044_v23  ;;  %2841 = vmatmul.mubr.bf16.gmra.mrb[60].mxu1 %v3045_v24 }
  0xc0   : > { %1226 = vmatprep.mubr.bf16.mxu0 %v3046_v25  ;;  %2844 = vmatprep.mubr.bf16.mxu1 %v3048_v26 }
  0xc7   : > { %1227 = vmatmul.mubr.bf16.gmra.mrb[64].mxu0 %v3049_v27  ;;  %2845 = vmatmul.mubr.bf16.gmra.mrb[64].mxu1 %v3050_v28 }
  0xc8   : > { %1234 = vmatprep.mubr.bf16.mxu0 %v3051_v29  ;;  %2848 = vmatprep.mubr.bf16.mxu1 %v3053_v30 }
  0xcf   : > { %1235 = vmatmul.mubr.bf16.gmra.mrb[68].mxu0 %v3054_v31  ;;  %2849 = vmatmul.mubr.bf16.gmra.mrb[68].mxu1 %v3055_v32 }
  0xd0   : > { %1242 = vmatprep.mubr.bf16.mxu0 %v3056_v33  ;;  %2852 = vmatprep.mubr.bf16.mxu1 %v3058_v34 }
  0xd7   : > { %1243 = vmatmul.mubr.bf16.gmra.mrb[72].mxu0 %v3059_v35  ;;  %2853 = vmatmul.mubr.bf16.gmra.mrb[72].mxu1 %v3060_v36 }
  0xd8   : > { %1250 = vmatprep.mubr.bf16.mxu0 %v3061_v37  ;;  %2856 = vmatprep.mubr.bf16.mxu1 %v3063_v38 }
  0xdf   : > { %1251 = vmatmul.mubr.bf16.gmra.mrb[76].mxu0 %v3064_v39  ;;  %2857 = vmatmul.mubr.bf16.gmra.mrb[76].mxu1 %v3065_v40 }
  0xe0   : > { %1258 = vmatprep.mubr.bf16.mxu0 %v3066_v41  ;;  %2860 = vmatprep.mubr.bf16.mxu1 %v3068_v42 }
  0xe7   : > { %1259 = vmatmul.mubr.bf16.gmra.mrb[80].mxu0 %v3069_v43  ;;  %2861 = vmatmul.mubr.bf16.gmra.mrb[80].mxu1 %v3070_v44 }
  0xe8   : > { %1266 = vmatprep.mubr.bf16.mxu0 %v3071_v45  ;;  %2864 = vmatprep.mubr.bf16.mxu1 %v3073_v46 }
  0xef   : > { %1267 = vmatmul.mubr.bf16.gmra.mrb[84].mxu0 %v3074_v47  ;;  %2865 = vmatmul.mubr.bf16.gmra.mrb[84].mxu1 %v3075_v48 }
  0xf0   : > { %1274 = vmatprep.mubr.bf16.mxu0 %v3076_v49  ;;  %2868 = vmatprep.mubr.bf16.mxu1 %v3078_v50 }
  0xf7   : > { %1275 = vmatmul.mubr.bf16.gmra.mrb[88].mxu0 %v3079_v51  ;;  %2869 = vmatmul.mubr.bf16.gmra.mrb[88].mxu1 %v3080_v52 }
  0xf8   : > { %1282 = vmatprep.mubr.bf16.mxu0 %v3081_v53  ;;  %2872 = vmatprep.mubr.bf16.mxu1 %v3083_v54 }
  0xff   : > { %1283 = vmatmul.mubr.bf16.gmra.mrb[92].mxu0 %v3084_v55  ;;  %2873 = vmatmul.mubr.bf16.gmra.mrb[92].mxu1 %v3085_v56 }
 0x11a   : > { %v3360_v57 = vpop.f32.mrb[0].mxu0  ;;  %v3362_v58 = vpop.f32.mrb[0].mxu1 }
 0x11b   : > { %v1102_v59 = vpop.f32.mrb[1].mxu0  ;;  %v1294_v60 = vpop.f32.mrb[1].mxu1 }
 0x11c   : > { %v3364_v61 = vpop.f32.mrb[2].mxu0  ;;  %v3366_v62 = vpop.f32.mrb[2].mxu1 }
 0x11d   : > { %v1105_v63 = vpop.f32.mrb[3].mxu0  ;;  %v1297_v0 = vpop.f32.mrb[3].mxu1 }
 0x122   : > { %v1108_v1 = vpop.f32.mrb[4].mxu0  ;;  %v3368_v2 = vpop.f32.mrb[4].mxu1 }
 0x123   : > { %v1110_v3 = vpop.f32.mrb[5].mxu0  ;;  %v1302_v4 = vpop.f32.mrb[5].mxu1 }
 0x124   : > { %v1111_v5 = vpop.f32.mrb[6].mxu0  ;;  %v3370_v6 = vpop.f32.mrb[6].mxu1 }
 0x125   : > { %v1113_v7 = vpop.f32.mrb[7].mxu0  ;;  %v1305_v8 = vpop.f32.mrb[7].mxu1 }
 0x12a   : > { %v3372_v9 = vpop.f32.mrb[8].mxu0  ;;  %v3374_v10 = vpop.f32.mrb[8].mxu1 }
 0x12b   : > { %v1118_v11 = vpop.f32.mrb[9].mxu0  ;;  %v1310_v12 = vpop.f32.mrb[9].mxu1 }
 0x12c   : > { %v3376_v13 = vpop.f32.mrb[10].mxu0  ;;  %v3378_v14 = vpop.f32.mrb[10].mxu1 }
 0x12d   : > { %v1121_v15 = vpop.f32.mrb[11].mxu0  ;;  %v1313_v16 = vpop.f32.mrb[11].mxu1 }
 0x132   : > { %v3380_v17 = vpop.f32.mrb[12].mxu0  ;;  %v3382_v18 = vpop.f32.mrb[12].mxu1 }
 0x133   : > { %v1126_v19 = vpop.f32.mrb[13].mxu0  ;;  %v1318_v20 = vpop.f32.mrb[13].mxu1 }
 0x134   : > { %v3384_v21 = vpop.f32.mrb[14].mxu0  ;;  %v3386_v22 = vpop.f32.mrb[14].mxu1 }
 0x135   : > { %v1129_v23 = vpop.f32.mrb[15].mxu0  ;;  %v1321_v24 = vpop.f32.mrb[15].mxu1 }
 0x13a   : > { %v3388_v25 = vpop.f32.mrb[16].mxu0  ;;  %v3390_v26 = vpop.f32.mrb[16].mxu1 }
 0x13b   : > { %v1134_v27 = vpop.f32.mrb[17].mxu0  ;;  %v1326_v28 = vpop.f32.mrb[17].mxu1 }
 0x13c   : > { %v3392_v29 = vpop.f32.mrb[18].mxu0  ;;  %v3394_v30 = vpop.f32.mrb[18].mxu1 }
 0x13d   : > { %v1137_v31 = vpop.f32.mrb[19].mxu0  ;;  %v1329_v32 = vpop.f32.mrb[19].mxu1 }
 0x142   : > { %v3396_v33 = vpop.f32.mrb[20].mxu0  ;;  %v3398_v34 = vpop.f32.mrb[20].mxu1 }
 0x143   : > { %v1142_v35 = vpop.f32.mrb[21].mxu0  ;;  %v1334_v36 = vpop.f32.mrb[21].mxu1 }
 0x144   : > { %v3400_v37 = vpop.f32.mrb[22].mxu0  ;;  %v3402_v38 = vpop.f32.mrb[22].mxu1 }
 0x145   : > { %v1145_v39 = vpop.f32.mrb[23].mxu0  ;;  %v1337_v40 = vpop.f32.mrb[23].mxu1 }
 0x14a   : > { %v3404_v41 = vpop.f32.mrb[24].mxu0  ;;  %v3406_v42 = vpop.f32.mrb[24].mxu1 }
 0x14b   : > { %v1150_v43 = vpop.f32.mrb[25].mxu0  ;;  %v1342_v44 = vpop.f32.mrb[25].mxu1 }
 0x14c   : > { %v3408_v45 = vpop.f32.mrb[26].mxu0  ;;  %v3410_v46 = vpop.f32.mrb[26].mxu1 }
 0x14d   : > { %v1153_v47 = vpop.f32.mrb[27].mxu0  ;;  %v1345_v48 = vpop.f32.mrb[27].mxu1 }
 0x152   : > { %v3412_v49 = vpop.f32.mrb[28].mxu0  ;;  %v3414_v50 = vpop.f32.mrb[28].mxu1 }
 0x153   : > { %v1158_v51 = vpop.f32.mrb[29].mxu0  ;;  %v1350_v52 = vpop.f32.mrb[29].mxu1 }
 0x154   : > { %v3416_v53 = vpop.f32.mrb[30].mxu0  ;;  %v3418_v54 = vpop.f32.mrb[30].mxu1 }
 0x155   : > { %v1161_v55 = vpop.f32.mrb[31].mxu0  ;;  %v1353_v56 = vpop.f32.mrb[31].mxu1 }
 0x15a   : > { %v3420_v59 = vpop.f32.mrb[32].mxu0  ;;  %v2814_v60 = vpop.f32.mrb[32].mxu1 }
 0x15b   : > { %v1398_v63 = vadd.f32 %v2814_v60, %v1108_v1  ;;  %v1166_v0 = vpop.f32.mrb[33].mxu0  ;;  %v1389_v3 = vpop.f32.mrb[33].mxu1 }
 0x15c   : > { %v1390_v4 = vadd.f32 %v1389_v3, %v3360_v57  ;;  %v3424_v7 = vpop.f32.mrb[34].mxu0  ;;  %v2815_v8 = vpop.f32.mrb[34].mxu1 }
 0x15d   : > { %v1401_v11 = vadd.f32 %v2815_v8, %v1111_v5  ;;  %v1169_v12 = vpop.f32.mrb[35].mxu0  ;;  %v1392_v15 = vpop.f32.mrb[35].mxu1  ;;  %v2035_v24 = vmul.f32 %v1398_v63, %v1398_v63 }
 0x15e   : > { %v1393_v1 = vadd.f32 %v1392_v15, %v3364_v61  ;;  %v2033_v19 = vmul.f32 %v1390_v4, %v1390_v4 }
 0x15f   : > { %v2573_v16 = vpack.c.bf16 %v1401_v11, %v1398_v63  ;;  %v2036_v39 = vmul.f32 %v1401_v11, %v1401_v11 }
 0x160   : > { %v2568_v20 = vpack.c.bf16 %v1393_v1, %v1390_v4  ;;  %v1964_v23 = vadd.f32 %v1393_v1, %v1390_v4  ;;  %v2034_v57 = vmul.f32 %v1393_v1, %v1393_v1 }
 0x161   : > { %2725 = vst [vmem:[%s3429_s28 + $0x8] sm:$0xff] %v2573_v16  }
 0x162   : > { %2569 = vst [vmem:[%s3429_s28] sm:$0xff] %v2568_v20   ;;  %v1965_v5 = vadd.f32 %v1964_v23, %v1398_v63  ;;  %v2097_v27 = vadd.f32 %v2034_v57, %v2033_v19  ;;  %v3434_v28 = vpop.f32.mrb[36].mxu0  ;;  %v2818_v31 = vpop.f32.mrb[36].mxu1 }
 0x163   : > { %v1414_v32 = vadd.f32 %v2818_v31, %v3380_v17  ;;  %v1174_v35 = vpop.f32.mrb[37].mxu0  ;;  %v1405_v36 = vpop.f32.mrb[37].mxu1 }
 0x164   : > { %v2098_v40 = vadd.f32 %v2097_v27, %v2035_v24  ;;  %v1406_v61 = vadd.f32 %v1405_v36, %v3372_v9  ;;  %v1966_v43 = vadd.f32 %v1965_v5, %v1401_v11  ;;  %v3438_v44 = vpop.f32.mrb[38].mxu0  ;;  %v2819_v47 = vpop.f32.mrb[38].mxu1 }
 0x165   : > { %v1417_v48 = vadd.f32 %v2819_v47, %v3384_v21  ;;  %v1177_v51 = vpop.f32.mrb[39].mxu0  ;;  %v1408_v52 = vpop.f32.mrb[39].mxu1  ;;  %v2039_v8 = vmul.f32 %v1414_v32, %v1414_v32 }
 0x166   : > { %v1967_v55 = vadd.f32 %v1966_v43, %v1406_v61  ;;  %v2037_v56 = vmul.f32 %v1406_v61, %v1406_v61  ;;  %v2099_v60 = vadd.f32 %v2098_v40, %v2036_v39  ;;  %v1409_v17 = vadd.f32 %v1408_v52, %v3376_v13 }
 0x167   : > { %v2583_v63 = vpack.c.bf16 %v1417_v48, %v1414_v32  ;;  %v2040_v20 = vmul.f32 %v1417_v48, %v1417_v48 }
 0x168   : > { %v2100_v0 = vadd.f32 %v2099_v60, %v2037_v56  ;;  %v2578_v3 = vpack.c.bf16 %v1409_v17, %v1406_v61  ;;  %v1968_v4 = vadd.f32 %v1967_v55, %v1409_v17  ;;  %v2038_v9 = vmul.f32 %v1409_v17, %v1409_v17 }
 0x169   : > { %2727 = vst [vmem:[%s3429_s28 + $0x18] sm:$0xff] %v2583_v63  }
 0x16a   : > { %2726 = vst [vmem:[%s3429_s28 + $0x10] sm:$0xff] %v2578_v3   ;;  %v1969_v11 = vadd.f32 %v1968_v4, %v1414_v32  ;;  %v2101_v12 = vadd.f32 %v2100_v0, %v2038_v9  ;;  %v3444_v15 = vpop.f32.mrb[40].mxu0  ;;  %v2822_v21 = vpop.f32.mrb[40].mxu1 }
 0x16b   : > { %v1430_v1 = vadd.f32 %v2822_v21, %v3396_v33  ;;  %v1182_v16 = vpop.f32.mrb[41].mxu0  ;;  %v1421_v19 = vpop.f32.mrb[41].mxu1 }
 0x16c   : > { %v2102_v23 = vadd.f32 %v2101_v12, %v2039_v8  ;;  %v1422_v13 = vadd.f32 %v1421_v19, %v3388_v25  ;;  %v1970_v57 = vadd.f32 %v1969_v11, %v1417_v48  ;;  %v3448_v24 = vpop.f32.mrb[42].mxu0  ;;  %v2823_v5 = vpop.f32.mrb[42].mxu1 }
 0x16d   : > { %v1433_v27 = vadd.f32 %v2823_v5, %v3400_v37  ;;  %v1185_v31 = vpop.f32.mrb[43].mxu0  ;;  %v1424_v32 = vpop.f32.mrb[43].mxu1  ;;  %v2043_v48 = vmul.f32 %v1430_v1, %v1430_v1 }
 0x16e   : > { %v1971_v35 = vadd.f32 %v1970_v57, %v1422_v13  ;;  %v2041_v36 = vmul.f32 %v1422_v13, %v1422_v13  ;;  %v2103_v39 = vadd.f32 %v2102_v23, %v2040_v20  ;;  %v1425_v33 = vadd.f32 %v1424_v32, %v3392_v29 }
 0x16f   : > { %v2593_v40 = vpack.c.bf16 %v1433_v27, %v1430_v1  ;;  %v2044_v63 = vmul.f32 %v1433_v27, %v1433_v27 }
 0x170   : > { %v2104_v61 = vadd.f32 %v2103_v39, %v2041_v36  ;;  %v2588_v43 = vpack.c.bf16 %v1425_v33, %v1422_v13  ;;  %v1972_v47 = vadd.f32 %v1971_v35, %v1425_v33  ;;  %v2042_v25 = vmul.f32 %v1425_v33, %v1425_v33 }
 0x171   : > { %2729 = vst [vmem:[%s3429_s28 + $0x28] sm:$0xff] %v2593_v40  }
 0x172   : > { %2728 = vst [vmem:[%s3429_s28 + $0x20] sm:$0xff] %v2588_v43   ;;  %v1973_v51 = vadd.f32 %v1972_v47, %v1430_v1  ;;  %v2105_v52 = vadd.f32 %v2104_v61, %v2042_v25  ;;  %v1188_v55 = vpop.f32.mrb[44].mxu0  ;;  %v2826_v56 = vpop.f32.mrb[44].mxu1 }
 0x173   : > { %v1446_v37 = vadd.f32 %v2826_v56, %v3412_v49  ;;  %v1190_v60 = vpop.f32.mrb[45].mxu0  ;;  %v1437_v17 = vpop.f32.mrb[45].mxu1 }
 0x174   : > { %v2106_v0 = vadd.f32 %v2105_v52, %v2043_v48  ;;  %v1438_v29 = vadd.f32 %v1437_v17, %v3404_v41  ;;  %v1974_v3 = vadd.f32 %v1973_v51, %v1433_v27  ;;  %v1191_v4 = vpop.f32.mrb[46].mxu0  ;;  %v2827_v9 = vpop.f32.mrb[46].mxu1 }
 0x175   : > { %v1449_v8 = vadd.f32 %v2827_v9, %v3416_v53  ;;  %v1193_v11 = vpop.f32.mrb[47].mxu0  ;;  %v1440_v12 = vpop.f32.mrb[47].mxu1  ;;  %v2047_v41 = vmul.f32 %v1446_v37, %v1446_v37 }
 0x176   : > { %v1975_v21 = vadd.f32 %v1974_v3, %v1438_v29  ;;  %v2045_v1 = vmul.f32 %v1438_v29, %v1438_v29  ;;  %v2107_v16 = vadd.f32 %v2106_v0, %v2044_v63  ;;  %v1441_v49 = vadd.f32 %v1440_v12, %v3408_v45 }
 0x177   : > { %v2603_v19 = vpack.c.bf16 %v1449_v8, %v1446_v37  ;;  %v2048_v39 = vmul.f32 %v1449_v8, %v1449_v8 }
 0x178   : > { %v2108_v20 = vadd.f32 %v2107_v16, %v2045_v1  ;;  %v2598_v23 = vpack.c.bf16 %v1441_v49, %v1438_v29  ;;  %v1976_v13 = vadd.f32 %v1975_v21, %v1441_v49  ;;  %v2046_v57 = vmul.f32 %v1441_v49, %v1441_v49 }
 0x179   : > { %2731 = vst [vmem:[%s3429_s28 + $0x38] sm:$0xff] %v2603_v19  }
 0x17a   : > { %2730 = vst [vmem:[%s3429_s28 + $0x30] sm:$0xff] %v2598_v23   ;;  %v1977_v5 = vadd.f32 %v1976_v13, %v1446_v37  ;;  %v2109_v27 = vadd.f32 %v2108_v20, %v2046_v57  ;;  %v3460_v31 = vpop.f32.mrb[48].mxu0  ;;  %v2830_v53 = vpop.f32.mrb[48].mxu1 }
 0x17b   : > { %v1462_v32 = vadd.f32 %v2830_v53, %v3434_v28  ;;  %v1198_v35 = vpop.f32.mrb[49].mxu0  ;;  %v1453_v36 = vpop.f32.mrb[49].mxu1 }
 0x17c   : > { %v2110_v33 = vadd.f32 %v2109_v27, %v2047_v41  ;;  %v1454_v45 = vadd.f32 %v1453_v36, %v3420_v59  ;;  %v1978_v40 = vadd.f32 %v1977_v5, %v1449_v8  ;;  %v3464_v61 = vpop.f32.mrb[50].mxu0  ;;  %v2831_v43 = vpop.f32.mrb[50].mxu1 }
 0x17d   : > { %v1465_v47 = vadd.f32 %v2831_v43, %v3438_v44  ;;  %v1201_v25 = vpop.f32.mrb[51].mxu0  ;;  %v1456_v48 = vpop.f32.mrb[51].mxu1  ;;  %v2051_v0 = vmul.f32 %v1462_v32, %v1462_v32 }
 0x17e   : > { %v1979_v51 = vadd.f32 %v1978_v40, %v1454_v45  ;;  %v2049_v52 = vmul.f32 %v1454_v45, %v1454_v45  ;;  %v2111_v56 = vadd.f32 %v2110_v33, %v2048_v39  ;;  %v1457_v28 = vadd.f32 %v1456_v48, %v3424_v7 }
 0x17f   : > { %v2613_v37 = vpack.c.bf16 %v1465_v47, %v1462_v32  ;;  %v2052_v21 = vmul.f32 %v1465_v47, %v1465_v47 }
 0x180   : > { %v2112_v60 = vadd.f32 %v2111_v56, %v2049_v52  ;;  %v2608_v17 = vpack.c.bf16 %v1457_v28, %v1454_v45  ;;  %v1980_v63 = vadd.f32 %v1979_v51, %v1457_v28  ;;  %v2050_v59 = vmul.f32 %v1457_v28, %v1457_v28 }
 0x181   : > { %2733 = vst [vmem:[%s3429_s28 + $0x48] sm:$0xff] %v2613_v37  }
 0x182   : > { %2732 = vst [vmem:[%s3429_s28 + $0x40] sm:$0xff] %v2608_v17   ;;  %v1981_v29 = vadd.f32 %v1980_v63, %v1462_v32  ;;  %v2113_v3 = vadd.f32 %v2112_v60, %v2050_v59  ;;  %v1204_v9 = vpop.f32.mrb[52].mxu0  ;;  %v2834_v8 = vpop.f32.mrb[52].mxu1 }
 0x183   : > { %v1478_v44 = vadd.f32 %v2834_v8, %v1188_v55  ;;  %v1206_v11 = vpop.f32.mrb[53].mxu0  ;;  %v1469_v12 = vpop.f32.mrb[53].mxu1 }
 0x184   : > { %v2114_v1 = vadd.f32 %v2113_v3, %v2051_v0  ;;  %v1470_v16 = vadd.f32 %v1469_v12, %v3444_v15  ;;  %v1982_v7 = vadd.f32 %v1981_v29, %v1465_v47  ;;  %v1207_v49 = vpop.f32.mrb[54].mxu0  ;;  %v2835_v19 = vpop.f32.mrb[54].mxu1 }
 0x185   : > { %v1481_v20 = vadd.f32 %v2835_v19, %v1191_v4  ;;  %v1209_v23 = vpop.f32.mrb[55].mxu0  ;;  %v1472_v13 = vpop.f32.mrb[55].mxu1  ;;  %v2055_v15 = vmul.f32 %v1478_v44, %v1478_v44 }
 0x186   : > { %v1983_v57 = vadd.f32 %v1982_v7, %v1470_v16  ;;  %v2053_v41 = vmul.f32 %v1470_v16, %v1470_v16  ;;  %v2115_v5 = vadd.f32 %v2114_v1, %v2052_v21  ;;  %v1473_v27 = vadd.f32 %v1472_v13, %v3448_v24 }
 0x187   : > { %v2623_v55 = vpack.c.bf16 %v1481_v20, %v1478_v44  ;;  %v2056_v25 = vmul.f32 %v1481_v20, %v1481_v20 }
 0x188   : > { %v2116_v53 = vadd.f32 %v2115_v5, %v2053_v41  ;;  %v2618_v32 = vpack.c.bf16 %v1473_v27, %v1470_v16  ;;  %v1984_v35 = vadd.f32 %v1983_v57, %v1473_v27  ;;  %v2054_v36 = vmul.f32 %v1473_v27, %v1473_v27 }
 0x189   : > { %2735 = vst [vmem:[%s3429_s28 + $0x58] sm:$0xff] %v2623_v55  }
 0x18a   : > { %2734 = vst [vmem:[%s3429_s28 + $0x50] sm:$0xff] %v2618_v32   ;;  %v1985_v39 = vadd.f32 %v1984_v35, %v1478_v44  ;;  %v2117_v33 = vadd.f32 %v2116_v53, %v2054_v36  ;;  %v1212_v45 = vpop.f32.mrb[56].mxu0  ;;  %v2838_v40 = vpop.f32.mrb[56].mxu1 }
 0x18b   : > { %v1494_v4 = vadd.f32 %v2838_v40, %v1204_v9  ;;  %v1214_v43 = vpop.f32.mrb[57].mxu0  ;;  %v1485_v47 = vpop.f32.mrb[57].mxu1 }
 0x18c   : > { %v2118_v48 = vadd.f32 %v2117_v33, %v2055_v15  ;;  %v1486_v51 = vadd.f32 %v1485_v47, %v3460_v31  ;;  %v1986_v24 = vadd.f32 %v1985_v39, %v1481_v20  ;;  %v1215_v52 = vpop.f32.mrb[58].mxu0  ;;  %v2839_v56 = vpop.f32.mrb[58].mxu1 }
 0x18d   : > { %v1497_v28 = vadd.f32 %v2839_v56, %v1207_v49  ;;  %v1217_v37 = vpop.f32.mrb[59].mxu0  ;;  %v1488_v60 = vpop.f32.mrb[59].mxu1  ;;  %v2059_v31 = vmul.f32 %v1494_v4, %v1494_v4 }
 0x18e   : > { %v1987_v17 = vadd.f32 %v1986_v24, %v1486_v51  ;;  %v2057_v63 = vmul.f32 %v1486_v51, %v1486_v51  ;;  %v2119_v59 = vadd.f32 %v2118_v48, %v2056_v25  ;;  %v1489_v0 = vadd.f32 %v1488_v60, %v3464_v61 }
 0x18f   : > { %v2633_v29 = vpack.c.bf16 %v1497_v28, %v1494_v4  ;;  %v2060_v19 = vmul.f32 %v1497_v28, %v1497_v28 }
 0x190   : > { %v2120_v3 = vadd.f32 %v2119_v59, %v2057_v63  ;;  %v2628_v9 = vpack.c.bf16 %v1489_v0, %v1486_v51  ;;  %v1988_v8 = vadd.f32 %v1987_v17, %v1489_v0  ;;  %v2058_v44 = vmul.f32 %v1489_v0, %v1489_v0 }
 0x191   : > { %2737 = vst [vmem:[%s3429_s28 + $0x68] sm:$0xff] %v2633_v29  }
 0x192   : > { %2736 = vst [vmem:[%s3429_s28 + $0x60] sm:$0xff] %v2628_v9   ;;  %v1989_v11 = vadd.f32 %v1988_v8, %v1494_v4  ;;  %v2121_v12 = vadd.f32 %v2120_v3, %v2058_v44  ;;  %v1220_v21 = vpop.f32.mrb[60].mxu0  ;;  %v2842_v1 = vpop.f32.mrb[60].mxu1 }
 0x193   : > { %v1510_v16 = vadd.f32 %v2842_v1, %v1220_v21  ;;  %v1222_v7 = vpop.f32.mrb[61].mxu0  ;;  %v1501_v49 = vpop.f32.mrb[61].mxu1 }
 0x194   : > { %v2122_v20 = vadd.f32 %v2121_v12, %v2059_v31  ;;  %v1502_v23 = vadd.f32 %v1501_v49, %v1212_v45  ;;  %v1990_v61 = vadd.f32 %v1989_v11, %v1497_v28  ;;  %v1223_v13 = vpop.f32.mrb[62].mxu0  ;;  %v2843_v57 = vpop.f32.mrb[62].mxu1 }
 0x195   : > { %v1513_v41 = vadd.f32 %v2843_v57, %v1223_v13  ;;  %v1225_v5 = vpop.f32.mrb[63].mxu0  ;;  %v1504_v27 = vpop.f32.mrb[63].mxu1  ;;  %v2063_v4 = vmul.f32 %v1510_v16, %v1510_v16 }
 0x196   : > { %v1991_v55 = vadd.f32 %v1990_v61, %v1502_v23  ;;  %v2061_v53 = vmul.f32 %v1502_v23, %v1502_v23  ;;  %v2123_v32 = vadd.f32 %v2122_v20, %v2060_v19  ;;  %v1505_v35 = vadd.f32 %v1504_v27, %v1215_v52 }
 0x197   : > { %v2643_v36 = vpack.c.bf16 %v1513_v41, %v1510_v16  ;;  %v2064_v24 = vmul.f32 %v1513_v41, %v1513_v41 }
 0x198   : > { %v2124_v15 = vadd.f32 %v2123_v32, %v2061_v53  ;;  %v2638_v39 = vpack.c.bf16 %v1505_v35, %v1502_v23  ;;  %v1992_v33 = vadd.f32 %v1991_v55, %v1505_v35  ;;  %v2062_v40 = vmul.f32 %v1505_v35, %v1505_v35 }
 0x199   : > { %2739 = vst [vmem:[%s3429_s28 + $0x78] sm:$0xff] %v2643_v36  }
 0x19a   : > { %2738 = vst [vmem:[%s3429_s28 + $0x70] sm:$0xff] %v2638_v39   ;;  %v1993_v45 = vadd.f32 %v1992_v33, %v1510_v16  ;;  %v2125_v43 = vadd.f32 %v2124_v15, %v2062_v40  ;;  %v1228_v47 = vpop.f32.mrb[64].mxu0  ;;  %v2846_v25 = vpop.f32.mrb[64].mxu1 }
 0x19b   : > { %v1230_v48 = vpop.f32.mrb[65].mxu0  ;;  %v1517_v51 = vpop.f32.mrb[65].mxu1 }
 0x19c   : > { %v2126_v56 = vadd.f32 %v2125_v43, %v2063_v4  ;;  %v1518_v28 = vadd.f32 %v1517_v51, %v1228_v47  ;;  %v1994_v37 = vadd.f32 %v1993_v45, %v1513_v41  ;;  %v1231_v52 = vpop.f32.mrb[66].mxu0  ;;  %v2847_v60 = vpop.f32.mrb[66].mxu1 }
 0x19d   : > { %v1233_v17 = vpop.f32.mrb[67].mxu0  ;;  %v1520_v63 = vpop.f32.mrb[67].mxu1 }
 0x19e   : > { %v1995_v59 = vadd.f32 %v1994_v37, %v1518_v28  ;;  %v2065_v0 = vmul.f32 %v1518_v28, %v1518_v28  ;;  %v2127_v29 = vadd.f32 %v2126_v56, %v2064_v24  ;;  %v1521_v3 = vadd.f32 %v1520_v63, %v1231_v52 }
 0x1a0   : > { %v2128_v9 = vadd.f32 %v2127_v29, %v2065_v0  ;;  %v2648_v8 = vpack.c.bf16 %v1521_v3, %v1518_v28  ;;  %v1996_v44 = vadd.f32 %v1995_v59, %v1521_v3  ;;  %v2066_v31 = vmul.f32 %v1521_v3, %v1521_v3 }
 0x1a2   : > { %2740 = vst [vmem:[%s3429_s28 + $0x80] sm:$0xff] %v2648_v8   ;;  %v2129_v11 = vadd.f32 %v2128_v9, %v2066_v31  ;;  %v1236_v12 = vpop.f32.mrb[68].mxu0  ;;  %v2850_v21 = vpop.f32.mrb[68].mxu1 }
 0x1a3   : > { %v1526_v1 = vadd.f32 %v2846_v25, %v1236_v12  ;;  %v1238_v16 = vpop.f32.mrb[69].mxu0  ;;  %v1533_v7 = vpop.f32.mrb[69].mxu1 }
 0x1a4   : > { %v1239_v49 = vpop.f32.mrb[70].mxu0  ;;  %v2851_v19 = vpop.f32.mrb[70].mxu1 }
 0x1a5   : > { %v1997_v20 = vadd.f32 %v1996_v44, %v1526_v1  ;;  %v2067_v23 = vmul.f32 %v1526_v1, %v1526_v1  ;;  %v1529_v61 = vadd.f32 %v2847_v60, %v1239_v49  ;;  %v1241_v13 = vpop.f32.mrb[71].mxu0  ;;  %v1536_v57 = vpop.f32.mrb[71].mxu1 }
 0x1a7   : > { %v2130_v41 = vadd.f32 %v2129_v11, %v2067_v23  ;;  %v2653_v5 = vpack.c.bf16 %v1529_v61, %v1526_v1  ;;  %v1998_v27 = vadd.f32 %v1997_v20, %v1529_v61  ;;  %v2068_v55 = vmul.f32 %v1529_v61, %v1529_v61 }
 0x1a9   : > { %2741 = vst [vmem:[%s3429_s28 + $0x88] sm:$0xff] %v2653_v5   ;;  %v2131_v53 = vadd.f32 %v2130_v41, %v2068_v55 }
 0x1aa   : > { %v1244_v32 = vpop.f32.mrb[72].mxu0  ;;  %v3482_v35 = vpop.f32.mrb[72].mxu1 }
 0x1ab   : > { %v1534_v36 = vadd.f32 %v1533_v7, %v1244_v32  ;;  %v1246_v15 = vpop.f32.mrb[73].mxu0  ;;  %v1549_v39 = vpop.f32.mrb[73].mxu1 }
 0x1ac   : > { %v1247_v33 = vpop.f32.mrb[74].mxu0  ;;  %v3484_v40 = vpop.f32.mrb[74].mxu1 }
 0x1ad   : > { %v1999_v4 = vadd.f32 %v1998_v27, %v1534_v36  ;;  %v2069_v45 = vmul.f32 %v1534_v36, %v1534_v36  ;;  %v1537_v43 = vadd.f32 %v1536_v57, %v1247_v33  ;;  %v1249_v47 = vpop.f32.mrb[75].mxu0  ;;  %v1552_v25 = vpop.f32.mrb[75].mxu1 }
 0x1af   : > { %v2132_v48 = vadd.f32 %v2131_v53, %v2069_v45  ;;  %v2658_v51 = vpack.c.bf16 %v1537_v43, %v1534_v36  ;;  %v2000_v24 = vadd.f32 %v1999_v4, %v1537_v43  ;;  %v2070_v56 = vmul.f32 %v1537_v43, %v1537_v43 }
 0x1b1   : > { %2742 = vst [vmem:[%s3429_s28 + $0x90] sm:$0xff] %v2658_v51   ;;  %v2133_v28 = vadd.f32 %v2132_v48, %v2070_v56 }
 0x1b2   : > { %v1252_v37 = vpop.f32.mrb[76].mxu0  ;;  %v3487_v52 = vpop.f32.mrb[76].mxu1 }
 0x1b3   : > { %v1542_v60 = vadd.f32 %v2850_v21, %v1252_v37  ;;  %v1254_v17 = vpop.f32.mrb[77].mxu0  ;;  %v3489_v63 = vpop.f32.mrb[77].mxu1 }
 0x1b4   : > { %v1255_v59 = vpop.f32.mrb[78].mxu0  ;;  %v3491_v0 = vpop.f32.mrb[78].mxu1 }
 0x1b5   : > { %v2001_v29 = vadd.f32 %v2000_v24, %v1542_v60  ;;  %v2071_v3 = vmul.f32 %v1542_v60, %v1542_v60  ;;  %v1545_v9 = vadd.f32 %v2851_v19, %v1255_v59  ;;  %v1257_v8 = vpop.f32.mrb[79].mxu0  ;;  %v3493_v44 = vpop.f32.mrb[79].mxu1 }
 0x1b7   : > { %v2134_v31 = vadd.f32 %v2133_v28, %v2071_v3  ;;  %v2663_v11 = vpack.c.bf16 %v1545_v9, %v1542_v60  ;;  %v2002_v12 = vadd.f32 %v2001_v29, %v1545_v9  ;;  %v2072_v1 = vmul.f32 %v1545_v9, %v1545_v9 }
 0x1b9   : > { %2743 = vst [vmem:[%s3429_s28 + $0x98] sm:$0xff] %v2663_v11   ;;  %v2135_v16 = vadd.f32 %v2134_v31, %v2072_v1 }
 0x1ba   : > { %v1260_v7 = vpop.f32.mrb[80].mxu0  ;;  %v2862_v21 = vpop.f32.mrb[80].mxu1 }
 0x1bb   : > { %v1550_v49 = vadd.f32 %v1549_v39, %v1260_v7  ;;  %v3497_v20 = vadd.f32 %v2862_v21, %v3368_v2  ;;  %v1262_v23 = vpop.f32.mrb[81].mxu0  ;;  %v1581_v61 = vpop.f32.mrb[81].mxu1 }
 0x1bc   : > { %v3500_v13 = vadd.f32 %v1581_v61, %v3362_v58  ;;  %v1263_v19 = vpop.f32.mrb[82].mxu0  ;;  %v2863_v57 = vpop.f32.mrb[82].mxu1 }
 0x1bd   : > { %v2003_v41 = vadd.f32 %v2002_v12, %v1550_v49  ;;  %v2073_v5 = vmul.f32 %v1550_v49, %v1550_v49  ;;  %v1553_v27 = vadd.f32 %v1552_v25, %v1263_v19  ;;  %v1265_v55 = vpop.f32.mrb[83].mxu0  ;;  %v1584_v53 = vpop.f32.mrb[83].mxu1  ;;  %v3503_v32 = vadd.f32 %v2863_v57, %v3370_v6 }
 0x1be   : > { %v3506_v2 = vadd.f32 %v1584_v53, %v3366_v62 }
 0x1bf   : > { %v2136_v36 = vadd.f32 %v2135_v16, %v2073_v5  ;;  %v2668_v15 = vpack.c.bf16 %v1553_v27, %v1550_v49  ;;  %v2004_v58 = vadd.f32 %v2003_v41, %v1553_v27  ;;  %v2074_v39 = vmul.f32 %v1553_v27, %v1553_v27 }
 0x1c0   : > { %v2693_v33 = vpack.c.bf16 %v3503_v32, %v3497_v20  ;;  %v2688_v4 = vpack.c.bf16 %v3506_v2, %v3500_v13 }
 0x1c1   : > { %2744 = vst [vmem:[%s3429_s28 + $0xa0] sm:$0xff] %v2668_v15   ;;  %v2137_v45 = vadd.f32 %v2136_v36, %v2074_v39 }
 0x1c2   : > { %2749 = vst [vmem:[%s3429_s28 + $0xc8] sm:$0xff] %v2693_v33   ;;  %2748 = vst [vmem:[%s3429_s28 + $0xc0] sm:$0xff] %v2688_v4   ;;  %v1268_v43 = vpop.f32.mrb[84].mxu0  ;;  %v2866_v6 = vpop.f32.mrb[84].mxu1 }
 0x1c3   : > { %v1558_v47 = vadd.f32 %v3482_v35, %v1268_v43  ;;  %v3517_v62 = vadd.f32 %v2866_v6, %v3382_v18  ;;  %v1270_v25 = vpop.f32.mrb[85].mxu0  ;;  %v1597_v48 = vpop.f32.mrb[85].mxu1 }
 0x1c4   : > { %v3520_v51 = vadd.f32 %v1597_v48, %v3374_v10  ;;  %v1271_v24 = vpop.f32.mrb[86].mxu0  ;;  %v2867_v56 = vpop.f32.mrb[86].mxu1 }
 0x1c5   : > { %v2005_v28 = vadd.f32 %v2004_v58, %v1558_v47  ;;  %v2075_v37 = vmul.f32 %v1558_v47, %v1558_v47  ;;  %v1561_v60 = vadd.f32 %v3484_v40, %v1271_v24  ;;  %v1273_v17 = vpop.f32.mrb[87].mxu0  ;;  %v1600_v59 = vpop.f32.mrb[87].mxu1  ;;  %v3524_v35 = vadd.f32 %v2867_v56, %v3386_v22 }
 0x1c6   : > { %v3527_v18 = vadd.f32 %v1600_v59, %v3378_v14  ;;  %v2081_v59 = vmul.f32 %v3500_v13, %v3500_v13 }
 0x1c7   : > { %v2138_v29 = vadd.f32 %v2137_v45, %v2075_v37  ;;  %v2673_v10 = vpack.c.bf16 %v1561_v60, %v1558_v47  ;;  %v2006_v3 = vadd.f32 %v2005_v28, %v1561_v60  ;;  %v2076_v9 = vmul.f32 %v1561_v60, %v1561_v60 }
 0x1c8   : > { %v2703_v8 = vpack.c.bf16 %v3524_v35, %v3517_v62  ;;  %v2698_v31 = vpack.c.bf16 %v3527_v18, %v3520_v51 }
 0x1c9   : > { %2745 = vst [vmem:[%s3429_s28 + $0xa8] sm:$0xff] %v2673_v10   ;;  %v2139_v40 = vadd.f32 %v2138_v29, %v2076_v9 }
 0x1ca   : > { %2751 = vst [vmem:[%s3429_s28 + $0xd8] sm:$0xff] %v2703_v8   ;;  %2750 = vst [vmem:[%s3429_s28 + $0xd0] sm:$0xff] %v2698_v31   ;;  %v1276_v11 = vpop.f32.mrb[88].mxu0  ;;  %v2870_v22 = vpop.f32.mrb[88].mxu1  ;;  %v2084_v31 = vmul.f32 %v3503_v32, %v3503_v32 }
 0x1cb   : > { %v1566_v12 = vadd.f32 %v3489_v63, %v1276_v11  ;;  %v3538_v14 = vadd.f32 %v2870_v22, %v3398_v34  ;;  %v1278_v1 = vpop.f32.mrb[89].mxu0  ;;  %v1613_v16 = vpop.f32.mrb[89].mxu1  ;;  %v2085_v11 = vmul.f32 %v3520_v51, %v3520_v51 }
 0x1cc   : > { %v3541_v7 = vadd.f32 %v1613_v16, %v3390_v26  ;;  %v1279_v21 = vpop.f32.mrb[90].mxu0  ;;  %v2871_v49 = vpop.f32.mrb[90].mxu1 }
 0x1cd   : > { %v2007_v23 = vadd.f32 %v2006_v3, %v1566_v12  ;;  %v2077_v61 = vmul.f32 %v1566_v12, %v1566_v12  ;;  %v1569_v19 = vadd.f32 %v3493_v44, %v1279_v21  ;;  %v1281_v57 = vpop.f32.mrb[91].mxu0  ;;  %v1616_v41 = vpop.f32.mrb[91].mxu1  ;;  %v3545_v63 = vadd.f32 %v2871_v49, %v3402_v38 }
 0x1ce   : > { %v3548_v34 = vadd.f32 %v1616_v41, %v3394_v30  ;;  %v2083_v3 = vmul.f32 %v3497_v20, %v3497_v20 }
 0x1cf   : > { %v2140_v5 = vadd.f32 %v2139_v40, %v2077_v61  ;;  %v2678_v26 = vpack.c.bf16 %v1569_v19, %v1566_v12  ;;  %v2008_v27 = vadd.f32 %v2007_v23, %v1569_v19  ;;  %v2078_v55 = vmul.f32 %v1569_v19, %v1569_v19 }
 0x1d0   : > { %v2713_v53 = vpack.c.bf16 %v3545_v63, %v3538_v14  ;;  %v2708_v36 = vpack.c.bf16 %v3548_v34, %v3541_v7 }
 0x1d1   : > { %2746 = vst [vmem:[%s3429_s28 + $0xb0] sm:$0xff] %v2678_v26   ;;  %v2141_v44 = vadd.f32 %v2140_v5, %v2078_v55 }
 0x1d2   : > { %2753 = vst [vmem:[%s3429_s28 + $0xe8] sm:$0xff] %v2713_v53   ;;  %2752 = vst [vmem:[%s3429_s28 + $0xe0] sm:$0xff] %v2708_v36   ;;  %v1284_v15 = vpop.f32.mrb[92].mxu0  ;;  %v2874_v38 = vpop.f32.mrb[92].mxu1 }
 0x1d3   : > { %v1574_v58 = vadd.f32 %v3487_v52, %v1284_v15  ;;  %v3559_v30 = vadd.f32 %v2874_v38, %v3414_v50  ;;  %v1286_v39 = vpop.f32.mrb[93].mxu0  ;;  %v1629_v33 = vpop.f32.mrb[93].mxu1 }
 0x1d4   : > { %v1630_v4 = vadd.f32 %v1629_v33, %v3406_v42  ;;  %v1287_v45 = vpop.f32.mrb[94].mxu0  ;;  %v2875_v43 = vpop.f32.mrb[94].mxu1 }
 0x1d5   : > { %v2009_v6 = vadd.f32 %v2008_v27, %v1574_v58  ;;  %v2079_v47 = vmul.f32 %v1574_v58, %v1574_v58  ;;  %v1577_v25 = vadd.f32 %v3491_v0, %v1287_v45  ;;  %v1289_v48 = vpop.f32.mrb[95].mxu0  ;;  %v1632_v24 = vpop.f32.mrb[95].mxu1  ;;  %v1641_v52 = vadd.f32 %v2875_v43, %v3418_v54 }
 0x1d6   : > { %v1633_v50 = vadd.f32 %v1632_v24, %v3410_v46  ;;  %v2082_v54 = vmul.f32 %v3506_v2, %v3506_v2  ;;  %v2093_v53 = vmul.f32 %v1630_v4, %v1630_v4 }
 0x1d7   : > { %v2142_v56 = vadd.f32 %v2141_v44, %v2079_v47  ;;  %v2683_v28 = vpack.c.bf16 %v1577_v25, %v1574_v58  ;;  %v2010_v37 = vadd.f32 %v2009_v6, %v1577_v25  ;;  %v2080_v60 = vmul.f32 %v1577_v25, %v1577_v25 }
 0x1d8   : > { %v2723_v42 = vpack.c.bf16 %v1641_v52, %v3559_v30  ;;  %v2718_v17 = vpack.c.bf16 %v1633_v50, %v1630_v4  ;;  %v2094_v38 = vmul.f32 %v1633_v50, %v1633_v50  ;;  %v2095_v58 = vmul.f32 %v3559_v30, %v3559_v30 }
 0x1d9   : > { %2747 = vst [vmem:[%s3429_s28 + $0xb8] sm:$0xff] %v2683_v28   ;;  %v2011_v0 = vadd.f32 %v2010_v37, %v3500_v13  ;;  %v2143_v29 = vadd.f32 %v2142_v56, %v2080_v60  ;;  %v2096_v33 = vmul.f32 %v1641_v52, %v1641_v52 }
 0x1da   : > { %2755 = vst [vmem:[%s3429_s28 + $0xf8] sm:$0xff] %v2723_v42   ;;  %2754 = vst [vmem:[%s3429_s28 + $0xf0] sm:$0xff] %v2718_v17  }
 0x1db   : > { %v2012_v46 = vadd.f32 %v2011_v0, %v3506_v2  ;;  %v2144_v10 = vadd.f32 %v2143_v29, %v2081_v59  ;;  %v2086_v2 = vmul.f32 %v3527_v18, %v3527_v18 }
 0x1dd   : > { %v2013_v9 = vadd.f32 %v2012_v46, %v3497_v20  ;;  %v2145_v8 = vadd.f32 %v2144_v10, %v2082_v54  ;;  %v2087_v20 = vmul.f32 %v3517_v62, %v3517_v62 }
 0x1df   : > { %v2014_v13 = vadd.f32 %v2013_v9, %v3503_v32  ;;  %v2146_v40 = vadd.f32 %v2145_v8, %v2083_v3  ;;  %v2088_v32 = vmul.f32 %v3524_v35, %v3524_v35 }
 0x1e1   : > { %v2015_v22 = vadd.f32 %v2014_v13, %v3520_v51  ;;  %v2147_v12 = vadd.f32 %v2146_v40, %v2084_v31  ;;  %v2089_v51 = vmul.f32 %v3541_v7, %v3541_v7 }
 0x1e3   : > { %v2016_v1 = vadd.f32 %v2015_v22, %v3527_v18  ;;  %v2148_v16 = vadd.f32 %v2147_v12, %v2085_v11  ;;  %v2090_v18 = vmul.f32 %v3548_v34, %v3548_v34 }
 0x1e5   : > { %v2149_v21 = vadd.f32 %v2148_v16, %v2086_v2  ;;  %v2017_v49 = vadd.f32 %v2016_v1, %v3517_v62  ;;  %v2091_v62 = vmul.f32 %v3538_v14, %v3538_v14 }
 0x1e7   : > { %v2018_v23 = vadd.f32 %v2017_v49, %v3524_v35  ;;  %v2150_v61 = vadd.f32 %v2149_v21, %v2087_v20  ;;  %v2092_v35 = vmul.f32 %v3545_v63, %v3545_v63 }
 0x1e9   : > { %v2019_v19 = vadd.f32 %v2018_v23, %v3541_v7  ;;  %v2151_v57 = vadd.f32 %v2150_v61, %v2088_v32 }
 0x1eb   : > { %v2020_v41 = vadd.f32 %v2019_v19, %v3548_v34  ;;  %v2152_v5 = vadd.f32 %v2151_v57, %v2089_v51 }
 0x1ed   : > { %v2021_v26 = vadd.f32 %v2020_v41, %v3538_v14  ;;  %v2153_v27 = vadd.f32 %v2152_v5, %v2090_v18 }
 0x1ef   : > { %v2022_v55 = vadd.f32 %v2021_v26, %v3545_v63  ;;  %v2154_v7 = vadd.f32 %v2153_v27, %v2091_v62 }
 0x1f1   : > { %v2023_v36 = vadd.f32 %v2022_v55, %v1630_v4  ;;  %v2155_v44 = vadd.f32 %v2154_v7, %v2092_v35  ;;  %v2166_v4 = vlaneseq }
 0x1f3   : > { %v2024_v15 = vadd.f32 %v2023_v36, %v1633_v50  ;;  %v2156_v34 = vadd.f32 %v2155_v44, %v2093_v53  ;;  %v2167_v28 = vshrl.u32 %v2166_v4, 7 }
 0x1f5   : > { %v2025_v14 = vadd.f32 %v2024_v15, %v3559_v30  ;;  %v2157_v39 = vadd.f32 %v2156_v34, %v2094_v38  ;;  %vm2169_vm0 = vcmp.eq.s32.totalorder %v2167_v28, 1  ;;  %vm2168_vm1 = vcmp.eq.s32.totalorder %v2167_v28, 0 }
 0x1f7   : > { %v2026_v45 = vadd.f32 %v2025_v14, %v1641_v52  ;;  %v2158_v43 = vadd.f32 %v2157_v39, %v2095_v58 }
 0x1f9   : > { %v2027_v6 = vrot.slane %v2026_v45, 4  ;;  %v2159_v63 = vadd.f32 %v2158_v43, %v2096_v33 }
 0x1fb   : > { %v2028_v47 = vadd.f32 %v2027_v6, %v2026_v45  ;;  %v2160_v25 = vrot.slane %v2159_v63, 4 }
 0x1fd   : > { %v2029_v48 = vrot.slane %v2028_v47, 2  ;;  %v2161_v24 = vadd.f32 %v2160_v25, %v2159_v63 }
 0x1ff   : > { %v2030_v50 = vadd.f32 %v2029_v48, %v2028_v47  ;;  %v2162_v56 = vrot.slane %v2161_v24, 2 }
 0x201   : > { %v2163_v37 = vadd.f32 %v2162_v56, %v2161_v24  ;;  %v2031_v60 = vrot.slane %v2030_v50, 1 }
 0x203   : > { %v2164_v30 = vrot.slane %v2163_v37, 1  ;;  %v2032_v52 = vadd.f32 %v2031_v60, %v2030_v50 }
 0x205   : > { %v2165_v42 = vadd.f32 %v2164_v30, %v2163_v37 }
 0x207   : > { %v2170_v17 = vsel %vm2169_vm0, %v2165_v42, 0.0 }
 0x208   : > { %v2171_v59 = vsel %vm2168_vm1, %v2032_v52, %v2170_v17 }
 0x209   : > { %2172 = vst [vmem:[%s232_s5] sm:$0xff] %v2171_v59 }
 0x20a PF: > { %s14_s14 = sadd.s32 1, %s3108_s14   ;;  %s3626_s12 = smov %s3104_s13 }
 0x20b   : > { %p11_p6 = scmp.ge.s32.totalorder %s14_s14, 10   ;;  %s3627_s13 = smov %s3629_s15 }
 0x20d   :  { %13 = sbr.rel (!%p11_p6) target bundleno = 2 (0x2), region = 73 }

// kernel: _lambda_.20
= control target key start
LH: loop header
LB: loop body
LE: loop exit
PB: predicated region body
PF: predicated region fallthrough
CT: control target
= control target key end

     0   :  { %s1550_s12 = smov 0   ;;  %s1552_s13 = smov 0   ;;  %s1796_s0 = inlined_call_operand.vmem [shape: bf16[4096,128], index: 0, kind: input, shape index: {}]   ;;  %s1797_s1 = inlined_call_operand.vmem [shape: f32[1,128], index: 1, kind: input, shape index: {}]   ;;  %s1798_s2 = inlined_call_operand.vmem [shape: f32[1,128], index: 2, kind: input, shape index: {}]   ;;  %s1799_s3 = inlined_call_operand.vmem [shape: bf16[4096,128], index: 3, kind: output, shape index: {}]  }
   0x1   :  { %s1554_s14 = smov 0  }
   0x2 LB: > { %s25_s15 = sadd.s32 1, %s1524_s13  ;;  %p995_p0 = scmp.ge.s32.totalorder %s1528_s14, 1  ;;  %s1528_s14 = sphi %s1554_s14, %s13_s14   ;;  %s1524_s13 = sphi %s1552_s13, %s1801_s13   ;;  %s1520_s12 = sphi %s1550_s12, %s1800_s12  }
   0x3   : > { %p27_p1 = scmp.ge.s32.totalorder %s25_s15, 8  ;;  %p173_p2 = scmp.lt.s32.totalorder %s1528_s14, 9 }
   0x5   : > { %s1803_s15 = smov (%p27_p1, %s25_s15), 0  ;;  %p174_p3 = pnand %p995_p0, %p173_p2 }
   0x6   : > { %s996_s16 = sshll.u32 (!%p174_p3), %s1520_s12, 6  ;;  %v1581_v0 = vld [vmem:[%s1797_s1] ss:$0 sm:$0xff] (!%p174_p3) }
   0x7   : > { %177 = sbr.rel (%p174_p3) target bundleno = 96 (0x60), region = 32  ;;  %p210_p4 = scmp.lt.s32.totalorder (!%p174_p3), %s996_s16, 511  ;;  %v1590_v9 = vld [vmem:[%s1798_s2] ss:$0 sm:$0xff] (!%p174_p3) }
   0xe   : > { %s1805_s16 = smov (!%p210_p4, %s996_s16), 511 }
   0xf   : > { %s997_s17 = sshll.u32 %s1805_s16, 2 }
  0x10   : > { %s1576_s20 = scalar_lea.vmem %s1796_s0, %s997_s17  ;;  %s1615_s27 = scalar_lea.vmem %s1799_s3, %s997_s17 }
  0x11   : > { %v1133_v1 = vld [vmem:[%s1576_s20] sm:$0xff]   ;;  %v1420_v2 = vld [vmem:[%s1576_s20 + $0x8] sm:$0xff]   ;;  %v1421_v3 = vld [vmem:[%s1576_s20 + $0x10] sm:$0xff]  }
  0x12   : > { %v1134_v4 = vunpack.c.l.bf16 %v1133_v1  ;;  %v1135_v5 = vunpack.c.h.bf16 %v1133_v1  ;;  %v1138_v6 = vunpack.c.l.bf16 %v1420_v2  ;;  %v1139_v7 = vunpack.c.h.bf16 %v1420_v2  ;;  %v1422_v8 = vld [vmem:[%s1576_s20 + $0x18] sm:$0xff]   ;;  %v1423_v30 = vld [vmem:[%s1576_s20 + $0x20] sm:$0xff]   ;;  %v1424_v35 = vld [vmem:[%s1576_s20 + $0x28] sm:$0xff]  }
  0x13   : > { %v1142_v10 = vunpack.c.l.bf16 %v1421_v3  ;;  %v1143_v11 = vunpack.c.h.bf16 %v1421_v3  ;;  %v1146_v12 = vunpack.c.l.bf16 %v1422_v8  ;;  %v1147_v13 = vunpack.c.h.bf16 %v1422_v8  ;;  %v1425_v40 = vld [vmem:[%s1576_s20 + $0x30] sm:$0xff]   ;;  %v1426_v45 = vld [vmem:[%s1576_s20 + $0x38] sm:$0xff]   ;;  %v1427_v3 = vld [vmem:[%s1576_s20 + $0x40] sm:$0xff]  }
  0x14   : > { %v368_v14 = vmul.f32 %v1134_v4, %v1581_v0  ;;  %v369_v15 = vmul.f32 %v1135_v5, %v1581_v0  ;;  %v370_v16 = vmul.f32 %v1138_v6, %v1581_v0  ;;  %v371_v17 = vmul.f32 %v1139_v7, %v1581_v0 }
  0x15   : > { %v372_v18 = vmul.f32 %v1142_v10, %v1581_v0  ;;  %v373_v19 = vmul.f32 %v1143_v11, %v1581_v0  ;;  %v374_v20 = vmul.f32 %v1146_v12, %v1581_v0  ;;  %v375_v21 = vmul.f32 %v1147_v13, %v1581_v0  ;;  %v1428_v13 = vld [vmem:[%s1576_s20 + $0x48] sm:$0xff]  }
  0x16   : > { %v439_v22 = vadd.f32 %v1590_v9, %v368_v14  ;;  %v440_v23 = vadd.f32 %v1590_v9, %v369_v15  ;;  %v441_v24 = vadd.f32 %v1590_v9, %v370_v16  ;;  %v442_v25 = vadd.f32 %v1590_v9, %v371_v17 }
  0x17   : > { %v443_v26 = vadd.f32 %v1590_v9, %v372_v18  ;;  %v444_v27 = vadd.f32 %v1590_v9, %v373_v19  ;;  %v445_v28 = vadd.f32 %v1590_v9, %v374_v20  ;;  %v446_v29 = vadd.f32 %v1590_v9, %v375_v21  ;;  %v1429_v18 = vld [vmem:[%s1576_s20 + $0x50] sm:$0xff]  }
  0x18   : > { %v503_v31 = vmax.f32 %v439_v22, 0.0  ;;  %v504_v32 = vmax.f32 %v440_v23, 0.0  ;;  %v505_v33 = vmax.f32 %v441_v24, 0.0  ;;  %v506_v34 = vmax.f32 %v442_v25, 0.0  ;;  %v1430_v23 = vld [vmem:[%s1576_s20 + $0x58] sm:$0xff]  }
  0x19   : > { %v507_v36 = vmax.f32 %v443_v26, 0.0  ;;  %v508_v37 = vmax.f32 %v444_v27, 0.0  ;;  %v509_v38 = vmax.f32 %v445_v28, 0.0  ;;  %v510_v39 = vmax.f32 %v446_v29, 0.0 }
  0x1a   : > { %v1263_v41 = vpack.c.bf16 %v504_v32, %v503_v31  ;;  %v1268_v42 = vpack.c.bf16 %v506_v34, %v505_v33  ;;  %v1150_v43 = vunpack.c.l.bf16 %v1423_v30  ;;  %v1151_v44 = vunpack.c.h.bf16 %v1423_v30 }
  0x1b   : > { %v1273_v46 = vpack.c.bf16 %v508_v37, %v507_v36  ;;  %v1278_v47 = vpack.c.bf16 %v510_v39, %v509_v38  ;;  %v1154_v48 = vunpack.c.l.bf16 %v1424_v35  ;;  %v1155_v49 = vunpack.c.h.bf16 %v1424_v35 }
  0x1c   : > { %1264 = vst [vmem:[%s1615_s27] sm:$0xff] %v1263_v41   ;;  %1451 = vst [vmem:[%s1615_s27 + $0x8] sm:$0xff] %v1268_v42   ;;  %v376_v50 = vmul.f32 %v1150_v43, %v1581_v0  ;;  %v377_v51 = vmul.f32 %v1151_v44, %v1581_v0  ;;  %v1158_v52 = vunpack.c.l.bf16 %v1425_v40  ;;  %v1159_v53 = vunpack.c.h.bf16 %v1425_v40  ;;  %v1431_v40 = vld [vmem:[%s1576_s20 + $0x60] sm:$0xff]  }
  0x1d   : > { %1452 = vst [vmem:[%s1615_s27 + $0x10] sm:$0xff] %v1273_v46   ;;  %1453 = vst [vmem:[%s1615_s27 + $0x18] sm:$0xff] %v1278_v47   ;;  %v378_v54 = vmul.f32 %v1154_v48, %v1581_v0  ;;  %v379_v55 = vmul.f32 %v1155_v49, %v1581_v0  ;;  %v1162_v56 = vunpack.c.l.bf16 %v1426_v45  ;;  %v1163_v57 = vunpack.c.h.bf16 %v1426_v45 }
  0x1e   : > { %v447_v58 = vadd.f32 %v1590_v9, %v376_v50  ;;  %v448_v59 = vadd.f32 %v1590_v9, %v377_v51  ;;  %v380_v60 = vmul.f32 %v1158_v52, %v1581_v0  ;;  %v381_v61 = vmul.f32 %v1159_v53, %v1581_v0  ;;  %v1432_v53 = vld [vmem:[%s1576_s20 + $0x68] sm:$0xff]  }
  0x1f   : > { %v449_v62 = vadd.f32 %v1590_v9, %v378_v54  ;;  %v450_v63 = vadd.f32 %v1590_v9, %v379_v55  ;;  %v382_v1 = vmul.f32 %v1162_v56, %v1581_v0  ;;  %v383_v2 = vmul.f32 %v1163_v57, %v1581_v0 }
  0x20   : > { %v511_v4 = vmax.f32 %v447_v58, 0.0  ;;  %v512_v5 = vmax.f32 %v448_v59, 0.0  ;;  %v451_v6 = vadd.f32 %v1590_v9, %v380_v60  ;;  %v452_v7 = vadd.f32 %v1590_v9, %v381_v61  ;;  %v1433_v58 = vld [vmem:[%s1576_s20 + $0x70] sm:$0xff]  }
  0x21   : > { %v513_v8 = vmax.f32 %v449_v62, 0.0  ;;  %v514_v10 = vmax.f32 %v450_v63, 0.0  ;;  %v453_v11 = vadd.f32 %v1590_v9, %v382_v1  ;;  %v454_v12 = vadd.f32 %v1590_v9, %v383_v2  ;;  %v1434_v63 = vld [vmem:[%s1576_s20 + $0x78] sm:$0xff]  }
  0x22   : > { %v1283_v14 = vpack.c.bf16 %v512_v5, %v511_v4  ;;  %v515_v15 = vmax.f32 %v451_v6, 0.0  ;;  %v516_v16 = vmax.f32 %v452_v7, 0.0  ;;  %v1166_v17 = vunpack.c.l.bf16 %v1427_v3 }
  0x23   : > { %v1288_v19 = vpack.c.bf16 %v514_v10, %v513_v8  ;;  %v517_v20 = vmax.f32 %v453_v11, 0.0  ;;  %v518_v21 = vmax.f32 %v454_v12, 0.0  ;;  %v1167_v22 = vunpack.c.h.bf16 %v1427_v3 }
  0x24   : > { %1454 = vst [vmem:[%s1615_s27 + $0x20] sm:$0xff] %v1283_v14   ;;  %v1293_v24 = vpack.c.bf16 %v516_v16, %v515_v15  ;;  %v384_v25 = vmul.f32 %v1166_v17, %v1581_v0  ;;  %v1170_v26 = vunpack.c.l.bf16 %v1428_v13  ;;  %v1171_v27 = vunpack.c.h.bf16 %v1428_v13  ;;  %v1435_v14 = vld [vmem:[%s1576_s20 + $0x80] sm:$0xff]  }
  0x25   : > { %1455 = vst [vmem:[%s1615_s27 + $0x28] sm:$0xff] %v1288_v19   ;;  %v1298_v28 = vpack.c.bf16 %v518_v21, %v517_v20  ;;  %v385_v29 = vmul.f32 %v1167_v22, %v1581_v0  ;;  %v1174_v30 = vunpack.c.l.bf16 %v1429_v18  ;;  %v1175_v31 = vunpack.c.h.bf16 %v1429_v18 }
  0x26   : > { %1456 = vst [vmem:[%s1615_s27 + $0x30] sm:$0xff] %v1293_v24   ;;  %v455_v32 = vadd.f32 %v1590_v9, %v384_v25  ;;  %v386_v33 = vmul.f32 %v1170_v26, %v1581_v0  ;;  %v387_v34 = vmul.f32 %v1171_v27, %v1581_v0  ;;  %v1178_v35 = vunpack.c.l.bf16 %v1430_v23 }
  0x27   : > { %1457 = vst [vmem:[%s1615_s27 + $0x38] sm:$0xff] %v1298_v28   ;;  %v456_v36 = vadd.f32 %v1590_v9, %v385_v29  ;;  %v388_v37 = vmul.f32 %v1174_v30, %v1581_v0  ;;  %v389_v38 = vmul.f32 %v1175_v31, %v1581_v0  ;;  %v1179_v39 = vunpack.c.h.bf16 %v1430_v23  ;;  %v1436_v31 = vld [vmem:[%s1576_s20 + $0x88] sm:$0xff]  }
  0x28   : > { %v519_v41 = vmax.f32 %v455_v32, 0.0  ;;  %v457_v42 = vadd.f32 %v1590_v9, %v386_v33  ;;  %v458_v43 = vadd.f32 %v1590_v9, %v387_v34  ;;  %v390_v44 = vmul.f32 %v1178_v35, %v1581_v0 }
  0x29   : > { %v520_v45 = vmax.f32 %v456_v36, 0.0  ;;  %v459_v46 = vadd.f32 %v1590_v9, %v388_v37  ;;  %v460_v47 = vadd.f32 %v1590_v9, %v389_v38  ;;  %v391_v48 = vmul.f32 %v1179_v39, %v1581_v0  ;;  %v1437_v36 = vld [vmem:[%s1576_s20 + $0x90] sm:$0xff]  }
  0x2a   : > { %v521_v49 = vmax.f32 %v457_v42, 0.0  ;;  %v522_v50 = vmax.f32 %v458_v43, 0.0  ;;  %v461_v51 = vadd.f32 %v1590_v9, %v390_v44  ;;  %v1182_v52 = vunpack.c.l.bf16 %v1431_v40 }
  0x2b   : > { %v1303_v54 = vpack.c.bf16 %v520_v45, %v519_v41  ;;  %v523_v55 = vmax.f32 %v459_v46, 0.0  ;;  %v524_v56 = vmax.f32 %v460_v47, 0.0  ;;  %v462_v57 = vadd.f32 %v1590_v9, %v391_v48  ;;  %v1438_v41 = vld [vmem:[%s1576_s20 + $0x98] sm:$0xff]  }
  0x2c   : > { %v1308_v59 = vpack.c.bf16 %v522_v50, %v521_v49  ;;  %v525_v60 = vmax.f32 %v461_v51, 0.0  ;;  %v1183_v61 = vunpack.c.h.bf16 %v1431_v40  ;;  %v392_v62 = vmul.f32 %v1182_v52, %v1581_v0 }
  0x2d   : > { %1458 = vst [vmem:[%s1615_s27 + $0x40] sm:$0xff] %v1303_v54   ;;  %v1313_v1 = vpack.c.bf16 %v524_v56, %v523_v55  ;;  %v526_v2 = vmax.f32 %v462_v57, 0.0  ;;  %v1186_v3 = vunpack.c.l.bf16 %v1432_v53  ;;  %v1187_v4 = vunpack.c.h.bf16 %v1432_v53  ;;  %v1439_v54 = vld [vmem:[%s1576_s20 + $0xa0] sm:$0xff]  }
  0x2e   : > { %1459 = vst [vmem:[%s1615_s27 + $0x48] sm:$0xff] %v1308_v59   ;;  %v393_v5 = vmul.f32 %v1183_v61, %v1581_v0  ;;  %v463_v6 = vadd.f32 %v1590_v9, %v392_v62  ;;  %v1190_v7 = vunpack.c.l.bf16 %v1433_v58  ;;  %v1191_v8 = vunpack.c.h.bf16 %v1433_v58 }
  0x2f   : > { %1460 = vst [vmem:[%s1615_s27 + $0x50] sm:$0xff] %v1313_v1   ;;  %v1318_v10 = vpack.c.bf16 %v526_v2, %v525_v60  ;;  %v394_v11 = vmul.f32 %v1186_v3, %v1581_v0  ;;  %v395_v12 = vmul.f32 %v1187_v4, %v1581_v0  ;;  %v1194_v13 = vunpack.c.l.bf16 %v1434_v63  ;;  %v1440_v4 = vld [vmem:[%s1576_s20 + $0xa8] sm:$0xff]  }
  0x30   : > { %v464_v15 = vadd.f32 %v1590_v9, %v393_v5  ;;  %v527_v16 = vmax.f32 %v463_v6, 0.0  ;;  %v396_v17 = vmul.f32 %v1190_v7, %v1581_v0  ;;  %v397_v18 = vmul.f32 %v1191_v8, %v1581_v0 }
  0x31   : > { %1461 = vst [vmem:[%s1615_s27 + $0x58] sm:$0xff] %v1318_v10   ;;  %v465_v19 = vadd.f32 %v1590_v9, %v394_v11  ;;  %v466_v20 = vadd.f32 %v1590_v9, %v395_v12  ;;  %v1195_v21 = vunpack.c.h.bf16 %v1434_v63  ;;  %v398_v22 = vmul.f32 %v1194_v13, %v1581_v0 }
  0x32   : > { %v528_v23 = vmax.f32 %v464_v15, 0.0  ;;  %v467_v24 = vadd.f32 %v1590_v9, %v396_v17  ;;  %v468_v25 = vadd.f32 %v1590_v9, %v397_v18  ;;  %v1198_v26 = vunpack.c.l.bf16 %v1435_v14 }
  0x33   : > { %v529_v27 = vmax.f32 %v465_v19, 0.0  ;;  %v530_v28 = vmax.f32 %v466_v20, 0.0  ;;  %v399_v29 = vmul.f32 %v1195_v21, %v1581_v0  ;;  %v469_v30 = vadd.f32 %v1590_v9, %v398_v22  ;;  %v1442_v19 = vld [vmem:[%s1576_s20 + $0xb8] sm:$0xff]  }
  0x34   : > { %v1323_v32 = vpack.c.bf16 %v528_v23, %v527_v16  ;;  %v531_v33 = vmax.f32 %v467_v24, 0.0  ;;  %v532_v34 = vmax.f32 %v468_v25, 0.0  ;;  %v1199_v35 = vunpack.c.h.bf16 %v1435_v14  ;;  %v1441_v14 = vld [vmem:[%s1576_s20 + $0xb0] sm:$0xff]  }
  0x35   : > { %v1328_v37 = vpack.c.bf16 %v530_v28, %v529_v27  ;;  %v470_v38 = vadd.f32 %v1590_v9, %v399_v29  ;;  %v533_v39 = vmax.f32 %v469_v30, 0.0  ;;  %v400_v40 = vmul.f32 %v1198_v26, %v1581_v0 }
  0x36   : > { %1462 = vst [vmem:[%s1615_s27 + $0x60] sm:$0xff] %v1323_v32   ;;  %v1333_v42 = vpack.c.bf16 %v532_v34, %v531_v33  ;;  %v401_v43 = vmul.f32 %v1199_v35, %v1581_v0  ;;  %v1202_v44 = vunpack.c.l.bf16 %v1436_v31  ;;  %v1203_v45 = vunpack.c.h.bf16 %v1436_v31  ;;  %v1443_v32 = vld [vmem:[%s1576_s20 + $0xc0] sm:$0xff]  }
  0x37   : > { %1463 = vst [vmem:[%s1615_s27 + $0x68] sm:$0xff] %v1328_v37   ;;  %v534_v46 = vmax.f32 %v470_v38, 0.0  ;;  %v471_v47 = vadd.f32 %v1590_v9, %v400_v40  ;;  %v1206_v48 = vunpack.c.l.bf16 %v1437_v36  ;;  %v1207_v49 = vunpack.c.h.bf16 %v1437_v36 }
  0x38   : > { %1464 = vst [vmem:[%s1615_s27 + $0x70] sm:$0xff] %v1333_v42   ;;  %v472_v50 = vadd.f32 %v1590_v9, %v401_v43  ;;  %v402_v51 = vmul.f32 %v1202_v44, %v1581_v0  ;;  %v403_v52 = vmul.f32 %v1203_v45, %v1581_v0  ;;  %v1210_v53 = vunpack.c.l.bf16 %v1438_v41  ;;  %v1444_v45 = vld [vmem:[%s1576_s20 + $0xc8] sm:$0xff]  }
  0x39   : > { %v1338_v55 = vpack.c.bf16 %v534_v46, %v533_v39  ;;  %v535_v56 = vmax.f32 %v471_v47, 0.0  ;;  %v404_v57 = vmul.f32 %v1206_v48, %v1581_v0  ;;  %v405_v58 = vmul.f32 %v1207_v49, %v1581_v0 }
  0x3a   : > { %v536_v59 = vmax.f32 %v472_v50, 0.0  ;;  %v473_v60 = vadd.f32 %v1590_v9, %v402_v51  ;;  %v474_v61 = vadd.f32 %v1590_v9, %v403_v52  ;;  %v1211_v62 = vunpack.c.h.bf16 %v1438_v41 }
  0x3b   : > { %1465 = vst [vmem:[%s1615_s27 + $0x78] sm:$0xff] %v1338_v55   ;;  %v475_v63 = vadd.f32 %v1590_v9, %v404_v57  ;;  %v476_v1 = vadd.f32 %v1590_v9, %v405_v58  ;;  %v406_v2 = vmul.f32 %v1210_v53, %v1581_v0  ;;  %v1214_v3 = vunpack.c.l.bf16 %v1439_v54 }
  0x3c   : > { %v1343_v5 = vpack.c.bf16 %v536_v59, %v535_v56  ;;  %v537_v6 = vmax.f32 %v473_v60, 0.0  ;;  %v538_v7 = vmax.f32 %v474_v61, 0.0  ;;  %v407_v8 = vmul.f32 %v1211_v62, %v1581_v0 }
  0x3d   : > { %v539_v10 = vmax.f32 %v475_v63, 0.0  ;;  %v540_v11 = vmax.f32 %v476_v1, 0.0  ;;  %v477_v12 = vadd.f32 %v1590_v9, %v406_v2  ;;  %v1215_v13 = vunpack.c.h.bf16 %v1439_v54  ;;  %v1445_v54 = vld [vmem:[%s1576_s20 + $0xd0] sm:$0xff]   ;;  %v1446_v63 = vld [vmem:[%s1576_s20 + $0xd8] sm:$0xff]  }
  0x3e   : > { %1466 = vst [vmem:[%s1615_s27 + $0x80] sm:$0xff] %v1343_v5   ;;  %v1348_v15 = vpack.c.bf16 %v538_v7, %v537_v6  ;;  %v478_v16 = vadd.f32 %v1590_v9, %v407_v8  ;;  %v408_v17 = vmul.f32 %v1214_v3, %v1581_v0  ;;  %v1218_v18 = vunpack.c.l.bf16 %v1440_v4 }
  0x3f   : > { %v1353_v20 = vpack.c.bf16 %v540_v11, %v539_v10  ;;  %v541_v21 = vmax.f32 %v477_v12, 0.0  ;;  %v409_v22 = vmul.f32 %v1215_v13, %v1581_v0  ;;  %v1219_v23 = vunpack.c.h.bf16 %v1440_v4  ;;  %v1447_v10 = vld [vmem:[%s1576_s20 + $0xe0] sm:$0xff]  }
  0x40   : > { %1467 = vst [vmem:[%s1615_s27 + $0x88] sm:$0xff] %v1348_v15   ;;  %v542_v24 = vmax.f32 %v478_v16, 0.0  ;;  %v479_v25 = vadd.f32 %v1590_v9, %v408_v17  ;;  %v410_v26 = vmul.f32 %v1218_v18, %v1581_v0  ;;  %v1222_v27 = vunpack.c.l.bf16 %v1441_v14 }
  0x41   : > { %1468 = vst [vmem:[%s1615_s27 + $0x90] sm:$0xff] %v1353_v20   ;;  %v480_v28 = vadd.f32 %v1590_v9, %v409_v22  ;;  %v411_v29 = vmul.f32 %v1219_v23, %v1581_v0  ;;  %v1223_v30 = vunpack.c.h.bf16 %v1441_v14  ;;  %v1226_v31 = vunpack.c.l.bf16 %v1442_v19  ;;  %v1448_v23 = vld [vmem:[%s1576_s20 + $0xe8] sm:$0xff]  }
  0x42   : > { %v1358_v33 = vpack.c.bf16 %v542_v24, %v541_v21  ;;  %v543_v34 = vmax.f32 %v479_v25, 0.0  ;;  %v481_v35 = vadd.f32 %v1590_v9, %v410_v26  ;;  %v412_v36 = vmul.f32 %v1222_v27, %v1581_v0 }
  0x43   : > { %v544_v37 = vmax.f32 %v480_v28, 0.0  ;;  %v482_v38 = vadd.f32 %v1590_v9, %v411_v29  ;;  %v413_v39 = vmul.f32 %v1223_v30, %v1581_v0  ;;  %v1227_v40 = vunpack.c.h.bf16 %v1442_v19 }
  0x44   : > { %1469 = vst [vmem:[%s1615_s27 + $0x98] sm:$0xff] %v1358_v33   ;;  %v545_v41 = vmax.f32 %v481_v35, 0.0  ;;  %v483_v42 = vadd.f32 %v1590_v9, %v412_v36  ;;  %v414_v43 = vmul.f32 %v1226_v31, %v1581_v0  ;;  %v1230_v44 = vunpack.c.l.bf16 %v1443_v32 }
  0x45   : > { %v1363_v46 = vpack.c.bf16 %v544_v37, %v543_v34  ;;  %v546_v47 = vmax.f32 %v482_v38, 0.0  ;;  %v484_v48 = vadd.f32 %v1590_v9, %v413_v39  ;;  %v415_v49 = vmul.f32 %v1227_v40, %v1581_v0 }
  0x46   : > { %v547_v50 = vmax.f32 %v483_v42, 0.0  ;;  %v485_v51 = vadd.f32 %v1590_v9, %v414_v43  ;;  %v1231_v52 = vunpack.c.h.bf16 %v1443_v32  ;;  %v416_v53 = vmul.f32 %v1230_v44, %v1581_v0  ;;  %v1449_v32 = vld [vmem:[%s1576_s20 + $0xf0] sm:$0xff]  }
  0x47   : > { %1470 = vst [vmem:[%s1615_s27 + $0xa0] sm:$0xff] %v1363_v46   ;;  %v1368_v55 = vpack.c.bf16 %v546_v47, %v545_v41  ;;  %v548_v56 = vmax.f32 %v484_v48, 0.0  ;;  %v486_v57 = vadd.f32 %v1590_v9, %v415_v49  ;;  %v1234_v58 = vunpack.c.l.bf16 %v1444_v45  ;;  %v1450_v41 = vld [vmem:[%s1576_s20 + $0xf8] sm:$0xff]  }
  0x48   : > { %v549_v59 = vmax.f32 %v485_v51, 0.0  ;;  %v417_v60 = vmul.f32 %v1231_v52, %v1581_v0  ;;  %v487_v61 = vadd.f32 %v1590_v9, %v416_v53  ;;  %v1235_v62 = vunpack.c.h.bf16 %v1444_v45 }
  0x49   : > { %1471 = vst [vmem:[%s1615_s27 + $0xa8] sm:$0xff] %v1368_v55   ;;  %v1373_v1 = vpack.c.bf16 %v548_v56, %v547_v50  ;;  %v550_v2 = vmax.f32 %v486_v57, 0.0  ;;  %v418_v3 = vmul.f32 %v1234_v58, %v1581_v0  ;;  %v1238_v4 = vunpack.c.l.bf16 %v1445_v54 }
  0x4a   : > { %v488_v5 = vadd.f32 %v1590_v9, %v417_v60  ;;  %v551_v6 = vmax.f32 %v487_v61, 0.0  ;;  %v419_v7 = vmul.f32 %v1235_v62, %v1581_v0  ;;  %v1239_v8 = vunpack.c.h.bf16 %v1445_v54 }
  0x4b   : > { %1472 = vst [vmem:[%s1615_s27 + $0xb0] sm:$0xff] %v1373_v1   ;;  %v1378_v11 = vpack.c.bf16 %v550_v2, %v549_v59  ;;  %v489_v12 = vadd.f32 %v1590_v9, %v418_v3  ;;  %v420_v13 = vmul.f32 %v1238_v4, %v1581_v0  ;;  %v1242_v14 = vunpack.c.l.bf16 %v1446_v63 }
  0x4c   : > { %v552_v15 = vmax.f32 %v488_v5, 0.0  ;;  %v490_v16 = vadd.f32 %v1590_v9, %v419_v7  ;;  %v421_v17 = vmul.f32 %v1239_v8, %v1581_v0  ;;  %v1243_v18 = vunpack.c.h.bf16 %v1446_v63 }
  0x4d   : > { %1473 = vst [vmem:[%s1615_s27 + $0xb8] sm:$0xff] %v1378_v11   ;;  %v553_v19 = vmax.f32 %v489_v12, 0.0  ;;  %v491_v20 = vadd.f32 %v1590_v9, %v420_v13  ;;  %v422_v21 = vmul.f32 %v1242_v14, %v1581_v0  ;;  %v1246_v22 = vunpack.c.l.bf16 %v1447_v10 }
  0x4e   : > { %v1383_v24 = vpack.c.bf16 %v552_v15, %v551_v6  ;;  %v554_v25 = vmax.f32 %v490_v16, 0.0  ;;  %v492_v26 = vadd.f32 %v1590_v9, %v421_v17  ;;  %v423_v27 = vmul.f32 %v1243_v18, %v1581_v0 }
  0x4f   : > { %v555_v28 = vmax.f32 %v491_v20, 0.0  ;;  %v493_v29 = vadd.f32 %v1590_v9, %v422_v21  ;;  %v1247_v30 = vunpack.c.h.bf16 %v1447_v10  ;;  %v424_v31 = vmul.f32 %v1246_v22, %v1581_v0 }
  0x50   : > { %1474 = vst [vmem:[%s1615_s27 + $0xc0] sm:$0xff] %v1383_v24   ;;  %v1388_v33 = vpack.c.bf16 %v554_v25, %v553_v19  ;;  %v556_v34 = vmax.f32 %v492_v26, 0.0  ;;  %v494_v35 = vadd.f32 %v1590_v9, %v423_v27  ;;  %v1250_v36 = vunpack.c.l.bf16 %v1448_v23 }
  0x51   : > { %v557_v37 = vmax.f32 %v493_v29, 0.0  ;;  %v425_v38 = vmul.f32 %v1247_v30, %v1581_v0  ;;  %v495_v39 = vadd.f32 %v1590_v9, %v424_v31  ;;  %v1251_v40 = vunpack.c.h.bf16 %v1448_v23 }
  0x52   : > { %1475 = vst [vmem:[%s1615_s27 + $0xc8] sm:$0xff] %v1388_v33   ;;  %v1393_v42 = vpack.c.bf16 %v556_v34, %v555_v28  ;;  %v558_v43 = vmax.f32 %v494_v35, 0.0  ;;  %v426_v44 = vmul.f32 %v1250_v36, %v1581_v0  ;;  %v1254_v45 = vunpack.c.l.bf16 %v1449_v32 }
  0x53   : > { %v496_v46 = vadd.f32 %v1590_v9, %v425_v38  ;;  %v559_v47 = vmax.f32 %v495_v39, 0.0  ;;  %v427_v48 = vmul.f32 %v1251_v40, %v1581_v0  ;;  %v1255_v49 = vunpack.c.h.bf16 %v1449_v32 }
  0x54   : > { %1476 = vst [vmem:[%s1615_s27 + $0xd0] sm:$0xff] %v1393_v42   ;;  %v1398_v50 = vpack.c.bf16 %v558_v43, %v557_v37  ;;  %v497_v51 = vadd.f32 %v1590_v9, %v426_v44  ;;  %v428_v52 = vmul.f32 %v1254_v45, %v1581_v0  ;;  %v1258_v53 = vunpack.c.l.bf16 %v1450_v41 }
  0x55   : > { %v560_v54 = vmax.f32 %v496_v46, 0.0  ;;  %v498_v55 = vadd.f32 %v1590_v9, %v427_v48  ;;  %v429_v56 = vmul.f32 %v1255_v49, %v1581_v0  ;;  %v1259_v57 = vunpack.c.h.bf16 %v1450_v41 }
  0x56   : > { %1477 = vst [vmem:[%s1615_s27 + $0xd8] sm:$0xff] %v1398_v50   ;;  %v561_v58 = vmax.f32 %v497_v51, 0.0  ;;  %v499_v59 = vadd.f32 %v1590_v9, %v428_v52  ;;  %v430_v60 = vmul.f32 %v1258_v53, %v1581_v0 }
  0x57   : > { %v1403_v61 = vpack.c.bf16 %v560_v54, %v559_v47  ;;  %v562_v62 = vmax.f32 %v498_v55, 0.0  ;;  %v500_v63 = vadd.f32 %v1590_v9, %v429_v56  ;;  %v431_v1 = vmul.f32 %v1259_v57, %v1581_v0 }
  0x58   : > { %v563_v2 = vmax.f32 %v499_v59, 0.0  ;;  %v501_v3 = vadd.f32 %v1590_v9, %v430_v60 }
  0x59   : > { %1478 = vst [vmem:[%s1615_s27 + $0xe0] sm:$0xff] %v1403_v61   ;;  %v1408_v4 = vpack.c.bf16 %v562_v62, %v561_v58  ;;  %v564_v5 = vmax.f32 %v500_v63, 0.0  ;;  %v502_v6 = vadd.f32 %v1590_v9, %v431_v1 }
  0x5a   : > { %v565_v7 = vmax.f32 %v501_v3, 0.0 }
  0x5b   : > { %1479 = vst [vmem:[%s1615_s27 + $0xe8] sm:$0xff] %v1408_v4   ;;  %v1413_v8 = vpack.c.bf16 %v564_v5, %v563_v2  ;;  %v566_v10 = vmax.f32 %v502_v6, 0.0 }
  0x5d   : > { %1480 = vst [vmem:[%s1615_s27 + $0xf0] sm:$0xff] %v1413_v8   ;;  %v1418_v11 = vpack.c.bf16 %v566_v10, %v565_v7 }
  0x5f   : > { %1481 = vst [vmem:[%s1615_s27 + $0xf8] sm:$0xff] %v1418_v11  }
  0x60 PF: > { %s13_s14 = sadd.s32 1, %s1528_s14   ;;  %s1800_s12 = smov %s1524_s13 }
  0x61   : > { %p10_p5 = scmp.ge.s32.totalorder %s13_s14, 10   ;;  %s1801_s13 = smov %s1803_s15 }
  0x63   :  { %12 = sbr.rel (!%p10_p5) target bundleno = 2 (0x2), region = 68 }

// kernel: _lambda_.21
= control target key start
LH: loop header
LB: loop body
LE: loop exit
PB: predicated region body
PF: predicated region fallthrough
CT: control target
= control target key end

     0   :  { %v1896_v0 = vmov 0   ;;  %s2480_s1 = inlined_call_operand.vmem [shape: bf16[256,128], index: 1, kind: input, shape index: {}]   ;;  %s2481_s0 = inlined_call_operand.vmem [shape: bf16[512,256], index: 0, kind: input, shape index: {}]   ;;  %s2482_s2 = inlined_call_operand.vmem [shape: bf16[512,128], index: 2, kind: output, shape index: {0}]   ;;  %s2483_s3 = inlined_call_operand.vmem [shape: f32[8,128], index: 3, kind: output, shape index: {1}]  }
   0x1   :  { %526 = vmatprep.subr.bf16.mxu0 %v1896_v0  ;;  %v1784_v1 = vld [vmem:[%s2480_s1] sm:$0xff]   ;;  %1751 = vmatprep.subr.bf16.mxu1 %v1896_v0  ;;  %v1785_v2 = vld [vmem:[%s2480_s1 + $0x8] sm:$0xff]   ;;  %v1786_v3 = vld [vmem:[%s2480_s1 + $0x10] sm:$0xff]  }
   0x2   :  { %527 = vmatpush1.bf16.msra.mxu0 %v1784_v1  ;;  %1767 = vmatpush1.bf16.msra.mxu1 %v1784_v1  ;;  %v1787_v4 = vld [vmem:[%s2480_s1 + $0x18] sm:$0xff]   ;;  %v1788_v5 = vld [vmem:[%s2480_s1 + $0x20] sm:$0xff]   ;;  %v1789_v7 = vld [vmem:[%s2480_s1 + $0x28] sm:$0xff]  }
   0x3   :  { %528 = vmatprep.subr.bf16.mxu0 %v1896_v0  ;;  %1752 = vmatprep.subr.bf16.mxu1 %v1896_v0  ;;  %v1802_v6 = vld [vmem:[%s2481_s0 + $0x4] ss:$8 sps:$4 sm:$0xff]   ;;  %v1790_v8 = vld [vmem:[%s2480_s1 + $0x30] sm:$0xff]   ;;  %v1791_v9 = vld [vmem:[%s2480_s1 + $0x38] sm:$0xff]  }
   0x4   :  { %558 = vmatprep.mubr.bf16.mxu0 %v1802_v6  ;;  %v1826_v10 = vld [vmem:[%s2481_s0 + $0x104] ss:$8 sps:$4 sm:$0xff]   ;;  %v1794_v13 = vld [vmem:[%s2480_s1 + $0x50] sm:$0xff]   ;;  %v1795_v14 = vld [vmem:[%s2480_s1 + $0x58] sm:$0xff]  }
   0x5   :  { %686 = vmatprep.mubr.bf16.mxu1 %v1826_v10  ;;  %v1792_v11 = vld [vmem:[%s2480_s1 + $0x40] sm:$0xff]   ;;  %v1793_v12 = vld [vmem:[%s2480_s1 + $0x48] sm:$0xff]   ;;  %v1798_v17 = vld [vmem:[%s2480_s1 + $0x70] sm:$0xff]  }
   0x6   :  { %529 = vmatpush1.bf16.msra.mxu0 %v1785_v2  ;;  %1768 = vmatpush1.bf16.msra.mxu1 %v1785_v2  ;;  %v1796_v15 = vld [vmem:[%s2480_s1 + $0x60] sm:$0xff]   ;;  %v1797_v16 = vld [vmem:[%s2480_s1 + $0x68] sm:$0xff]   ;;  %v1799_v18 = vld [vmem:[%s2480_s1 + $0x78] sm:$0xff]  }
   0x7   :  { %530 = vmatprep.subr.bf16.mxu0 %v1896_v0  ;;  %1753 = vmatprep.subr.bf16.mxu1 %v1896_v0  ;;  %v1800_v19 = vld [vmem:[%s2481_s0] ss:$8 sps:$4 sm:$0xff]   ;;  %v1803_v21 = vld [vmem:[%s2481_s0 + $0x14] ss:$8 sps:$4 sm:$0xff]   ;;  %v1805_v23 = vld [vmem:[%s2481_s0 + $0x10] ss:$8 sps:$4 sm:$0xff]  }
   0x8   :  { %v1824_v20 = vld [vmem:[%s2481_s0 + $0x100] ss:$8 sps:$4 sm:$0xff]   ;;  %v1830_v22 = vld [vmem:[%s2481_s0 + $0x114] ss:$8 sps:$4 sm:$0xff]   ;;  %v1832_v24 = vld [vmem:[%s2481_s0 + $0x110] ss:$8 sps:$4 sm:$0xff]  }
   0x9   :  { %v1806_v25 = vld [vmem:[%s2481_s0 + $0x24] ss:$8 sps:$4 sm:$0xff]   ;;  %v1808_v27 = vld [vmem:[%s2481_s0 + $0x20] ss:$8 sps:$4 sm:$0xff]   ;;  %v1809_v29 = vld [vmem:[%s2481_s0 + $0x34] ss:$8 sps:$4 sm:$0xff]  }
   0xa   :  { %531 = vmatpush1.bf16.msra.mxu0 %v1786_v3  ;;  %1769 = vmatpush1.bf16.msra.mxu1 %v1786_v3  ;;  %v1836_v26 = vld [vmem:[%s2481_s0 + $0x124] ss:$8 sps:$4 sm:$0xff]   ;;  %v1838_v28 = vld [vmem:[%s2481_s0 + $0x120] ss:$8 sps:$4 sm:$0xff]   ;;  %v1842_v30 = vld [vmem:[%s2481_s0 + $0x134] ss:$8 sps:$4 sm:$0xff]  }
   0xb   :  { %532 = vmatprep.subr.bf16.mxu0 %v1896_v0  ;;  %1754 = vmatprep.subr.bf16.mxu1 %v1896_v0  ;;  %v1811_v31 = vld [vmem:[%s2481_s0 + $0x30] ss:$8 sps:$4 sm:$0xff]   ;;  %v1812_v33 = vld [vmem:[%s2481_s0 + $0x44] ss:$8 sps:$4 sm:$0xff]   ;;  %v1814_v35 = vld [vmem:[%s2481_s0 + $0x40] ss:$8 sps:$4 sm:$0xff]  }
   0xc   :  { %v1844_v32 = vld [vmem:[%s2481_s0 + $0x130] ss:$8 sps:$4 sm:$0xff]   ;;  %v1848_v34 = vld [vmem:[%s2481_s0 + $0x144] ss:$8 sps:$4 sm:$0xff]   ;;  %v1850_v36 = vld [vmem:[%s2481_s0 + $0x140] ss:$8 sps:$4 sm:$0xff]  }
   0xd   :  { %v1815_v37 = vld [vmem:[%s2481_s0 + $0x54] ss:$8 sps:$4 sm:$0xff]   ;;  %v1817_v39 = vld [vmem:[%s2481_s0 + $0x50] ss:$8 sps:$4 sm:$0xff]   ;;  %v1818_v41 = vld [vmem:[%s2481_s0 + $0x64] ss:$8 sps:$4 sm:$0xff]  }
   0xe   :  { %533 = vmatpush1.bf16.msra.mxu0 %v1787_v4  ;;  %1770 = vmatpush1.bf16.msra.mxu1 %v1787_v4  ;;  %v1854_v38 = vld [vmem:[%s2481_s0 + $0x154] ss:$8 sps:$4 sm:$0xff]   ;;  %v1856_v40 = vld [vmem:[%s2481_s0 + $0x150] ss:$8 sps:$4 sm:$0xff]   ;;  %v1860_v42 = vld [vmem:[%s2481_s0 + $0x164] ss:$8 sps:$4 sm:$0xff]  }
   0xf   :  { %534 = vmatprep.subr.bf16.mxu0 %v1896_v0  ;;  %1755 = vmatprep.subr.bf16.mxu1 %v1896_v0  ;;  %v1820_v43 = vld [vmem:[%s2481_s0 + $0x60] ss:$8 sps:$4 sm:$0xff]   ;;  %v1821_v45 = vld [vmem:[%s2481_s0 + $0x74] ss:$8 sps:$4 sm:$0xff]   ;;  %v1823_v47 = vld [vmem:[%s2481_s0 + $0x70] ss:$8 sps:$4 sm:$0xff]  }
  0x10   :  { %v1862_v44 = vld [vmem:[%s2481_s0 + $0x160] ss:$8 sps:$4 sm:$0xff]   ;;  %v1866_v46 = vld [vmem:[%s2481_s0 + $0x174] ss:$8 sps:$4 sm:$0xff]   ;;  %v1868_v48 = vld [vmem:[%s2481_s0 + $0x170] ss:$8 sps:$4 sm:$0xff]  }
  0x11   :  { %v1827_v49 = vld [vmem:[%s2481_s0 + $0x84] ss:$8 sps:$4 sm:$0xff]   ;;  %v1829_v51 = vld [vmem:[%s2481_s0 + $0x80] ss:$8 sps:$4 sm:$0xff]   ;;  %v1833_v53 = vld [vmem:[%s2481_s0 + $0x94] ss:$8 sps:$4 sm:$0xff]  }
  0x12   :  { %535 = vmatpush1.bf16.msra.mxu0 %v1788_v5  ;;  %1771 = vmatpush1.bf16.msra.mxu1 %v1788_v5  ;;  %v1872_v50 = vld [vmem:[%s2481_s0 + $0x184] ss:$8 sps:$4 sm:$0xff]   ;;  %v1874_v52 = vld [vmem:[%s2481_s0 + $0x180] ss:$8 sps:$4 sm:$0xff]   ;;  %v1875_v54 = vld [vmem:[%s2481_s0 + $0x194] ss:$8 sps:$4 sm:$0xff]  }
  0x13   :  { %536 = vmatprep.subr.bf16.mxu0 %v1896_v0  ;;  %1756 = vmatprep.subr.bf16.mxu1 %v1896_v0  ;;  %v1835_v55 = vld [vmem:[%s2481_s0 + $0x90] ss:$8 sps:$4 sm:$0xff]   ;;  %v1839_v57 = vld [vmem:[%s2481_s0 + $0xa4] ss:$8 sps:$4 sm:$0xff]   ;;  %v1841_v59 = vld [vmem:[%s2481_s0 + $0xa0] ss:$8 sps:$4 sm:$0xff]  }
  0x14   :  { %v1877_v56 = vld [vmem:[%s2481_s0 + $0x190] ss:$8 sps:$4 sm:$0xff]   ;;  %v1878_v58 = vld [vmem:[%s2481_s0 + $0x1a4] ss:$8 sps:$4 sm:$0xff]   ;;  %v1880_v60 = vld [vmem:[%s2481_s0 + $0x1a0] ss:$8 sps:$4 sm:$0xff]  }
  0x15   :  { %v1845_v61 = vld [vmem:[%s2481_s0 + $0xb4] ss:$8 sps:$4 sm:$0xff]   ;;  %v1847_v63 = vld [vmem:[%s2481_s0 + $0xb0] ss:$8 sps:$4 sm:$0xff]   ;;  %v1851_v1 = vld [vmem:[%s2481_s0 + $0xc4] ss:$8 sps:$4 sm:$0xff]  }
  0x16   :  { %537 = vmatpush1.bf16.msra.mxu0 %v1789_v7  ;;  %1772 = vmatpush1.bf16.msra.mxu1 %v1789_v7  ;;  %v1881_v62 = vld [vmem:[%s2481_s0 + $0x1b4] ss:$8 sps:$4 sm:$0xff]   ;;  %v1884_v2 = vld [vmem:[%s2481_s0 + $0x1c4] ss:$8 sps:$4 sm:$0xff]   ;;  %v1853_v3 = vld [vmem:[%s2481_s0 + $0xc0] ss:$8 sps:$4 sm:$0xff]  }
  0x17   :  { %538 = vmatprep.subr.bf16.mxu0 %v1896_v0  ;;  %1757 = vmatprep.subr.bf16.mxu1 %v1896_v0  ;;  %v1886_v4 = vld [vmem:[%s2481_s0 + $0x1c0] ss:$8 sps:$4 sm:$0xff]   ;;  %v1857_v5 = vld [vmem:[%s2481_s0 + $0xd4] ss:$8 sps:$4 sm:$0xff]   ;;  %v1859_v7 = vld [vmem:[%s2481_s0 + $0xd0] ss:$8 sps:$4 sm:$0xff]  }
  0x18   :  { %v1887_v6 = vld [vmem:[%s2481_s0 + $0x1d4] ss:$8 sps:$4 sm:$0xff]   ;;  %v1890_v10 = vld [vmem:[%s2481_s0 + $0x1e4] ss:$8 sps:$4 sm:$0xff]  }
  0x1a   :  { %539 = vmatpush1.bf16.msra.mxu0 %v1790_v8  ;;  %1773 = vmatpush1.bf16.msra.mxu1 %v1790_v8  ;;  %v1889_v8 = vld [vmem:[%s2481_s0 + $0x1d0] ss:$8 sps:$4 sm:$0xff]  }
  0x1b   :  { %540 = vmatprep.subr.bf16.mxu0 %v1896_v0  ;;  %1758 = vmatprep.subr.bf16.mxu1 %v1896_v0 }
  0x1e   :  { %541 = vmatpush1.bf16.msra.mxu0 %v1791_v9  ;;  %1774 = vmatpush1.bf16.msra.mxu1 %v1791_v9  ;;  %v1863_v9 = vld [vmem:[%s2481_s0 + $0xe4] ss:$8 sps:$4 sm:$0xff]  }
  0x1f   :  { %542 = vmatprep.subr.bf16.mxu0 %v1896_v0  ;;  %1759 = vmatprep.subr.bf16.mxu1 %v1896_v0 }
  0x22   :  { %543 = vmatpush1.bf16.msra.mxu0 %v1792_v11  ;;  %1775 = vmatpush1.bf16.msra.mxu1 %v1792_v11  ;;  %v1865_v11 = vld [vmem:[%s2481_s0 + $0xe0] ss:$8 sps:$4 sm:$0xff]  }
  0x23   :  { %544 = vmatprep.subr.bf16.mxu0 %v1896_v0  ;;  %1760 = vmatprep.subr.bf16.mxu1 %v1896_v0 }
  0x26   :  { %545 = vmatpush1.bf16.msra.mxu0 %v1793_v12  ;;  %1776 = vmatpush1.bf16.msra.mxu1 %v1793_v12  ;;  %v1892_v12 = vld [vmem:[%s2481_s0 + $0x1e0] ss:$8 sps:$4 sm:$0xff]  }
  0x27   :  { %546 = vmatprep.subr.bf16.mxu0 %v1896_v0  ;;  %1761 = vmatprep.subr.bf16.mxu1 %v1896_v0 }
  0x2a   :  { %547 = vmatpush1.bf16.msra.mxu0 %v1794_v13  ;;  %1777 = vmatpush1.bf16.msra.mxu1 %v1794_v13  ;;  %v1869_v13 = vld [vmem:[%s2481_s0 + $0xf4] ss:$8 sps:$4 sm:$0xff]  }
  0x2b   :  { %548 = vmatprep.subr.bf16.mxu0 %v1896_v0  ;;  %1762 = vmatprep.subr.bf16.mxu1 %v1896_v0 }
  0x2e   :  { %549 = vmatpush1.bf16.msra.mxu0 %v1795_v14  ;;  %1778 = vmatpush1.bf16.msra.mxu1 %v1795_v14  ;;  %v1893_v14 = vld [vmem:[%s2481_s0 + $0x1f4] ss:$8 sps:$4 sm:$0xff]  }
  0x2f   :  { %550 = vmatprep.subr.bf16.mxu0 %v1896_v0  ;;  %1763 = vmatprep.subr.bf16.mxu1 %v1896_v0 }
  0x32   :  { %551 = vmatpush1.bf16.msra.mxu0 %v1796_v15  ;;  %1779 = vmatpush1.bf16.msra.mxu1 %v1796_v15  ;;  %v1871_v15 = vld [vmem:[%s2481_s0 + $0xf0] ss:$8 sps:$4 sm:$0xff]  }
  0x33   :  { %552 = vmatprep.subr.bf16.mxu0 %v1896_v0  ;;  %1764 = vmatprep.subr.bf16.mxu1 %v1896_v0 }
  0x36   :  { %553 = vmatpush1.bf16.msra.mxu0 %v1797_v16  ;;  %1780 = vmatpush1.bf16.msra.mxu1 %v1797_v16  ;;  %v1895_v16 = vld [vmem:[%s2481_s0 + $0x1f0] ss:$8 sps:$4 sm:$0xff]  }
  0x37   :  { %554 = vmatprep.subr.bf16.mxu0 %v1896_v0  ;;  %1765 = vmatprep.subr.bf16.mxu1 %v1896_v0 }
  0x3a   :  { %555 = vmatpush1.bf16.msra.mxu0 %v1798_v17  ;;  %1781 = vmatpush1.bf16.msra.mxu1 %v1798_v17 }
  0x3b   :  { %556 = vmatprep.subr.bf16.mxu0 %v1896_v0  ;;  %1766 = vmatprep.subr.bf16.mxu1 %v1896_v0  ;;  %v1883_v0 = vld [vmem:[%s2481_s0 + $0x1b0] ss:$8 sps:$4 sm:$0xff]  }
  0x3e   :  { %557 = vmatpush1.bf16.msra.mxu0 %v1799_v18  ;;  %1782 = vmatpush1.bf16.msra.mxu1 %v1799_v18 }
  0x41   :  { %559 = vmatmul.mubr.bf16.vlgmr.msra.gmra.mrb[0].mxu0 %v1800_v19  ;;  %687 = vmatmul.mubr.bf16.vlgmr.msra.gmra.mrb[0].mxu1 %v1824_v20 }
  0x42   :  { %566 = vmatprep.mubr.bf16.mxu0 %v1803_v21  ;;  %694 = vmatprep.mubr.bf16.mxu1 %v1830_v22 }
  0x49   :  { %567 = vmatmul.mubr.bf16.gmra.mrb[4].mxu0 %v1805_v23  ;;  %695 = vmatmul.mubr.bf16.gmra.mrb[4].mxu1 %v1832_v24 }
  0x4a   :  { %574 = vmatprep.mubr.bf16.mxu0 %v1806_v25  ;;  %702 = vmatprep.mubr.bf16.mxu1 %v1836_v26 }
  0x51   :  { %575 = vmatmul.mubr.bf16.gmra.mrb[8].mxu0 %v1808_v27  ;;  %703 = vmatmul.mubr.bf16.gmra.mrb[8].mxu1 %v1838_v28 }
  0x52   :  { %582 = vmatprep.mubr.bf16.mxu0 %v1809_v29  ;;  %710 = vmatprep.mubr.bf16.mxu1 %v1842_v30 }
  0x59   :  { %583 = vmatmul.mubr.bf16.gmra.mrb[12].mxu0 %v1811_v31  ;;  %711 = vmatmul.mubr.bf16.gmra.mrb[12].mxu1 %v1844_v32 }
  0x5a   :  { %590 = vmatprep.mubr.bf16.mxu0 %v1812_v33  ;;  %718 = vmatprep.mubr.bf16.mxu1 %v1848_v34 }
  0x61   :  { %591 = vmatmul.mubr.bf16.gmra.mrb[16].mxu0 %v1814_v35  ;;  %719 = vmatmul.mubr.bf16.gmra.mrb[16].mxu1 %v1850_v36 }
  0x62   :  { %598 = vmatprep.mubr.bf16.mxu0 %v1815_v37  ;;  %726 = vmatprep.mubr.bf16.mxu1 %v1854_v38 }
  0x69   :  { %599 = vmatmul.mubr.bf16.gmra.mrb[20].mxu0 %v1817_v39  ;;  %727 = vmatmul.mubr.bf16.gmra.mrb[20].mxu1 %v1856_v40 }
  0x6a   :  { %606 = vmatprep.mubr.bf16.mxu0 %v1818_v41  ;;  %734 = vmatprep.mubr.bf16.mxu1 %v1860_v42 }
  0x71   :  { %607 = vmatmul.mubr.bf16.gmra.mrb[24].mxu0 %v1820_v43  ;;  %735 = vmatmul.mubr.bf16.gmra.mrb[24].mxu1 %v1862_v44 }
  0x72   :  { %614 = vmatprep.mubr.bf16.mxu0 %v1821_v45  ;;  %742 = vmatprep.mubr.bf16.mxu1 %v1866_v46 }
  0x79   :  { %615 = vmatmul.mubr.bf16.gmra.mrb[28].mxu0 %v1823_v47  ;;  %743 = vmatmul.mubr.bf16.gmra.mrb[28].mxu1 %v1868_v48 }
  0x7a   :  { %622 = vmatprep.mubr.bf16.mxu0 %v1827_v49  ;;  %750 = vmatprep.mubr.bf16.mxu1 %v1872_v50 }
  0x81   :  { %623 = vmatmul.mubr.bf16.gmra.mrb[32].mxu0 %v1829_v51  ;;  %751 = vmatmul.mubr.bf16.gmra.mrb[32].mxu1 %v1874_v52 }
  0x82   :  { %630 = vmatprep.mubr.bf16.mxu0 %v1833_v53  ;;  %758 = vmatprep.mubr.bf16.mxu1 %v1875_v54 }
  0x89   :  { %631 = vmatmul.mubr.bf16.gmra.mrb[36].mxu0 %v1835_v55  ;;  %759 = vmatmul.mubr.bf16.gmra.mrb[36].mxu1 %v1877_v56 }
  0x8a   :  { %638 = vmatprep.mubr.bf16.mxu0 %v1839_v57  ;;  %766 = vmatprep.mubr.bf16.mxu1 %v1878_v58 }
  0x91   :  { %639 = vmatmul.mubr.bf16.gmra.mrb[40].mxu0 %v1841_v59  ;;  %767 = vmatmul.mubr.bf16.gmra.mrb[40].mxu1 %v1880_v60 }
  0x92   :  { %646 = vmatprep.mubr.bf16.mxu0 %v1845_v61  ;;  %774 = vmatprep.mubr.bf16.mxu1 %v1881_v62 }
  0x99   :  { %647 = vmatmul.mubr.bf16.gmra.mrb[44].mxu0 %v1847_v63  ;;  %775 = vmatmul.mubr.bf16.gmra.mrb[44].mxu1 %v1883_v0 }
  0x9a   :  { %654 = vmatprep.mubr.bf16.mxu0 %v1851_v1  ;;  %782 = vmatprep.mubr.bf16.mxu1 %v1884_v2 }
  0xa1   :  { %655 = vmatmul.mubr.bf16.gmra.mrb[48].mxu0 %v1853_v3  ;;  %783 = vmatmul.mubr.bf16.gmra.mrb[48].mxu1 %v1886_v4 }
  0xa2   :  { %662 = vmatprep.mubr.bf16.mxu0 %v1857_v5  ;;  %790 = vmatprep.mubr.bf16.mxu1 %v1887_v6 }
  0xa9   :  { %663 = vmatmul.mubr.bf16.gmra.mrb[52].mxu0 %v1859_v7  ;;  %791 = vmatmul.mubr.bf16.gmra.mrb[52].mxu1 %v1889_v8 }
  0xaa   :  { %670 = vmatprep.mubr.bf16.mxu0 %v1863_v9  ;;  %798 = vmatprep.mubr.bf16.mxu1 %v1890_v10 }
  0xb1   :  { %671 = vmatmul.mubr.bf16.gmra.mrb[56].mxu0 %v1865_v11  ;;  %799 = vmatmul.mubr.bf16.gmra.mrb[56].mxu1 %v1892_v12 }
  0xb2   :  { %678 = vmatprep.mubr.bf16.mxu0 %v1869_v13  ;;  %806 = vmatprep.mubr.bf16.mxu1 %v1893_v14 }
  0xb9   :  { %679 = vmatmul.mubr.bf16.gmra.mrb[60].mxu0 %v1871_v15  ;;  %807 = vmatmul.mubr.bf16.gmra.mrb[60].mxu1 %v1895_v16 }
 0x114   :  { %v560_v17 = vpop.f32.mrb[0].mxu0  ;;  %v2189_v18 = vpop.f32.mrb[0].mxu1 }
 0x115   :  { %v562_v19 = vpop.f32.mrb[1].mxu0  ;;  %v690_v20 = vpop.f32.mrb[1].mxu1  ;;  %v1204_v21 = vmul.f32 %v560_v17, %v560_v17 }
 0x116   :  { %v563_v22 = vpop.f32.mrb[2].mxu0  ;;  %v2191_v23 = vpop.f32.mrb[2].mxu1 }
 0x117   :  { %v1563_v24 = vpack.c.bf16 %v563_v22, %v560_v17  ;;  %v1135_v25 = vadd.f32 %v563_v22, %v560_v17  ;;  %v1205_v26 = vmul.f32 %v563_v22, %v563_v22  ;;  %v565_v27 = vpop.f32.mrb[3].mxu0  ;;  %v1643_v28 = vpack.c.bf16 %v2191_v23, %v2189_v18  ;;  %v693_v29 = vpop.f32.mrb[3].mxu1 }
 0x119   :  { %1564 = vst [vmem:[%s2482_s2] sm:$0xff] %v1563_v24   ;;  %v1268_v30 = vadd.f32 %v1205_v26, %v1204_v21  ;;  %1735 = vst [vmem:[%s2482_s2 + $0x80] sm:$0xff] %v1643_v28  }
 0x11c   :  { %v568_v31 = vpop.f32.mrb[4].mxu0  ;;  %v2201_v32 = vpop.f32.mrb[4].mxu1 }
 0x11d   :  { %v1136_v33 = vadd.f32 %v1135_v25, %v568_v31  ;;  %v1206_v34 = vmul.f32 %v568_v31, %v568_v31  ;;  %v570_v35 = vpop.f32.mrb[5].mxu0  ;;  %v698_v36 = vpop.f32.mrb[5].mxu1 }
 0x11e   :  { %v571_v37 = vpop.f32.mrb[6].mxu0  ;;  %v2203_v38 = vpop.f32.mrb[6].mxu1 }
 0x11f   :  { %v1269_v39 = vadd.f32 %v1268_v30, %v1206_v34  ;;  %v1568_v40 = vpack.c.bf16 %v571_v37, %v568_v31  ;;  %v1137_v41 = vadd.f32 %v1136_v33, %v571_v37  ;;  %v1207_v42 = vmul.f32 %v571_v37, %v571_v37  ;;  %v573_v43 = vpop.f32.mrb[7].mxu0  ;;  %v701_v44 = vpop.f32.mrb[7].mxu1 }
 0x120   :  { %v1648_v45 = vpack.c.bf16 %v2203_v38, %v2201_v32 }
 0x121   :  { %1720 = vst [vmem:[%s2482_s2 + $0x8] sm:$0xff] %v1568_v40   ;;  %v1270_v46 = vadd.f32 %v1269_v39, %v1207_v42 }
 0x122   :  { %1736 = vst [vmem:[%s2482_s2 + $0x88] sm:$0xff] %v1648_v45  }
 0x124   :  { %v576_v47 = vpop.f32.mrb[8].mxu0  ;;  %v2213_v48 = vpop.f32.mrb[8].mxu1 }
 0x125   :  { %v1138_v49 = vadd.f32 %v1137_v41, %v576_v47  ;;  %v1208_v50 = vmul.f32 %v576_v47, %v576_v47  ;;  %v578_v51 = vpop.f32.mrb[9].mxu0  ;;  %v706_v52 = vpop.f32.mrb[9].mxu1 }
 0x126   :  { %v579_v53 = vpop.f32.mrb[10].mxu0  ;;  %v2215_v54 = vpop.f32.mrb[10].mxu1 }
 0x127   :  { %v1271_v55 = vadd.f32 %v1270_v46, %v1208_v50  ;;  %v1573_v56 = vpack.c.bf16 %v579_v53, %v576_v47  ;;  %v1139_v57 = vadd.f32 %v1138_v49, %v579_v53  ;;  %v1209_v58 = vmul.f32 %v579_v53, %v579_v53  ;;  %v581_v59 = vpop.f32.mrb[11].mxu0  ;;  %v709_v60 = vpop.f32.mrb[11].mxu1 }
 0x128   :  { %v1653_v61 = vpack.c.bf16 %v2215_v54, %v2213_v48 }
 0x129   :  { %1721 = vst [vmem:[%s2482_s2 + $0x10] sm:$0xff] %v1573_v56   ;;  %v1272_v62 = vadd.f32 %v1271_v55, %v1209_v58 }
 0x12a   :  { %1737 = vst [vmem:[%s2482_s2 + $0x90] sm:$0xff] %v1653_v61  }
 0x12c   :  { %v584_v63 = vpop.f32.mrb[12].mxu0  ;;  %v2225_v0 = vpop.f32.mrb[12].mxu1 }
 0x12d   :  { %v1140_v1 = vadd.f32 %v1139_v57, %v584_v63  ;;  %v1210_v2 = vmul.f32 %v584_v63, %v584_v63  ;;  %v586_v3 = vpop.f32.mrb[13].mxu0  ;;  %v714_v4 = vpop.f32.mrb[13].mxu1 }
 0x12e   :  { %v587_v5 = vpop.f32.mrb[14].mxu0  ;;  %v2227_v6 = vpop.f32.mrb[14].mxu1 }
 0x12f   :  { %v1273_v7 = vadd.f32 %v1272_v62, %v1210_v2  ;;  %v1578_v8 = vpack.c.bf16 %v587_v5, %v584_v63  ;;  %v1141_v9 = vadd.f32 %v1140_v1, %v587_v5  ;;  %v1211_v10 = vmul.f32 %v587_v5, %v587_v5  ;;  %v589_v11 = vpop.f32.mrb[15].mxu0  ;;  %v717_v12 = vpop.f32.mrb[15].mxu1 }
 0x130   :  { %v1658_v13 = vpack.c.bf16 %v2227_v6, %v2225_v0 }
 0x131   :  { %1722 = vst [vmem:[%s2482_s2 + $0x18] sm:$0xff] %v1578_v8   ;;  %v1274_v14 = vadd.f32 %v1273_v7, %v1211_v10 }
 0x132   :  { %1738 = vst [vmem:[%s2482_s2 + $0x98] sm:$0xff] %v1658_v13  }
 0x134   :  { %v592_v15 = vpop.f32.mrb[16].mxu0  ;;  %v2237_v16 = vpop.f32.mrb[16].mxu1 }
 0x135   :  { %v1142_v17 = vadd.f32 %v1141_v9, %v592_v15  ;;  %v1212_v19 = vmul.f32 %v592_v15, %v592_v15  ;;  %v594_v20 = vpop.f32.mrb[17].mxu0  ;;  %v722_v21 = vpop.f32.mrb[17].mxu1 }
 0x136   :  { %v595_v22 = vpop.f32.mrb[18].mxu0  ;;  %v2239_v24 = vpop.f32.mrb[18].mxu1 }
 0x137   :  { %v1275_v25 = vadd.f32 %v1274_v14, %v1212_v19  ;;  %v1583_v26 = vpack.c.bf16 %v595_v22, %v592_v15  ;;  %v1143_v27 = vadd.f32 %v1142_v17, %v595_v22  ;;  %v1213_v28 = vmul.f32 %v595_v22, %v595_v22  ;;  %v597_v29 = vpop.f32.mrb[19].mxu0  ;;  %v725_v30 = vpop.f32.mrb[19].mxu1 }
 0x138   :  { %v1663_v31 = vpack.c.bf16 %v2239_v24, %v2237_v16 }
 0x139   :  { %1723 = vst [vmem:[%s2482_s2 + $0x20] sm:$0xff] %v1583_v26   ;;  %v1276_v33 = vadd.f32 %v1275_v25, %v1213_v28 }
 0x13a   :  { %1739 = vst [vmem:[%s2482_s2 + $0xa0] sm:$0xff] %v1663_v31  }
 0x13c   :  { %v600_v34 = vpop.f32.mrb[20].mxu0  ;;  %v2249_v35 = vpop.f32.mrb[20].mxu1 }
 0x13d   :  { %v1144_v36 = vadd.f32 %v1143_v27, %v600_v34  ;;  %v1214_v37 = vmul.f32 %v600_v34, %v600_v34  ;;  %v602_v39 = vpop.f32.mrb[21].mxu0  ;;  %v730_v40 = vpop.f32.mrb[21].mxu1 }
 0x13e   :  { %v603_v41 = vpop.f32.mrb[22].mxu0  ;;  %v2251_v42 = vpop.f32.mrb[22].mxu1 }
 0x13f   :  { %v1277_v43 = vadd.f32 %v1276_v33, %v1214_v37  ;;  %v1588_v44 = vpack.c.bf16 %v603_v41, %v600_v34  ;;  %v1145_v45 = vadd.f32 %v1144_v36, %v603_v41  ;;  %v1215_v46 = vmul.f32 %v603_v41, %v603_v41  ;;  %v605_v47 = vpop.f32.mrb[23].mxu0  ;;  %v733_v49 = vpop.f32.mrb[23].mxu1 }
 0x140   :  { %v1668_v50 = vpack.c.bf16 %v2251_v42, %v2249_v35 }
 0x141   :  { %1724 = vst [vmem:[%s2482_s2 + $0x28] sm:$0xff] %v1588_v44   ;;  %v1278_v51 = vadd.f32 %v1277_v43, %v1215_v46 }
 0x142   :  { %1740 = vst [vmem:[%s2482_s2 + $0xa8] sm:$0xff] %v1668_v50  }
 0x144   :  { %v608_v52 = vpop.f32.mrb[24].mxu0  ;;  %v2261_v53 = vpop.f32.mrb[24].mxu1 }
 0x145   :  { %v1146_v55 = vadd.f32 %v1145_v45, %v608_v52  ;;  %v1216_v56 = vmul.f32 %v608_v52, %v608_v52  ;;  %v610_v57 = vpop.f32.mrb[25].mxu0  ;;  %v738_v58 = vpop.f32.mrb[25].mxu1 }
 0x146   :  { %v611_v59 = vpop.f32.mrb[26].mxu0  ;;  %v2263_v60 = vpop.f32.mrb[26].mxu1 }
 0x147   :  { %v1279_v61 = vadd.f32 %v1278_v51, %v1216_v56  ;;  %v1593_v62 = vpack.c.bf16 %v611_v59, %v608_v52  ;;  %v1147_v63 = vadd.f32 %v1146_v55, %v611_v59  ;;  %v1217_v1 = vmul.f32 %v611_v59, %v611_v59  ;;  %v613_v2 = vpop.f32.mrb[27].mxu0  ;;  %v741_v3 = vpop.f32.mrb[27].mxu1 }
 0x148   :  { %v1673_v4 = vpack.c.bf16 %v2263_v60, %v2261_v53 }
 0x149   :  { %1725 = vst [vmem:[%s2482_s2 + $0x30] sm:$0xff] %v1593_v62   ;;  %v1280_v5 = vadd.f32 %v1279_v61, %v1217_v1 }
 0x14a   :  { %1741 = vst [vmem:[%s2482_s2 + $0xb0] sm:$0xff] %v1673_v4  }
 0x14c   :  { %v616_v7 = vpop.f32.mrb[28].mxu0  ;;  %v2273_v8 = vpop.f32.mrb[28].mxu1 }
 0x14d   :  { %v1148_v9 = vadd.f32 %v1147_v63, %v616_v7  ;;  %v1218_v10 = vmul.f32 %v616_v7, %v616_v7  ;;  %v618_v11 = vpop.f32.mrb[29].mxu0  ;;  %v746_v12 = vpop.f32.mrb[29].mxu1 }
 0x14e   :  { %v619_v13 = vpop.f32.mrb[30].mxu0  ;;  %v2275_v14 = vpop.f32.mrb[30].mxu1 }
 0x14f   :  { %v1281_v15 = vadd.f32 %v1280_v5, %v1218_v10  ;;  %v1598_v17 = vpack.c.bf16 %v619_v13, %v616_v7  ;;  %v1149_v19 = vadd.f32 %v1148_v9, %v619_v13  ;;  %v1219_v20 = vmul.f32 %v619_v13, %v619_v13  ;;  %v621_v21 = vpop.f32.mrb[31].mxu0  ;;  %v749_v22 = vpop.f32.mrb[31].mxu1 }
 0x150   :  { %v1678_v25 = vpack.c.bf16 %v2275_v14, %v2273_v8 }
 0x151   :  { %1726 = vst [vmem:[%s2482_s2 + $0x38] sm:$0xff] %v1598_v17   ;;  %v1282_v26 = vadd.f32 %v1281_v15, %v1219_v20 }
 0x152   :  { %1742 = vst [vmem:[%s2482_s2 + $0xb8] sm:$0xff] %v1678_v25  }
 0x154   :  { %v624_v27 = vpop.f32.mrb[32].mxu0  ;;  %v2285_v28 = vpop.f32.mrb[32].mxu1 }
 0x155   :  { %v1150_v29 = vadd.f32 %v1149_v19, %v624_v27  ;;  %v1220_v30 = vmul.f32 %v624_v27, %v624_v27  ;;  %v626_v31 = vpop.f32.mrb[33].mxu0  ;;  %v754_v33 = vpop.f32.mrb[33].mxu1 }
 0x156   :  { %v627_v34 = vpop.f32.mrb[34].mxu0  ;;  %v2287_v36 = vpop.f32.mrb[34].mxu1 }
 0x157   :  { %v1283_v37 = vadd.f32 %v1282_v26, %v1220_v30  ;;  %v1603_v39 = vpack.c.bf16 %v627_v34, %v624_v27  ;;  %v1151_v40 = vadd.f32 %v1150_v29, %v627_v34  ;;  %v1221_v41 = vmul.f32 %v627_v34, %v627_v34  ;;  %v629_v43 = vpop.f32.mrb[35].mxu0  ;;  %v757_v44 = vpop.f32.mrb[35].mxu1 }
 0x158   :  { %v1683_v45 = vpack.c.bf16 %v2287_v36, %v2285_v28 }
 0x159   :  { %1727 = vst [vmem:[%s2482_s2 + $0x40] sm:$0xff] %v1603_v39   ;;  %v1284_v46 = vadd.f32 %v1283_v37, %v1221_v41 }
 0x15a   :  { %1743 = vst [vmem:[%s2482_s2 + $0xc0] sm:$0xff] %v1683_v45  }
 0x15c   :  { %v632_v47 = vpop.f32.mrb[36].mxu0  ;;  %v2297_v49 = vpop.f32.mrb[36].mxu1 }
 0x15d   :  { %v1152_v50 = vadd.f32 %v1151_v40, %v632_v47  ;;  %v1222_v51 = vmul.f32 %v632_v47, %v632_v47  ;;  %v634_v52 = vpop.f32.mrb[37].mxu0  ;;  %v762_v55 = vpop.f32.mrb[37].mxu1 }
 0x15e   :  { %v635_v56 = vpop.f32.mrb[38].mxu0  ;;  %v2299_v57 = vpop.f32.mrb[38].mxu1 }
 0x15f   :  { %v1285_v58 = vadd.f32 %v1284_v46, %v1222_v51  ;;  %v1608_v59 = vpack.c.bf16 %v635_v56, %v632_v47  ;;  %v1153_v61 = vadd.f32 %v1152_v50, %v635_v56  ;;  %v1223_v62 = vmul.f32 %v635_v56, %v635_v56  ;;  %v637_v63 = vpop.f32.mrb[39].mxu0  ;;  %v765_v1 = vpop.f32.mrb[39].mxu1 }
 0x160   :  { %v1688_v2 = vpack.c.bf16 %v2299_v57, %v2297_v49 }
 0x161   :  { %1728 = vst [vmem:[%s2482_s2 + $0x48] sm:$0xff] %v1608_v59   ;;  %v1286_v3 = vadd.f32 %v1285_v58, %v1223_v62 }
 0x162   :  { %1744 = vst [vmem:[%s2482_s2 + $0xc8] sm:$0xff] %v1688_v2  }
 0x164   :  { %v640_v4 = vpop.f32.mrb[40].mxu0  ;;  %v2309_v5 = vpop.f32.mrb[40].mxu1 }
 0x165   :  { %v1154_v7 = vadd.f32 %v1153_v61, %v640_v4  ;;  %v1224_v9 = vmul.f32 %v640_v4, %v640_v4  ;;  %v642_v10 = vpop.f32.mrb[41].mxu0  ;;  %v770_v11 = vpop.f32.mrb[41].mxu1 }
 0x166   :  { %v643_v12 = vpop.f32.mrb[42].mxu0  ;;  %v2311_v13 = vpop.f32.mrb[42].mxu1 }
 0x167   :  { %v1287_v15 = vadd.f32 %v1286_v3, %v1224_v9  ;;  %v1613_v17 = vpack.c.bf16 %v643_v12, %v640_v4  ;;  %v1155_v19 = vadd.f32 %v1154_v7, %v643_v12  ;;  %v1225_v20 = vmul.f32 %v643_v12, %v643_v12  ;;  %v645_v21 = vpop.f32.mrb[43].mxu0  ;;  %v773_v22 = vpop.f32.mrb[43].mxu1 }
 0x168   :  { %v1693_v25 = vpack.c.bf16 %v2311_v13, %v2309_v5 }
 0x169   :  { %1729 = vst [vmem:[%s2482_s2 + $0x50] sm:$0xff] %v1613_v17   ;;  %v1288_v26 = vadd.f32 %v1287_v15, %v1225_v20 }
 0x16a   :  { %1745 = vst [vmem:[%s2482_s2 + $0xd0] sm:$0xff] %v1693_v25  }
 0x16c   :  { %v648_v27 = vpop.f32.mrb[44].mxu0  ;;  %v2321_v29 = vpop.f32.mrb[44].mxu1 }
 0x16d   :  { %v1156_v30 = vadd.f32 %v1155_v19, %v648_v27  ;;  %v1226_v31 = vmul.f32 %v648_v27, %v648_v27  ;;  %v650_v33 = vpop.f32.mrb[45].mxu0  ;;  %v778_v34 = vpop.f32.mrb[45].mxu1 }
 0x16e   :  { %v651_v37 = vpop.f32.mrb[46].mxu0  ;;  %v2323_v39 = vpop.f32.mrb[46].mxu1 }
 0x16f   :  { %v1289_v40 = vadd.f32 %v1288_v26, %v1226_v31  ;;  %v1618_v41 = vpack.c.bf16 %v651_v37, %v648_v27  ;;  %v1157_v43 = vadd.f32 %v1156_v30, %v651_v37  ;;  %v1227_v44 = vmul.f32 %v651_v37, %v651_v37  ;;  %v653_v45 = vpop.f32.mrb[47].mxu0  ;;  %v781_v46 = vpop.f32.mrb[47].mxu1 }
 0x170   :  { %v1698_v47 = vpack.c.bf16 %v2323_v39, %v2321_v29 }
 0x171   :  { %1730 = vst [vmem:[%s2482_s2 + $0x58] sm:$0xff] %v1618_v41   ;;  %v1290_v50 = vadd.f32 %v1289_v40, %v1227_v44 }
 0x172   :  { %1746 = vst [vmem:[%s2482_s2 + $0xd8] sm:$0xff] %v1698_v47  }
 0x174   :  { %v656_v51 = vpop.f32.mrb[48].mxu0  ;;  %v2333_v52 = vpop.f32.mrb[48].mxu1 }
 0x175   :  { %v1158_v55 = vadd.f32 %v1157_v43, %v656_v51  ;;  %v1228_v56 = vmul.f32 %v656_v51, %v656_v51  ;;  %v658_v58 = vpop.f32.mrb[49].mxu0  ;;  %v786_v59 = vpop.f32.mrb[49].mxu1 }
 0x176   :  { %v659_v61 = vpop.f32.mrb[50].mxu0  ;;  %v2335_v62 = vpop.f32.mrb[50].mxu1 }
 0x177   :  { %v1291_v63 = vadd.f32 %v1290_v50, %v1228_v56  ;;  %v1623_v1 = vpack.c.bf16 %v659_v61, %v656_v51  ;;  %v1159_v2 = vadd.f32 %v1158_v55, %v659_v61  ;;  %v1229_v3 = vmul.f32 %v659_v61, %v659_v61  ;;  %v661_v4 = vpop.f32.mrb[51].mxu0  ;;  %v789_v7 = vpop.f32.mrb[51].mxu1 }
 0x178   :  { %v1703_v9 = vpack.c.bf16 %v2335_v62, %v2333_v52 }
 0x179   :  { %1731 = vst [vmem:[%s2482_s2 + $0x60] sm:$0xff] %v1623_v1   ;;  %v1292_v10 = vadd.f32 %v1291_v63, %v1229_v3 }
 0x17a   :  { %1747 = vst [vmem:[%s2482_s2 + $0xe0] sm:$0xff] %v1703_v9  }
 0x17c   :  { %v664_v11 = vpop.f32.mrb[52].mxu0  ;;  %v2345_v12 = vpop.f32.mrb[52].mxu1 }
 0x17d   :  { %v1160_v15 = vadd.f32 %v1159_v2, %v664_v11  ;;  %v1230_v17 = vmul.f32 %v664_v11, %v664_v11  ;;  %v666_v19 = vpop.f32.mrb[53].mxu0  ;;  %v794_v20 = vpop.f32.mrb[53].mxu1 }
 0x17e   :  { %v667_v21 = vpop.f32.mrb[54].mxu0  ;;  %v2347_v22 = vpop.f32.mrb[54].mxu1 }
 0x17f   :  { %v1293_v25 = vadd.f32 %v1292_v10, %v1230_v17  ;;  %v1628_v26 = vpack.c.bf16 %v667_v21, %v664_v11  ;;  %v1161_v27 = vadd.f32 %v1160_v15, %v667_v21  ;;  %v1231_v30 = vmul.f32 %v667_v21, %v667_v21  ;;  %v669_v31 = vpop.f32.mrb[55].mxu0  ;;  %v797_v33 = vpop.f32.mrb[55].mxu1 }
 0x180   :  { %v1708_v34 = vpack.c.bf16 %v2347_v22, %v2345_v12 }
 0x181   :  { %1732 = vst [vmem:[%s2482_s2 + $0x68] sm:$0xff] %v1628_v26   ;;  %v1294_v37 = vadd.f32 %v1293_v25, %v1231_v30  ;;  %v1236_v30 = vmul.f32 %v2189_v18, %v2189_v18 }
 0x182   :  { %1748 = vst [vmem:[%s2482_s2 + $0xe8] sm:$0xff] %v1708_v34   ;;  %v1237_v34 = vmul.f32 %v2191_v23, %v2191_v23 }
 0x184   :  { %v672_v40 = vpop.f32.mrb[56].mxu0  ;;  %v2357_v41 = vpop.f32.mrb[56].mxu1 }
 0x185   :  { %v1162_v43 = vadd.f32 %v1161_v27, %v672_v40  ;;  %v1232_v44 = vmul.f32 %v672_v40, %v672_v40  ;;  %v674_v45 = vpop.f32.mrb[57].mxu0  ;;  %v802_v46 = vpop.f32.mrb[57].mxu1 }
 0x186   :  { %v675_v47 = vpop.f32.mrb[58].mxu0  ;;  %v2359_v50 = vpop.f32.mrb[58].mxu1 }
 0x187   :  { %v1295_v51 = vadd.f32 %v1294_v37, %v1232_v44  ;;  %v1633_v55 = vpack.c.bf16 %v675_v47, %v672_v40  ;;  %v1163_v56 = vadd.f32 %v1162_v43, %v675_v47  ;;  %v1233_v58 = vmul.f32 %v675_v47, %v675_v47  ;;  %v677_v59 = vpop.f32.mrb[59].mxu0  ;;  %v805_v61 = vpop.f32.mrb[59].mxu1 }
 0x188   :  { %v1713_v63 = vpack.c.bf16 %v2359_v50, %v2357_v41  ;;  %v1238_v43 = vmul.f32 %v2201_v32, %v2201_v32 }
 0x189   :  { %1733 = vst [vmem:[%s2482_s2 + $0x70] sm:$0xff] %v1633_v55   ;;  %v1296_v1 = vadd.f32 %v1295_v51, %v1233_v58  ;;  %v1240_v51 = vmul.f32 %v2213_v48, %v2213_v48 }
 0x18a   :  { %1749 = vst [vmem:[%s2482_s2 + $0xf0] sm:$0xff] %v1713_v63  }
 0x18c   :  { %v680_v2 = vpop.f32.mrb[60].mxu0  ;;  %v2369_v3 = vpop.f32.mrb[60].mxu1 }
 0x18d   :  { %v1164_v4 = vadd.f32 %v1163_v56, %v680_v2  ;;  %v1234_v7 = vmul.f32 %v680_v2, %v680_v2  ;;  %v682_v9 = vpop.f32.mrb[61].mxu0  ;;  %v810_v10 = vpop.f32.mrb[61].mxu1 }
 0x18e   :  { %v683_v11 = vpop.f32.mrb[62].mxu0  ;;  %v2371_v15 = vpop.f32.mrb[62].mxu1 }
 0x18f   :  { %v1297_v17 = vadd.f32 %v1296_v1, %v1234_v7  ;;  %v1638_v19 = vpack.c.bf16 %v683_v11, %v680_v2  ;;  %v1165_v20 = vadd.f32 %v1164_v4, %v683_v11  ;;  %v1235_v21 = vmul.f32 %v683_v11, %v683_v11  ;;  %v685_v25 = vpop.f32.mrb[63].mxu0  ;;  %v813_v26 = vpop.f32.mrb[63].mxu1 }
 0x190   :  { %v1718_v27 = vpack.c.bf16 %v2371_v15, %v2369_v3 }
 0x191   :  { %1734 = vst [vmem:[%s2482_s2 + $0x78] sm:$0xff] %v1638_v19   ;;  %v1166_v31 = vadd.f32 %v1165_v20, %v2189_v18  ;;  %v1298_v33 = vadd.f32 %v1297_v17, %v1235_v21  ;;  %v1239_v18 = vmul.f32 %v2203_v38, %v2203_v38 }
 0x192   :  { %1750 = vst [vmem:[%s2482_s2 + $0xf8] sm:$0xff] %v1718_v27  }
 0x193   :  { %v1167_v37 = vadd.f32 %v1166_v31, %v2191_v23  ;;  %v1299_v40 = vadd.f32 %v1298_v33, %v1236_v30  ;;  %v1241_v23 = vmul.f32 %v2215_v54, %v2215_v54 }
 0x195   :  { %v1168_v44 = vadd.f32 %v1167_v37, %v2201_v32  ;;  %v1300_v45 = vadd.f32 %v1299_v40, %v1237_v34  ;;  %v1242_v32 = vmul.f32 %v2225_v0, %v2225_v0  ;;  %v1252_v37 = vmul.f32 %v2285_v28, %v2285_v28 }
 0x197   :  { %v1169_v46 = vadd.f32 %v1168_v44, %v2203_v38  ;;  %v1301_v47 = vadd.f32 %v1300_v45, %v1238_v43  ;;  %v1243_v38 = vmul.f32 %v2227_v6, %v2227_v6  ;;  %v1253_v44 = vmul.f32 %v2287_v36, %v2287_v36 }
 0x199   :  { %v1170_v55 = vadd.f32 %v1169_v46, %v2213_v48  ;;  %v1302_v56 = vadd.f32 %v1301_v47, %v1239_v18  ;;  %v1244_v48 = vmul.f32 %v2237_v16, %v2237_v16  ;;  %v1254_v18 = vmul.f32 %v2297_v49, %v2297_v49 }
 0x19a   :  { %v1255_v47 = vmul.f32 %v2299_v57, %v2299_v57 }
 0x19b   :  { %v1171_v58 = vadd.f32 %v1170_v55, %v2215_v54  ;;  %v1303_v59 = vadd.f32 %v1302_v56, %v1240_v51  ;;  %v1245_v54 = vmul.f32 %v2239_v24, %v2239_v24  ;;  %v1256_v55 = vmul.f32 %v2309_v5, %v2309_v5 }
 0x19d   :  { %v1172_v61 = vadd.f32 %v1171_v58, %v2225_v0  ;;  %v1304_v63 = vadd.f32 %v1303_v59, %v1241_v23  ;;  %v1246_v0 = vmul.f32 %v2249_v35, %v2249_v35  ;;  %v1257_v23 = vmul.f32 %v2311_v13, %v2311_v13 }
 0x19e   :  { %v1258_v59 = vmul.f32 %v2321_v29, %v2321_v29 }
 0x19f   :  { %v1173_v1 = vadd.f32 %v1172_v61, %v2227_v6  ;;  %v1305_v2 = vadd.f32 %v1304_v63, %v1242_v32  ;;  %v1247_v6 = vmul.f32 %v2251_v42, %v2251_v42  ;;  %v1259_v61 = vmul.f32 %v2323_v39, %v2323_v39 }
 0x1a1   :  { %v1306_v4 = vadd.f32 %v1305_v2, %v1243_v38  ;;  %v1174_v7 = vadd.f32 %v1173_v1, %v2237_v16  ;;  %v1248_v16 = vmul.f32 %v2261_v53, %v2261_v53  ;;  %v1260_v38 = vmul.f32 %v2333_v52, %v2333_v52 }
 0x1a2   :  { %v1261_v2 = vmul.f32 %v2335_v62, %v2335_v62 }
 0x1a3   :  { %v1175_v9 = vadd.f32 %v1174_v7, %v2239_v24  ;;  %v1307_v10 = vadd.f32 %v1306_v4, %v1244_v48  ;;  %v1249_v24 = vmul.f32 %v2263_v60, %v2263_v60  ;;  %v1262_v4 = vmul.f32 %v2345_v12, %v2345_v12 }
 0x1a5   :  { %v1176_v11 = vadd.f32 %v1175_v9, %v2249_v35  ;;  %v1308_v17 = vadd.f32 %v1307_v10, %v1245_v54  ;;  %v1250_v35 = vmul.f32 %v2273_v8, %v2273_v8  ;;  %v1263_v54 = vmul.f32 %v2347_v22, %v2347_v22 }
 0x1a6   :  { %v1264_v10 = vmul.f32 %v2357_v41, %v2357_v41 }
 0x1a7   :  { %v1177_v19 = vadd.f32 %v1176_v11, %v2251_v42  ;;  %v1309_v20 = vadd.f32 %v1308_v17, %v1246_v0  ;;  %v1251_v42 = vmul.f32 %v2275_v14, %v2275_v14  ;;  %v1265_v11 = vmul.f32 %v2359_v50, %v2359_v50 }
 0x1a9   :  { %v1178_v21 = vadd.f32 %v1177_v19, %v2261_v53  ;;  %v1310_v25 = vadd.f32 %v1309_v20, %v1247_v6  ;;  %v1267_v20 = vmul.f32 %v2371_v15, %v2371_v15 }
 0x1ab   :  { %v1179_v26 = vadd.f32 %v1178_v21, %v2263_v60  ;;  %v1311_v27 = vadd.f32 %v1310_v25, %v1248_v16 }
 0x1ad   :  { %v1180_v30 = vadd.f32 %v1179_v26, %v2273_v8  ;;  %v1312_v31 = vadd.f32 %v1311_v27, %v1249_v24  ;;  %v1337_v24 = vlaneseq }
 0x1af   :  { %v1181_v33 = vadd.f32 %v1180_v30, %v2275_v14  ;;  %v1313_v34 = vadd.f32 %v1312_v31, %v1250_v35  ;;  %v1338_v30 = vshrl.u32 %v1337_v24, 7 }
 0x1b1   :  { %v1182_v53 = vadd.f32 %v1181_v33, %v2285_v28  ;;  %v1314_v40 = vadd.f32 %v1313_v34, %v1251_v42  ;;  %vm1340_vm0 = vcmp.eq.s32.totalorder %v1338_v30, 1  ;;  %vm1339_vm1 = vcmp.eq.s32.totalorder %v1338_v30, 0 }
 0x1b3   :  { %v1315_v60 = vadd.f32 %v1314_v40, %v1252_v37  ;;  %v1183_v43 = vadd.f32 %v1182_v53, %v2287_v36 }
 0x1b5   :  { %v1316_v8 = vadd.f32 %v1315_v60, %v1253_v44  ;;  %v1184_v45 = vadd.f32 %v1183_v43, %v2297_v49 }
 0x1b7   :  { %v1317_v14 = vadd.f32 %v1316_v8, %v1254_v18  ;;  %v1185_v46 = vadd.f32 %v1184_v45, %v2299_v57 }
 0x1b9   :  { %v1318_v28 = vadd.f32 %v1317_v14, %v1255_v47  ;;  %v1186_v51 = vadd.f32 %v1185_v46, %v2309_v5 }
 0x1bb   :  { %v1319_v56 = vadd.f32 %v1318_v28, %v1256_v55  ;;  %v1187_v36 = vadd.f32 %v1186_v51, %v2311_v13 }
 0x1bd   :  { %v1320_v58 = vadd.f32 %v1319_v56, %v1257_v23  ;;  %v1188_v49 = vadd.f32 %v1187_v36, %v2321_v29 }
 0x1bf   :  { %v1321_v32 = vadd.f32 %v1320_v58, %v1258_v59  ;;  %v1189_v57 = vadd.f32 %v1188_v49, %v2323_v39 }
 0x1c1   :  { %v1322_v63 = vadd.f32 %v1321_v32, %v1259_v61  ;;  %v1190_v5 = vadd.f32 %v1189_v57, %v2333_v52 }
 0x1c3   :  { %v1323_v1 = vadd.f32 %v1322_v63, %v1260_v38  ;;  %v1191_v13 = vadd.f32 %v1190_v5, %v2335_v62 }
 0x1c5   :  { %v1324_v48 = vadd.f32 %v1323_v1, %v1261_v2  ;;  %v1192_v29 = vadd.f32 %v1191_v13, %v2345_v12  ;;  %v1266_v12 = vmul.f32 %v2369_v3, %v2369_v3 }
 0x1c7   :  { %v1325_v7 = vadd.f32 %v1324_v48, %v1262_v4  ;;  %v1193_v39 = vadd.f32 %v1192_v29, %v2347_v22 }
 0x1c9   :  { %v1326_v9 = vadd.f32 %v1325_v7, %v1263_v54  ;;  %v1194_v52 = vadd.f32 %v1193_v39, %v2357_v41 }
 0x1cb   :  { %v1327_v0 = vadd.f32 %v1326_v9, %v1264_v10  ;;  %v1195_v62 = vadd.f32 %v1194_v52, %v2359_v50 }
 0x1cd   :  { %v1328_v17 = vadd.f32 %v1327_v0, %v1265_v11  ;;  %v1196_v6 = vadd.f32 %v1195_v62, %v2369_v3 }
 0x1cf   :  { %v1329_v19 = vadd.f32 %v1328_v17, %v1266_v12  ;;  %v1197_v22 = vadd.f32 %v1196_v6, %v2371_v15 }
 0x1d1   :  { %v1198_v16 = vrot.slane %v1197_v22, 4  ;;  %v1330_v41 = vadd.f32 %v1329_v19, %v1267_v20 }
 0x1d3   :  { %v1199_v21 = vadd.f32 %v1198_v16, %v1197_v22  ;;  %v1331_v25 = vrot.slane %v1330_v41, 4 }
 0x1d5   :  { %v1200_v26 = vrot.slane %v1199_v21, 2  ;;  %v1332_v27 = vadd.f32 %v1331_v25, %v1330_v41 }
 0x1d7   :  { %v1201_v50 = vadd.f32 %v1200_v26, %v1199_v21  ;;  %v1333_v35 = vrot.slane %v1332_v27, 2 }
 0x1d9   :  { %v1334_v31 = vadd.f32 %v1333_v35, %v1332_v27  ;;  %v1202_v42 = vrot.slane %v1201_v50, 1 }
 0x1db   :  { %v1335_v33 = vrot.slane %v1334_v31, 1  ;;  %v1203_v34 = vadd.f32 %v1202_v42, %v1201_v50 }
 0x1dd   :  { %v1336_v3 = vadd.f32 %v1335_v33, %v1334_v31 }
 0x1df   :  { %v1341_v53 = vsel %vm1340_vm0, %v1336_v3, 0.0 }
 0x1e0   :  { %v1342_v37 = vsel %vm1339_vm1, %v1203_v34, %v1341_v53 }
 0x1e1   :  { %1343 = vst [vmem:[%s2483_s3] sm:$0xff] %v1342_v37 }

// kernel: _lambda_.22
= control target key start
LH: loop header
LB: loop body
LE: loop exit
PB: predicated region body
PF: predicated region fallthrough
CT: control target
= control target key end

     0   :  { %s1502_s0 = inlined_call_operand.vmem [shape: bf16[512,128], index: 0, kind: input, shape index: {}]   ;;  %s1503_s1 = inlined_call_operand.vmem [shape: f32[1,128], index: 1, kind: input, shape index: {}]   ;;  %s1504_s2 = inlined_call_operand.vmem [shape: f32[1,128], index: 2, kind: input, shape index: {}]   ;;  %s1505_s3 = inlined_call_operand.vmem [shape: bf16[512,128], index: 3, kind: output, shape index: {}]  }
   0x1   :  { %v803_v0 = vld [vmem:[%s1502_s0] sm:$0xff]   ;;  %v1090_v4 = vld [vmem:[%s1502_s0 + $0x8] sm:$0xff]   ;;  %v1091_v5 = vld [vmem:[%s1502_s0 + $0x10] sm:$0xff]  }
   0x2   :  { %v1178_v1 = vld [vmem:[%s1503_s1] ss:$0 sm:$0xff]  ;;  %v804_v2 = vunpack.c.l.bf16 %v803_v0  ;;  %v805_v3 = vunpack.c.h.bf16 %v803_v0  ;;  %v1092_v6 = vld [vmem:[%s1502_s0 + $0x18] sm:$0xff]   ;;  %v808_v8 = vunpack.c.l.bf16 %v1090_v4  ;;  %v809_v9 = vunpack.c.h.bf16 %v1090_v4  ;;  %v1094_v33 = vld [vmem:[%s1502_s0 + $0x28] sm:$0xff]  }
   0x3   :  { %v1192_v7 = vld [vmem:[%s1504_s2] ss:$0 sm:$0xff]  ;;  %v812_v10 = vunpack.c.l.bf16 %v1091_v5  ;;  %v813_v11 = vunpack.c.h.bf16 %v1091_v5  ;;  %v816_v14 = vunpack.c.l.bf16 %v1092_v6  ;;  %v817_v15 = vunpack.c.h.bf16 %v1092_v6  ;;  %v1095_v38 = vld [vmem:[%s1502_s0 + $0x30] sm:$0xff]   ;;  %v1096_v43 = vld [vmem:[%s1502_s0 + $0x38] sm:$0xff]  }
   0x4   :  { %v149_v12 = vmul.f32 %v804_v2, %v1178_v1  ;;  %v150_v13 = vmul.f32 %v805_v3, %v1178_v1  ;;  %v151_v16 = vmul.f32 %v808_v8, %v1178_v1  ;;  %v152_v17 = vmul.f32 %v809_v9, %v1178_v1  ;;  %v1093_v28 = vld [vmem:[%s1502_s0 + $0x20] sm:$0xff]  }
   0x5   :  { %v153_v18 = vmul.f32 %v812_v10, %v1178_v1  ;;  %v154_v19 = vmul.f32 %v813_v11, %v1178_v1  ;;  %v155_v22 = vmul.f32 %v816_v14, %v1178_v1  ;;  %v156_v23 = vmul.f32 %v817_v15, %v1178_v1  ;;  %v1097_v0 = vld [vmem:[%s1502_s0 + $0x40] sm:$0xff]   ;;  %v1098_v11 = vld [vmem:[%s1502_s0 + $0x48] sm:$0xff]  }
   0x6   :  { %v220_v20 = vadd.f32 %v1192_v7, %v149_v12  ;;  %v221_v21 = vadd.f32 %v1192_v7, %v150_v13  ;;  %v222_v24 = vadd.f32 %v1192_v7, %v151_v16  ;;  %v223_v25 = vadd.f32 %v1192_v7, %v152_v17  ;;  %v1099_v16 = vld [vmem:[%s1502_s0 + $0x50] sm:$0xff]  }
   0x7   :  { %v224_v26 = vadd.f32 %v1192_v7, %v153_v18  ;;  %v225_v27 = vadd.f32 %v1192_v7, %v154_v19  ;;  %v226_v31 = vadd.f32 %v1192_v7, %v155_v22  ;;  %v227_v32 = vadd.f32 %v1192_v7, %v156_v23 }
   0x8   :  { %v284_v29 = vmax.f32 %v220_v20, 0.0  ;;  %v285_v30 = vmax.f32 %v221_v21, 0.0  ;;  %v286_v34 = vmax.f32 %v222_v24, 0.0  ;;  %v287_v35 = vmax.f32 %v223_v25, 0.0  ;;  %v1100_v25 = vld [vmem:[%s1502_s0 + $0x58] sm:$0xff]  }
   0x9   :  { %v288_v36 = vmax.f32 %v224_v26, 0.0  ;;  %v289_v37 = vmax.f32 %v225_v27, 0.0  ;;  %v290_v40 = vmax.f32 %v226_v31, 0.0  ;;  %v291_v41 = vmax.f32 %v227_v32, 0.0 }
   0xa   :  { %v933_v39 = vpack.c.bf16 %v285_v30, %v284_v29  ;;  %v820_v42 = vunpack.c.l.bf16 %v1093_v28  ;;  %v938_v44 = vpack.c.bf16 %v287_v35, %v286_v34  ;;  %v821_v46 = vunpack.c.h.bf16 %v1093_v28 }
   0xb   :  { %v943_v45 = vpack.c.bf16 %v289_v37, %v288_v36  ;;  %v824_v47 = vunpack.c.l.bf16 %v1094_v33  ;;  %v948_v48 = vpack.c.bf16 %v291_v41, %v290_v40  ;;  %v825_v50 = vunpack.c.h.bf16 %v1094_v33 }
   0xc   :  { %934 = vst [vmem:[%s1505_s3] sm:$0xff] %v933_v39   ;;  %v157_v49 = vmul.f32 %v820_v42, %v1178_v1  ;;  %v828_v51 = vunpack.c.l.bf16 %v1095_v38  ;;  %1121 = vst [vmem:[%s1505_s3 + $0x8] sm:$0xff] %v938_v44   ;;  %v158_v52 = vmul.f32 %v821_v46, %v1178_v1  ;;  %v829_v54 = vunpack.c.h.bf16 %v1095_v38  ;;  %v1101_v38 = vld [vmem:[%s1502_s0 + $0x60] sm:$0xff]  }
   0xd   :  { %1122 = vst [vmem:[%s1505_s3 + $0x10] sm:$0xff] %v943_v45   ;;  %v159_v53 = vmul.f32 %v824_v47, %v1178_v1  ;;  %v832_v55 = vunpack.c.l.bf16 %v1096_v43  ;;  %1123 = vst [vmem:[%s1505_s3 + $0x18] sm:$0xff] %v948_v48   ;;  %v160_v57 = vmul.f32 %v825_v50, %v1178_v1  ;;  %v833_v59 = vunpack.c.h.bf16 %v1096_v43 }
   0xe   :  { %v228_v56 = vadd.f32 %v1192_v7, %v157_v49  ;;  %v161_v58 = vmul.f32 %v828_v51, %v1178_v1  ;;  %v229_v60 = vadd.f32 %v1192_v7, %v158_v52  ;;  %v162_v62 = vmul.f32 %v829_v54, %v1178_v1  ;;  %v1102_v51 = vld [vmem:[%s1502_s0 + $0x68] sm:$0xff]  }
   0xf   :  { %v230_v61 = vadd.f32 %v1192_v7, %v159_v53  ;;  %v163_v63 = vmul.f32 %v832_v55, %v1178_v1  ;;  %v231_v3 = vadd.f32 %v1192_v7, %v160_v57  ;;  %v164_v5 = vmul.f32 %v833_v59, %v1178_v1 }
  0x10   :  { %v292_v2 = vmax.f32 %v228_v56, 0.0  ;;  %v232_v4 = vadd.f32 %v1192_v7, %v161_v58  ;;  %v293_v6 = vmax.f32 %v229_v60, 0.0  ;;  %v233_v9 = vadd.f32 %v1192_v7, %v162_v62  ;;  %v1103_v60 = vld [vmem:[%s1502_s0 + $0x70] sm:$0xff]  }
  0x11   :  { %v294_v8 = vmax.f32 %v230_v61, 0.0  ;;  %v234_v10 = vadd.f32 %v1192_v7, %v163_v63  ;;  %v295_v12 = vmax.f32 %v231_v3, 0.0  ;;  %v235_v14 = vadd.f32 %v1192_v7, %v164_v5 }
  0x12   :  { %v296_v13 = vmax.f32 %v232_v4, 0.0  ;;  %v836_v15 = vunpack.c.l.bf16 %v1097_v0  ;;  %v953_v17 = vpack.c.bf16 %v293_v6, %v292_v2  ;;  %v297_v18 = vmax.f32 %v233_v9, 0.0  ;;  %v1104_v2 = vld [vmem:[%s1502_s0 + $0x78] sm:$0xff]  }
  0x13   :  { %v298_v19 = vmax.f32 %v234_v10, 0.0  ;;  %v837_v20 = vunpack.c.h.bf16 %v1097_v0  ;;  %v958_v21 = vpack.c.bf16 %v295_v12, %v294_v8  ;;  %v299_v22 = vmax.f32 %v235_v14, 0.0  ;;  %v1105_v12 = vld [vmem:[%s1502_s0 + $0x80] sm:$0xff]  }
  0x14   :  { %v165_v23 = vmul.f32 %v836_v15, %v1178_v1  ;;  %v840_v24 = vunpack.c.l.bf16 %v1098_v11  ;;  %1124 = vst [vmem:[%s1505_s3 + $0x20] sm:$0xff] %v953_v17   ;;  %v963_v26 = vpack.c.bf16 %v297_v18, %v296_v13  ;;  %v841_v28 = vunpack.c.h.bf16 %v1098_v11 }
  0x15   :  { %v166_v27 = vmul.f32 %v837_v20, %v1178_v1  ;;  %v844_v29 = vunpack.c.l.bf16 %v1099_v16  ;;  %1125 = vst [vmem:[%s1505_s3 + $0x28] sm:$0xff] %v958_v21   ;;  %v968_v30 = vpack.c.bf16 %v299_v22, %v298_v19  ;;  %v845_v33 = vunpack.c.h.bf16 %v1099_v16 }
  0x16   :  { %v236_v31 = vadd.f32 %v1192_v7, %v165_v23  ;;  %v167_v32 = vmul.f32 %v840_v24, %v1178_v1  ;;  %1126 = vst [vmem:[%s1505_s3 + $0x30] sm:$0xff] %v963_v26   ;;  %v168_v35 = vmul.f32 %v841_v28, %v1178_v1  ;;  %v848_v37 = vunpack.c.l.bf16 %v1100_v25 }
  0x17   :  { %v237_v34 = vadd.f32 %v1192_v7, %v166_v27  ;;  %v169_v36 = vmul.f32 %v844_v29, %v1178_v1  ;;  %1127 = vst [vmem:[%s1505_s3 + $0x38] sm:$0xff] %v968_v30   ;;  %v170_v41 = vmul.f32 %v845_v33, %v1178_v1  ;;  %v849_v42 = vunpack.c.h.bf16 %v1100_v25  ;;  %v1106_v29 = vld [vmem:[%s1502_s0 + $0x88] sm:$0xff]  }
  0x18   :  { %v300_v39 = vmax.f32 %v236_v31, 0.0  ;;  %v238_v40 = vadd.f32 %v1192_v7, %v167_v32  ;;  %v239_v44 = vadd.f32 %v1192_v7, %v168_v35  ;;  %v171_v46 = vmul.f32 %v848_v37, %v1178_v1 }
  0x19   :  { %v301_v43 = vmax.f32 %v237_v34, 0.0  ;;  %v240_v45 = vadd.f32 %v1192_v7, %v169_v36  ;;  %v241_v48 = vadd.f32 %v1192_v7, %v170_v41  ;;  %v172_v49 = vmul.f32 %v849_v42, %v1178_v1  ;;  %v1107_v34 = vld [vmem:[%s1502_s0 + $0x90] sm:$0xff]  }
  0x1a   :  { %v302_v47 = vmax.f32 %v238_v40, 0.0  ;;  %v852_v50 = vunpack.c.l.bf16 %v1101_v38  ;;  %v303_v53 = vmax.f32 %v239_v44, 0.0  ;;  %v242_v55 = vadd.f32 %v1192_v7, %v171_v46 }
  0x1b   :  { %v973_v52 = vpack.c.bf16 %v301_v43, %v300_v39  ;;  %v304_v54 = vmax.f32 %v240_v45, 0.0  ;;  %v305_v56 = vmax.f32 %v241_v48, 0.0  ;;  %v243_v57 = vadd.f32 %v1192_v7, %v172_v49  ;;  %v1108_v43 = vld [vmem:[%s1502_s0 + $0x98] sm:$0xff]  }
  0x1c   :  { %v853_v58 = vunpack.c.h.bf16 %v1101_v38  ;;  %v173_v59 = vmul.f32 %v852_v50, %v1178_v1  ;;  %v978_v61 = vpack.c.bf16 %v303_v53, %v302_v47  ;;  %v306_v62 = vmax.f32 %v242_v55, 0.0 }
  0x1d   :  { %1128 = vst [vmem:[%s1505_s3 + $0x40] sm:$0xff] %v973_v52   ;;  %v856_v63 = vunpack.c.l.bf16 %v1102_v51  ;;  %v857_v0 = vunpack.c.h.bf16 %v1102_v51  ;;  %v983_v3 = vpack.c.bf16 %v305_v56, %v304_v54  ;;  %v307_v4 = vmax.f32 %v243_v57, 0.0  ;;  %v1109_v56 = vld [vmem:[%s1502_s0 + $0xa0] sm:$0xff]  }
  0x1e   :  { %v174_v5 = vmul.f32 %v853_v58, %v1178_v1  ;;  %v244_v6 = vadd.f32 %v1192_v7, %v173_v59  ;;  %1129 = vst [vmem:[%s1505_s3 + $0x48] sm:$0xff] %v978_v61   ;;  %v860_v10 = vunpack.c.l.bf16 %v1103_v60  ;;  %v861_v11 = vunpack.c.h.bf16 %v1103_v60 }
  0x1f   :  { %v175_v8 = vmul.f32 %v856_v63, %v1178_v1  ;;  %v176_v9 = vmul.f32 %v857_v0, %v1178_v1  ;;  %1130 = vst [vmem:[%s1505_s3 + $0x50] sm:$0xff] %v983_v3   ;;  %v988_v13 = vpack.c.bf16 %v307_v4, %v306_v62  ;;  %v864_v16 = vunpack.c.l.bf16 %v1104_v2 }
  0x20   :  { %v245_v14 = vadd.f32 %v1192_v7, %v174_v5  ;;  %v308_v15 = vmax.f32 %v244_v6, 0.0  ;;  %v177_v19 = vmul.f32 %v860_v10, %v1178_v1  ;;  %v178_v20 = vmul.f32 %v861_v11, %v1178_v1 }
  0x21   :  { %v246_v17 = vadd.f32 %v1192_v7, %v175_v8  ;;  %v247_v18 = vadd.f32 %v1192_v7, %v176_v9  ;;  %1131 = vst [vmem:[%s1505_s3 + $0x58] sm:$0xff] %v988_v13   ;;  %v865_v22 = vunpack.c.h.bf16 %v1104_v2  ;;  %v179_v23 = vmul.f32 %v864_v16, %v1178_v1  ;;  %v1110_v2 = vld [vmem:[%s1502_s0 + $0xa8] sm:$0xff]   ;;  %v1111_v16 = vld [vmem:[%s1502_s0 + $0xb0] sm:$0xff]  }
  0x22   :  { %v309_v21 = vmax.f32 %v245_v14, 0.0  ;;  %v868_v24 = vunpack.c.l.bf16 %v1105_v12  ;;  %v248_v27 = vadd.f32 %v1192_v7, %v177_v19  ;;  %v249_v28 = vadd.f32 %v1192_v7, %v178_v20 }
  0x23   :  { %v310_v25 = vmax.f32 %v246_v17, 0.0  ;;  %v311_v26 = vmax.f32 %v247_v18, 0.0  ;;  %v180_v31 = vmul.f32 %v865_v22, %v1178_v1  ;;  %v250_v32 = vadd.f32 %v1192_v7, %v179_v23 }
  0x24   :  { %v993_v30 = vpack.c.bf16 %v309_v21, %v308_v15  ;;  %v869_v33 = vunpack.c.h.bf16 %v1105_v12  ;;  %v312_v36 = vmax.f32 %v248_v27, 0.0  ;;  %v313_v37 = vmax.f32 %v249_v28, 0.0  ;;  %v1112_v21 = vld [vmem:[%s1502_s0 + $0xb8] sm:$0xff]  }
  0x25   :  { %v998_v35 = vpack.c.bf16 %v311_v26, %v310_v25  ;;  %v181_v38 = vmul.f32 %v868_v24, %v1178_v1  ;;  %v251_v39 = vadd.f32 %v1192_v7, %v180_v31  ;;  %v314_v40 = vmax.f32 %v250_v32, 0.0 }
  0x26   :  { %1132 = vst [vmem:[%s1505_s3 + $0x60] sm:$0xff] %v993_v30   ;;  %v182_v41 = vmul.f32 %v869_v33, %v1178_v1  ;;  %v872_v42 = vunpack.c.l.bf16 %v1106_v29  ;;  %v1003_v44 = vpack.c.bf16 %v313_v37, %v312_v36  ;;  %v873_v46 = vunpack.c.h.bf16 %v1106_v29 }
  0x27   :  { %1133 = vst [vmem:[%s1505_s3 + $0x68] sm:$0xff] %v998_v35   ;;  %v252_v45 = vadd.f32 %v1192_v7, %v181_v38  ;;  %v876_v47 = vunpack.c.l.bf16 %v1107_v34  ;;  %v315_v48 = vmax.f32 %v251_v39, 0.0  ;;  %v877_v51 = vunpack.c.h.bf16 %v1107_v34  ;;  %v1113_v34 = vld [vmem:[%s1502_s0 + $0xc0] sm:$0xff]  }
  0x28   :  { %v253_v49 = vadd.f32 %v1192_v7, %v182_v41  ;;  %v183_v50 = vmul.f32 %v872_v42, %v1178_v1  ;;  %1134 = vst [vmem:[%s1505_s3 + $0x70] sm:$0xff] %v1003_v44   ;;  %v184_v53 = vmul.f32 %v873_v46, %v1178_v1  ;;  %v880_v55 = vunpack.c.l.bf16 %v1108_v43 }
  0x29   :  { %v316_v52 = vmax.f32 %v252_v45, 0.0  ;;  %v185_v54 = vmul.f32 %v876_v47, %v1178_v1  ;;  %v1008_v57 = vpack.c.bf16 %v315_v48, %v314_v40  ;;  %v186_v60 = vmul.f32 %v877_v51, %v1178_v1  ;;  %v1114_v47 = vld [vmem:[%s1502_s0 + $0xc8] sm:$0xff]  }
  0x2a   :  { %v317_v58 = vmax.f32 %v253_v49, 0.0  ;;  %v254_v59 = vadd.f32 %v1192_v7, %v183_v50  ;;  %v255_v61 = vadd.f32 %v1192_v7, %v184_v53  ;;  %v881_v63 = vunpack.c.h.bf16 %v1108_v43 }
  0x2b   :  { %v256_v62 = vadd.f32 %v1192_v7, %v185_v54  ;;  %v187_v0 = vmul.f32 %v880_v55, %v1178_v1  ;;  %1135 = vst [vmem:[%s1505_s3 + $0x78] sm:$0xff] %v1008_v57   ;;  %v257_v5 = vadd.f32 %v1192_v7, %v186_v60  ;;  %v884_v6 = vunpack.c.l.bf16 %v1109_v56 }
  0x2c   :  { %v1013_v3 = vpack.c.bf16 %v317_v58, %v316_v52  ;;  %v318_v4 = vmax.f32 %v254_v59, 0.0  ;;  %v319_v8 = vmax.f32 %v255_v61, 0.0  ;;  %v188_v10 = vmul.f32 %v881_v63, %v1178_v1  ;;  %v1115_v52 = vld [vmem:[%s1502_s0 + $0xd0] sm:$0xff]   ;;  %v1116_v61 = vld [vmem:[%s1502_s0 + $0xd8] sm:$0xff]  }
  0x2d   :  { %v320_v9 = vmax.f32 %v256_v62, 0.0  ;;  %v258_v11 = vadd.f32 %v1192_v7, %v187_v0  ;;  %v321_v12 = vmax.f32 %v257_v5, 0.0  ;;  %v885_v13 = vunpack.c.h.bf16 %v1109_v56 }
  0x2e   :  { %1136 = vst [vmem:[%s1505_s3 + $0x80] sm:$0xff] %v1013_v3   ;;  %v189_v14 = vmul.f32 %v884_v6, %v1178_v1  ;;  %v888_v15 = vunpack.c.l.bf16 %v1110_v2  ;;  %v1018_v17 = vpack.c.bf16 %v319_v8, %v318_v4  ;;  %v259_v18 = vadd.f32 %v1192_v7, %v188_v10 }
  0x2f   :  { %v322_v19 = vmax.f32 %v258_v11, 0.0  ;;  %v889_v20 = vunpack.c.h.bf16 %v1110_v2  ;;  %v1023_v22 = vpack.c.bf16 %v321_v12, %v320_v9  ;;  %v190_v23 = vmul.f32 %v885_v13, %v1178_v1  ;;  %v1117_v12 = vld [vmem:[%s1502_s0 + $0xe0] sm:$0xff]  }
  0x30   :  { %v260_v24 = vadd.f32 %v1192_v7, %v189_v14  ;;  %v191_v25 = vmul.f32 %v888_v15, %v1178_v1  ;;  %1137 = vst [vmem:[%s1505_s3 + $0x88] sm:$0xff] %v1018_v17   ;;  %v323_v26 = vmax.f32 %v259_v18, 0.0  ;;  %v892_v28 = vunpack.c.l.bf16 %v1111_v16 }
  0x31   :  { %v192_v27 = vmul.f32 %v889_v20, %v1178_v1  ;;  %v893_v29 = vunpack.c.h.bf16 %v1111_v16  ;;  %1138 = vst [vmem:[%s1505_s3 + $0x90] sm:$0xff] %v1023_v22   ;;  %v261_v30 = vadd.f32 %v1192_v7, %v190_v23  ;;  %v896_v33 = vunpack.c.l.bf16 %v1112_v21 }
  0x32   :  { %v324_v31 = vmax.f32 %v260_v24, 0.0  ;;  %v262_v32 = vadd.f32 %v1192_v7, %v191_v25  ;;  %v1028_v35 = vpack.c.bf16 %v323_v26, %v322_v19  ;;  %v193_v37 = vmul.f32 %v892_v28, %v1178_v1 }
  0x33   :  { %v263_v36 = vadd.f32 %v1192_v7, %v192_v27  ;;  %v194_v38 = vmul.f32 %v893_v29, %v1178_v1  ;;  %v325_v39 = vmax.f32 %v261_v30, 0.0  ;;  %v897_v41 = vunpack.c.h.bf16 %v1112_v21  ;;  %v1118_v21 = vld [vmem:[%s1502_s0 + $0xe8] sm:$0xff]  }
  0x34   :  { %v326_v40 = vmax.f32 %v262_v32, 0.0  ;;  %v195_v42 = vmul.f32 %v896_v33, %v1178_v1  ;;  %1139 = vst [vmem:[%s1505_s3 + $0x98] sm:$0xff] %v1028_v35   ;;  %v264_v44 = vadd.f32 %v1192_v7, %v193_v37  ;;  %v900_v46 = vunpack.c.l.bf16 %v1113_v34 }
  0x35   :  { %v327_v43 = vmax.f32 %v263_v36, 0.0  ;;  %v265_v45 = vadd.f32 %v1192_v7, %v194_v38  ;;  %v1033_v48 = vpack.c.bf16 %v325_v39, %v324_v31  ;;  %v196_v49 = vmul.f32 %v897_v41, %v1178_v1  ;;  %v1120_v39 = vld [vmem:[%s1502_s0 + $0xf8] sm:$0xff]  }
  0x36   :  { %v266_v50 = vadd.f32 %v1192_v7, %v195_v42  ;;  %v901_v51 = vunpack.c.h.bf16 %v1113_v34  ;;  %v328_v54 = vmax.f32 %v264_v44, 0.0  ;;  %v197_v56 = vmul.f32 %v900_v46, %v1178_v1  ;;  %v1119_v34 = vld [vmem:[%s1502_s0 + $0xf0] sm:$0xff]  }
  0x37   :  { %v1038_v53 = vpack.c.bf16 %v327_v43, %v326_v40  ;;  %v329_v55 = vmax.f32 %v265_v45, 0.0  ;;  %1140 = vst [vmem:[%s1505_s3 + $0xa0] sm:$0xff] %v1033_v48   ;;  %v267_v57 = vadd.f32 %v1192_v7, %v196_v49  ;;  %v904_v60 = vunpack.c.l.bf16 %v1114_v47 }
  0x38   :  { %v330_v58 = vmax.f32 %v266_v50, 0.0  ;;  %v198_v59 = vmul.f32 %v901_v51, %v1178_v1  ;;  %v268_v63 = vadd.f32 %v1192_v7, %v197_v56  ;;  %v905_v0 = vunpack.c.h.bf16 %v1114_v47 }
  0x39   :  { %1141 = vst [vmem:[%s1505_s3 + $0xa8] sm:$0xff] %v1038_v53   ;;  %v1043_v62 = vpack.c.bf16 %v329_v55, %v328_v54  ;;  %v908_v2 = vunpack.c.l.bf16 %v1115_v52  ;;  %v331_v3 = vmax.f32 %v267_v57, 0.0  ;;  %v199_v5 = vmul.f32 %v904_v60, %v1178_v1 }
  0x3a   :  { %v269_v4 = vadd.f32 %v1192_v7, %v198_v59  ;;  %v909_v6 = vunpack.c.h.bf16 %v1115_v52  ;;  %v332_v8 = vmax.f32 %v268_v63, 0.0  ;;  %v200_v9 = vmul.f32 %v905_v0, %v1178_v1 }
  0x3b   :  { %1142 = vst [vmem:[%s1505_s3 + $0xb0] sm:$0xff] %v1043_v62   ;;  %v201_v10 = vmul.f32 %v908_v2, %v1178_v1  ;;  %v912_v11 = vunpack.c.l.bf16 %v1116_v61  ;;  %v1048_v13 = vpack.c.bf16 %v331_v3, %v330_v58  ;;  %v270_v15 = vadd.f32 %v1192_v7, %v199_v5 }
  0x3c   :  { %v333_v14 = vmax.f32 %v269_v4, 0.0  ;;  %v202_v16 = vmul.f32 %v909_v6, %v1178_v1  ;;  %v271_v17 = vadd.f32 %v1192_v7, %v200_v9  ;;  %v913_v19 = vunpack.c.h.bf16 %v1116_v61 }
  0x3d   :  { %v272_v18 = vadd.f32 %v1192_v7, %v201_v10  ;;  %v203_v20 = vmul.f32 %v912_v11, %v1178_v1  ;;  %1143 = vst [vmem:[%s1505_s3 + $0xb8] sm:$0xff] %v1048_v13   ;;  %v334_v23 = vmax.f32 %v270_v15, 0.0  ;;  %v916_v25 = vunpack.c.l.bf16 %v1117_v12 }
  0x3e   :  { %v1053_v22 = vpack.c.bf16 %v333_v14, %v332_v8  ;;  %v273_v24 = vadd.f32 %v1192_v7, %v202_v16  ;;  %v335_v26 = vmax.f32 %v271_v17, 0.0  ;;  %v204_v28 = vmul.f32 %v913_v19, %v1178_v1 }
  0x3f   :  { %v336_v27 = vmax.f32 %v272_v18, 0.0  ;;  %v274_v29 = vadd.f32 %v1192_v7, %v203_v20  ;;  %v917_v31 = vunpack.c.h.bf16 %v1117_v12  ;;  %v205_v32 = vmul.f32 %v916_v25, %v1178_v1 }
  0x40   :  { %1144 = vst [vmem:[%s1505_s3 + $0xc0] sm:$0xff] %v1053_v22   ;;  %v337_v30 = vmax.f32 %v273_v24, 0.0  ;;  %v920_v33 = vunpack.c.l.bf16 %v1118_v21  ;;  %v1058_v35 = vpack.c.bf16 %v335_v26, %v334_v23  ;;  %v275_v36 = vadd.f32 %v1192_v7, %v204_v28 }
  0x41   :  { %v338_v37 = vmax.f32 %v274_v29, 0.0  ;;  %v921_v38 = vunpack.c.h.bf16 %v1118_v21  ;;  %v206_v41 = vmul.f32 %v917_v31, %v1178_v1  ;;  %v276_v42 = vadd.f32 %v1192_v7, %v205_v32 }
  0x42   :  { %v1063_v40 = vpack.c.bf16 %v337_v30, %v336_v27  ;;  %v207_v43 = vmul.f32 %v920_v33, %v1178_v1  ;;  %1145 = vst [vmem:[%s1505_s3 + $0xc8] sm:$0xff] %v1058_v35   ;;  %v339_v44 = vmax.f32 %v275_v36, 0.0  ;;  %v924_v46 = vunpack.c.l.bf16 %v1119_v34 }
  0x43   :  { %v208_v45 = vmul.f32 %v921_v38, %v1178_v1  ;;  %v925_v47 = vunpack.c.h.bf16 %v1119_v34  ;;  %v277_v48 = vadd.f32 %v1192_v7, %v206_v41  ;;  %v340_v49 = vmax.f32 %v276_v42, 0.0 }
  0x44   :  { %1146 = vst [vmem:[%s1505_s3 + $0xd0] sm:$0xff] %v1063_v40   ;;  %v278_v50 = vadd.f32 %v1192_v7, %v207_v43  ;;  %v928_v51 = vunpack.c.l.bf16 %v1120_v39  ;;  %v1068_v52 = vpack.c.bf16 %v339_v44, %v338_v37  ;;  %v209_v54 = vmul.f32 %v924_v46, %v1178_v1 }
  0x45   :  { %v279_v53 = vadd.f32 %v1192_v7, %v208_v45  ;;  %v210_v55 = vmul.f32 %v925_v47, %v1178_v1  ;;  %v341_v56 = vmax.f32 %v277_v48, 0.0  ;;  %v929_v58 = vunpack.c.h.bf16 %v1120_v39 }
  0x46   :  { %v342_v57 = vmax.f32 %v278_v50, 0.0  ;;  %v211_v59 = vmul.f32 %v928_v51, %v1178_v1  ;;  %1147 = vst [vmem:[%s1505_s3 + $0xd8] sm:$0xff] %v1068_v52   ;;  %v280_v61 = vadd.f32 %v1192_v7, %v209_v54 }
  0x47   :  { %v343_v60 = vmax.f32 %v279_v53, 0.0  ;;  %v281_v62 = vadd.f32 %v1192_v7, %v210_v55  ;;  %v1073_v63 = vpack.c.bf16 %v341_v56, %v340_v49  ;;  %v212_v0 = vmul.f32 %v929_v58, %v1178_v1 }
  0x48   :  { %v282_v2 = vadd.f32 %v1192_v7, %v211_v59  ;;  %v344_v4 = vmax.f32 %v280_v61, 0.0 }
  0x49   :  { %v1078_v3 = vpack.c.bf16 %v343_v60, %v342_v57  ;;  %v345_v5 = vmax.f32 %v281_v62, 0.0  ;;  %1148 = vst [vmem:[%s1505_s3 + $0xe0] sm:$0xff] %v1073_v63   ;;  %v283_v6 = vadd.f32 %v1192_v7, %v212_v0 }
  0x4a   :  { %v346_v8 = vmax.f32 %v282_v2, 0.0 }
  0x4b   :  { %1149 = vst [vmem:[%s1505_s3 + $0xe8] sm:$0xff] %v1078_v3   ;;  %v1083_v9 = vpack.c.bf16 %v345_v5, %v344_v4  ;;  %v347_v10 = vmax.f32 %v283_v6, 0.0 }
  0x4d   :  { %1150 = vst [vmem:[%s1505_s3 + $0xf0] sm:$0xff] %v1083_v9   ;;  %v1088_v1 = vpack.c.bf16 %v347_v10, %v346_v8 }
  0x4f   :  { %1151 = vst [vmem:[%s1505_s3 + $0xf8] sm:$0xff] %v1088_v1  }

// kernel: _lambda_.24
= control target key start
LH: loop header
LB: loop body
LE: loop exit
PB: predicated region body
PF: predicated region fallthrough
CT: control target
= control target key end

     0   :  { %s222_s0 = inlined_call_operand.vmem [shape: bf16[64,128], index: 0, kind: input, shape index: {}]   ;;  %s223_s1 = inlined_call_operand.vmem [shape: f32[1,128], index: 1, kind: input, shape index: {}]   ;;  %s224_s2 = inlined_call_operand.vmem [shape: f32[1,128], index: 2, kind: input, shape index: {}]   ;;  %s225_s3 = inlined_call_operand.vmem [shape: bf16[64,128], index: 3, kind: output, shape index: {}]  }
   0x1   :  { %v131_v0 = vld [vmem:[%s222_s0] sm:$0xff]   ;;  %v166_v4 = vld [vmem:[%s222_s0 + $0x8] sm:$0xff]   ;;  %v167_v5 = vld [vmem:[%s222_s0 + $0x10] sm:$0xff]  }
   0x2   :  { %v112_v1 = vld [vmem:[%s223_s1] ss:$0 sm:$0xff]  ;;  %v132_v2 = vunpack.c.l.bf16 %v131_v0  ;;  %v133_v3 = vunpack.c.h.bf16 %v131_v0  ;;  %v168_v6 = vld [vmem:[%s222_s0 + $0x18] sm:$0xff]   ;;  %v136_v8 = vunpack.c.l.bf16 %v166_v4  ;;  %v137_v9 = vunpack.c.h.bf16 %v166_v4 }
   0x3   :  { %v113_v7 = vld [vmem:[%s224_s2] ss:$0 sm:$0xff]  ;;  %v140_v10 = vunpack.c.l.bf16 %v167_v5  ;;  %v141_v11 = vunpack.c.h.bf16 %v167_v5  ;;  %v144_v14 = vunpack.c.l.bf16 %v168_v6  ;;  %v145_v15 = vunpack.c.h.bf16 %v168_v6 }
   0x4   :  { %v37_v12 = vmul.f32 %v132_v2, %v112_v1  ;;  %v38_v13 = vmul.f32 %v133_v3, %v112_v1  ;;  %v39_v16 = vmul.f32 %v136_v8, %v112_v1  ;;  %v40_v17 = vmul.f32 %v137_v9, %v112_v1 }
   0x5   :  { %v41_v18 = vmul.f32 %v140_v10, %v112_v1  ;;  %v42_v19 = vmul.f32 %v141_v11, %v112_v1  ;;  %v43_v22 = vmul.f32 %v144_v14, %v112_v1  ;;  %v44_v23 = vmul.f32 %v145_v15, %v112_v1 }
   0x6   :  { %v52_v20 = vadd.f32 %v113_v7, %v37_v12  ;;  %v53_v21 = vadd.f32 %v113_v7, %v38_v13  ;;  %v54_v24 = vadd.f32 %v113_v7, %v39_v16  ;;  %v55_v25 = vadd.f32 %v113_v7, %v40_v17 }
   0x7   :  { %v56_v26 = vadd.f32 %v113_v7, %v41_v18  ;;  %v57_v27 = vadd.f32 %v113_v7, %v42_v19  ;;  %v58_v30 = vadd.f32 %v113_v7, %v43_v22  ;;  %v59_v31 = vadd.f32 %v113_v7, %v44_v23 }
   0x8   :  { %v60_v28 = vmax.f32 %v52_v20, 0.0  ;;  %v61_v29 = vmax.f32 %v53_v21, 0.0  ;;  %v62_v32 = vmax.f32 %v54_v24, 0.0  ;;  %v63_v33 = vmax.f32 %v55_v25, 0.0 }
   0x9   :  { %v64_v34 = vmax.f32 %v56_v26, 0.0  ;;  %v65_v35 = vmax.f32 %v57_v27, 0.0  ;;  %v66_v37 = vmax.f32 %v58_v30, 0.0  ;;  %v67_v38 = vmax.f32 %v59_v31, 0.0 }
   0xa   :  { %v149_v36 = vpack.c.bf16 %v61_v29, %v60_v28  ;;  %v154_v39 = vpack.c.bf16 %v63_v33, %v62_v32 }
   0xb   :  { %v159_v40 = vpack.c.bf16 %v65_v35, %v64_v34  ;;  %v164_v41 = vpack.c.bf16 %v67_v38, %v66_v37 }
   0xc   :  { %150 = vst [vmem:[%s225_s3] sm:$0xff] %v149_v36   ;;  %169 = vst [vmem:[%s225_s3 + $0x8] sm:$0xff] %v154_v39  }
   0xd   :  { %170 = vst [vmem:[%s225_s3 + $0x10] sm:$0xff] %v159_v40   ;;  %171 = vst [vmem:[%s225_s3 + $0x18] sm:$0xff] %v164_v41  }

// kernel: _lambda_.23
= control target key start
LH: loop header
LB: loop body
LE: loop exit
PB: predicated region body
PF: predicated region fallthrough
CT: control target
= control target key end

     0   :  { %s987_s1 = inlined_call_operand.vmem [shape: bf16[512,128], index: 1, kind: input, shape index: {}]   ;;  %s988_s0 = inlined_call_operand.vmem [shape: bf16[64,512], index: 0, kind: input, shape index: {}]   ;;  %s989_s2 = inlined_call_operand.vmem [shape: bf16[64,128], index: 2, kind: output, shape index: {0}]   ;;  %s990_s3 = inlined_call_operand.vmem [shape: f32[8,128], index: 3, kind: output, shape index: {1}]  }
   0x1   :  { %v752_v0 = vld [vmem:[%s987_s1 + $0x40] sm:$0xff]   ;;  %v756_v4 = vld [vmem:[%s987_s1 + $0x48] sm:$0xff]   ;;  %v760_v8 = vld [vmem:[%s987_s1 + $0x50] sm:$0xff]  }
   0x2   :  { %v753_v1 = vld [vmem:[%s987_s1 + $0xc0] sm:$0xff]   ;;  %672 = vmatprep.subr.bf16.mxu0 %v752_v0  ;;  %v757_v5 = vld [vmem:[%s987_s1 + $0xc8] sm:$0xff]   ;;  %v761_v9 = vld [vmem:[%s987_s1 + $0xd0] sm:$0xff]  }
   0x3   :  { %v754_v2 = vld [vmem:[%s987_s1] sm:$0xff]   ;;  %712 = vmatprep.subr.bf16.mxu1 %v753_v1  ;;  %v758_v6 = vld [vmem:[%s987_s1 + $0x8] sm:$0xff]   ;;  %v762_v10 = vld [vmem:[%s987_s1 + $0x10] sm:$0xff]  }
   0x4   :  { %v755_v3 = vld [vmem:[%s987_s1 + $0x80] sm:$0xff]   ;;  %673 = vmatpush3.bf16.msra.mxu0 %v754_v2  ;;  %v759_v7 = vld [vmem:[%s987_s1 + $0x88] sm:$0xff]   ;;  %v763_v11 = vld [vmem:[%s987_s1 + $0x90] sm:$0xff]  }
   0x5   :  { %713 = vmatpush3.bf16.msra.mxu1 %v755_v3  ;;  %674 = vmatprep.subr.bf16.mxu0 %v756_v4  ;;  %v764_v12 = vld [vmem:[%s987_s1 + $0x58] sm:$0xff]   ;;  %v768_v16 = vld [vmem:[%s987_s1 + $0x60] sm:$0xff]   ;;  %v772_v20 = vld [vmem:[%s987_s1 + $0x68] sm:$0xff]  }
   0x6   :  { %714 = vmatprep.subr.bf16.mxu1 %v757_v5  ;;  %v765_v13 = vld [vmem:[%s987_s1 + $0xd8] sm:$0xff]   ;;  %v769_v17 = vld [vmem:[%s987_s1 + $0xe0] sm:$0xff]   ;;  %v773_v21 = vld [vmem:[%s987_s1 + $0xe8] sm:$0xff]  }
   0x7   :  { %v766_v14 = vld [vmem:[%s987_s1 + $0x18] sm:$0xff]   ;;  %v770_v18 = vld [vmem:[%s987_s1 + $0x20] sm:$0xff]   ;;  %v774_v22 = vld [vmem:[%s987_s1 + $0x28] sm:$0xff]  }
   0x8   :  { %675 = vmatpush3.bf16.msra.mxu0 %v758_v6  ;;  %v767_v15 = vld [vmem:[%s987_s1 + $0x98] sm:$0xff]   ;;  %v771_v19 = vld [vmem:[%s987_s1 + $0xa0] sm:$0xff]   ;;  %v775_v23 = vld [vmem:[%s987_s1 + $0xa8] sm:$0xff]  }
   0x9   :  { %715 = vmatpush3.bf16.msra.mxu1 %v759_v7  ;;  %676 = vmatprep.subr.bf16.mxu0 %v760_v8  ;;  %v776_v24 = vld [vmem:[%s987_s1 + $0x70] sm:$0xff]   ;;  %v780_v28 = vld [vmem:[%s987_s1 + $0x78] sm:$0xff]  }
   0xa   :  { %716 = vmatprep.subr.bf16.mxu1 %v761_v9  ;;  %v777_v25 = vld [vmem:[%s987_s1 + $0xf0] sm:$0xff]   ;;  %v781_v29 = vld [vmem:[%s987_s1 + $0xf8] sm:$0xff]  }
   0xb   :  { %v778_v26 = vld [vmem:[%s987_s1 + $0x30] sm:$0xff]   ;;  %v782_v30 = vld [vmem:[%s987_s1 + $0x38] sm:$0xff]  }
   0xc   :  { %677 = vmatpush3.bf16.msra.mxu0 %v762_v10  ;;  %v779_v27 = vld [vmem:[%s987_s1 + $0xb0] sm:$0xff]   ;;  %v783_v31 = vld [vmem:[%s987_s1 + $0xb8] sm:$0xff]  }
   0xd   :  { %717 = vmatpush3.bf16.msra.mxu1 %v763_v11  ;;  %678 = vmatprep.subr.bf16.mxu0 %v764_v12  ;;  %v784_v32 = vld [vmem:[%s988_s0] ss:$16 sps:$4 sm:$0xff]   ;;  %v786_v33 = vld [vmem:[%s988_s0 + $0x4] ss:$16 sps:$4 sm:$0xff]   ;;  %v787_v34 = vld [vmem:[%s988_s0 + $0x8] ss:$16 sps:$4 sm:$0xff]  }
   0xe   :  { %718 = vmatprep.subr.bf16.mxu1 %v765_v13  ;;  %v789_v35 = vld [vmem:[%s988_s0 + $0xc] ss:$16 sps:$4 sm:$0xff]   ;;  %398 = vmatprep.mubr.bf16.mxu0 %v786_v33  ;;  %v790_v36 = vld [vmem:[%s988_s0 + $0x24] ss:$16 sps:$4 sm:$0xff]   ;;  %v794_v38 = vld [vmem:[%s988_s0 + $0x20] ss:$16 sps:$4 sm:$0xff]  }
   0xf   :  { %463 = vmatprep.mubr.bf16.mxu1 %v789_v35  ;;  %v792_v37 = vld [vmem:[%s988_s0 + $0x2c] ss:$16 sps:$4 sm:$0xff]   ;;  %v795_v39 = vld [vmem:[%s988_s0 + $0x28] ss:$16 sps:$4 sm:$0xff]   ;;  %v796_v40 = vld [vmem:[%s988_s0 + $0x44] ss:$16 sps:$4 sm:$0xff]  }
  0x10   :  { %679 = vmatpush3.bf16.msra.mxu0 %v766_v14  ;;  %v798_v41 = vld [vmem:[%s988_s0 + $0x4c] ss:$16 sps:$4 sm:$0xff]   ;;  %v800_v42 = vld [vmem:[%s988_s0 + $0x40] ss:$16 sps:$4 sm:$0xff]   ;;  %v801_v43 = vld [vmem:[%s988_s0 + $0x48] ss:$16 sps:$4 sm:$0xff]  }
  0x11   :  { %719 = vmatpush3.bf16.msra.mxu1 %v767_v15  ;;  %680 = vmatprep.subr.bf16.mxu0 %v768_v16  ;;  %v802_v44 = vld [vmem:[%s988_s0 + $0x64] ss:$16 sps:$4 sm:$0xff]   ;;  %v804_v45 = vld [vmem:[%s988_s0 + $0x6c] ss:$16 sps:$4 sm:$0xff]   ;;  %v806_v46 = vld [vmem:[%s988_s0 + $0x60] ss:$16 sps:$4 sm:$0xff]  }
  0x12   :  { %720 = vmatprep.subr.bf16.mxu1 %v769_v17  ;;  %v807_v47 = vld [vmem:[%s988_s0 + $0x68] ss:$16 sps:$4 sm:$0xff]  }
  0x14   :  { %681 = vmatpush3.bf16.msra.mxu0 %v770_v18 }
  0x15   :  { %721 = vmatpush3.bf16.msra.mxu1 %v771_v19  ;;  %682 = vmatprep.subr.bf16.mxu0 %v772_v20 }
  0x16   :  { %722 = vmatprep.subr.bf16.mxu1 %v773_v21 }
  0x18   :  { %683 = vmatpush3.bf16.msra.mxu0 %v774_v22 }
  0x19   :  { %723 = vmatpush3.bf16.msra.mxu1 %v775_v23  ;;  %684 = vmatprep.subr.bf16.mxu0 %v776_v24 }
  0x1a   :  { %724 = vmatprep.subr.bf16.mxu1 %v777_v25 }
  0x1c   :  { %685 = vmatpush3.bf16.msra.mxu0 %v778_v26 }
  0x1d   :  { %725 = vmatpush3.bf16.msra.mxu1 %v779_v27  ;;  %686 = vmatprep.subr.bf16.mxu0 %v780_v28 }
  0x1e   :  { %726 = vmatprep.subr.bf16.mxu1 %v781_v29 }
  0x20   :  { %687 = vmatpush3.bf16.msra.mxu0 %v782_v30 }
  0x21   :  { %727 = vmatpush3.bf16.msra.mxu1 %v783_v31 }
  0x23   :  { %399 = vmatmul.mubr.bf16.vlgmr.msra.gmra.mrb[0].mxu0 %v784_v32 }
  0x24   :  { %464 = vmatmul.mubr.bf16.vlgmr.msra.gmra.mrb[0].mxu1 %v787_v34  ;;  %406 = vmatprep.mubr.bf16.mxu0 %v790_v36 }
  0x25   :  { %471 = vmatprep.mubr.bf16.mxu1 %v792_v37 }
  0x2b   :  { %407 = vmatmul.mubr.bf16.gmra.mrb[4].mxu0 %v794_v38 }
  0x2c   :  { %472 = vmatmul.mubr.bf16.gmra.mrb[4].mxu1 %v795_v39  ;;  %414 = vmatprep.mubr.bf16.mxu0 %v796_v40 }
  0x2d   :  { %479 = vmatprep.mubr.bf16.mxu1 %v798_v41 }
  0x33   :  { %415 = vmatmul.mubr.bf16.gmra.mrb[8].mxu0 %v800_v42 }
  0x34   :  { %480 = vmatmul.mubr.bf16.gmra.mrb[8].mxu1 %v801_v43  ;;  %422 = vmatprep.mubr.bf16.mxu0 %v802_v44 }
  0x35   :  { %487 = vmatprep.mubr.bf16.mxu1 %v804_v45 }
  0x3b   :  { %423 = vmatmul.mubr.bf16.gmra.mrb[12].mxu0 %v806_v46 }
  0x3c   :  { %488 = vmatmul.mubr.bf16.gmra.mrb[12].mxu1 %v807_v47 }
  0xf6   :  { %v688_v48 = vpop.f32.mrb[0].mxu0 }
  0xf7   :  { %v728_v49 = vpop.f32.mrb[0].mxu1  ;;  %v689_v50 = vpop.f32.mrb[1].mxu0 }
  0xf8   :  { %v690_v51 = vadd.f32 %v689_v50, %v688_v48  ;;  %v729_v52 = vpop.f32.mrb[1].mxu1  ;;  %v691_v53 = vpop.f32.mrb[2].mxu0 }
  0xf9   :  { %v730_v54 = vadd.f32 %v729_v52, %v728_v49  ;;  %v731_v55 = vpop.f32.mrb[2].mxu1  ;;  %v692_v56 = vpop.f32.mrb[3].mxu0 }
  0xfa   :  { %v693_v57 = vadd.f32 %v692_v56, %v691_v53  ;;  %v732_v58 = vpop.f32.mrb[3].mxu1 }
  0xfb   :  { %v466_v59 = vadd.f32 %v730_v54, %v690_v51  ;;  %v733_v60 = vadd.f32 %v732_v58, %v731_v55 }
  0xfd   :  { %v469_v61 = vadd.f32 %v733_v60, %v693_v57  ;;  %v549_v63 = vmul.f32 %v466_v59, %v466_v59 }
  0xfe   :  { %v694_v62 = vpop.f32.mrb[4].mxu0 }
  0xff   :  { %v652_v0 = vpack.c.bf16 %v469_v61, %v466_v59  ;;  %v536_v1 = vadd.f32 %v469_v61, %v466_v59  ;;  %v550_v2 = vmul.f32 %v469_v61, %v469_v61  ;;  %v734_v3 = vpop.f32.mrb[4].mxu1  ;;  %v695_v4 = vpop.f32.mrb[5].mxu0 }
 0x100   :  { %v696_v5 = vadd.f32 %v695_v4, %v694_v62  ;;  %v735_v6 = vpop.f32.mrb[5].mxu1  ;;  %v697_v7 = vpop.f32.mrb[6].mxu0 }
 0x101   :  { %653 = vst [vmem:[%s989_s2] sm:$0xff] %v652_v0   ;;  %v557_v8 = vadd.f32 %v550_v2, %v549_v63  ;;  %v736_v9 = vadd.f32 %v735_v6, %v734_v3  ;;  %v737_v10 = vpop.f32.mrb[6].mxu1  ;;  %v698_v11 = vpop.f32.mrb[7].mxu0 }
 0x102   :  { %v699_v12 = vadd.f32 %v698_v11, %v697_v7  ;;  %v738_v13 = vpop.f32.mrb[7].mxu1 }
 0x103   :  { %v474_v14 = vadd.f32 %v736_v9, %v696_v5  ;;  %v739_v15 = vadd.f32 %v738_v13, %v737_v10  ;;  %v570_v5 = vlaneseq }
 0x105   :  { %v537_v16 = vadd.f32 %v536_v1, %v474_v14  ;;  %v551_v17 = vmul.f32 %v474_v14, %v474_v14  ;;  %v477_v18 = vadd.f32 %v739_v15, %v699_v12  ;;  %v571_v10 = vshrl.u32 %v570_v5, 7 }
 0x106   :  { %v700_v19 = vpop.f32.mrb[8].mxu0 }
 0x107   :  { %v558_v20 = vadd.f32 %v557_v8, %v551_v17  ;;  %v657_v21 = vpack.c.bf16 %v477_v18, %v474_v14  ;;  %v538_v22 = vadd.f32 %v537_v16, %v477_v18  ;;  %v552_v23 = vmul.f32 %v477_v18, %v477_v18  ;;  %v740_v24 = vpop.f32.mrb[8].mxu1  ;;  %v701_v25 = vpop.f32.mrb[9].mxu0 }
 0x108   :  { %v702_v26 = vadd.f32 %v701_v25, %v700_v19  ;;  %v741_v27 = vpop.f32.mrb[9].mxu1  ;;  %v703_v28 = vpop.f32.mrb[10].mxu0  ;;  %vm573_vm0 = vcmp.eq.s32.totalorder %v571_v10, 1  ;;  %vm572_vm1 = vcmp.eq.s32.totalorder %v571_v10, 0 }
 0x109   :  { %669 = vst [vmem:[%s989_s2 + $0x8] sm:$0xff] %v657_v21   ;;  %v559_v29 = vadd.f32 %v558_v20, %v552_v23  ;;  %v742_v30 = vadd.f32 %v741_v27, %v740_v24  ;;  %v743_v31 = vpop.f32.mrb[10].mxu1  ;;  %v704_v32 = vpop.f32.mrb[11].mxu0 }
 0x10a   :  { %v705_v33 = vadd.f32 %v704_v32, %v703_v28  ;;  %v744_v34 = vpop.f32.mrb[11].mxu1 }
 0x10b   :  { %v482_v35 = vadd.f32 %v742_v30, %v702_v26  ;;  %v745_v36 = vadd.f32 %v744_v34, %v743_v31 }
 0x10d   :  { %v539_v37 = vadd.f32 %v538_v22, %v482_v35  ;;  %v553_v38 = vmul.f32 %v482_v35, %v482_v35  ;;  %v485_v39 = vadd.f32 %v745_v36, %v705_v33 }
 0x10e   :  { %v706_v40 = vpop.f32.mrb[12].mxu0 }
 0x10f   :  { %v560_v41 = vadd.f32 %v559_v29, %v553_v38  ;;  %v662_v42 = vpack.c.bf16 %v485_v39, %v482_v35  ;;  %v540_v43 = vadd.f32 %v539_v37, %v485_v39  ;;  %v554_v44 = vmul.f32 %v485_v39, %v485_v39  ;;  %v746_v45 = vpop.f32.mrb[12].mxu1  ;;  %v707_v46 = vpop.f32.mrb[13].mxu0 }
 0x110   :  { %v708_v47 = vadd.f32 %v707_v46, %v706_v40  ;;  %v747_v48 = vpop.f32.mrb[13].mxu1  ;;  %v709_v49 = vpop.f32.mrb[14].mxu0 }
 0x111   :  { %670 = vst [vmem:[%s989_s2 + $0x10] sm:$0xff] %v662_v42   ;;  %v561_v50 = vadd.f32 %v560_v41, %v554_v44  ;;  %v748_v51 = vadd.f32 %v747_v48, %v746_v45  ;;  %v749_v52 = vpop.f32.mrb[14].mxu1  ;;  %v710_v53 = vpop.f32.mrb[15].mxu0 }
 0x112   :  { %v711_v54 = vadd.f32 %v710_v53, %v709_v49  ;;  %v750_v55 = vpop.f32.mrb[15].mxu1 }
 0x113   :  { %v490_v56 = vadd.f32 %v748_v51, %v708_v47  ;;  %v751_v57 = vadd.f32 %v750_v55, %v749_v52 }
 0x115   :  { %v541_v58 = vadd.f32 %v540_v43, %v490_v56  ;;  %v555_v59 = vmul.f32 %v490_v56, %v490_v56  ;;  %v493_v60 = vadd.f32 %v751_v57, %v711_v54 }
 0x117   :  { %v562_v61 = vadd.f32 %v561_v50, %v555_v59  ;;  %v667_v62 = vpack.c.bf16 %v493_v60, %v490_v56  ;;  %v542_v63 = vadd.f32 %v541_v58, %v493_v60  ;;  %v556_v0 = vmul.f32 %v493_v60, %v493_v60 }
 0x119   :  { %671 = vst [vmem:[%s989_s2 + $0x18] sm:$0xff] %v667_v62   ;;  %v543_v1 = vrot.slane %v542_v63, 4  ;;  %v563_v2 = vadd.f32 %v562_v61, %v556_v0 }
 0x11b   :  { %v544_v3 = vadd.f32 %v543_v1, %v542_v63  ;;  %v564_v4 = vrot.slane %v563_v2, 4 }
 0x11d   :  { %v545_v6 = vrot.slane %v544_v3, 2  ;;  %v565_v7 = vadd.f32 %v564_v4, %v563_v2 }
 0x11f   :  { %v546_v8 = vadd.f32 %v545_v6, %v544_v3  ;;  %v566_v9 = vrot.slane %v565_v7, 2 }
 0x121   :  { %v567_v11 = vadd.f32 %v566_v9, %v565_v7  ;;  %v547_v12 = vrot.slane %v546_v8, 1 }
 0x123   :  { %v568_v13 = vrot.slane %v567_v11, 1  ;;  %v548_v15 = vadd.f32 %v547_v12, %v546_v8 }
 0x125   :  { %v569_v14 = vadd.f32 %v568_v13, %v567_v11 }
 0x127   :  { %v574_v16 = vsel %vm573_vm0, %v569_v14, 0.0 }
 0x128   :  { %v575_v17 = vsel %vm572_vm1, %v548_v15, %v574_v16 }
 0x129   :  { %576 = vst [vmem:[%s990_s3] sm:$0xff] %v575_v17 }

// kernel: _lambda_.28
= control target key start
LH: loop header
LB: loop body
LE: loop exit
PB: predicated region body
PF: predicated region fallthrough
CT: control target
= control target key end

     0   :  { %s277_s0 = inlined_call_operand.vmem [shape: bf16[64,128], index: 0, kind: input, shape index: {}]   ;;  %s278_s1 = inlined_call_operand.vmem [shape: f32[1,128], index: 1, kind: input, shape index: {}]   ;;  %s279_s2 = inlined_call_operand.vmem [shape: f32[1,128], index: 2, kind: input, shape index: {}]   ;;  %s280_s3 = inlined_call_operand.vmem [shape: bf16[64,128], index: 3, kind: input, shape index: {}]   ;;  %s281_s4 = inlined_call_operand.vmem [shape: bf16[64,128], index: 4, kind: output, shape index: {}]  }
   0x1   :  { %v150_v0 = vld [vmem:[%s277_s0] sm:$0xff]   ;;  %v201_v5 = vld [vmem:[%s277_s0 + $0x8] sm:$0xff]   ;;  %v202_v12 = vld [vmem:[%s277_s0 + $0x10] sm:$0xff]  }
   0x2   :  { %v131_v1 = vld [vmem:[%s278_s1] ss:$0 sm:$0xff]  ;;  %v151_v2 = vunpack.c.l.bf16 %v150_v0  ;;  %v152_v3 = vunpack.c.h.bf16 %v150_v0  ;;  %v204_v6 = vld [vmem:[%s280_s3 + $0x8] sm:$0xff]   ;;  %v155_v10 = vunpack.c.l.bf16 %v201_v5  ;;  %v156_v11 = vunpack.c.h.bf16 %v201_v5  ;;  %v205_v13 = vld [vmem:[%s280_s3 + $0x10] sm:$0xff]  }
   0x3   :  { %v166_v4 = vld [vmem:[%s280_s3] sm:$0xff]   ;;  %v171_v16 = vunpack.c.l.bf16 %v204_v6  ;;  %v172_v17 = vunpack.c.h.bf16 %v204_v6  ;;  %v159_v20 = vunpack.c.l.bf16 %v202_v12  ;;  %v160_v21 = vunpack.c.h.bf16 %v202_v12  ;;  %v203_v22 = vld [vmem:[%s277_s0 + $0x18] sm:$0xff]  }
   0x4   :  { %v132_v7 = vld [vmem:[%s279_s2] ss:$0 sm:$0xff]  ;;  %v167_v8 = vunpack.c.l.bf16 %v166_v4  ;;  %v168_v9 = vunpack.c.h.bf16 %v166_v4  ;;  %v40_v14 = vmul.f32 %v151_v2, %v131_v1  ;;  %v41_v15 = vmul.f32 %v152_v3, %v131_v1  ;;  %v206_v31 = vld [vmem:[%s280_s3 + $0x18] sm:$0xff]  }
   0x5   :  { %v42_v18 = vmul.f32 %v155_v10, %v131_v1  ;;  %v43_v19 = vmul.f32 %v156_v11, %v131_v1  ;;  %v175_v25 = vunpack.c.l.bf16 %v205_v13  ;;  %v176_v26 = vunpack.c.h.bf16 %v205_v13 }
   0x6   :  { %v55_v23 = vadd.f32 %v132_v7, %v40_v14  ;;  %v56_v24 = vadd.f32 %v132_v7, %v41_v15  ;;  %v44_v29 = vmul.f32 %v159_v20, %v131_v1  ;;  %v45_v30 = vmul.f32 %v160_v21, %v131_v1 }
   0x7   :  { %v57_v27 = vadd.f32 %v132_v7, %v42_v18  ;;  %v58_v28 = vadd.f32 %v132_v7, %v43_v19  ;;  %v163_v34 = vunpack.c.l.bf16 %v203_v22  ;;  %v164_v35 = vunpack.c.h.bf16 %v203_v22 }
   0x8   :  { %v79_v32 = vadd.f32 %v167_v8, %v55_v23  ;;  %v80_v33 = vadd.f32 %v168_v9, %v56_v24  ;;  %v59_v38 = vadd.f32 %v132_v7, %v44_v29  ;;  %v60_v39 = vadd.f32 %v132_v7, %v45_v30 }
   0x9   :  { %v81_v36 = vadd.f32 %v171_v16, %v57_v27  ;;  %v82_v37 = vadd.f32 %v172_v17, %v58_v28  ;;  %v46_v41 = vmul.f32 %v163_v34, %v131_v1  ;;  %v47_v42 = vmul.f32 %v164_v35, %v131_v1 }
   0xa   :  { %v184_v40 = vpack.c.bf16 %v80_v33, %v79_v32  ;;  %v179_v43 = vunpack.c.l.bf16 %v206_v31  ;;  %v83_v45 = vadd.f32 %v175_v25, %v59_v38  ;;  %v84_v46 = vadd.f32 %v176_v26, %v60_v39 }
   0xb   :  { %v189_v44 = vpack.c.bf16 %v82_v37, %v81_v36  ;;  %v180_v47 = vunpack.c.h.bf16 %v206_v31  ;;  %v61_v48 = vadd.f32 %v132_v7, %v46_v41  ;;  %v62_v49 = vadd.f32 %v132_v7, %v47_v42 }
   0xc   :  { %185 = vst [vmem:[%s281_s4] sm:$0xff] %v184_v40   ;;  %v194_v50 = vpack.c.bf16 %v84_v46, %v83_v45 }
   0xd   :  { %207 = vst [vmem:[%s281_s4 + $0x8] sm:$0xff] %v189_v44   ;;  %v85_v51 = vadd.f32 %v179_v43, %v61_v48  ;;  %v86_v52 = vadd.f32 %v180_v47, %v62_v49 }
   0xe   :  { %208 = vst [vmem:[%s281_s4 + $0x10] sm:$0xff] %v194_v50  }
   0xf   :  { %v199_v53 = vpack.c.bf16 %v86_v52, %v85_v51 }
  0x11   :  { %209 = vst [vmem:[%s281_s4 + $0x18] sm:$0xff] %v199_v53  }

// kernel: _lambda_.25
= control target key start
LH: loop header
LB: loop body
LE: loop exit
PB: predicated region body
PF: predicated region fallthrough
CT: control target
= control target key end

     0   :  { %s1661_s1 = inlined_call_operand.vmem [shape: bf16[896,128], index: 1, kind: input, shape index: {}]   ;;  %s1662_s0 = inlined_call_operand.vmem [shape: bf16[64,896], index: 0, kind: input, shape index: {}]   ;;  %s1663_s2 = inlined_call_operand.vmem [shape: bf16[64,128], index: 2, kind: output, shape index: {0}]   ;;  %s1664_s3 = inlined_call_operand.vmem [shape: f32[8,128], index: 3, kind: output, shape index: {1}]  }
   0x1   :  { %v1266_v0 = vld [vmem:[%s1661_s1 + $0x40] sm:$0xff]   ;;  %v1270_v4 = vld [vmem:[%s1661_s1 + $0x48] sm:$0xff]   ;;  %v1274_v8 = vld [vmem:[%s1661_s1 + $0x50] sm:$0xff]  }
   0x2   :  { %v1267_v1 = vld [vmem:[%s1661_s1 + $0xc0] sm:$0xff]   ;;  %1110 = vmatprep.subr.bf16.mxu0 %v1266_v0  ;;  %v1271_v5 = vld [vmem:[%s1661_s1 + $0xc8] sm:$0xff]   ;;  %v1275_v9 = vld [vmem:[%s1661_s1 + $0xd0] sm:$0xff]  }
   0x3   :  { %v1268_v2 = vld [vmem:[%s1661_s1] sm:$0xff]   ;;  %1150 = vmatprep.subr.bf16.mxu1 %v1267_v1  ;;  %v1272_v6 = vld [vmem:[%s1661_s1 + $0x8] sm:$0xff]   ;;  %v1276_v10 = vld [vmem:[%s1661_s1 + $0x10] sm:$0xff]  }
   0x4   :  { %v1269_v3 = vld [vmem:[%s1661_s1 + $0x80] sm:$0xff]   ;;  %1111 = vmatpush3.bf16.msra.mxu0 %v1268_v2  ;;  %v1273_v7 = vld [vmem:[%s1661_s1 + $0x88] sm:$0xff]   ;;  %v1277_v11 = vld [vmem:[%s1661_s1 + $0x90] sm:$0xff]  }
   0x5   :  { %1151 = vmatpush3.bf16.msra.mxu1 %v1269_v3  ;;  %1112 = vmatprep.subr.bf16.mxu0 %v1270_v4  ;;  %v1278_v12 = vld [vmem:[%s1661_s1 + $0x58] sm:$0xff]   ;;  %v1282_v16 = vld [vmem:[%s1661_s1 + $0x60] sm:$0xff]   ;;  %v1286_v20 = vld [vmem:[%s1661_s1 + $0x68] sm:$0xff]  }
   0x6   :  { %1152 = vmatprep.subr.bf16.mxu1 %v1271_v5  ;;  %v1279_v13 = vld [vmem:[%s1661_s1 + $0xd8] sm:$0xff]   ;;  %v1283_v17 = vld [vmem:[%s1661_s1 + $0xe0] sm:$0xff]   ;;  %v1287_v21 = vld [vmem:[%s1661_s1 + $0xe8] sm:$0xff]  }
   0x7   :  { %v1280_v14 = vld [vmem:[%s1661_s1 + $0x18] sm:$0xff]   ;;  %v1284_v18 = vld [vmem:[%s1661_s1 + $0x20] sm:$0xff]   ;;  %v1288_v22 = vld [vmem:[%s1661_s1 + $0x28] sm:$0xff]  }
   0x8   :  { %1113 = vmatpush3.bf16.msra.mxu0 %v1272_v6  ;;  %v1281_v15 = vld [vmem:[%s1661_s1 + $0x98] sm:$0xff]   ;;  %v1285_v19 = vld [vmem:[%s1661_s1 + $0xa0] sm:$0xff]   ;;  %v1289_v23 = vld [vmem:[%s1661_s1 + $0xa8] sm:$0xff]  }
   0x9   :  { %1153 = vmatpush3.bf16.msra.mxu1 %v1273_v7  ;;  %1114 = vmatprep.subr.bf16.mxu0 %v1274_v8  ;;  %v1290_v24 = vld [vmem:[%s1661_s1 + $0x70] sm:$0xff]   ;;  %v1294_v28 = vld [vmem:[%s1661_s1 + $0x78] sm:$0xff]   ;;  %v1300_v33 = vld [vmem:[%s1662_s0 + $0x4] ss:$28 sps:$4 sm:$0xff]  }
   0xa   :  { %1154 = vmatprep.subr.bf16.mxu1 %v1275_v9  ;;  %v1291_v25 = vld [vmem:[%s1661_s1 + $0xf0] sm:$0xff]   ;;  %v1295_v29 = vld [vmem:[%s1661_s1 + $0xf8] sm:$0xff]   ;;  %v1301_v34 = vld [vmem:[%s1662_s0 + $0x8] ss:$28 sps:$4 sm:$0xff]   ;;  %670 = vmatprep.mubr.bf16.mxu0 %v1300_v33 }
   0xb   :  { %v1292_v26 = vld [vmem:[%s1661_s1 + $0x30] sm:$0xff]   ;;  %v1296_v30 = vld [vmem:[%s1661_s1 + $0x38] sm:$0xff]   ;;  %v1303_v35 = vld [vmem:[%s1662_s0 + $0xc] ss:$28 sps:$4 sm:$0xff]  }
   0xc   :  { %1115 = vmatpush3.bf16.msra.mxu0 %v1276_v10  ;;  %v1293_v27 = vld [vmem:[%s1661_s1 + $0xb0] sm:$0xff]   ;;  %v1297_v31 = vld [vmem:[%s1661_s1 + $0xb8] sm:$0xff]   ;;  %v1304_v36 = vld [vmem:[%s1661_s1 + $0x140] sm:$0xff]   ;;  %735 = vmatprep.mubr.bf16.mxu1 %v1303_v35 }
   0xd   :  { %1155 = vmatpush3.bf16.msra.mxu1 %v1277_v11  ;;  %1116 = vmatprep.subr.bf16.mxu0 %v1278_v12  ;;  %v1298_v32 = vld [vmem:[%s1662_s0] ss:$28 sps:$4 sm:$0xff]   ;;  %v1306_v38 = vld [vmem:[%s1661_s1 + $0x148] sm:$0xff]   ;;  %v1313_v43 = vld [vmem:[%s1662_s0 + $0x38] ss:$28 sps:$4 sm:$0xff]  }
   0xe   :  { %1156 = vmatprep.subr.bf16.mxu1 %v1279_v13  ;;  %v1305_v37 = vld [vmem:[%s1661_s1 + $0x100] sm:$0xff]   ;;  %v1308_v40 = vld [vmem:[%s1661_s1 + $0x108] sm:$0xff]   ;;  %v1309_v41 = vld [vmem:[%s1662_s0 + $0x3c] ss:$28 sps:$4 sm:$0xff]  }
   0xf   :  { %v1307_v39 = vld [vmem:[%s1661_s1 + $0x180] sm:$0xff]   ;;  %v1315_v45 = vld [vmem:[%s1661_s1 + $0x150] sm:$0xff]   ;;  %v1316_v46 = vld [vmem:[%s1661_s1 + $0x188] sm:$0xff]  }
  0x10   :  { %1117 = vmatpush3.bf16.msra.mxu0 %v1280_v14  ;;  %v1311_v42 = vld [vmem:[%s1662_s0 + $0x44] ss:$28 sps:$4 sm:$0xff]   ;;  %v1317_v47 = vld [vmem:[%s1661_s1 + $0x110] sm:$0xff]   ;;  %v1318_v48 = vld [vmem:[%s1661_s1 + $0x158] sm:$0xff]  }
  0x11   :  { %1157 = vmatpush3.bf16.msra.mxu1 %v1281_v15  ;;  %1118 = vmatprep.subr.bf16.mxu0 %v1282_v16  ;;  %v1314_v44 = vld [vmem:[%s1662_s0 + $0x40] ss:$28 sps:$4 sm:$0xff]   ;;  %v1319_v49 = vld [vmem:[%s1661_s1 + $0x190] sm:$0xff]   ;;  %v1330_v58 = vld [vmem:[%s1661_s1 + $0x168] sm:$0xff]  }
  0x12   :  { %1158 = vmatprep.subr.bf16.mxu1 %v1283_v17  ;;  %v1320_v50 = vld [vmem:[%s1661_s1 + $0x118] sm:$0xff]   ;;  %v1321_v51 = vld [vmem:[%s1662_s0 + $0x74] ss:$28 sps:$4 sm:$0xff]   ;;  %v1327_v55 = vld [vmem:[%s1661_s1 + $0x160] sm:$0xff]  }
  0x13   :  { %v1323_v52 = vld [vmem:[%s1662_s0 + $0x7c] ss:$28 sps:$4 sm:$0xff]   ;;  %v1325_v53 = vld [vmem:[%s1662_s0 + $0x70] ss:$28 sps:$4 sm:$0xff]   ;;  %v1329_v57 = vld [vmem:[%s1661_s1 + $0x120] sm:$0xff]  }
  0x14   :  { %1119 = vmatpush3.bf16.msra.mxu0 %v1284_v18  ;;  %v1326_v54 = vld [vmem:[%s1662_s0 + $0x78] ss:$28 sps:$4 sm:$0xff]   ;;  %v1331_v59 = vld [vmem:[%s1661_s1 + $0x1a0] sm:$0xff]   ;;  %v1332_v60 = vld [vmem:[%s1661_s1 + $0x128] sm:$0xff]  }
  0x15   :  { %1159 = vmatpush3.bf16.msra.mxu1 %v1285_v19  ;;  %1120 = vmatprep.subr.bf16.mxu0 %v1286_v20  ;;  %v1328_v56 = vld [vmem:[%s1661_s1 + $0x198] sm:$0xff]   ;;  %v1333_v61 = vld [vmem:[%s1662_s0 + $0xac] ss:$28 sps:$4 sm:$0xff]   ;;  %v1335_v62 = vld [vmem:[%s1662_s0 + $0xb4] ss:$28 sps:$4 sm:$0xff]  }
  0x16   :  { %1160 = vmatprep.subr.bf16.mxu1 %v1287_v21  ;;  %v1337_v63 = vld [vmem:[%s1662_s0 + $0xa8] ss:$28 sps:$4 sm:$0xff]   ;;  %v1338_v0 = vld [vmem:[%s1662_s0 + $0xb0] ss:$28 sps:$4 sm:$0xff]   ;;  %v1342_v4 = vld [vmem:[%s1661_s1 + $0x178] sm:$0xff]  }
  0x17   :  { %v1339_v1 = vld [vmem:[%s1661_s1 + $0x170] sm:$0xff]   ;;  %v1340_v2 = vld [vmem:[%s1661_s1 + $0x1a8] sm:$0xff]   ;;  %v1344_v6 = vld [vmem:[%s1661_s1 + $0x138] sm:$0xff]  }
  0x18   :  { %1121 = vmatpush3.bf16.msra.mxu0 %v1288_v22  ;;  %v1341_v3 = vld [vmem:[%s1661_s1 + $0x130] sm:$0xff]   ;;  %v1348_v9 = vld [vmem:[%s1661_s1 + $0x1b8] sm:$0xff]   ;;  %v1351_v11 = vld [vmem:[%s1662_s0 + $0x4c] ss:$28 sps:$4 sm:$0xff]  }
  0x19   :  { %1161 = vmatpush3.bf16.msra.mxu1 %v1289_v23  ;;  %1122 = vmatprep.subr.bf16.mxu0 %v1290_v24  ;;  %v1343_v5 = vld [vmem:[%s1661_s1 + $0x1b0] sm:$0xff]   ;;  %v1357_v13 = vld [vmem:[%s1662_s0 + $0x88] ss:$28 sps:$4 sm:$0xff]   ;;  %v1358_v16 = vld [vmem:[%s1662_s0 + $0xc0] ss:$28 sps:$4 sm:$0xff]  }
  0x1a   :  { %1162 = vmatprep.subr.bf16.mxu1 %v1291_v25  ;;  %v1345_v7 = vld [vmem:[%s1662_s0 + $0x10] ss:$28 sps:$4 sm:$0xff]   ;;  %v1349_v10 = vld [vmem:[%s1662_s0 + $0x18] ss:$28 sps:$4 sm:$0xff]   ;;  %v1353_v14 = vld [vmem:[%s1662_s0 + $0x48] ss:$28 sps:$4 sm:$0xff]  }
  0x1b   :  { %v1347_v8 = vld [vmem:[%s1662_s0 + $0x14] ss:$28 sps:$4 sm:$0xff]   ;;  %v1354_v15 = vld [vmem:[%s1662_s0 + $0x84] ss:$28 sps:$4 sm:$0xff]   ;;  %v1359_v18 = vld [vmem:[%s1662_s0 + $0xbc] ss:$28 sps:$4 sm:$0xff]  }
  0x1c   :  { %1123 = vmatpush3.bf16.msra.mxu0 %v1292_v26  ;;  %v1350_v12 = vld [vmem:[%s1662_s0 + $0x50] ss:$28 sps:$4 sm:$0xff]   ;;  %v1356_v17 = vld [vmem:[%s1662_s0 + $0x80] ss:$28 sps:$4 sm:$0xff]   ;;  %v1361_v19 = vld [vmem:[%s1662_s0 + $0xb8] ss:$28 sps:$4 sm:$0xff]  }
  0x1d   :  { %1163 = vmatpush3.bf16.msra.mxu1 %v1293_v27  ;;  %1124 = vmatprep.subr.bf16.mxu0 %v1294_v28 }
  0x1e   :  { %1164 = vmatprep.subr.bf16.mxu1 %v1295_v29 }
  0x20   :  { %1125 = vmatpush3.bf16.msra.mxu0 %v1296_v30 }
  0x21   :  { %1165 = vmatpush3.bf16.msra.mxu1 %v1297_v31  ;;  %1190 = vmatprep.subr.bf16.mxu0 %v1304_v36 }
  0x22   :  { %1242 = vmatprep.subr.bf16.mxu1 %v1307_v39 }
  0x23   :  { %671 = vmatmul.mubr.bf16.vlgmr.msra.gmra.mrb[0].mxu0 %v1298_v32 }
  0x24   :  { %736 = vmatmul.mubr.bf16.vlgmr.msra.gmra.mrb[0].mxu1 %v1301_v34  ;;  %1191 = vmatpush3.bf16.msra.mxu0 %v1305_v37 }
  0x25   :  { %1192 = vmatprep.subr.bf16.mxu0 %v1306_v38  ;;  %1243 = vmatpush3.bf16.msra.mxu1 %v1307_v39 }
  0x26   :  { %678 = vmatprep.mubr.bf16.mxu0 %v1309_v41  ;;  %743 = vmatprep.mubr.bf16.mxu1 %v1311_v42 }
  0x27   :  { %1244 = vmatprep.subr.bf16.mxu1 %v1316_v46 }
  0x28   :  { %1193 = vmatpush3.bf16.msra.mxu0 %v1308_v40 }
  0x29   :  { %1194 = vmatprep.subr.bf16.mxu0 %v1315_v45  ;;  %1245 = vmatpush3.bf16.msra.mxu1 %v1316_v46 }
  0x2a   :  { %1246 = vmatprep.subr.bf16.mxu1 %v1319_v49 }
  0x2b   :  { %679 = vmatmul.mubr.bf16.gmra.mrb[4].mxu0 %v1313_v43 }
  0x2c   :  { %744 = vmatmul.mubr.bf16.gmra.mrb[4].mxu1 %v1314_v44  ;;  %1195 = vmatpush3.bf16.msra.mxu0 %v1317_v47 }
  0x2d   :  { %1196 = vmatprep.subr.bf16.mxu0 %v1318_v48  ;;  %1247 = vmatpush3.bf16.msra.mxu1 %v1319_v49 }
  0x2e   :  { %686 = vmatprep.mubr.bf16.mxu0 %v1321_v51  ;;  %751 = vmatprep.mubr.bf16.mxu1 %v1323_v52 }
  0x2f   :  { %1248 = vmatprep.subr.bf16.mxu1 %v1328_v56 }
  0x30   :  { %1197 = vmatpush3.bf16.msra.mxu0 %v1320_v50 }
  0x31   :  { %1198 = vmatprep.subr.bf16.mxu0 %v1327_v55  ;;  %1249 = vmatpush3.bf16.msra.mxu1 %v1328_v56 }
  0x32   :  { %1250 = vmatprep.subr.bf16.mxu1 %v1331_v59 }
  0x33   :  { %687 = vmatmul.mubr.bf16.gmra.mrb[8].mxu0 %v1325_v53 }
  0x34   :  { %752 = vmatmul.mubr.bf16.gmra.mrb[8].mxu1 %v1326_v54  ;;  %1199 = vmatpush3.bf16.msra.mxu0 %v1329_v57 }
  0x35   :  { %1200 = vmatprep.subr.bf16.mxu0 %v1330_v58  ;;  %1251 = vmatpush3.bf16.msra.mxu1 %v1331_v59 }
  0x36   :  { %694 = vmatprep.mubr.bf16.mxu0 %v1333_v61  ;;  %759 = vmatprep.mubr.bf16.mxu1 %v1335_v62 }
  0x37   :  { %1252 = vmatprep.subr.bf16.mxu1 %v1340_v2 }
  0x38   :  { %1201 = vmatpush3.bf16.msra.mxu0 %v1332_v60 }
  0x39   :  { %1202 = vmatprep.subr.bf16.mxu0 %v1339_v1  ;;  %1253 = vmatpush3.bf16.msra.mxu1 %v1340_v2 }
  0x3a   :  { %1254 = vmatprep.subr.bf16.mxu1 %v1343_v5 }
  0x3b   :  { %695 = vmatmul.mubr.bf16.gmra.mrb[12].mxu0 %v1337_v63 }
  0x3c   :  { %760 = vmatmul.mubr.bf16.gmra.mrb[12].mxu1 %v1338_v0  ;;  %1203 = vmatpush3.bf16.msra.mxu0 %v1341_v3 }
  0x3d   :  { %1204 = vmatprep.subr.bf16.mxu0 %v1342_v4  ;;  %1255 = vmatpush3.bf16.msra.mxu1 %v1343_v5 }
  0x3e   :  { %800 = vmatprep.mubr.bf16.mxu0 %v1347_v8  ;;  %1256 = vmatprep.subr.bf16.mxu1 %v1348_v9 }
  0x3f   :  { %1258 = vmatprep.mubr.bf16.mxu1 %v1349_v10 }
  0x40   :  { %1205 = vmatpush3.bf16.msra.mxu0 %v1344_v6 }
  0x41   :  { %1257 = vmatpush3.bf16.msra.mxu1 %v1348_v9 }
  0x43   :  { %801 = vmatmul.mubr.bf16.vlgmr.msra.gmra.mrb[16].mxu0 %v1345_v7 }
  0x44   :  { %808 = vmatprep.mubr.bf16.mxu0 %v1351_v11  ;;  %1259 = vmatmul.mubr.bf16.vlgmr.msra.gmra.mrb[16].mxu1 %v1350_v12 }
  0x45   :  { %1262 = vmatprep.mubr.bf16.mxu1 %v1357_v13 }
  0x4b   :  { %809 = vmatmul.mubr.bf16.gmra.mrb[20].mxu0 %v1353_v14 }
  0x4c   :  { %816 = vmatprep.mubr.bf16.mxu0 %v1354_v15  ;;  %1263 = vmatmul.mubr.bf16.gmra.mrb[20].mxu1 %v1358_v16 }
  0x53   :  { %817 = vmatmul.mubr.bf16.gmra.mrb[24].mxu0 %v1356_v17 }
  0x54   :  { %824 = vmatprep.mubr.bf16.mxu0 %v1359_v18 }
  0x5b   :  { %825 = vmatmul.mubr.bf16.gmra.mrb[28].mxu0 %v1361_v19 }
  0xf6   :  { %v1126_v20 = vpop.f32.mrb[0].mxu0 }
  0xf7   :  { %v1166_v21 = vpop.f32.mrb[0].mxu1  ;;  %v1127_v22 = vpop.f32.mrb[1].mxu0 }
  0xf8   :  { %v1128_v23 = vadd.f32 %v1127_v22, %v1126_v20  ;;  %v1167_v24 = vpop.f32.mrb[1].mxu1  ;;  %v1129_v25 = vpop.f32.mrb[2].mxu0 }
  0xf9   :  { %v1168_v26 = vadd.f32 %v1167_v24, %v1166_v21  ;;  %v1169_v27 = vpop.f32.mrb[2].mxu1  ;;  %v1130_v28 = vpop.f32.mrb[3].mxu0 }
  0xfa   :  { %v1131_v29 = vadd.f32 %v1130_v28, %v1129_v25  ;;  %v1170_v30 = vpop.f32.mrb[3].mxu1 }
  0xfb   :  { %v738_v31 = vadd.f32 %v1168_v26, %v1128_v23  ;;  %v1171_v32 = vadd.f32 %v1170_v30, %v1169_v27 }
  0xfd   :  { %v741_v33 = vadd.f32 %v1171_v32, %v1131_v29 }
  0xfe   :  { %v1132_v34 = vpop.f32.mrb[4].mxu0 }
  0xff   :  { %v1172_v35 = vpop.f32.mrb[4].mxu1  ;;  %v1133_v36 = vpop.f32.mrb[5].mxu0 }
 0x100   :  { %v1134_v37 = vadd.f32 %v1133_v36, %v1132_v34  ;;  %v1173_v38 = vpop.f32.mrb[5].mxu1  ;;  %v1135_v39 = vpop.f32.mrb[6].mxu0 }
 0x101   :  { %v1174_v40 = vadd.f32 %v1173_v38, %v1172_v35  ;;  %v1175_v41 = vpop.f32.mrb[6].mxu1  ;;  %v1136_v42 = vpop.f32.mrb[7].mxu0 }
 0x102   :  { %v1137_v43 = vadd.f32 %v1136_v42, %v1135_v39  ;;  %v1176_v44 = vpop.f32.mrb[7].mxu1 }
 0x103   :  { %v746_v45 = vadd.f32 %v1174_v40, %v1134_v37  ;;  %v1177_v46 = vadd.f32 %v1176_v44, %v1175_v41 }
 0x105   :  { %v749_v47 = vadd.f32 %v1177_v46, %v1137_v43 }
 0x106   :  { %v1138_v48 = vpop.f32.mrb[8].mxu0 }
 0x107   :  { %v1178_v49 = vpop.f32.mrb[8].mxu1  ;;  %v1139_v50 = vpop.f32.mrb[9].mxu0 }
 0x108   :  { %v1179_v51 = vpop.f32.mrb[9].mxu1  ;;  %v1140_v52 = vadd.f32 %v1139_v50, %v1138_v48  ;;  %v1141_v54 = vpop.f32.mrb[10].mxu0 }
 0x109   :  { %v1180_v53 = vadd.f32 %v1179_v51, %v1178_v49  ;;  %v1181_v55 = vpop.f32.mrb[10].mxu1  ;;  %v1142_v56 = vpop.f32.mrb[11].mxu0 }
 0x10a   :  { %v1182_v57 = vpop.f32.mrb[11].mxu1  ;;  %v1143_v59 = vadd.f32 %v1142_v56, %v1141_v54 }
 0x10b   :  { %v1634_v58 = vadd.f32 %v1180_v53, %v1140_v52  ;;  %v1183_v60 = vadd.f32 %v1182_v57, %v1181_v55 }
 0x10d   :  { %v1636_v61 = vadd.f32 %v1183_v60, %v1143_v59 }
 0x10e   :  { %v1144_v62 = vpop.f32.mrb[12].mxu0 }
 0x10f   :  { %v1184_v63 = vpop.f32.mrb[12].mxu1  ;;  %v1145_v0 = vpop.f32.mrb[13].mxu0 }
 0x110   :  { %v1185_v1 = vpop.f32.mrb[13].mxu1  ;;  %v1146_v2 = vadd.f32 %v1145_v0, %v1144_v62  ;;  %v1147_v4 = vpop.f32.mrb[14].mxu0 }
 0x111   :  { %v1186_v3 = vadd.f32 %v1185_v1, %v1184_v63  ;;  %v1187_v5 = vpop.f32.mrb[14].mxu1  ;;  %v1148_v6 = vpop.f32.mrb[15].mxu0 }
 0x112   :  { %v1188_v7 = vpop.f32.mrb[15].mxu1  ;;  %v1149_v9 = vadd.f32 %v1148_v6, %v1147_v4 }
 0x113   :  { %v1638_v8 = vadd.f32 %v1186_v3, %v1146_v2  ;;  %v1189_v10 = vadd.f32 %v1188_v7, %v1187_v5 }
 0x115   :  { %v1640_v11 = vadd.f32 %v1189_v10, %v1149_v9 }
 0x116   :  { %v1206_v12 = vpop.f32.mrb[16].mxu0 }
 0x117   :  { %v1207_v13 = vpop.f32.mrb[17].mxu0  ;;  %v1260_v18 = vpop.f32.mrb[16].mxu1 }
 0x118   :  { %v1208_v14 = vadd.f32 %v1207_v13, %v1206_v12  ;;  %v1209_v15 = vpop.f32.mrb[18].mxu0  ;;  %v867_v20 = vpop.f32.mrb[17].mxu1 }
 0x119   :  { %v1210_v16 = vpop.f32.mrb[19].mxu0  ;;  %v1261_v22 = vpop.f32.mrb[18].mxu1 }
 0x11a   :  { %v1211_v17 = vadd.f32 %v1210_v16, %v1209_v15  ;;  %v803_v19 = vadd.f32 %v1208_v14, %v738_v31  ;;  %v870_v24 = vpop.f32.mrb[19].mxu1 }
 0x11c   :  { %v868_v21 = vadd.f32 %v867_v20, %v803_v19  ;;  %v806_v23 = vadd.f32 %v1211_v17, %v741_v33 }
 0x11e   :  { %v871_v25 = vadd.f32 %v870_v24, %v806_v23  ;;  %v1212_v26 = vpop.f32.mrb[20].mxu0  ;;  %v951_v27 = vmul.f32 %v868_v21, %v868_v21 }
 0x11f   :  { %v1213_v28 = vpop.f32.mrb[21].mxu0  ;;  %v1264_v39 = vpop.f32.mrb[20].mxu1 }
 0x120   :  { %v1090_v29 = vpack.c.bf16 %v871_v25, %v868_v21  ;;  %v938_v30 = vadd.f32 %v871_v25, %v868_v21  ;;  %v952_v32 = vmul.f32 %v871_v25, %v871_v25  ;;  %v1214_v34 = vadd.f32 %v1213_v28, %v1212_v26  ;;  %v1215_v35 = vpop.f32.mrb[22].mxu0  ;;  %v883_v33 = vpop.f32.mrb[21].mxu1 }
 0x121   :  { %v1216_v36 = vpop.f32.mrb[23].mxu0  ;;  %v1265_v42 = vpop.f32.mrb[22].mxu1 }
 0x122   :  { %1091 = vst [vmem:[%s1663_s2] sm:$0xff] %v1090_v29   ;;  %v959_v31 = vadd.f32 %v952_v32, %v951_v27  ;;  %v811_v37 = vadd.f32 %v1214_v34, %v746_v45  ;;  %v1217_v38 = vadd.f32 %v1216_v36, %v1215_v35  ;;  %v886_v43 = vpop.f32.mrb[23].mxu1  ;;  %v972_v27 = vlaneseq }
 0x124   :  { %v876_v40 = vadd.f32 %v1260_v18, %v811_v37  ;;  %v814_v41 = vadd.f32 %v1217_v38, %v749_v47 }
 0x126   :  { %v953_v44 = vmul.f32 %v876_v40, %v876_v40  ;;  %v879_v46 = vadd.f32 %v1261_v22, %v814_v41  ;;  %v1218_v48 = vpop.f32.mrb[24].mxu0  ;;  %v939_v49 = vadd.f32 %v938_v30, %v876_v40  ;;  %v973_v30 = vshrl.u32 %v972_v27, 7 }
 0x127   :  { %v1219_v50 = vpop.f32.mrb[25].mxu0 }
 0x128   :  { %v1095_v51 = vpack.c.bf16 %v879_v46, %v876_v40  ;;  %v954_v52 = vmul.f32 %v879_v46, %v879_v46  ;;  %v1220_v53 = vadd.f32 %v1219_v50, %v1218_v48  ;;  %v1221_v54 = vpop.f32.mrb[26].mxu0  ;;  %v940_v55 = vadd.f32 %v939_v49, %v879_v46 }
 0x129   :  { %v1222_v56 = vpop.f32.mrb[27].mxu0  ;;  %v960_v57 = vadd.f32 %v959_v31, %v953_v44  ;;  %vm975_vm0 = vcmp.eq.s32.totalorder %v973_v30, 1  ;;  %vm974_vm1 = vcmp.eq.s32.totalorder %v973_v30, 0 }
 0x12a   :  { %1107 = vst [vmem:[%s1663_s2 + $0x8] sm:$0xff] %v1095_v51   ;;  %v1223_v45 = vadd.f32 %v1222_v56, %v1221_v54  ;;  %v819_v47 = vadd.f32 %v1220_v53, %v1634_v58 }
 0x12b   :  { %v961_v59 = vadd.f32 %v960_v57, %v954_v52 }
 0x12c   :  { %v884_v60 = vadd.f32 %v883_v33, %v819_v47  ;;  %v822_v62 = vadd.f32 %v1223_v45, %v1636_v61 }
 0x12e   :  { %v941_v63 = vadd.f32 %v940_v55, %v884_v60  ;;  %v955_v0 = vmul.f32 %v884_v60, %v884_v60  ;;  %v887_v1 = vadd.f32 %v886_v43, %v822_v62  ;;  %v1224_v2 = vpop.f32.mrb[28].mxu0 }
 0x12f   :  { %v1225_v3 = vpop.f32.mrb[29].mxu0 }
 0x130   :  { %v962_v4 = vadd.f32 %v961_v59, %v955_v0  ;;  %v1100_v5 = vpack.c.bf16 %v887_v1, %v884_v60  ;;  %v942_v6 = vadd.f32 %v941_v63, %v887_v1  ;;  %v956_v7 = vmul.f32 %v887_v1, %v887_v1  ;;  %v1227_v9 = vpop.f32.mrb[30].mxu0 }
 0x131   :  { %v1226_v10 = vadd.f32 %v1225_v3, %v1224_v2  ;;  %v1228_v12 = vpop.f32.mrb[31].mxu0 }
 0x132   :  { %1108 = vst [vmem:[%s1663_s2 + $0x10] sm:$0xff] %v1100_v5   ;;  %v963_v58 = vadd.f32 %v962_v4, %v956_v7  ;;  %v1229_v13 = vadd.f32 %v1228_v12, %v1227_v9 }
 0x133   :  { %v827_v61 = vadd.f32 %v1226_v10, %v1638_v8 }
 0x134   :  { %v830_v14 = vadd.f32 %v1229_v13, %v1640_v11 }
 0x135   :  { %v892_v15 = vadd.f32 %v1264_v39, %v827_v61 }
 0x136   :  { %v895_v16 = vadd.f32 %v1265_v42, %v830_v14 }
 0x137   :  { %v943_v17 = vadd.f32 %v942_v6, %v892_v15  ;;  %v957_v18 = vmul.f32 %v892_v15, %v892_v15 }
 0x138   :  { %v1105_v19 = vpack.c.bf16 %v895_v16, %v892_v15  ;;  %v958_v20 = vmul.f32 %v895_v16, %v895_v16 }
 0x139   :  { %v964_v21 = vadd.f32 %v963_v58, %v957_v18  ;;  %v944_v22 = vadd.f32 %v943_v17, %v895_v16 }
 0x13a   :  { %1109 = vst [vmem:[%s1663_s2 + $0x18] sm:$0xff] %v1105_v19  }
 0x13b   :  { %v945_v23 = vrot.slane %v944_v22, 4  ;;  %v965_v24 = vadd.f32 %v964_v21, %v958_v20 }
 0x13d   :  { %v946_v25 = vadd.f32 %v945_v23, %v944_v22  ;;  %v966_v26 = vrot.slane %v965_v24, 4 }
 0x13f   :  { %v947_v8 = vrot.slane %v946_v25, 2  ;;  %v967_v28 = vadd.f32 %v966_v26, %v965_v24 }
 0x141   :  { %v948_v11 = vadd.f32 %v947_v8, %v946_v25  ;;  %v968_v29 = vrot.slane %v967_v28, 2 }
 0x143   :  { %v969_v32 = vadd.f32 %v968_v29, %v967_v28  ;;  %v949_v34 = vrot.slane %v948_v11, 1 }
 0x145   :  { %v970_v35 = vrot.slane %v969_v32, 1  ;;  %v950_v31 = vadd.f32 %v949_v34, %v948_v11 }
 0x147   :  { %v971_v36 = vadd.f32 %v970_v35, %v969_v32 }
 0x149   :  { %v976_v37 = vsel %vm975_vm0, %v971_v36, 0.0 }
 0x14a   :  { %v977_v38 = vsel %vm974_vm1, %v950_v31, %v976_v37 }
 0x14b   :  { %978 = vst [vmem:[%s1664_s3] sm:$0xff] %v977_v38 }

// kernel: tile.23
= control target key start
LH: loop header
LB: loop body
LE: loop exit
PB: predicated region body
PF: predicated region fallthrough
CT: control target
= control target key end

     0   :  { %s22_s0 = inlined_call_operand.vmem [shape: f32[16], index: 0, kind: input, shape index: {}]   ;;  %s23_s1 = inlined_call_operand.vmem [shape: f32[8,16], index: 1, kind: output, shape index: {}]  }
   0x1   :  { %v4_v0 = vld [vmem:[%s22_s0] ss:$0 sm:$0xff] }
   0x2   :  { %5 = vst [vmem:[%s23_s1] sm:$0xff] %v4_v0 }

// kernel: _lambda_.33
= control target key start
LH: loop header
LB: loop body
LE: loop exit
PB: predicated region body
PF: predicated region fallthrough
CT: control target
= control target key end

     0   :  { %s598_s1 = inlined_call_operand.vmem [shape: bf16[256,128], index: 1, kind: input, shape index: {}]   ;;  %s599_s0 = inlined_call_operand.vmem [shape: bf16[64,256], index: 0, kind: input, shape index: {}]   ;;  %s600_s2 = inlined_call_operand.vmem [shape: bf16[64,128], index: 2, kind: output, shape index: {0}]   ;;  %s601_s3 = inlined_call_operand.vmem [shape: f32[8,128], index: 3, kind: output, shape index: {1}]  }
   0x1   :  { %v463_v0 = vld [vmem:[%s598_s1 + $0x40] sm:$0xff]   ;;  %v465_v2 = vld [vmem:[%s598_s1 + $0x48] sm:$0xff]   ;;  %v467_v4 = vld [vmem:[%s598_s1 + $0x50] sm:$0xff]  }
   0x2   :  { %v464_v1 = vld [vmem:[%s598_s1] sm:$0xff]   ;;  %407 = vmatprep.subr.bf16.mxu0 %v463_v0  ;;  %447 = vmatprep.subr.bf16.mxu1 %v463_v0  ;;  %v466_v3 = vld [vmem:[%s598_s1 + $0x8] sm:$0xff]   ;;  %v468_v5 = vld [vmem:[%s598_s1 + $0x10] sm:$0xff]  }
   0x3   :  { %408 = vmatpush3.bf16.msra.mxu0 %v464_v1  ;;  %455 = vmatpush3.bf16.msra.mxu1 %v464_v1  ;;  %v469_v6 = vld [vmem:[%s598_s1 + $0x58] sm:$0xff]   ;;  %v471_v8 = vld [vmem:[%s598_s1 + $0x60] sm:$0xff]   ;;  %v473_v10 = vld [vmem:[%s598_s1 + $0x68] sm:$0xff]  }
   0x4   :  { %409 = vmatprep.subr.bf16.mxu0 %v465_v2  ;;  %448 = vmatprep.subr.bf16.mxu1 %v465_v2  ;;  %v470_v7 = vld [vmem:[%s598_s1 + $0x18] sm:$0xff]   ;;  %v472_v9 = vld [vmem:[%s598_s1 + $0x20] sm:$0xff]   ;;  %v474_v13 = vld [vmem:[%s598_s1 + $0x28] sm:$0xff]  }
   0x5   :  { %v481_v11 = vld [vmem:[%s599_s0 + $0x4] ss:$8 sps:$4 sm:$0xff]   ;;  %v475_v14 = vld [vmem:[%s598_s1 + $0x70] sm:$0xff]   ;;  %v477_v16 = vld [vmem:[%s598_s1 + $0x78] sm:$0xff]  }
   0x6   :  { %v484_v12 = vld [vmem:[%s599_s0 + $0x24] ss:$8 sps:$4 sm:$0xff]   ;;  %222 = vmatprep.mubr.bf16.mxu0 %v481_v11  ;;  %v476_v15 = vld [vmem:[%s598_s1 + $0x30] sm:$0xff]   ;;  %v478_v17 = vld [vmem:[%s598_s1 + $0x38] sm:$0xff]  }
   0x7   :  { %410 = vmatpush3.bf16.msra.mxu0 %v466_v3  ;;  %456 = vmatpush3.bf16.msra.mxu1 %v466_v3  ;;  %v479_v18 = vld [vmem:[%s599_s0] ss:$8 sps:$4 sm:$0xff]   ;;  %v485_v20 = vld [vmem:[%s599_s0 + $0x14] ss:$8 sps:$4 sm:$0xff]   ;;  %v487_v22 = vld [vmem:[%s599_s0 + $0x10] ss:$8 sps:$4 sm:$0xff]  }
   0x8   :  { %411 = vmatprep.subr.bf16.mxu0 %v467_v4  ;;  %449 = vmatprep.subr.bf16.mxu1 %v467_v4  ;;  %v482_v19 = vld [vmem:[%s599_s0 + $0x20] ss:$8 sps:$4 sm:$0xff]   ;;  %v488_v21 = vld [vmem:[%s599_s0 + $0x34] ss:$8 sps:$4 sm:$0xff]   ;;  %v490_v23 = vld [vmem:[%s599_s0 + $0x30] ss:$8 sps:$4 sm:$0xff]  }
   0x9   :  { %238 = vmatprep.mubr.bf16.mxu1 %v484_v12 }
   0xb   :  { %412 = vmatpush3.bf16.msra.mxu0 %v468_v5  ;;  %457 = vmatpush3.bf16.msra.mxu1 %v468_v5 }
   0xc   :  { %413 = vmatprep.subr.bf16.mxu0 %v469_v6  ;;  %450 = vmatprep.subr.bf16.mxu1 %v469_v6 }
   0xf   :  { %414 = vmatpush3.bf16.msra.mxu0 %v470_v7  ;;  %458 = vmatpush3.bf16.msra.mxu1 %v470_v7 }
  0x10   :  { %415 = vmatprep.subr.bf16.mxu0 %v471_v8  ;;  %451 = vmatprep.subr.bf16.mxu1 %v471_v8 }
  0x13   :  { %416 = vmatpush3.bf16.msra.mxu0 %v472_v9  ;;  %459 = vmatpush3.bf16.msra.mxu1 %v472_v9 }
  0x14   :  { %417 = vmatprep.subr.bf16.mxu0 %v473_v10  ;;  %452 = vmatprep.subr.bf16.mxu1 %v473_v10 }
  0x17   :  { %418 = vmatpush3.bf16.msra.mxu0 %v474_v13  ;;  %460 = vmatpush3.bf16.msra.mxu1 %v474_v13  ;;  %v329_v13 = vlaneseq }
  0x18   :  { %419 = vmatprep.subr.bf16.mxu0 %v475_v14  ;;  %453 = vmatprep.subr.bf16.mxu1 %v475_v14 }
  0x1b   :  { %420 = vmatpush3.bf16.msra.mxu0 %v476_v15  ;;  %461 = vmatpush3.bf16.msra.mxu1 %v476_v15 }
  0x1c   :  { %421 = vmatprep.subr.bf16.mxu0 %v477_v16  ;;  %454 = vmatprep.subr.bf16.mxu1 %v477_v16 }
  0x1f   :  { %422 = vmatpush3.bf16.msra.mxu0 %v478_v17  ;;  %462 = vmatpush3.bf16.msra.mxu1 %v478_v17 }
  0x22   :  { %223 = vmatmul.mubr.bf16.vlgmr.msra.gmra.mrb[0].mxu0 %v479_v18  ;;  %239 = vmatmul.mubr.bf16.vlgmr.msra.gmra.mrb[0].mxu1 %v482_v19  ;;  %v330_v18 = vshrl.u32 %v329_v13, 7 }
  0x23   :  { %230 = vmatprep.mubr.bf16.mxu0 %v485_v20  ;;  %246 = vmatprep.mubr.bf16.mxu1 %v488_v21 }
  0x24   :  { %vm332_vm0 = vcmp.eq.s32.totalorder %v330_v18, 1  ;;  %vm331_vm1 = vcmp.eq.s32.totalorder %v330_v18, 0 }
  0x2a   :  { %231 = vmatmul.mubr.bf16.gmra.mrb[4].mxu0 %v487_v22  ;;  %247 = vmatmul.mubr.bf16.gmra.mrb[4].mxu1 %v490_v23 }
  0xf5   :  { %v423_v24 = vpop.f32.mrb[0].mxu0  ;;  %v435_v25 = vpop.f32.mrb[0].mxu1 }
  0xf6   :  { %v424_v26 = vpop.f32.mrb[1].mxu0  ;;  %v436_v27 = vpop.f32.mrb[1].mxu1 }
  0xf7   :  { %v425_v28 = vadd.f32 %v424_v26, %v423_v24  ;;  %v426_v29 = vpop.f32.mrb[2].mxu0  ;;  %v437_v30 = vadd.f32 %v436_v27, %v435_v25  ;;  %v438_v31 = vpop.f32.mrb[2].mxu1 }
  0xf8   :  { %v427_v32 = vpop.f32.mrb[3].mxu0  ;;  %v439_v33 = vpop.f32.mrb[3].mxu1 }
  0xf9   :  { %v428_v34 = vadd.f32 %v427_v32, %v426_v29  ;;  %v440_v35 = vadd.f32 %v439_v33, %v438_v31  ;;  %v308_v36 = vmul.f32 %v425_v28, %v425_v28  ;;  %v312_v61 = vmul.f32 %v437_v30, %v437_v30 }
  0xfb   :  { %v387_v37 = vpack.c.bf16 %v428_v34, %v425_v28  ;;  %v295_v38 = vadd.f32 %v428_v34, %v425_v28  ;;  %v309_v39 = vmul.f32 %v428_v34, %v428_v34  ;;  %v397_v40 = vpack.c.bf16 %v440_v35, %v437_v30 }
  0xfc   :  { %v313_v0 = vmul.f32 %v440_v35, %v440_v35 }
  0xfd   :  { %388 = vst [vmem:[%s600_s2] sm:$0xff] %v387_v37   ;;  %v316_v41 = vadd.f32 %v309_v39, %v308_v36  ;;  %v429_v42 = vpop.f32.mrb[4].mxu0  ;;  %405 = vst [vmem:[%s600_s2 + $0x10] sm:$0xff] %v397_v40   ;;  %v441_v43 = vpop.f32.mrb[4].mxu1 }
  0xfe   :  { %v430_v44 = vpop.f32.mrb[5].mxu0  ;;  %v442_v45 = vpop.f32.mrb[5].mxu1 }
  0xff   :  { %v431_v46 = vadd.f32 %v430_v44, %v429_v42  ;;  %v432_v47 = vpop.f32.mrb[6].mxu0  ;;  %v443_v48 = vadd.f32 %v442_v45, %v441_v43  ;;  %v444_v49 = vpop.f32.mrb[6].mxu1 }
 0x100   :  { %v433_v50 = vpop.f32.mrb[7].mxu0  ;;  %v445_v51 = vpop.f32.mrb[7].mxu1 }
 0x101   :  { %v296_v52 = vadd.f32 %v431_v46, %v295_v38  ;;  %v310_v53 = vmul.f32 %v431_v46, %v431_v46  ;;  %v434_v54 = vadd.f32 %v433_v50, %v432_v47  ;;  %v446_v55 = vadd.f32 %v445_v51, %v444_v49 }
 0x102   :  { %v314_v3 = vmul.f32 %v443_v48, %v443_v48 }
 0x103   :  { %v317_v56 = vadd.f32 %v316_v41, %v310_v53  ;;  %v392_v57 = vpack.c.bf16 %v434_v54, %v431_v46  ;;  %v297_v58 = vadd.f32 %v434_v54, %v296_v52  ;;  %v311_v59 = vmul.f32 %v434_v54, %v434_v54 }
 0x104   :  { %v402_v60 = vpack.c.bf16 %v446_v55, %v443_v48  ;;  %v315_v8 = vmul.f32 %v446_v55, %v446_v55 }
 0x105   :  { %404 = vst [vmem:[%s600_s2 + $0x8] sm:$0xff] %v392_v57   ;;  %v298_v62 = vadd.f32 %v437_v30, %v297_v58  ;;  %v318_v63 = vadd.f32 %v317_v56, %v311_v59 }
 0x106   :  { %406 = vst [vmem:[%s600_s2 + $0x18] sm:$0xff] %v402_v60  }
 0x107   :  { %v319_v1 = vadd.f32 %v318_v63, %v312_v61  ;;  %v299_v2 = vadd.f32 %v440_v35, %v298_v62 }
 0x109   :  { %v300_v4 = vadd.f32 %v443_v48, %v299_v2  ;;  %v320_v5 = vadd.f32 %v319_v1, %v313_v0 }
 0x10b   :  { %v321_v6 = vadd.f32 %v320_v5, %v314_v3  ;;  %v301_v7 = vadd.f32 %v446_v55, %v300_v4 }
 0x10d   :  { %v302_v9 = vrot.slane %v301_v7, 4  ;;  %v322_v10 = vadd.f32 %v321_v6, %v315_v8 }
 0x10f   :  { %v303_v11 = vadd.f32 %v302_v9, %v301_v7  ;;  %v323_v12 = vrot.slane %v322_v10, 4 }
 0x111   :  { %v304_v14 = vrot.slane %v303_v11, 2  ;;  %v324_v15 = vadd.f32 %v323_v12, %v322_v10 }
 0x113   :  { %v305_v16 = vadd.f32 %v304_v14, %v303_v11  ;;  %v325_v17 = vrot.slane %v324_v15, 2 }
 0x115   :  { %v326_v19 = vadd.f32 %v325_v17, %v324_v15  ;;  %v306_v20 = vrot.slane %v305_v16, 1 }
 0x117   :  { %v327_v21 = vrot.slane %v326_v19, 1  ;;  %v307_v23 = vadd.f32 %v306_v20, %v305_v16 }
 0x119   :  { %v328_v22 = vadd.f32 %v327_v21, %v326_v19 }
 0x11b   :  { %v333_v24 = vsel %vm332_vm0, %v328_v22, 0.0 }
 0x11c   :  { %v334_v25 = vsel %vm331_vm1, %v307_v23, %v333_v24 }
 0x11d   :  { %335 = vst [vmem:[%s601_s3] sm:$0xff] %v334_v25 }

// kernel: tile.33
= control target key start
LH: loop header
LB: loop body
LE: loop exit
PB: predicated region body
PF: predicated region fallthrough
CT: control target
= control target key end

     0   :  { %s22_s0 = inlined_call_operand.vmem [shape: f32[8], index: 0, kind: input, shape index: {}]   ;;  %s23_s1 = inlined_call_operand.vmem [shape: f32[8,8], index: 1, kind: output, shape index: {}]  }
   0x1   :  { %v4_v0 = vld [vmem:[%s22_s0] ss:$0 sm:$0xff] }
   0x2   :  { %5 = vst [vmem:[%s23_s1] sm:$0xff] %v4_v0 }

// kernel: tile.34
= control target key start
LH: loop header
LB: loop body
LE: loop exit
PB: predicated region body
PF: predicated region fallthrough
CT: control target
= control target key end

     0   :  { %s67_s10 = smov 56   ;;  %s68_s11 = smov 40   ;;  %vm3_vm0 = vcmask 64512   ;;  %vm9_vm1 = vcmask 523712   ;;  %vm15_vm2 = vcmask 458112   ;;  %vm21_vm3 = vcmask 392512   ;;  %s111_s0 = inlined_call_operand.vmem [shape: f32[8,8], index: 0, kind: input, shape index: {}]   ;;  %s112_s1 = inlined_call_operand.vmem [shape: f32[64], index: 1, kind: output, shape index: {}]  }
   0x1   :  { %v53_v0 = vld [vmem:[%s111_s0 + $0x7] sm:$0x1]   ;;  %v55_v1 = vld [vmem:[%s111_s0 + $0x5] sm:$0x1]   ;;  %v54_v2 = vld [vmem:[%s111_s0 + $0x6] sm:$0x1]  }
   0x2   :  { %7 = vrot.lane.b32.xlu0 %v53_v0, %s67_s10  ;;  %19 = vrot.lane.b32.xlu1 %v55_v1, %s68_s11  ;;  %v56_v3 = vld [vmem:[%s111_s0 + $0x4] sm:$0x1]   ;;  %v2_v4 = vld [vmem:[%s111_s0] sm:$0x1]   ;;  %s69_s18 = smov 48   ;;  %s70_s19 = smov 32  }
   0x3   :  { %4 = vst.msk [vmem:[#allocation0] sm:$0x1] %vm3_vm0, %v2_v4   ;;  %v57_v5 = vld [vmem:[%s111_s0 + $0x3] sm:$0x1]   ;;  %v58_v6 = vld [vmem:[%s111_s0 + $0x2] sm:$0x1]  }
   0x4   :  { %s71_s24 = smov 24   ;;  %s72_s25 = smov 16   ;;  %v59_v7 = vld [vmem:[%s111_s0 + $0x1] sm:$0x1]   ;;  %vm27_vm4 = vcmask 326912   ;;  %vm33_vm5 = vcmask 261312  }
   0x5   :  { %s73_s0 = smov 8   ;;  %vm39_vm6 = vcmask 195712   ;;  %vm45_vm7 = vcmask 130112  }
   0x6   :  { %13 = vrot.lane.b32.xlu0 %v54_v2, %s69_s18  ;;  %25 = vrot.lane.b32.xlu1 %v56_v3, %s70_s19 }
   0xa   :  { %31 = vrot.lane.b32.xlu0 %v57_v5, %s71_s24  ;;  %37 = vrot.lane.b32.xlu1 %v58_v6, %s72_s25 }
   0xe   :  { %43 = vrot.lane.b32.xlu0 %v59_v7, %s73_s0 }
  0x74   :  { %v8_v8 = vpop.permute.xlu0 %7   ;;  %v20_v9 = vpop.permute.xlu1 %19  }
  0x75   :  { %10 = vst.msk [vmem:[#allocation0] sm:$0x1] %vm9_vm1, %v8_v8  }
  0x78   :  { %v14_v10 = vpop.permute.xlu0 %13   ;;  %v26_v11 = vpop.permute.xlu1 %25  }
  0x79   :  { %16 = vst.msk [vmem:[#allocation0] sm:$0x1] %vm15_vm2, %v14_v10  }
  0x7a   :  { %22 = vst.msk [vmem:[#allocation0] sm:$0x1] %vm21_vm3, %v20_v9  }
  0x7b   :  { %28 = vst.msk [vmem:[#allocation0] sm:$0x1] %vm27_vm4, %v26_v11  }
  0x7c   :  { %v32_v12 = vpop.permute.xlu0 %31   ;;  %v38_v13 = vpop.permute.xlu1 %37  }
  0x7d   :  { %34 = vst.msk [vmem:[#allocation0] sm:$0x1] %vm33_vm5, %v32_v12  }
  0x7e   :  { %40 = vst.msk [vmem:[#allocation0] sm:$0x1] %vm39_vm6, %v38_v13  }
  0x80   :  { %v44_v14 = vpop.permute.xlu0 %43  }
  0x81   :  { %46 = vst.msk [vmem:[#allocation0] sm:$0x1] %vm45_vm7, %v44_v14  }
  0x88   :  { %v50_v15 = vld [vmem:[#allocation0] sm:$0x1] }
  0x89   :  { %52 = vst [vmem:[%s112_s1] sm:$0x1] %v50_v15 }

// kernel: _lambda_.35
= control target key start
LH: loop header
LB: loop body
LE: loop exit
PB: predicated region body
PF: predicated region fallthrough
CT: control target
= control target key end

     0   :  { %s2126_s1 = inlined_call_operand.vmem [shape: bf16[128,128], index: 1, kind: input, shape index: {}]   ;;  %s2127_s0 = inlined_call_operand.vmem [shape: bf16[512,128], index: 0, kind: input, shape index: {}]   ;;  %s2128_s2 = inlined_call_operand.vmem [shape: bf16[512,128], index: 2, kind: output, shape index: {0}]   ;;  %s2129_s3 = inlined_call_operand.vmem [shape: f32[8,128], index: 3, kind: output, shape index: {1}]  }
   0x1   :  { %v1655_v0 = vld [vmem:[%s2126_s1] sm:$0xff]   ;;  %v1656_v1 = vld [vmem:[%s2126_s1 + $0x8] sm:$0xff]   ;;  %v1657_v2 = vld [vmem:[%s2126_s1 + $0x10] sm:$0xff]  }
   0x2   :  { %1559 = vmatprep.subr.bf16.mxu0 %v1655_v0  ;;  %1639 = vmatprep.subr.bf16.mxu1 %v1655_v0  ;;  %v1658_v3 = vld [vmem:[%s2126_s1 + $0x18] sm:$0xff]   ;;  %v1663_v4 = vld [vmem:[%s2127_s0] sm:$0xff]   ;;  %v1660_v6 = vld [vmem:[%s2126_s1 + $0x28] sm:$0xff]  }
   0x3   :  { %1560 = vmatpush3.bf16.msra.mxu0 %v1655_v0  ;;  %1647 = vmatpush3.bf16.msra.mxu1 %v1655_v0  ;;  %v1659_v5 = vld [vmem:[%s2126_s1 + $0x20] sm:$0xff]   ;;  %v1661_v7 = vld [vmem:[%s2126_s1 + $0x30] sm:$0xff]   ;;  %v1662_v8 = vld [vmem:[%s2126_s1 + $0x38] sm:$0xff]  }
   0x4   :  { %1561 = vmatprep.subr.bf16.mxu0 %v1656_v1  ;;  %1640 = vmatprep.subr.bf16.mxu1 %v1656_v1  ;;  %v1679_v9 = vld [vmem:[%s2127_s0 + $0x80] sm:$0xff]   ;;  %v1664_v10 = vld [vmem:[%s2127_s0 + $0x8] sm:$0xff]   ;;  %v1665_v11 = vld [vmem:[%s2127_s0 + $0x10] sm:$0xff]  }
   0x5   :  { %1575 = vmatprep.mubr.bf16.mxu0 %v1663_v4  ;;  %1607 = vmatprep.mubr.bf16.mxu1 %v1679_v9  ;;  %v1680_v12 = vld [vmem:[%s2127_s0 + $0x88] sm:$0xff]   ;;  %v1681_v13 = vld [vmem:[%s2127_s0 + $0x90] sm:$0xff]   ;;  %v1666_v14 = vld [vmem:[%s2127_s0 + $0x18] sm:$0xff]  }
   0x6   :  { %v1667_v15 = vld [vmem:[%s2127_s0 + $0x20] sm:$0xff]   ;;  %v1682_v16 = vld [vmem:[%s2127_s0 + $0x98] sm:$0xff]   ;;  %v1668_v18 = vld [vmem:[%s2127_s0 + $0x28] sm:$0xff]  }
   0x7   :  { %1562 = vmatpush3.bf16.msra.mxu0 %v1656_v1  ;;  %1648 = vmatpush3.bf16.msra.mxu1 %v1656_v1  ;;  %v1683_v17 = vld [vmem:[%s2127_s0 + $0xa0] sm:$0xff]   ;;  %v1684_v19 = vld [vmem:[%s2127_s0 + $0xa8] sm:$0xff]   ;;  %v1669_v20 = vld [vmem:[%s2127_s0 + $0x30] sm:$0xff]  }
   0x8   :  { %1563 = vmatprep.subr.bf16.mxu0 %v1657_v2  ;;  %1641 = vmatprep.subr.bf16.mxu1 %v1657_v2  ;;  %v1685_v21 = vld [vmem:[%s2127_s0 + $0xb0] sm:$0xff]   ;;  %v1670_v22 = vld [vmem:[%s2127_s0 + $0x38] sm:$0xff]   ;;  %v1671_v24 = vld [vmem:[%s2127_s0 + $0x40] sm:$0xff]  }
   0x9   :  { %v1686_v23 = vld [vmem:[%s2127_s0 + $0xb8] sm:$0xff]   ;;  %v1687_v25 = vld [vmem:[%s2127_s0 + $0xc0] sm:$0xff]   ;;  %v1672_v26 = vld [vmem:[%s2127_s0 + $0x48] sm:$0xff]  }
   0xa   :  { %v1688_v27 = vld [vmem:[%s2127_s0 + $0xc8] sm:$0xff]   ;;  %v1673_v28 = vld [vmem:[%s2127_s0 + $0x50] sm:$0xff]   ;;  %v1674_v30 = vld [vmem:[%s2127_s0 + $0x58] sm:$0xff]  }
   0xb   :  { %1564 = vmatpush3.bf16.msra.mxu0 %v1657_v2  ;;  %1649 = vmatpush3.bf16.msra.mxu1 %v1657_v2  ;;  %v1689_v29 = vld [vmem:[%s2127_s0 + $0xd0] sm:$0xff]   ;;  %v1690_v31 = vld [vmem:[%s2127_s0 + $0xd8] sm:$0xff]   ;;  %v1675_v32 = vld [vmem:[%s2127_s0 + $0x60] sm:$0xff]  }
   0xc   :  { %1565 = vmatprep.subr.bf16.mxu0 %v1658_v3  ;;  %1642 = vmatprep.subr.bf16.mxu1 %v1658_v3  ;;  %v1691_v33 = vld [vmem:[%s2127_s0 + $0xe0] sm:$0xff]   ;;  %v1676_v34 = vld [vmem:[%s2127_s0 + $0x68] sm:$0xff]   ;;  %v1677_v36 = vld [vmem:[%s2127_s0 + $0x70] sm:$0xff]  }
   0xd   :  { %v1692_v35 = vld [vmem:[%s2127_s0 + $0xe8] sm:$0xff]   ;;  %v1693_v37 = vld [vmem:[%s2127_s0 + $0xf0] sm:$0xff]   ;;  %v1678_v38 = vld [vmem:[%s2127_s0 + $0x78] sm:$0xff]  }
   0xe   :  { %v1694_v39 = vld [vmem:[%s2127_s0 + $0xf8] sm:$0xff]  }
   0xf   :  { %1566 = vmatpush3.bf16.msra.mxu0 %v1658_v3  ;;  %1650 = vmatpush3.bf16.msra.mxu1 %v1658_v3 }
  0x10   :  { %1567 = vmatprep.subr.bf16.mxu0 %v1659_v5  ;;  %1643 = vmatprep.subr.bf16.mxu1 %v1659_v5 }
  0x13   :  { %1568 = vmatpush3.bf16.msra.mxu0 %v1659_v5  ;;  %1651 = vmatpush3.bf16.msra.mxu1 %v1659_v5 }
  0x14   :  { %1569 = vmatprep.subr.bf16.mxu0 %v1660_v6  ;;  %1644 = vmatprep.subr.bf16.mxu1 %v1660_v6 }
  0x17   :  { %1570 = vmatpush3.bf16.msra.mxu0 %v1660_v6  ;;  %1652 = vmatpush3.bf16.msra.mxu1 %v1660_v6 }
  0x18   :  { %1571 = vmatprep.subr.bf16.mxu0 %v1661_v7  ;;  %1645 = vmatprep.subr.bf16.mxu1 %v1661_v7 }
  0x1b   :  { %1572 = vmatpush3.bf16.msra.mxu0 %v1661_v7  ;;  %1653 = vmatpush3.bf16.msra.mxu1 %v1661_v7 }
  0x1c   :  { %1573 = vmatprep.subr.bf16.mxu0 %v1662_v8  ;;  %1646 = vmatprep.subr.bf16.mxu1 %v1662_v8 }
  0x1f   :  { %1574 = vmatpush3.bf16.msra.mxu0 %v1662_v8  ;;  %1654 = vmatpush3.bf16.msra.mxu1 %v1662_v8 }
  0x22   :  { %1576 = vmatmul.mubr.bf16.vlgmr.msra.gmra.mrb[0].mxu0 %v1664_v10  ;;  %1608 = vmatmul.mubr.bf16.vlgmr.msra.gmra.mrb[0].mxu1 %v1680_v12 }
  0x23   :  { %1579 = vmatprep.mubr.bf16.mxu0 %v1665_v11  ;;  %1611 = vmatprep.mubr.bf16.mxu1 %v1681_v13 }
  0x2a   :  { %1580 = vmatmul.mubr.bf16.gmra.mrb[4].mxu0 %v1666_v14  ;;  %1612 = vmatmul.mubr.bf16.gmra.mrb[4].mxu1 %v1682_v16 }
  0x2b   :  { %1583 = vmatprep.mubr.bf16.mxu0 %v1667_v15  ;;  %1615 = vmatprep.mubr.bf16.mxu1 %v1683_v17 }
  0x32   :  { %1584 = vmatmul.mubr.bf16.gmra.mrb[8].mxu0 %v1668_v18  ;;  %1616 = vmatmul.mubr.bf16.gmra.mrb[8].mxu1 %v1684_v19 }
  0x33   :  { %1587 = vmatprep.mubr.bf16.mxu0 %v1669_v20  ;;  %1619 = vmatprep.mubr.bf16.mxu1 %v1685_v21 }
  0x3a   :  { %1588 = vmatmul.mubr.bf16.gmra.mrb[12].mxu0 %v1670_v22  ;;  %1620 = vmatmul.mubr.bf16.gmra.mrb[12].mxu1 %v1686_v23 }
  0x3b   :  { %1591 = vmatprep.mubr.bf16.mxu0 %v1671_v24  ;;  %1623 = vmatprep.mubr.bf16.mxu1 %v1687_v25 }
  0x42   :  { %1592 = vmatmul.mubr.bf16.gmra.mrb[16].mxu0 %v1672_v26  ;;  %1624 = vmatmul.mubr.bf16.gmra.mrb[16].mxu1 %v1688_v27 }
  0x43   :  { %1595 = vmatprep.mubr.bf16.mxu0 %v1673_v28  ;;  %1627 = vmatprep.mubr.bf16.mxu1 %v1689_v29 }
  0x4a   :  { %1596 = vmatmul.mubr.bf16.gmra.mrb[20].mxu0 %v1674_v30  ;;  %1628 = vmatmul.mubr.bf16.gmra.mrb[20].mxu1 %v1690_v31 }
  0x4b   :  { %1599 = vmatprep.mubr.bf16.mxu0 %v1675_v32  ;;  %1631 = vmatprep.mubr.bf16.mxu1 %v1691_v33 }
  0x52   :  { %1600 = vmatmul.mubr.bf16.gmra.mrb[24].mxu0 %v1676_v34  ;;  %1632 = vmatmul.mubr.bf16.gmra.mrb[24].mxu1 %v1692_v35 }
  0x53   :  { %1603 = vmatprep.mubr.bf16.mxu0 %v1677_v36  ;;  %1635 = vmatprep.mubr.bf16.mxu1 %v1693_v37 }
  0x5a   :  { %1604 = vmatmul.mubr.bf16.gmra.mrb[28].mxu0 %v1678_v38  ;;  %1636 = vmatmul.mubr.bf16.gmra.mrb[28].mxu1 %v1694_v39 }
  0xf5   :  { %v1577_v40 = vpop.f32.mrb[0].mxu0  ;;  %v1835_v41 = vpop.f32.mrb[0].mxu1 }
  0xf6   :  { %v368_v42 = vpop.f32.mrb[1].mxu0  ;;  %v1837_v43 = vpop.f32.mrb[1].mxu1  ;;  %v1014_v55 = vmul.f32 %v1577_v40, %v1577_v40 }
  0xf7   :  { %v1578_v44 = vpop.f32.mrb[2].mxu0  ;;  %v1839_v45 = vpop.f32.mrb[2].mxu1  ;;  %v1012_v46 = vmul.f32 %v368_v42, %v368_v42 }
  0xf8   :  { %v1336_v47 = vpack.c.bf16 %v1578_v44, %v1577_v40  ;;  %v371_v48 = vpop.f32.mrb[3].mxu0  ;;  %v1416_v49 = vpack.c.bf16 %v1839_v45, %v1835_v41  ;;  %v1843_v50 = vpop.f32.mrb[3].mxu1  ;;  %v1015_v58 = vmul.f32 %v1578_v44, %v1578_v44 }
  0xf9   :  { %v1331_v51 = vpack.c.bf16 %v371_v48, %v368_v42  ;;  %v943_v52 = vadd.f32 %v371_v48, %v368_v42  ;;  %v1013_v53 = vmul.f32 %v371_v48, %v371_v48  ;;  %v1411_v54 = vpack.c.bf16 %v1843_v50, %v1837_v43 }
  0xfa   :  { %1488 = vst [vmem:[%s2128_s2 + $0x8] sm:$0xff] %v1336_v47   ;;  %1504 = vst [vmem:[%s2128_s2 + $0x88] sm:$0xff] %v1416_v49  }
  0xfb   :  { %1332 = vst [vmem:[%s2128_s2] sm:$0xff] %v1331_v51   ;;  %v944_v56 = vadd.f32 %v1577_v40, %v943_v52  ;;  %v1076_v57 = vadd.f32 %v1013_v53, %v1012_v46  ;;  %1503 = vst [vmem:[%s2128_s2 + $0x80] sm:$0xff] %v1411_v54  }
  0xfd   :  { %v1077_v59 = vadd.f32 %v1076_v57, %v1014_v55  ;;  %v1581_v60 = vpop.f32.mrb[4].mxu0  ;;  %v945_v61 = vadd.f32 %v1578_v44, %v944_v56  ;;  %v1859_v62 = vpop.f32.mrb[4].mxu1 }
  0xfe   :  { %v384_v63 = vpop.f32.mrb[5].mxu0  ;;  %v1861_v0 = vpop.f32.mrb[5].mxu1  ;;  %v1018_v15 = vmul.f32 %v1581_v60, %v1581_v60 }
  0xff   :  { %v946_v1 = vadd.f32 %v945_v61, %v384_v63  ;;  %v1016_v2 = vmul.f32 %v384_v63, %v384_v63  ;;  %v1078_v3 = vadd.f32 %v1077_v59, %v1015_v58  ;;  %v1582_v4 = vpop.f32.mrb[6].mxu0  ;;  %v1863_v5 = vpop.f32.mrb[6].mxu1 }
 0x100   :  { %v1346_v6 = vpack.c.bf16 %v1582_v4, %v1581_v60  ;;  %v387_v7 = vpop.f32.mrb[7].mxu0  ;;  %v1426_v8 = vpack.c.bf16 %v1863_v5, %v1859_v62  ;;  %v1867_v9 = vpop.f32.mrb[7].mxu1  ;;  %v1019_v18 = vmul.f32 %v1582_v4, %v1582_v4 }
 0x101   :  { %v1079_v10 = vadd.f32 %v1078_v3, %v1016_v2  ;;  %v1341_v11 = vpack.c.bf16 %v387_v7, %v384_v63  ;;  %v947_v12 = vadd.f32 %v946_v1, %v387_v7  ;;  %v1017_v13 = vmul.f32 %v387_v7, %v387_v7 }
 0x102   :  { %1490 = vst [vmem:[%s2128_s2 + $0x18] sm:$0xff] %v1346_v6   ;;  %1506 = vst [vmem:[%s2128_s2 + $0x98] sm:$0xff] %v1426_v8   ;;  %v1421_v14 = vpack.c.bf16 %v1867_v9, %v1861_v0 }
 0x103   :  { %1489 = vst [vmem:[%s2128_s2 + $0x10] sm:$0xff] %v1341_v11   ;;  %v948_v16 = vadd.f32 %v1581_v60, %v947_v12  ;;  %v1080_v17 = vadd.f32 %v1079_v10, %v1017_v13 }
 0x104   :  { %1505 = vst [vmem:[%s2128_s2 + $0x90] sm:$0xff] %v1421_v14  }
 0x105   :  { %v1081_v19 = vadd.f32 %v1080_v17, %v1018_v15  ;;  %v1585_v20 = vpop.f32.mrb[8].mxu0  ;;  %v949_v21 = vadd.f32 %v1582_v4, %v948_v16  ;;  %v1883_v22 = vpop.f32.mrb[8].mxu1 }
 0x106   :  { %v400_v23 = vpop.f32.mrb[9].mxu0  ;;  %v1885_v24 = vpop.f32.mrb[9].mxu1  ;;  %v1022_v39 = vmul.f32 %v1585_v20, %v1585_v20 }
 0x107   :  { %v950_v25 = vadd.f32 %v949_v21, %v400_v23  ;;  %v1020_v26 = vmul.f32 %v400_v23, %v400_v23  ;;  %v1082_v27 = vadd.f32 %v1081_v19, %v1019_v18  ;;  %v1586_v28 = vpop.f32.mrb[10].mxu0  ;;  %v1887_v29 = vpop.f32.mrb[10].mxu1 }
 0x108   :  { %v1356_v30 = vpack.c.bf16 %v1586_v28, %v1585_v20  ;;  %v403_v31 = vpop.f32.mrb[11].mxu0  ;;  %v1436_v32 = vpack.c.bf16 %v1887_v29, %v1883_v22  ;;  %v1891_v33 = vpop.f32.mrb[11].mxu1  ;;  %v1023_v44 = vmul.f32 %v1586_v28, %v1586_v28 }
 0x109   :  { %v1083_v34 = vadd.f32 %v1082_v27, %v1020_v26  ;;  %v1351_v35 = vpack.c.bf16 %v403_v31, %v400_v23  ;;  %v951_v36 = vadd.f32 %v950_v25, %v403_v31  ;;  %v1021_v37 = vmul.f32 %v403_v31, %v403_v31 }
 0x10a   :  { %1492 = vst [vmem:[%s2128_s2 + $0x28] sm:$0xff] %v1356_v30   ;;  %1508 = vst [vmem:[%s2128_s2 + $0xa8] sm:$0xff] %v1436_v32   ;;  %v1431_v38 = vpack.c.bf16 %v1891_v33, %v1885_v24 }
 0x10b   :  { %1491 = vst [vmem:[%s2128_s2 + $0x20] sm:$0xff] %v1351_v35   ;;  %v952_v40 = vadd.f32 %v1585_v20, %v951_v36  ;;  %v1084_v42 = vadd.f32 %v1083_v34, %v1021_v37 }
 0x10c   :  { %1507 = vst [vmem:[%s2128_s2 + $0xa0] sm:$0xff] %v1431_v38  }
 0x10d   :  { %v1085_v46 = vadd.f32 %v1084_v42, %v1022_v39  ;;  %v1589_v47 = vpop.f32.mrb[12].mxu0  ;;  %v953_v48 = vadd.f32 %v1586_v28, %v952_v40  ;;  %v1907_v49 = vpop.f32.mrb[12].mxu1 }
 0x10e   :  { %v416_v51 = vpop.f32.mrb[13].mxu0  ;;  %v1909_v52 = vpop.f32.mrb[13].mxu1  ;;  %v1026_v6 = vmul.f32 %v1589_v47, %v1589_v47 }
 0x10f   :  { %v954_v53 = vadd.f32 %v953_v48, %v416_v51  ;;  %v1024_v54 = vmul.f32 %v416_v51, %v416_v51  ;;  %v1086_v55 = vadd.f32 %v1085_v46, %v1023_v44  ;;  %v1590_v56 = vpop.f32.mrb[14].mxu0  ;;  %v1911_v57 = vpop.f32.mrb[14].mxu1 }
 0x110   :  { %v1366_v58 = vpack.c.bf16 %v1590_v56, %v1589_v47  ;;  %v419_v59 = vpop.f32.mrb[15].mxu0  ;;  %v1446_v60 = vpack.c.bf16 %v1911_v57, %v1907_v49  ;;  %v1915_v61 = vpop.f32.mrb[15].mxu1  ;;  %v1027_v10 = vmul.f32 %v1590_v56, %v1590_v56 }
 0x111   :  { %v1087_v63 = vadd.f32 %v1086_v55, %v1024_v54  ;;  %v1361_v1 = vpack.c.bf16 %v419_v59, %v416_v51  ;;  %v955_v2 = vadd.f32 %v954_v53, %v419_v59  ;;  %v1025_v3 = vmul.f32 %v419_v59, %v419_v59 }
 0x112   :  { %1494 = vst [vmem:[%s2128_s2 + $0x38] sm:$0xff] %v1366_v58   ;;  %1510 = vst [vmem:[%s2128_s2 + $0xb8] sm:$0xff] %v1446_v60   ;;  %v1441_v4 = vpack.c.bf16 %v1915_v61, %v1909_v52 }
 0x113   :  { %1493 = vst [vmem:[%s2128_s2 + $0x30] sm:$0xff] %v1361_v1   ;;  %v956_v7 = vadd.f32 %v1589_v47, %v955_v2  ;;  %v1088_v8 = vadd.f32 %v1087_v63, %v1025_v3 }
 0x114   :  { %1509 = vst [vmem:[%s2128_s2 + $0xb0] sm:$0xff] %v1441_v4  }
 0x115   :  { %v1089_v11 = vadd.f32 %v1088_v8, %v1026_v6  ;;  %v1593_v12 = vpop.f32.mrb[16].mxu0  ;;  %v957_v13 = vadd.f32 %v1590_v56, %v956_v7  ;;  %v1931_v14 = vpop.f32.mrb[16].mxu1 }
 0x116   :  { %v432_v15 = vpop.f32.mrb[17].mxu0  ;;  %v1933_v16 = vpop.f32.mrb[17].mxu1  ;;  %v1030_v35 = vmul.f32 %v1593_v12, %v1593_v12 }
 0x117   :  { %v958_v17 = vadd.f32 %v957_v13, %v432_v15  ;;  %v1028_v18 = vmul.f32 %v432_v15, %v432_v15  ;;  %v1090_v19 = vadd.f32 %v1089_v11, %v1027_v10  ;;  %v1594_v20 = vpop.f32.mrb[18].mxu0  ;;  %v1935_v21 = vpop.f32.mrb[18].mxu1 }
 0x118   :  { %v1376_v23 = vpack.c.bf16 %v1594_v20, %v1593_v12  ;;  %v435_v25 = vpop.f32.mrb[19].mxu0  ;;  %v1456_v26 = vpack.c.bf16 %v1935_v21, %v1931_v14  ;;  %v1939_v27 = vpop.f32.mrb[19].mxu1  ;;  %v1031_v38 = vmul.f32 %v1594_v20, %v1594_v20 }
 0x119   :  { %v1091_v28 = vadd.f32 %v1090_v19, %v1028_v18  ;;  %v1371_v30 = vpack.c.bf16 %v435_v25, %v432_v15  ;;  %v959_v31 = vadd.f32 %v958_v17, %v435_v25  ;;  %v1029_v32 = vmul.f32 %v435_v25, %v435_v25 }
 0x11a   :  { %1496 = vst [vmem:[%s2128_s2 + $0x48] sm:$0xff] %v1376_v23   ;;  %1512 = vst [vmem:[%s2128_s2 + $0xc8] sm:$0xff] %v1456_v26   ;;  %v1451_v34 = vpack.c.bf16 %v1939_v27, %v1933_v16 }
 0x11b   :  { %1495 = vst [vmem:[%s2128_s2 + $0x40] sm:$0xff] %v1371_v30   ;;  %v960_v36 = vadd.f32 %v1593_v12, %v959_v31  ;;  %v1092_v37 = vadd.f32 %v1091_v28, %v1029_v32 }
 0x11c   :  { %1511 = vst [vmem:[%s2128_s2 + $0xc0] sm:$0xff] %v1451_v34  }
 0x11d   :  { %v1093_v39 = vadd.f32 %v1092_v37, %v1030_v35  ;;  %v1597_v40 = vpop.f32.mrb[20].mxu0  ;;  %v961_v42 = vadd.f32 %v1594_v20, %v960_v36  ;;  %v1955_v44 = vpop.f32.mrb[20].mxu1 }
 0x11e   :  { %v448_v46 = vpop.f32.mrb[21].mxu0  ;;  %v1957_v47 = vpop.f32.mrb[21].mxu1  ;;  %v1034_v6 = vmul.f32 %v1597_v40, %v1597_v40 }
 0x11f   :  { %v962_v48 = vadd.f32 %v961_v42, %v448_v46  ;;  %v1032_v51 = vmul.f32 %v448_v46, %v448_v46  ;;  %v1094_v53 = vadd.f32 %v1093_v39, %v1031_v38  ;;  %v1598_v54 = vpop.f32.mrb[22].mxu0  ;;  %v1959_v55 = vpop.f32.mrb[22].mxu1 }
 0x120   :  { %v1386_v56 = vpack.c.bf16 %v1598_v54, %v1597_v40  ;;  %v451_v58 = vpop.f32.mrb[23].mxu0  ;;  %v1466_v59 = vpack.c.bf16 %v1959_v55, %v1955_v44  ;;  %v1963_v60 = vpop.f32.mrb[23].mxu1  ;;  %v1035_v10 = vmul.f32 %v1598_v54, %v1598_v54 }
 0x121   :  { %v1095_v63 = vadd.f32 %v1094_v53, %v1032_v51  ;;  %v1381_v1 = vpack.c.bf16 %v451_v58, %v448_v46  ;;  %v963_v2 = vadd.f32 %v962_v48, %v451_v58  ;;  %v1033_v3 = vmul.f32 %v451_v58, %v451_v58 }
 0x122   :  { %1498 = vst [vmem:[%s2128_s2 + $0x58] sm:$0xff] %v1386_v56   ;;  %1514 = vst [vmem:[%s2128_s2 + $0xd8] sm:$0xff] %v1466_v59   ;;  %v1461_v4 = vpack.c.bf16 %v1963_v60, %v1957_v47 }
 0x123   :  { %1497 = vst [vmem:[%s2128_s2 + $0x50] sm:$0xff] %v1381_v1   ;;  %v964_v7 = vadd.f32 %v1597_v40, %v963_v2  ;;  %v1096_v8 = vadd.f32 %v1095_v63, %v1033_v3 }
 0x124   :  { %1513 = vst [vmem:[%s2128_s2 + $0xd0] sm:$0xff] %v1461_v4  }
 0x125   :  { %v1097_v11 = vadd.f32 %v1096_v8, %v1034_v6  ;;  %v1601_v12 = vpop.f32.mrb[24].mxu0  ;;  %v965_v13 = vadd.f32 %v1598_v54, %v964_v7  ;;  %v1979_v15 = vpop.f32.mrb[24].mxu1 }
 0x126   :  { %v464_v17 = vpop.f32.mrb[25].mxu0  ;;  %v1981_v18 = vpop.f32.mrb[25].mxu1  ;;  %v1038_v39 = vmul.f32 %v1601_v12, %v1601_v12 }
 0x127   :  { %v966_v19 = vadd.f32 %v965_v13, %v464_v17  ;;  %v1036_v20 = vmul.f32 %v464_v17, %v464_v17  ;;  %v1098_v23 = vadd.f32 %v1097_v11, %v1035_v10  ;;  %v1602_v25 = vpop.f32.mrb[26].mxu0  ;;  %v1983_v26 = vpop.f32.mrb[26].mxu1 }
 0x128   :  { %v1396_v28 = vpack.c.bf16 %v1602_v25, %v1601_v12  ;;  %v467_v30 = vpop.f32.mrb[27].mxu0  ;;  %v1476_v31 = vpack.c.bf16 %v1983_v26, %v1979_v15  ;;  %v1987_v32 = vpop.f32.mrb[27].mxu1  ;;  %v1039_v46 = vmul.f32 %v1602_v25, %v1602_v25 }
 0x129   :  { %v1099_v34 = vadd.f32 %v1098_v23, %v1036_v20  ;;  %v1391_v35 = vpack.c.bf16 %v467_v30, %v464_v17  ;;  %v967_v36 = vadd.f32 %v966_v19, %v467_v30  ;;  %v1037_v37 = vmul.f32 %v467_v30, %v467_v30 }
 0x12a   :  { %1500 = vst [vmem:[%s2128_s2 + $0x68] sm:$0xff] %v1396_v28   ;;  %1516 = vst [vmem:[%s2128_s2 + $0xe8] sm:$0xff] %v1476_v31   ;;  %v1471_v38 = vpack.c.bf16 %v1987_v32, %v1981_v18  ;;  %v1044_v31 = vmul.f32 %v1837_v43, %v1837_v43 }
 0x12b   :  { %1499 = vst [vmem:[%s2128_s2 + $0x60] sm:$0xff] %v1391_v35   ;;  %v968_v40 = vadd.f32 %v1601_v12, %v967_v36  ;;  %v1100_v42 = vadd.f32 %v1099_v34, %v1037_v37 }
 0x12c   :  { %1515 = vst [vmem:[%s2128_s2 + $0xe0] sm:$0xff] %v1471_v38   ;;  %v1045_v38 = vmul.f32 %v1843_v50, %v1843_v50 }
 0x12d   :  { %v1101_v48 = vadd.f32 %v1100_v42, %v1038_v39  ;;  %v1605_v51 = vpop.f32.mrb[28].mxu0  ;;  %v969_v53 = vadd.f32 %v1602_v25, %v968_v40  ;;  %v2003_v54 = vpop.f32.mrb[28].mxu1  ;;  %v1046_v39 = vmul.f32 %v1835_v41, %v1835_v41 }
 0x12e   :  { %v480_v56 = vpop.f32.mrb[29].mxu0  ;;  %v2005_v58 = vpop.f32.mrb[29].mxu1  ;;  %v1042_v19 = vmul.f32 %v1605_v51, %v1605_v51 }
 0x12f   :  { %v970_v59 = vadd.f32 %v969_v53, %v480_v56  ;;  %v1040_v63 = vmul.f32 %v480_v56, %v480_v56  ;;  %v1102_v1 = vadd.f32 %v1101_v48, %v1039_v46  ;;  %v1606_v2 = vpop.f32.mrb[30].mxu0  ;;  %v2007_v3 = vpop.f32.mrb[30].mxu1  ;;  %v1047_v46 = vmul.f32 %v1839_v45, %v1839_v45 }
 0x130   :  { %v1406_v4 = vpack.c.bf16 %v1606_v2, %v1605_v51  ;;  %v483_v6 = vpop.f32.mrb[31].mxu0  ;;  %v1486_v7 = vpack.c.bf16 %v2007_v3, %v2003_v54  ;;  %v2011_v8 = vpop.f32.mrb[31].mxu1  ;;  %v1043_v25 = vmul.f32 %v1606_v2, %v1606_v2 }
 0x131   :  { %v1103_v10 = vadd.f32 %v1102_v1, %v1040_v63  ;;  %v1401_v11 = vpack.c.bf16 %v483_v6, %v480_v56  ;;  %v971_v12 = vadd.f32 %v970_v59, %v483_v6  ;;  %v1041_v13 = vmul.f32 %v483_v6, %v483_v6 }
 0x132   :  { %1502 = vst [vmem:[%s2128_s2 + $0x78] sm:$0xff] %v1406_v4   ;;  %1518 = vst [vmem:[%s2128_s2 + $0xf8] sm:$0xff] %v1486_v7   ;;  %v1481_v17 = vpack.c.bf16 %v2011_v8, %v2005_v58  ;;  %v1049_v63 = vmul.f32 %v1867_v9, %v1867_v9 }
 0x133   :  { %1501 = vst [vmem:[%s2128_s2 + $0x70] sm:$0xff] %v1401_v11   ;;  %v972_v20 = vadd.f32 %v1605_v51, %v971_v12  ;;  %v1104_v23 = vadd.f32 %v1103_v10, %v1041_v13  ;;  %v1053_v12 = vmul.f32 %v1891_v33, %v1891_v33 }
 0x134   :  { %1517 = vst [vmem:[%s2128_s2 + $0xf0] sm:$0xff] %v1481_v17  }
 0x135   :  { %v1105_v28 = vadd.f32 %v1104_v23, %v1042_v19  ;;  %v973_v30 = vadd.f32 %v1606_v2, %v972_v20 }
 0x137   :  { %v974_v34 = vadd.f32 %v973_v30, %v1837_v43  ;;  %v1106_v35 = vadd.f32 %v1105_v28, %v1043_v25  ;;  %v1048_v43 = vmul.f32 %v1861_v0, %v1861_v0  ;;  %v1057_v30 = vmul.f32 %v1915_v61, %v1915_v61 }
 0x139   :  { %v1107_v36 = vadd.f32 %v1106_v35, %v1044_v31  ;;  %v975_v37 = vadd.f32 %v974_v34, %v1843_v50 }
 0x13b   :  { %v976_v40 = vadd.f32 %v1835_v41, %v975_v37  ;;  %v1108_v42 = vadd.f32 %v1107_v36, %v1045_v38  ;;  %v1050_v41 = vmul.f32 %v1859_v62, %v1859_v62 }
 0x13d   :  { %v1109_v48 = vadd.f32 %v1108_v42, %v1046_v39  ;;  %v977_v51 = vadd.f32 %v1839_v45, %v976_v40  ;;  %v1051_v45 = vmul.f32 %v1863_v5, %v1863_v5  ;;  %v1061_v40 = vmul.f32 %v1939_v27, %v1939_v27 }
 0x13f   :  { %v978_v53 = vadd.f32 %v977_v51, %v1861_v0  ;;  %v1110_v56 = vadd.f32 %v1109_v48, %v1047_v46  ;;  %v1052_v0 = vmul.f32 %v1885_v24, %v1885_v24 }
 0x141   :  { %v1111_v59 = vadd.f32 %v1110_v56, %v1048_v43  ;;  %v979_v50 = vadd.f32 %v978_v53, %v1867_v9 }
 0x143   :  { %v980_v1 = vadd.f32 %v1859_v62, %v979_v50  ;;  %v1112_v2 = vadd.f32 %v1111_v59, %v1049_v63  ;;  %v1054_v62 = vmul.f32 %v1883_v22, %v1883_v22  ;;  %v1065_v59 = vmul.f32 %v1963_v60, %v1963_v60 }
 0x145   :  { %v1113_v4 = vadd.f32 %v1112_v2, %v1050_v41  ;;  %v981_v6 = vadd.f32 %v1863_v5, %v980_v1  ;;  %v1055_v5 = vmul.f32 %v1887_v29, %v1887_v29 }
 0x147   :  { %v982_v7 = vadd.f32 %v981_v6, %v1885_v24  ;;  %v1114_v10 = vadd.f32 %v1113_v4, %v1051_v45  ;;  %v1056_v24 = vmul.f32 %v1909_v52, %v1909_v52  ;;  %v1069_v6 = vmul.f32 %v1987_v32, %v1987_v32 }
 0x149   :  { %v1115_v11 = vadd.f32 %v1114_v10, %v1052_v0  ;;  %v983_v9 = vadd.f32 %v982_v7, %v1891_v33 }
 0x14b   :  { %v984_v13 = vadd.f32 %v1883_v22, %v983_v9  ;;  %v1116_v17 = vadd.f32 %v1115_v11, %v1053_v12  ;;  %v1058_v22 = vmul.f32 %v1907_v49, %v1907_v49 }
 0x14d   :  { %v1117_v19 = vadd.f32 %v1116_v17, %v1054_v62  ;;  %v985_v20 = vadd.f32 %v1887_v29, %v984_v13  ;;  %v1059_v29 = vmul.f32 %v1911_v57, %v1911_v57  ;;  %v1073_v13 = vmul.f32 %v2011_v8, %v2011_v8 }
 0x14f   :  { %v986_v23 = vadd.f32 %v985_v20, %v1909_v52  ;;  %v1118_v25 = vadd.f32 %v1117_v19, %v1055_v5  ;;  %v1060_v52 = vmul.f32 %v1933_v16, %v1933_v16 }
 0x151   :  { %v1119_v28 = vadd.f32 %v1118_v25, %v1056_v24  ;;  %v987_v33 = vadd.f32 %v986_v23, %v1915_v61 }
 0x153   :  { %v988_v31 = vadd.f32 %v1907_v49, %v987_v33  ;;  %v1120_v34 = vadd.f32 %v1119_v28, %v1057_v30  ;;  %v1062_v49 = vmul.f32 %v1931_v14, %v1931_v14  ;;  %v1145_v28 = vlaneseq }
 0x155   :  { %v1121_v35 = vadd.f32 %v1120_v34, %v1058_v22  ;;  %v989_v36 = vadd.f32 %v1911_v57, %v988_v31  ;;  %v1063_v57 = vmul.f32 %v1935_v21, %v1935_v21  ;;  %v1146_v31 = vshrl.u32 %v1145_v28, 7 }
 0x157   :  { %v990_v37 = vadd.f32 %v989_v36, %v1933_v16  ;;  %v1122_v38 = vadd.f32 %v1121_v35, %v1059_v29  ;;  %v1064_v16 = vmul.f32 %v1957_v47, %v1957_v47  ;;  %vm1148_vm0 = vcmp.eq.s32.totalorder %v1146_v31, 1 }
 0x158   :  { %vm1147_vm1 = vcmp.eq.s32.totalorder %v1146_v31, 0 }
 0x159   :  { %v1123_v39 = vadd.f32 %v1122_v38, %v1060_v52  ;;  %v991_v61 = vadd.f32 %v990_v37, %v1939_v27 }
 0x15b   :  { %v992_v42 = vadd.f32 %v1931_v14, %v991_v61  ;;  %v1124_v46 = vadd.f32 %v1123_v39, %v1061_v40  ;;  %v1066_v14 = vmul.f32 %v1955_v44, %v1955_v44 }
 0x15d   :  { %v1125_v48 = vadd.f32 %v1124_v46, %v1062_v49  ;;  %v993_v51 = vadd.f32 %v1935_v21, %v992_v42  ;;  %v1067_v21 = vmul.f32 %v1959_v55, %v1959_v55 }
 0x15f   :  { %v994_v43 = vadd.f32 %v993_v51, %v1957_v47  ;;  %v1126_v53 = vadd.f32 %v1125_v48, %v1063_v57  ;;  %v1068_v47 = vmul.f32 %v1981_v18, %v1981_v18 }
 0x161   :  { %v1127_v56 = vadd.f32 %v1126_v53, %v1064_v16  ;;  %v995_v27 = vadd.f32 %v994_v43, %v1963_v60 }
 0x163   :  { %v996_v50 = vadd.f32 %v1955_v44, %v995_v27  ;;  %v1128_v63 = vadd.f32 %v1127_v56, %v1065_v59  ;;  %v1070_v44 = vmul.f32 %v1979_v15, %v1979_v15 }
 0x165   :  { %v1129_v41 = vadd.f32 %v1128_v63, %v1066_v14  ;;  %v997_v1 = vadd.f32 %v1959_v55, %v996_v50  ;;  %v1071_v55 = vmul.f32 %v1983_v26, %v1983_v26 }
 0x167   :  { %v998_v2 = vadd.f32 %v997_v1, %v1981_v18  ;;  %v1130_v45 = vadd.f32 %v1129_v41, %v1067_v21  ;;  %v1072_v18 = vmul.f32 %v2005_v58, %v2005_v58 }
 0x169   :  { %v1131_v4 = vadd.f32 %v1130_v45, %v1068_v47  ;;  %v999_v60 = vadd.f32 %v998_v2, %v1987_v32 }
 0x16b   :  { %v1000_v0 = vadd.f32 %v1979_v15, %v999_v60  ;;  %v1132_v7 = vadd.f32 %v1131_v4, %v1069_v6  ;;  %v1074_v15 = vmul.f32 %v2003_v54, %v2003_v54 }
 0x16d   :  { %v1133_v10 = vadd.f32 %v1132_v7, %v1070_v44  ;;  %v1001_v11 = vadd.f32 %v1983_v26, %v1000_v0  ;;  %v1075_v26 = vmul.f32 %v2007_v3, %v2007_v3 }
 0x16f   :  { %v1002_v9 = vadd.f32 %v1001_v11, %v2005_v58  ;;  %v1134_v12 = vadd.f32 %v1133_v10, %v1071_v55 }
 0x171   :  { %v1135_v62 = vadd.f32 %v1134_v12, %v1072_v18  ;;  %v1003_v32 = vadd.f32 %v1002_v9, %v2011_v8 }
 0x173   :  { %v1004_v17 = vadd.f32 %v2003_v54, %v1003_v32  ;;  %v1136_v5 = vadd.f32 %v1135_v62, %v1073_v13 }
 0x175   :  { %v1005_v19 = vadd.f32 %v2007_v3, %v1004_v17  ;;  %v1137_v20 = vadd.f32 %v1136_v5, %v1074_v15 }
 0x177   :  { %v1006_v58 = vrot.slane %v1005_v19, 4  ;;  %v1138_v24 = vadd.f32 %v1137_v20, %v1075_v26 }
 0x179   :  { %v1007_v23 = vadd.f32 %v1006_v58, %v1005_v19  ;;  %v1139_v25 = vrot.slane %v1138_v24, 4 }
 0x17b   :  { %v1008_v33 = vrot.slane %v1007_v23, 2  ;;  %v1140_v30 = vadd.f32 %v1139_v25, %v1138_v24 }
 0x17d   :  { %v1009_v8 = vadd.f32 %v1008_v33, %v1007_v23  ;;  %v1141_v22 = vrot.slane %v1140_v30, 2 }
 0x17f   :  { %v1142_v34 = vadd.f32 %v1141_v22, %v1140_v30  ;;  %v1010_v29 = vrot.slane %v1009_v8, 1 }
 0x181   :  { %v1143_v54 = vrot.slane %v1142_v34, 1  ;;  %v1011_v36 = vadd.f32 %v1010_v29, %v1009_v8 }
 0x183   :  { %v1144_v35 = vadd.f32 %v1143_v54, %v1142_v34 }
 0x185   :  { %v1149_v52 = vsel %vm1148_vm0, %v1144_v35, 0.0 }
 0x186   :  { %v1150_v3 = vsel %vm1147_vm1, %v1011_v36, %v1149_v52 }
 0x187   :  { %1151 = vst [vmem:[%s2129_s3] sm:$0xff] %v1150_v3 }

// kernel: _lambda_.37
= control target key start
LH: loop header
LB: loop body
LE: loop exit
PB: predicated region body
PF: predicated region fallthrough
CT: control target
= control target key end

     0   :  { %s12931_s12 = smov 0   ;;  %s12933_s13 = smov 0   ;;  %s14675_s0 = inlined_call_operand.vmem [shape: bf16[4096,2816], index: 0, kind: input, shape index: {}]   ;;  %s14676_s1 = inlined_call_operand.vmem [shape: bf16[2816,128], index: 1, kind: input, shape index: {}]   ;;  %s14677_s2 = inlined_call_operand.vmem [shape: f32[1,128], index: 2, kind: input, shape index: {}]   ;;  %s14678_s3 = inlined_call_operand.vmem [shape: f32[4096,128], index: 3, kind: output, shape index: {}]  }
   0x1   :  { %s12935_s14 = smov 0  }
   0x2 LB: > { %s25_s15 = sadd.s32 1, %s12904_s13  ;;  %p9283_p0 = scmp.ge.s32.totalorder %s12908_s14, 1  ;;  %s12908_s14 = sphi %s12935_s14, %s13_s14   ;;  %s12904_s13 = sphi %s12933_s13, %s14680_s13   ;;  %s12900_s12 = sphi %s12931_s12, %s14679_s12  }
   0x3   : > { %p27_p1 = scmp.ge.s32.totalorder %s25_s15, 8  ;;  %p170_p2 = scmp.lt.s32.totalorder %s12908_s14, 9 }
   0x5   : > { %s14682_s15 = smov (%p27_p1, %s25_s15), 0  ;;  %p171_p3 = pnand %p9283_p0, %p170_p2 }
   0x6   : > { %v11509_v0 = vld [vmem:[%s14676_s1] sm:$0xff] (!%p171_p3)   ;;  %v12910_v1 = vmov (!%p171_p3), 0   ;;  %v11511_v3 = vld [vmem:[%s14676_s1 + $0x8] sm:$0xff] (!%p171_p3)   ;;  %v11513_v5 = vld [vmem:[%s14676_s1 + $0x10] sm:$0xff] (!%p171_p3)   ;;  %s9284_s9 = sshll.u32 (!%p171_p3), %s12900_s12, 6 }
   0x7   : > { %174 = sbr.rel (%p171_p3) target bundleno = 1701 (0x6a5), region = 32  ;;  %5868 = vmatprep.subr.bf16.mxu1 (!%p171_p3), %v12910_v1  ;;  %7313 = vmatprep.subr.bf16.mxu0 (!%p171_p3), %v12910_v1  ;;  %v11510_v2 = vld [vmem:[%s14676_s1 + $0x280] sm:$0xff] (!%p171_p3)   ;;  %v11512_v4 = vld [vmem:[%s14676_s1 + $0x288] sm:$0xff] (!%p171_p3)   ;;  %v11514_v6 = vld [vmem:[%s14676_s1 + $0x290] sm:$0xff] (!%p171_p3)   ;;  %p206_p4 = scmp.lt.s32.totalorder (!%p171_p3), %s9284_s9, 511 }
   0x8   : > { %5869 = vmatpush1.bf16.msra.mxu1 (!%p171_p3), %v11509_v0  ;;  %7314 = vmatpush1.bf16.msra.mxu0 (!%p171_p3), %v11510_v2  ;;  %v11515_v7 = vld [vmem:[%s14676_s1 + $0x18] sm:$0xff] (!%p171_p3)   ;;  %v11517_v9 = vld [vmem:[%s14676_s1 + $0x20] sm:$0xff] (!%p171_p3)   ;;  %v11519_v11 = vld [vmem:[%s14676_s1 + $0x28] sm:$0xff] (!%p171_p3)  }
   0x9   : > { %5870 = vmatprep.subr.bf16.mxu1 (!%p171_p3), %v12910_v1  ;;  %7315 = vmatprep.subr.bf16.mxu0 (!%p171_p3), %v12910_v1  ;;  %v11516_v8 = vld [vmem:[%s14676_s1 + $0x298] sm:$0xff] (!%p171_p3)   ;;  %v11518_v10 = vld [vmem:[%s14676_s1 + $0x2a0] sm:$0xff] (!%p171_p3)   ;;  %v11520_v12 = vld [vmem:[%s14676_s1 + $0x2a8] sm:$0xff] (!%p171_p3)  }
   0xa   : > { %v11521_v13 = vld [vmem:[%s14676_s1 + $0x30] sm:$0xff] (!%p171_p3)   ;;  %v11523_v15 = vld [vmem:[%s14676_s1 + $0x38] sm:$0xff] (!%p171_p3)   ;;  %v11525_v17 = vld [vmem:[%s14676_s1 + $0x40] sm:$0xff] (!%p171_p3)  }
   0xb   : > { %v11522_v14 = vld [vmem:[%s14676_s1 + $0x2b0] sm:$0xff] (!%p171_p3)   ;;  %v11524_v16 = vld [vmem:[%s14676_s1 + $0x2b8] sm:$0xff] (!%p171_p3)   ;;  %v11526_v18 = vld [vmem:[%s14676_s1 + $0x2c0] sm:$0xff] (!%p171_p3)  }
   0xc   : > { %5871 = vmatpush1.bf16.msra.mxu1 (!%p171_p3), %v11511_v3  ;;  %7316 = vmatpush1.bf16.msra.mxu0 (!%p171_p3), %v11512_v4  ;;  %v11527_v20 = vld [vmem:[%s14676_s1 + $0x48] sm:$0xff] (!%p171_p3)   ;;  %v11529_v23 = vld [vmem:[%s14676_s1 + $0x50] sm:$0xff] (!%p171_p3)   ;;  %v11531_v25 = vld [vmem:[%s14676_s1 + $0x58] sm:$0xff] (!%p171_p3)  }
   0xd   : > { %5872 = vmatprep.subr.bf16.mxu1 (!%p171_p3), %v12910_v1  ;;  %7317 = vmatprep.subr.bf16.mxu0 (!%p171_p3), %v12910_v1  ;;  %v11528_v22 = vld [vmem:[%s14676_s1 + $0x2c8] sm:$0xff] (!%p171_p3)   ;;  %v11530_v24 = vld [vmem:[%s14676_s1 + $0x2d0] sm:$0xff] (!%p171_p3)   ;;  %v11532_v26 = vld [vmem:[%s14676_s1 + $0x2d8] sm:$0xff] (!%p171_p3)  }
   0xe   : > { %s14684_s9 = smov (!%p206_p4, %s9284_s9), 511  ;;  %v11533_v27 = vld [vmem:[%s14676_s1 + $0x60] sm:$0xff]   ;;  %v11535_v29 = vld [vmem:[%s14676_s1 + $0x68] sm:$0xff]   ;;  %v11537_v31 = vld [vmem:[%s14676_s1 + $0x70] sm:$0xff]  }
   0xf   : > { %s11483_s23 = smul.u32 88, %s14684_s9  ;;  %v11534_v28 = vld [vmem:[%s14676_s1 + $0x2e0] sm:$0xff]   ;;  %v11536_v30 = vld [vmem:[%s14676_s1 + $0x2e8] sm:$0xff]   ;;  %v11538_v32 = vld [vmem:[%s14676_s1 + $0x2f0] sm:$0xff]   ;;  %s9287_s4 = sshll.u32 %s14684_s9, 3 }
  0x10   : > { %5873 = vmatpush1.bf16.msra.mxu1 %v11513_v5  ;;  %7318 = vmatpush1.bf16.msra.mxu0 %v11514_v6  ;;  %v11539_v33 = vld [vmem:[%s14676_s1 + $0x78] sm:$0xff]   ;;  %v11547_v37 = vld [vmem:[%s14676_s1 + $0x80] sm:$0xff]   ;;  %v11562_v41 = vld [vmem:[%s14676_s1 + $0x88] sm:$0xff]   ;;  %s14503_s7 = scalar_lea.vmem %s14678_s3, %s9287_s4 }
  0x11   : > { %5874 = vmatprep.subr.bf16.mxu1 %v12910_v1  ;;  %7319 = vmatprep.subr.bf16.mxu0 %v12910_v1  ;;  %s13025_s30 = scalar_lea.vmem %s14675_s0, %s11483_s23  ;;  %v11540_v34 = vld [vmem:[%s14676_s1 + $0x2f8] sm:$0xff]   ;;  %v11548_v38 = vld [vmem:[%s14676_s1 + $0x300] sm:$0xff]   ;;  %v11555_v43 = vld [vmem:[%s14676_s1 + $0x308] sm:$0xff]  }
  0x12   : > { %v11543_v19 = vld [vmem:[%s13025_s30 + $0x4] ss:$88 sps:$4 sm:$0xff]   ;;  %v11541_v35 = vld [vmem:[%s13025_s30] ss:$88 sps:$4 sm:$0xff]   ;;  %v11549_v39 = vld [vmem:[%s13025_s30 + $0xb4] ss:$88 sps:$4 sm:$0xff]  }
  0x13   : > { %v11546_v21 = vld [vmem:[%s13025_s30 + $0x2c] ss:$88 sps:$4 sm:$0xff]   ;;  %5900 = vmatprep.mubr.bf16.mxu1 %v11543_v19  ;;  %v11544_v36 = vld [vmem:[%s13025_s30 + $0x28] ss:$88 sps:$4 sm:$0xff]   ;;  %v11551_v40 = vld [vmem:[%s13025_s30 + $0xdc] ss:$88 sps:$4 sm:$0xff]  }
  0x14   : > { %5875 = vmatpush1.bf16.msra.mxu1 %v11515_v7  ;;  %7320 = vmatpush1.bf16.msra.mxu0 %v11516_v8  ;;  %v11553_v42 = vld [vmem:[%s13025_s30 + $0xb0] ss:$88 sps:$4 sm:$0xff]   ;;  %v11556_v45 = vld [vmem:[%s13025_s30 + $0x164] ss:$88 sps:$4 sm:$0xff]   ;;  %v11560_v49 = vld [vmem:[%s13025_s30 + $0x160] ss:$88 sps:$4 sm:$0xff]  }
  0x15   : > { %5876 = vmatprep.subr.bf16.mxu1 %v12910_v1  ;;  %7321 = vmatprep.subr.bf16.mxu0 %v12910_v1  ;;  %v11554_v44 = vld [vmem:[%s13025_s30 + $0xd8] ss:$88 sps:$4 sm:$0xff]   ;;  %v11558_v46 = vld [vmem:[%s13025_s30 + $0x18c] ss:$88 sps:$4 sm:$0xff]   ;;  %v11561_v51 = vld [vmem:[%s13025_s30 + $0x188] ss:$88 sps:$4 sm:$0xff]  }
  0x16   : > { %7345 = vmatprep.mubr.bf16.mxu0 %v11546_v21  ;;  %v11563_v47 = vld [vmem:[%s14676_s1 + $0x310] sm:$0xff]   ;;  %v11570_v50 = vld [vmem:[%s14676_s1 + $0x318] sm:$0xff]   ;;  %v11578_v55 = vld [vmem:[%s14676_s1 + $0x320] sm:$0xff]  }
  0x17   : > { %v11577_v48 = vld [vmem:[%s14676_s1 + $0x90] sm:$0xff]   ;;  %v11592_v52 = vld [vmem:[%s14676_s1 + $0x98] sm:$0xff]   ;;  %v11607_v56 = vld [vmem:[%s14676_s1 + $0xa0] sm:$0xff]  }
  0x18   : > { %5877 = vmatpush1.bf16.msra.mxu1 %v11517_v9  ;;  %7322 = vmatpush1.bf16.msra.mxu0 %v11518_v10  ;;  %v11564_v53 = vld [vmem:[%s13025_s30 + $0x214] ss:$88 sps:$4 sm:$0xff]   ;;  %v11568_v57 = vld [vmem:[%s13025_s30 + $0x210] ss:$88 sps:$4 sm:$0xff]   ;;  %v11571_v61 = vld [vmem:[%s13025_s30 + $0x2c4] ss:$88 sps:$4 sm:$0xff]  }
  0x19   : > { %5878 = vmatprep.subr.bf16.mxu1 %v12910_v1  ;;  %7323 = vmatprep.subr.bf16.mxu0 %v12910_v1  ;;  %v11566_v54 = vld [vmem:[%s13025_s30 + $0x23c] ss:$88 sps:$4 sm:$0xff]   ;;  %v11585_v58 = vld [vmem:[%s14676_s1 + $0x328] sm:$0xff]   ;;  %v11569_v59 = vld [vmem:[%s13025_s30 + $0x238] ss:$88 sps:$4 sm:$0xff]  }
  0x1a   : > { %v11622_v60 = vld [vmem:[%s14676_s1 + $0xa8] sm:$0xff]   ;;  %v11593_v63 = vld [vmem:[%s14676_s1 + $0x330] sm:$0xff]   ;;  %v11600_v2 = vld [vmem:[%s14676_s1 + $0x338] sm:$0xff]  }
  0x1b   : > { %v11573_v62 = vld [vmem:[%s13025_s30 + $0x2ec] ss:$88 sps:$4 sm:$0xff]   ;;  %v11637_v0 = vld [vmem:[%s14676_s1 + $0xb0] sm:$0xff]   ;;  %v11575_v3 = vld [vmem:[%s13025_s30 + $0x2c0] ss:$88 sps:$4 sm:$0xff]  }
  0x1c   : > { %5879 = vmatpush1.bf16.msra.mxu1 %v11519_v11  ;;  %7324 = vmatpush1.bf16.msra.mxu0 %v11520_v12  ;;  %v11576_v4 = vld [vmem:[%s13025_s30 + $0x2e8] ss:$88 sps:$4 sm:$0xff]   ;;  %v11579_v5 = vld [vmem:[%s13025_s30 + $0x374] ss:$88 sps:$4 sm:$0xff]   ;;  %v11652_v6 = vld [vmem:[%s14676_s1 + $0xb8] sm:$0xff]  }
  0x1d   : > { %5880 = vmatprep.subr.bf16.mxu1 %v12910_v1  ;;  %7325 = vmatprep.subr.bf16.mxu0 %v12910_v1  ;;  %v11581_v7 = vld [vmem:[%s13025_s30 + $0x39c] ss:$88 sps:$4 sm:$0xff]   ;;  %v11608_v8 = vld [vmem:[%s14676_s1 + $0x340] sm:$0xff]   ;;  %v11583_v9 = vld [vmem:[%s13025_s30 + $0x370] ss:$88 sps:$4 sm:$0xff]  }
  0x1e   : > { %v11615_v10 = vld [vmem:[%s14676_s1 + $0x348] sm:$0xff]   ;;  %v11584_v11 = vld [vmem:[%s13025_s30 + $0x398] ss:$88 sps:$4 sm:$0xff]   ;;  %v11586_v12 = vld [vmem:[%s13025_s30 + $0x424] ss:$88 sps:$4 sm:$0xff]  }
  0x1f   : > { %v11594_v19 = vld [vmem:[%s13025_s30 + $0x4d4] ss:$88 sps:$4 sm:$0xff]  }
  0x20   : > { %5881 = vmatpush1.bf16.msra.mxu1 %v11521_v13  ;;  %7326 = vmatpush1.bf16.msra.mxu0 %v11522_v14  ;;  %v11588_v13 = vld [vmem:[%s13025_s30 + $0x44c] ss:$88 sps:$4 sm:$0xff]   ;;  %v11596_v21 = vld [vmem:[%s13025_s30 + $0x4fc] ss:$88 sps:$4 sm:$0xff]  }
  0x21   : > { %5882 = vmatprep.subr.bf16.mxu1 %v12910_v1  ;;  %7327 = vmatprep.subr.bf16.mxu0 %v12910_v1  ;;  %v11667_v14 = vld [vmem:[%s14676_s1 + $0xc0] sm:$0xff]  }
  0x24   : > { %5883 = vmatpush1.bf16.msra.mxu1 %v11523_v15  ;;  %7328 = vmatpush1.bf16.msra.mxu0 %v11524_v16  ;;  %v11623_v15 = vld [vmem:[%s14676_s1 + $0x350] sm:$0xff]   ;;  %v11590_v16 = vld [vmem:[%s13025_s30 + $0x420] ss:$88 sps:$4 sm:$0xff]  }
  0x25   : > { %5884 = vmatprep.subr.bf16.mxu1 %v12910_v1  ;;  %7329 = vmatprep.subr.bf16.mxu0 %v12910_v1 }
  0x28   : > { %5885 = vmatpush1.bf16.msra.mxu1 %v11525_v17  ;;  %7330 = vmatpush1.bf16.msra.mxu0 %v11526_v18  ;;  %v11630_v17 = vld [vmem:[%s14676_s1 + $0x358] sm:$0xff]   ;;  %v11591_v18 = vld [vmem:[%s13025_s30 + $0x448] ss:$88 sps:$4 sm:$0xff]  }
  0x29   : > { %5886 = vmatprep.subr.bf16.mxu1 %v12910_v1  ;;  %7331 = vmatprep.subr.bf16.mxu0 %v12910_v1 }
  0x2c   : > { %5887 = vmatpush1.bf16.msra.mxu1 %v11527_v20  ;;  %7332 = vmatpush1.bf16.msra.mxu0 %v11528_v22  ;;  %v11681_v20 = vld [vmem:[%s14676_s1 + $0xc8] sm:$0xff]   ;;  %v11638_v22 = vld [vmem:[%s14676_s1 + $0x360] sm:$0xff]  }
  0x2d   : > { %5888 = vmatprep.subr.bf16.mxu1 %v12910_v1  ;;  %7333 = vmatprep.subr.bf16.mxu0 %v12910_v1 }
  0x30   : > { %5889 = vmatpush1.bf16.msra.mxu1 %v11529_v23  ;;  %7334 = vmatpush1.bf16.msra.mxu0 %v11530_v24  ;;  %v11598_v23 = vld [vmem:[%s13025_s30 + $0x4d0] ss:$88 sps:$4 sm:$0xff]  }
  0x31   : > { %5890 = vmatprep.subr.bf16.mxu1 %v12910_v1  ;;  %7335 = vmatprep.subr.bf16.mxu0 %v12910_v1  ;;  %v11645_v24 = vld [vmem:[%s14676_s1 + $0x368] sm:$0xff]  }
  0x34   : > { %5891 = vmatpush1.bf16.msra.mxu1 %v11531_v25  ;;  %7336 = vmatpush1.bf16.msra.mxu0 %v11532_v26  ;;  %v11599_v25 = vld [vmem:[%s13025_s30 + $0x4f8] ss:$88 sps:$4 sm:$0xff]  }
  0x35   : > { %5892 = vmatprep.subr.bf16.mxu1 %v12910_v1  ;;  %7337 = vmatprep.subr.bf16.mxu0 %v12910_v1  ;;  %v11695_v26 = vld [vmem:[%s14676_s1 + $0xd0] sm:$0xff]  }
  0x38   : > { %5893 = vmatpush1.bf16.msra.mxu1 %v11533_v27  ;;  %7338 = vmatpush1.bf16.msra.mxu0 %v11534_v28  ;;  %v11601_v27 = vld [vmem:[%s13025_s30 + $0x584] ss:$88 sps:$4 sm:$0xff]  }
  0x39   : > { %5894 = vmatprep.subr.bf16.mxu1 %v12910_v1  ;;  %7339 = vmatprep.subr.bf16.mxu0 %v12910_v1  ;;  %v11603_v28 = vld [vmem:[%s13025_s30 + $0x5ac] ss:$88 sps:$4 sm:$0xff]  }
  0x3c   : > { %5895 = vmatpush1.bf16.msra.mxu1 %v11535_v29  ;;  %7340 = vmatpush1.bf16.msra.mxu0 %v11536_v30  ;;  %v11653_v29 = vld [vmem:[%s14676_s1 + $0x370] sm:$0xff]   ;;  %v11605_v30 = vld [vmem:[%s13025_s30 + $0x580] ss:$88 sps:$4 sm:$0xff]  }
  0x3d   : > { %5896 = vmatprep.subr.bf16.mxu1 %v12910_v1  ;;  %7341 = vmatprep.subr.bf16.mxu0 %v12910_v1 }
  0x40   : > { %5897 = vmatpush1.bf16.msra.mxu1 %v11537_v31  ;;  %7342 = vmatpush1.bf16.msra.mxu0 %v11538_v32  ;;  %v11660_v31 = vld [vmem:[%s14676_s1 + $0x378] sm:$0xff]  }
  0x41   : > { %5898 = vmatprep.subr.bf16.mxu1 %v12910_v1  ;;  %7343 = vmatprep.subr.bf16.mxu0 %v12910_v1  ;;  %v11709_v32 = vld [vmem:[%s14676_s1 + $0xd8] sm:$0xff]  }
  0x44   : > { %5899 = vmatpush1.bf16.msra.mxu1 %v11539_v33  ;;  %7344 = vmatpush1.bf16.msra.mxu0 %v11540_v34  ;;  %v11606_v33 = vld [vmem:[%s13025_s30 + $0x5a8] ss:$88 sps:$4 sm:$0xff]   ;;  %v11609_v34 = vld [vmem:[%s13025_s30 + $0x634] ss:$88 sps:$4 sm:$0xff]  }
  0x45   : > { %6157 = vmatprep.subr.bf16.mxu1 %v12910_v1  ;;  %7602 = vmatprep.subr.bf16.mxu0 %v12910_v1 }
  0x47   : > { %5901 = vmatmul.mubr.bf16.vlgmr.msra.gmra.mrb[0].mxu1 %v11541_v35  ;;  %7346 = vmatmul.mubr.bf16.vlgmr.msra.gmra.mrb[0].mxu0 %v11544_v36  ;;  %v11611_v35 = vld [vmem:[%s13025_s30 + $0x65c] ss:$88 sps:$4 sm:$0xff]   ;;  %v11723_v36 = vld [vmem:[%s14676_s1 + $0xe0] sm:$0xff]  }
  0x48   : > { %6158 = vmatpush1.bf16.msra.mxu1 %v11547_v37  ;;  %7603 = vmatpush1.bf16.msra.mxu0 %v11548_v38  ;;  %v11613_v37 = vld [vmem:[%s13025_s30 + $0x630] ss:$88 sps:$4 sm:$0xff]  }
  0x49   : > { %5908 = vmatprep.mubr.bf16.mxu1 %v11549_v39  ;;  %7353 = vmatprep.mubr.bf16.mxu0 %v11551_v40  ;;  %v11614_v38 = vld [vmem:[%s13025_s30 + $0x658] ss:$88 sps:$4 sm:$0xff]   ;;  %v11616_v39 = vld [vmem:[%s13025_s30 + $0x6e4] ss:$88 sps:$4 sm:$0xff]  }
  0x4a   : > { %7604 = vmatprep.subr.bf16.mxu0 %v12910_v1  ;;  %6159 = vmatprep.subr.bf16.mxu1 %v12910_v1  ;;  %v11618_v40 = vld [vmem:[%s13025_s30 + $0x70c] ss:$88 sps:$4 sm:$0xff]  }
  0x4c   : > { %6160 = vmatpush1.bf16.msra.mxu1 %v11562_v41  ;;  %7605 = vmatpush1.bf16.msra.mxu0 %v11555_v43  ;;  %v11620_v41 = vld [vmem:[%s13025_s30 + $0x6e0] ss:$88 sps:$4 sm:$0xff]   ;;  %v11624_v43 = vld [vmem:[%s13025_s30 + $0x794] ss:$88 sps:$4 sm:$0xff]  }
  0x4d   : > { %6161 = vmatprep.subr.bf16.mxu1 %v12910_v1  ;;  %7606 = vmatprep.subr.bf16.mxu0 %v12910_v1 }
  0x4f   : > { %5909 = vmatmul.mubr.bf16.gmra.mrb[4].mxu1 %v11553_v42  ;;  %7354 = vmatmul.mubr.bf16.gmra.mrb[4].mxu0 %v11554_v44  ;;  %v11621_v42 = vld [vmem:[%s13025_s30 + $0x708] ss:$88 sps:$4 sm:$0xff]   ;;  %v11626_v44 = vld [vmem:[%s13025_s30 + $0x7bc] ss:$88 sps:$4 sm:$0xff]  }
  0x50   : > { %5916 = vmatprep.mubr.bf16.mxu1 %v11556_v45  ;;  %7361 = vmatprep.mubr.bf16.mxu0 %v11558_v46  ;;  %v11737_v45 = vld [vmem:[%s14676_s1 + $0xe8] sm:$0xff]  }
  0x51   : > { %7607 = vmatpush1.bf16.msra.mxu0 %v11563_v47  ;;  %6162 = vmatpush1.bf16.msra.mxu1 %v11577_v48  ;;  %v11628_v46 = vld [vmem:[%s13025_s30 + $0x790] ss:$88 sps:$4 sm:$0xff]   ;;  %v11631_v48 = vld [vmem:[%s13025_s30 + $0x844] ss:$88 sps:$4 sm:$0xff]  }
  0x52   : > { %7608 = vmatprep.subr.bf16.mxu0 %v12910_v1  ;;  %6163 = vmatprep.subr.bf16.mxu1 %v12910_v1  ;;  %v11629_v47 = vld [vmem:[%s13025_s30 + $0x7b8] ss:$88 sps:$4 sm:$0xff]  }
  0x55   : > { %7609 = vmatpush1.bf16.msra.mxu0 %v11570_v50  ;;  %6164 = vmatpush1.bf16.msra.mxu1 %v11592_v52  ;;  %v11635_v50 = vld [vmem:[%s13025_s30 + $0x840] ss:$88 sps:$4 sm:$0xff]   ;;  %v11639_v52 = vld [vmem:[%s13025_s30 + $0x8f4] ss:$88 sps:$4 sm:$0xff]  }
  0x56   : > { %7610 = vmatprep.subr.bf16.mxu0 %v12910_v1  ;;  %6165 = vmatprep.subr.bf16.mxu1 %v12910_v1 }
  0x57   : > { %5917 = vmatmul.mubr.bf16.gmra.mrb[8].mxu1 %v11560_v49  ;;  %7362 = vmatmul.mubr.bf16.gmra.mrb[8].mxu0 %v11561_v51  ;;  %v11633_v49 = vld [vmem:[%s13025_s30 + $0x86c] ss:$88 sps:$4 sm:$0xff]   ;;  %v11636_v51 = vld [vmem:[%s13025_s30 + $0x868] ss:$88 sps:$4 sm:$0xff]  }
  0x58   : > { %5924 = vmatprep.mubr.bf16.mxu1 %v11564_v53  ;;  %7369 = vmatprep.mubr.bf16.mxu0 %v11566_v54  ;;  %v11641_v53 = vld [vmem:[%s13025_s30 + $0x91c] ss:$88 sps:$4 sm:$0xff]  }
  0x59   : > { %7611 = vmatpush1.bf16.msra.mxu0 %v11578_v55  ;;  %6166 = vmatpush1.bf16.msra.mxu1 %v11607_v56  ;;  %v11751_v54 = vld [vmem:[%s14676_s1 + $0xf0] sm:$0xff]  }
  0x5a   : > { %7612 = vmatprep.subr.bf16.mxu0 %v12910_v1  ;;  %6167 = vmatprep.subr.bf16.mxu1 %v12910_v1  ;;  %v11643_v55 = vld [vmem:[%s13025_s30 + $0x8f0] ss:$88 sps:$4 sm:$0xff]  }
  0x5b   : > { %v11644_v56 = vld [vmem:[%s13025_s30 + $0x918] ss:$88 sps:$4 sm:$0xff]  }
  0x5d   : > { %7613 = vmatpush1.bf16.msra.mxu0 %v11585_v58  ;;  %6168 = vmatpush1.bf16.msra.mxu1 %v11622_v60  ;;  %v11648_v58 = vld [vmem:[%s13025_s30 + $0x9cc] ss:$88 sps:$4 sm:$0xff]   ;;  %v11651_v60 = vld [vmem:[%s13025_s30 + $0x9c8] ss:$88 sps:$4 sm:$0xff]  }
  0x5e   : > { %7614 = vmatprep.subr.bf16.mxu0 %v12910_v1  ;;  %6169 = vmatprep.subr.bf16.mxu1 %v12910_v1 }
  0x5f   : > { %5925 = vmatmul.mubr.bf16.gmra.mrb[12].mxu1 %v11568_v57  ;;  %7370 = vmatmul.mubr.bf16.gmra.mrb[12].mxu0 %v11569_v59  ;;  %v11646_v57 = vld [vmem:[%s13025_s30 + $0x9a4] ss:$88 sps:$4 sm:$0xff]   ;;  %v11650_v59 = vld [vmem:[%s13025_s30 + $0x9a0] ss:$88 sps:$4 sm:$0xff]  }
  0x60   : > { %5932 = vmatprep.mubr.bf16.mxu1 %v11571_v61  ;;  %7377 = vmatprep.mubr.bf16.mxu0 %v11573_v62  ;;  %v11654_v61 = vld [vmem:[%s13025_s30 + $0xa54] ss:$88 sps:$4 sm:$0xff]  }
  0x61   : > { %7615 = vmatpush1.bf16.msra.mxu0 %v11593_v63  ;;  %6170 = vmatpush1.bf16.msra.mxu1 %v11637_v0  ;;  %v11656_v62 = vld [vmem:[%s13025_s30 + $0xa7c] ss:$88 sps:$4 sm:$0xff]   ;;  %v11658_v0 = vld [vmem:[%s13025_s30 + $0xa50] ss:$88 sps:$4 sm:$0xff]  }
  0x62   : > { %7616 = vmatprep.subr.bf16.mxu0 %v12910_v1  ;;  %6171 = vmatprep.subr.bf16.mxu1 %v12910_v1  ;;  %v11765_v63 = vld [vmem:[%s14676_s1 + $0xf8] sm:$0xff]  }
  0x65   : > { %7617 = vmatpush1.bf16.msra.mxu0 %v11600_v2  ;;  %6172 = vmatpush1.bf16.msra.mxu1 %v11652_v6  ;;  %v11659_v2 = vld [vmem:[%s13025_s30 + $0xa78] ss:$88 sps:$4 sm:$0xff]  }
  0x66   : > { %7618 = vmatprep.subr.bf16.mxu0 %v12910_v1  ;;  %6173 = vmatprep.subr.bf16.mxu1 %v12910_v1  ;;  %v11663_v6 = vld [vmem:[%s13025_s30 + $0x30] ss:$88 sps:$4 sm:$0xff]  }
  0x67   : > { %5933 = vmatmul.mubr.bf16.gmra.mrb[16].mxu1 %v11575_v3  ;;  %7378 = vmatmul.mubr.bf16.gmra.mrb[16].mxu0 %v11576_v4  ;;  %v11661_v3 = vld [vmem:[%s13025_s30 + $0xb04] ss:$88 sps:$4 sm:$0xff]   ;;  %v11665_v4 = vld [vmem:[%s13025_s30 + $0x34] ss:$88 sps:$4 sm:$0xff]  }
  0x68   : > { %5940 = vmatprep.mubr.bf16.mxu1 %v11579_v5  ;;  %7385 = vmatprep.mubr.bf16.mxu0 %v11581_v7  ;;  %v11666_v5 = vld [vmem:[%s13025_s30 + $0xb00] ss:$88 sps:$4 sm:$0xff]   ;;  %v11669_v7 = vld [vmem:[%s13025_s30 + $0xbb4] ss:$88 sps:$4 sm:$0xff]  }
  0x69   : > { %7619 = vmatpush1.bf16.msra.mxu0 %v11608_v8  ;;  %6174 = vmatpush1.bf16.msra.mxu1 %v11667_v14  ;;  %v11668_v8 = vld [vmem:[%s14676_s1 + $0x380] sm:$0xff]   ;;  %v11677_v14 = vld [vmem:[%s13025_s30 + $0x194] ss:$88 sps:$4 sm:$0xff]  }
  0x6a   : > { %7620 = vmatprep.subr.bf16.mxu0 %v12910_v1  ;;  %6175 = vmatprep.subr.bf16.mxu1 %v12910_v1 }
  0x6d   : > { %7621 = vmatpush1.bf16.msra.mxu0 %v11615_v10  ;;  %6176 = vmatpush1.bf16.msra.mxu1 %v11681_v20  ;;  %v11673_v10 = vld [vmem:[%s13025_s30 + $0xbb0] ss:$88 sps:$4 sm:$0xff]   ;;  %v11685_v20 = vld [vmem:[%s13025_s30 + $0x244] ss:$88 sps:$4 sm:$0xff]  }
  0x6e   : > { %7622 = vmatprep.subr.bf16.mxu0 %v12910_v1  ;;  %6177 = vmatprep.subr.bf16.mxu1 %v12910_v1 }
  0x6f   : > { %5941 = vmatmul.mubr.bf16.gmra.mrb[20].mxu1 %v11583_v9  ;;  %7386 = vmatmul.mubr.bf16.gmra.mrb[20].mxu0 %v11584_v11  ;;  %v11671_v9 = vld [vmem:[%s13025_s30 + $0xe4] ss:$88 sps:$4 sm:$0xff]   ;;  %v11682_v11 = vld [vmem:[%s14676_s1 + $0x388] sm:$0xff]  }
  0x70   : > { %5948 = vmatprep.mubr.bf16.mxu1 %v11586_v12  ;;  %7393 = vmatprep.mubr.bf16.mxu0 %v11588_v13  ;;  %v11674_v12 = vld [vmem:[%s13025_s30 + $0xe0] ss:$88 sps:$4 sm:$0xff]   ;;  %v11675_v13 = vld [vmem:[%s13025_s30 + $0xc64] ss:$88 sps:$4 sm:$0xff]  }
  0x71   : > { %7623 = vmatpush1.bf16.msra.mxu0 %v11623_v15  ;;  %6178 = vmatpush1.bf16.msra.mxu1 %v11695_v26  ;;  %v11696_v15 = vld [vmem:[%s14676_s1 + $0x390] sm:$0xff]  }
  0x72   : > { %7624 = vmatprep.subr.bf16.mxu0 %v12910_v1  ;;  %6179 = vmatprep.subr.bf16.mxu1 %v12910_v1  ;;  %v11691_v26 = vld [vmem:[%s13025_s30 + $0x2f4] ss:$88 sps:$4 sm:$0xff]  }
  0x75   : > { %7625 = vmatpush1.bf16.msra.mxu0 %v11630_v17  ;;  %6180 = vmatpush1.bf16.msra.mxu1 %v11709_v32  ;;  %v11710_v17 = vld [vmem:[%s14676_s1 + $0x398] sm:$0xff]  }
  0x76   : > { %7626 = vmatprep.subr.bf16.mxu0 %v12910_v1  ;;  %6181 = vmatprep.subr.bf16.mxu1 %v12910_v1  ;;  %v11699_v32 = vld [vmem:[%s13025_s30 + $0x3a4] ss:$88 sps:$4 sm:$0xff]  }
  0x77   : > { %5949 = vmatmul.mubr.bf16.gmra.mrb[24].mxu1 %v11590_v16  ;;  %7394 = vmatmul.mubr.bf16.gmra.mrb[24].mxu0 %v11591_v18  ;;  %v11679_v16 = vld [vmem:[%s13025_s30 + $0xc60] ss:$88 sps:$4 sm:$0xff]   ;;  %v11680_v18 = vld [vmem:[%s13025_s30 + $0x190] ss:$88 sps:$4 sm:$0xff]  }
  0x78   : > { %5956 = vmatprep.mubr.bf16.mxu1 %v11594_v19  ;;  %7401 = vmatprep.mubr.bf16.mxu0 %v11596_v21  ;;  %v11683_v19 = vld [vmem:[%s13025_s30 + $0xd14] ss:$88 sps:$4 sm:$0xff]   ;;  %v11724_v21 = vld [vmem:[%s14676_s1 + $0x3a0] sm:$0xff]  }
  0x79   : > { %7627 = vmatpush1.bf16.msra.mxu0 %v11638_v22  ;;  %6182 = vmatpush1.bf16.msra.mxu1 %v11723_v36  ;;  %v11687_v22 = vld [vmem:[%s13025_s30 + $0xd10] ss:$88 sps:$4 sm:$0xff]   ;;  %v11702_v36 = vld [vmem:[%s13025_s30 + $0x3a0] ss:$88 sps:$4 sm:$0xff]  }
  0x7a   : > { %7628 = vmatprep.subr.bf16.mxu0 %v12910_v1  ;;  %6183 = vmatprep.subr.bf16.mxu1 %v12910_v1 }
  0x7d   : > { %7629 = vmatpush1.bf16.msra.mxu0 %v11645_v24  ;;  %6184 = vmatpush1.bf16.msra.mxu1 %v11737_v45  ;;  %v11688_v24 = vld [vmem:[%s13025_s30 + $0x240] ss:$88 sps:$4 sm:$0xff]   ;;  %v11715_v45 = vld [vmem:[%s13025_s30 + $0xfd0] ss:$88 sps:$4 sm:$0xff]  }
  0x7e   : > { %7630 = vmatprep.subr.bf16.mxu0 %v12910_v1  ;;  %6185 = vmatprep.subr.bf16.mxu1 %v12910_v1 }
  0x7f   : > { %5957 = vmatmul.mubr.bf16.gmra.mrb[28].mxu1 %v11598_v23  ;;  %7402 = vmatmul.mubr.bf16.gmra.mrb[28].mxu0 %v11599_v25  ;;  %v11738_v23 = vld [vmem:[%s14676_s1 + $0x3a8] sm:$0xff]   ;;  %v11689_v25 = vld [vmem:[%s13025_s30 + $0xdc4] ss:$88 sps:$4 sm:$0xff]  }
  0x80   : > { %5964 = vmatprep.mubr.bf16.mxu1 %v11601_v27  ;;  %7409 = vmatprep.mubr.bf16.mxu0 %v11603_v28  ;;  %v11752_v27 = vld [vmem:[%s14676_s1 + $0x3b0] sm:$0xff]   ;;  %v11693_v28 = vld [vmem:[%s13025_s30 + $0xdc0] ss:$88 sps:$4 sm:$0xff]  }
  0x81   : > { %7631 = vmatpush1.bf16.msra.mxu0 %v11653_v29  ;;  %6186 = vmatpush1.bf16.msra.mxu1 %v11751_v54  ;;  %v11766_v29 = vld [vmem:[%s14676_s1 + $0x3b8] sm:$0xff]   ;;  %v11729_v54 = vld [vmem:[%s13025_s30 + $0x1130] ss:$88 sps:$4 sm:$0xff]  }
  0x82   : > { %7632 = vmatprep.subr.bf16.mxu0 %v12910_v1  ;;  %6187 = vmatprep.subr.bf16.mxu1 %v12910_v1 }
  0x85   : > { %7633 = vmatpush1.bf16.msra.mxu0 %v11660_v31  ;;  %6188 = vmatpush1.bf16.msra.mxu1 %v11765_v63  ;;  %v11697_v31 = vld [vmem:[%s13025_s30 + $0xe74] ss:$88 sps:$4 sm:$0xff]   ;;  %v11743_v63 = vld [vmem:[%s13025_s30 + $0x1290] ss:$88 sps:$4 sm:$0xff]  }
  0x86   : > { %7891 = vmatprep.subr.bf16.mxu0 %v12910_v1  ;;  %6446 = vmatprep.subr.bf16.mxu1 %v12910_v1 }
  0x87   : > { %5965 = vmatmul.mubr.bf16.gmra.mrb[32].mxu1 %v11605_v30  ;;  %7410 = vmatmul.mubr.bf16.gmra.mrb[32].mxu0 %v11606_v33  ;;  %v11694_v30 = vld [vmem:[%s13025_s30 + $0x2f0] ss:$88 sps:$4 sm:$0xff]   ;;  %v11780_v33 = vld [vmem:[%s14676_s1 + $0x3c0] sm:$0xff]  }
  0x88   : > { %5972 = vmatprep.mubr.bf16.mxu1 %v11609_v34  ;;  %7417 = vmatprep.mubr.bf16.mxu0 %v11611_v35  ;;  %v11701_v34 = vld [vmem:[%s13025_s30 + $0xe70] ss:$88 sps:$4 sm:$0xff]  }
  0x89   : > { %v11794_v35 = vld [vmem:[%s14676_s1 + $0x3c8] sm:$0xff]  }
  0x8f   : > { %5973 = vmatmul.mubr.bf16.gmra.mrb[36].mxu1 %v11613_v37  ;;  %7418 = vmatmul.mubr.bf16.gmra.mrb[36].mxu0 %v11614_v38  ;;  %v11703_v37 = vld [vmem:[%s13025_s30 + $0xf24] ss:$88 sps:$4 sm:$0xff]   ;;  %v11705_v38 = vld [vmem:[%s13025_s30 + $0x454] ss:$88 sps:$4 sm:$0xff]  }
  0x90   : > { %5980 = vmatprep.mubr.bf16.mxu1 %v11616_v39  ;;  %7425 = vmatprep.mubr.bf16.mxu0 %v11618_v40  ;;  %v11808_v39 = vld [vmem:[%s14676_s1 + $0x3d0] sm:$0xff]   ;;  %v11707_v40 = vld [vmem:[%s13025_s30 + $0xf20] ss:$88 sps:$4 sm:$0xff]  }
  0x97   : > { %5981 = vmatmul.mubr.bf16.gmra.mrb[40].mxu1 %v11620_v41  ;;  %7426 = vmatmul.mubr.bf16.gmra.mrb[40].mxu0 %v11621_v42  ;;  %v11708_v41 = vld [vmem:[%s13025_s30 + $0x450] ss:$88 sps:$4 sm:$0xff]   ;;  %v11711_v42 = vld [vmem:[%s13025_s30 + $0xfd4] ss:$88 sps:$4 sm:$0xff]  }
  0x98   : > { %5988 = vmatprep.mubr.bf16.mxu1 %v11624_v43  ;;  %7433 = vmatprep.mubr.bf16.mxu0 %v11626_v44  ;;  %v11713_v43 = vld [vmem:[%s13025_s30 + $0x504] ss:$88 sps:$4 sm:$0xff]  }
  0x99   : > { %v11822_v44 = vld [vmem:[%s14676_s1 + $0x3d8] sm:$0xff]  }
  0x9f   : > { %5989 = vmatmul.mubr.bf16.gmra.mrb[44].mxu1 %v11628_v46  ;;  %7434 = vmatmul.mubr.bf16.gmra.mrb[44].mxu0 %v11629_v47  ;;  %v11716_v46 = vld [vmem:[%s13025_s30 + $0x500] ss:$88 sps:$4 sm:$0xff]   ;;  %v11717_v47 = vld [vmem:[%s13025_s30 + $0x1084] ss:$88 sps:$4 sm:$0xff]  }
  0xa0   : > { %5996 = vmatprep.mubr.bf16.mxu1 %v11631_v48  ;;  %7441 = vmatprep.mubr.bf16.mxu0 %v11633_v49  ;;  %v11719_v48 = vld [vmem:[%s13025_s30 + $0x5b4] ss:$88 sps:$4 sm:$0xff]   ;;  %v11721_v49 = vld [vmem:[%s13025_s30 + $0x1080] ss:$88 sps:$4 sm:$0xff]  }
  0xa7   : > { %5997 = vmatmul.mubr.bf16.gmra.mrb[48].mxu1 %v11635_v50  ;;  %7442 = vmatmul.mubr.bf16.gmra.mrb[48].mxu0 %v11636_v51  ;;  %v11722_v50 = vld [vmem:[%s13025_s30 + $0x5b0] ss:$88 sps:$4 sm:$0xff]   ;;  %v11725_v51 = vld [vmem:[%s13025_s30 + $0x1134] ss:$88 sps:$4 sm:$0xff]  }
  0xa8   : > { %6004 = vmatprep.mubr.bf16.mxu1 %v11639_v52  ;;  %7449 = vmatprep.mubr.bf16.mxu0 %v11641_v53  ;;  %v11727_v52 = vld [vmem:[%s13025_s30 + $0x664] ss:$88 sps:$4 sm:$0xff]  }
  0xa9   : > { %v11836_v53 = vld [vmem:[%s14676_s1 + $0x3e0] sm:$0xff]  }
  0xaf   : > { %6005 = vmatmul.mubr.bf16.gmra.mrb[52].mxu1 %v11643_v55  ;;  %7450 = vmatmul.mubr.bf16.gmra.mrb[52].mxu0 %v11644_v56  ;;  %v11730_v55 = vld [vmem:[%s13025_s30 + $0x660] ss:$88 sps:$4 sm:$0xff]   ;;  %v11731_v56 = vld [vmem:[%s13025_s30 + $0x11e4] ss:$88 sps:$4 sm:$0xff]  }
  0xb0   : > { %6012 = vmatprep.mubr.bf16.mxu1 %v11646_v57  ;;  %7457 = vmatprep.mubr.bf16.mxu0 %v11648_v58  ;;  %v11733_v57 = vld [vmem:[%s13025_s30 + $0x714] ss:$88 sps:$4 sm:$0xff]   ;;  %v11735_v58 = vld [vmem:[%s13025_s30 + $0x11e0] ss:$88 sps:$4 sm:$0xff]  }
  0xb7   : > { %6013 = vmatmul.mubr.bf16.gmra.mrb[56].mxu1 %v11650_v59  ;;  %7458 = vmatmul.mubr.bf16.gmra.mrb[56].mxu0 %v11651_v60  ;;  %v11736_v59 = vld [vmem:[%s13025_s30 + $0x710] ss:$88 sps:$4 sm:$0xff]   ;;  %v11739_v60 = vld [vmem:[%s13025_s30 + $0x1294] ss:$88 sps:$4 sm:$0xff]  }
  0xb8   : > { %6020 = vmatprep.mubr.bf16.mxu1 %v11654_v61  ;;  %7465 = vmatprep.mubr.bf16.mxu0 %v11656_v62  ;;  %v11741_v61 = vld [vmem:[%s13025_s30 + $0x7c4] ss:$88 sps:$4 sm:$0xff]   ;;  %v11850_v62 = vld [vmem:[%s14676_s1 + $0x3e8] sm:$0xff]  }
  0xbf   : > { %6021 = vmatmul.mubr.bf16.gmra.mrb[60].mxu1 %v11658_v0  ;;  %7466 = vmatmul.mubr.bf16.gmra.mrb[60].mxu0 %v11659_v2  ;;  %v11744_v0 = vld [vmem:[%s13025_s30 + $0x7c0] ss:$88 sps:$4 sm:$0xff]   ;;  %v11745_v2 = vld [vmem:[%s13025_s30 + $0x1344] ss:$88 sps:$4 sm:$0xff]  }
  0xc0   : > { %6028 = vmatprep.mubr.bf16.mxu1 %v11661_v3  ;;  %7634 = vmatprep.mubr.bf16.mxu0 %v11665_v4  ;;  %v11747_v3 = vld [vmem:[%s13025_s30 + $0x874] ss:$88 sps:$4 sm:$0xff]   ;;  %v11749_v4 = vld [vmem:[%s13025_s30 + $0x1340] ss:$88 sps:$4 sm:$0xff]  }
  0xc7   : > { %6029 = vmatmul.mubr.bf16.gmra.mrb[64].mxu1 %v11666_v5  ;;  %7635 = vmatmul.mubr.bf16.vlgmr.msra.gmra.mrb[0].mxu0 %v11663_v6  ;;  %v11750_v5 = vld [vmem:[%s13025_s30 + $0x870] ss:$88 sps:$4 sm:$0xff]   ;;  %v11753_v6 = vld [vmem:[%s13025_s30 + $0x13f4] ss:$88 sps:$4 sm:$0xff]  }
  0xc8   : > { %6036 = vmatprep.mubr.bf16.mxu1 %v11669_v7  ;;  %7892 = vmatpush1.bf16.msra.mxu0 %v11668_v8  ;;  %v11755_v7 = vld [vmem:[%s13025_s30 + $0x924] ss:$88 sps:$4 sm:$0xff]   ;;  %v11864_v8 = vld [vmem:[%s14676_s1 + $0x3f0] sm:$0xff]  }
  0xc9   : > { %7642 = vmatprep.mubr.bf16.mxu0 %v11671_v9  ;;  %7893 = vmatprep.subr.bf16.mxu0 %v12910_v1  ;;  %v11757_v9 = vld [vmem:[%s13025_s30 + $0x13f0] ss:$88 sps:$4 sm:$0xff]  }
  0xcc   : > { %7894 = vmatpush1.bf16.msra.mxu0 %v11682_v11  ;;  %v11759_v11 = vld [vmem:[%s13025_s30 + $0x14a4] ss:$88 sps:$4 sm:$0xff]  }
  0xcd   : > { %7895 = vmatprep.subr.bf16.mxu0 %v12910_v1 }
  0xcf   : > { %6037 = vmatmul.mubr.bf16.gmra.mrb[68].mxu1 %v11673_v10  ;;  %7643 = vmatmul.mubr.bf16.gmra.mrb[4].mxu0 %v11674_v12  ;;  %v11758_v10 = vld [vmem:[%s13025_s30 + $0x920] ss:$88 sps:$4 sm:$0xff]   ;;  %v11761_v12 = vld [vmem:[%s13025_s30 + $0x9d4] ss:$88 sps:$4 sm:$0xff]  }
  0xd0   : > { %6044 = vmatprep.mubr.bf16.mxu1 %v11675_v13  ;;  %7650 = vmatprep.mubr.bf16.mxu0 %v11677_v14  ;;  %v11763_v13 = vld [vmem:[%s13025_s30 + $0x14a0] ss:$88 sps:$4 sm:$0xff]   ;;  %v11764_v14 = vld [vmem:[%s13025_s30 + $0x9d0] ss:$88 sps:$4 sm:$0xff]  }
  0xd1   : > { %7896 = vmatpush1.bf16.msra.mxu0 %v11696_v15  ;;  %v11767_v15 = vld [vmem:[%s13025_s30 + $0x1554] ss:$88 sps:$4 sm:$0xff]  }
  0xd2   : > { %7897 = vmatprep.subr.bf16.mxu0 %v12910_v1 }
  0xd5   : > { %7898 = vmatpush1.bf16.msra.mxu0 %v11710_v17  ;;  %v11878_v17 = vld [vmem:[%s14676_s1 + $0x3f8] sm:$0xff]  }
  0xd6   : > { %7899 = vmatprep.subr.bf16.mxu0 %v12910_v1 }
  0xd7   : > { %6045 = vmatmul.mubr.bf16.gmra.mrb[72].mxu1 %v11679_v16  ;;  %7651 = vmatmul.mubr.bf16.gmra.mrb[8].mxu0 %v11680_v18  ;;  %v11769_v16 = vld [vmem:[%s13025_s30 + $0xa84] ss:$88 sps:$4 sm:$0xff]   ;;  %v11771_v18 = vld [vmem:[%s13025_s30 + $0x1550] ss:$88 sps:$4 sm:$0xff]  }
  0xd8   : > { %6052 = vmatprep.mubr.bf16.mxu1 %v11683_v19  ;;  %7658 = vmatprep.mubr.bf16.mxu0 %v11685_v20  ;;  %v11772_v19 = vld [vmem:[%s13025_s30 + $0xa80] ss:$88 sps:$4 sm:$0xff]   ;;  %v11775_v20 = vld [vmem:[%s13025_s30 + $0xc] ss:$88 sps:$4 sm:$0xff]  }
  0xd9   : > { %7900 = vmatpush1.bf16.msra.mxu0 %v11724_v21  ;;  %v11776_v21 = vld [vmem:[%s13025_s30 + $0xb34] ss:$88 sps:$4 sm:$0xff]  }
  0xda   : > { %7901 = vmatprep.subr.bf16.mxu0 %v12910_v1 }
  0xdd   : > { %7902 = vmatpush1.bf16.msra.mxu0 %v11738_v23  ;;  %v11778_v23 = vld [vmem:[%s13025_s30 + $0xb30] ss:$88 sps:$4 sm:$0xff]  }
  0xde   : > { %7903 = vmatprep.subr.bf16.mxu0 %v12910_v1 }
  0xdf   : > { %6053 = vmatmul.mubr.bf16.gmra.mrb[76].mxu1 %v11687_v22  ;;  %7659 = vmatmul.mubr.bf16.gmra.mrb[12].mxu0 %v11688_v24  ;;  %v11773_v22 = vld [vmem:[%s13025_s30 + $0x8] ss:$88 sps:$4 sm:$0xff]  }
  0xe0   : > { %6060 = vmatprep.mubr.bf16.mxu1 %v11689_v25  ;;  %7666 = vmatprep.mubr.bf16.mxu0 %v11691_v26  ;;  %v11779_v24 = vld [vmem:[%s14676_s1 + $0x100] sm:$0xff]   ;;  %v11781_v25 = vld [vmem:[%s13025_s30 + $0xbc] ss:$88 sps:$4 sm:$0xff]  }
  0xe1   : > { %7904 = vmatpush1.bf16.msra.mxu0 %v11752_v27  ;;  %v11783_v26 = vld [vmem:[%s13025_s30 + $0xbe4] ss:$88 sps:$4 sm:$0xff]   ;;  %v11793_v27 = vld [vmem:[%s14676_s1 + $0x108] sm:$0xff]  }
  0xe2   : > { %7905 = vmatprep.subr.bf16.mxu0 %v12910_v1 }
  0xe5   : > { %7906 = vmatpush1.bf16.msra.mxu0 %v11766_v29  ;;  %v11786_v29 = vld [vmem:[%s13025_s30 + $0xbe0] ss:$88 sps:$4 sm:$0xff]  }
  0xe6   : > { %7907 = vmatprep.subr.bf16.mxu0 %v12910_v1 }
  0xe7   : > { %6061 = vmatmul.mubr.bf16.gmra.mrb[80].mxu1 %v11693_v28  ;;  %7667 = vmatmul.mubr.bf16.gmra.mrb[16].mxu0 %v11694_v30  ;;  %v11785_v28 = vld [vmem:[%s13025_s30 + $0xb8] ss:$88 sps:$4 sm:$0xff]   ;;  %v11787_v30 = vld [vmem:[%s13025_s30 + $0x16c] ss:$88 sps:$4 sm:$0xff]  }
  0xe8   : > { %6068 = vmatprep.mubr.bf16.mxu1 %v11697_v31  ;;  %7674 = vmatprep.mubr.bf16.mxu0 %v11699_v32  ;;  %v11789_v31 = vld [vmem:[%s13025_s30 + $0xc94] ss:$88 sps:$4 sm:$0xff]  }
  0xe9   : > { %7908 = vmatpush1.bf16.msra.mxu0 %v11780_v33  ;;  %v11807_v32 = vld [vmem:[%s14676_s1 + $0x110] sm:$0xff]   ;;  %v11791_v33 = vld [vmem:[%s13025_s30 + $0x168] ss:$88 sps:$4 sm:$0xff]  }
  0xea   : > { %7909 = vmatprep.subr.bf16.mxu0 %v12910_v1 }
  0xed   : > { %7910 = vmatpush1.bf16.msra.mxu0 %v11794_v35  ;;  %v11792_v35 = vld [vmem:[%s13025_s30 + $0xc90] ss:$88 sps:$4 sm:$0xff]  }
  0xee   : > { %7911 = vmatprep.subr.bf16.mxu0 %v12910_v1 }
  0xef   : > { %6069 = vmatmul.mubr.bf16.gmra.mrb[84].mxu1 %v11701_v34  ;;  %7675 = vmatmul.mubr.bf16.gmra.mrb[20].mxu0 %v11702_v36  ;;  %v11821_v34 = vld [vmem:[%s14676_s1 + $0x118] sm:$0xff]  }
  0xf0   : > { %6076 = vmatprep.mubr.bf16.mxu1 %v11703_v37  ;;  %7682 = vmatprep.mubr.bf16.mxu0 %v11705_v38  ;;  %v11795_v36 = vld [vmem:[%s13025_s30 + $0x21c] ss:$88 sps:$4 sm:$0xff]   ;;  %v11835_v38 = vld [vmem:[%s14676_s1 + $0x120] sm:$0xff]  }
  0xf1   : > { %7912 = vmatpush1.bf16.msra.mxu0 %v11808_v39  ;;  %v11797_v37 = vld [vmem:[%s13025_s30 + $0xd44] ss:$88 sps:$4 sm:$0xff]   ;;  %v11799_v39 = vld [vmem:[%s13025_s30 + $0x218] ss:$88 sps:$4 sm:$0xff]  }
  0xf2   : > { %7913 = vmatprep.subr.bf16.mxu0 %v12910_v1 }
  0xf5   : > { %7914 = vmatpush1.bf16.msra.mxu0 %v11822_v44  ;;  %v11863_v44 = vld [vmem:[%s14676_s1 + $0x130] sm:$0xff]  }
  0xf6   : > { %7915 = vmatprep.subr.bf16.mxu0 %v12910_v1 }
  0xf7   : > { %6077 = vmatmul.mubr.bf16.gmra.mrb[88].mxu1 %v11707_v40  ;;  %7683 = vmatmul.mubr.bf16.gmra.mrb[24].mxu0 %v11708_v41  ;;  %v11849_v40 = vld [vmem:[%s14676_s1 + $0x128] sm:$0xff]   ;;  %v11800_v41 = vld [vmem:[%s13025_s30 + $0xd40] ss:$88 sps:$4 sm:$0xff]  }
  0xf8   : > { %6084 = vmatprep.mubr.bf16.mxu1 %v11711_v42  ;;  %7690 = vmatprep.mubr.bf16.mxu0 %v11713_v43  ;;  %v11801_v42 = vld [vmem:[%s13025_s30 + $0x2cc] ss:$88 sps:$4 sm:$0xff]  }
  0xf9   : > { %7916 = vmatpush1.bf16.msra.mxu0 %v11836_v53  ;;  %v11803_v43 = vld [vmem:[%s13025_s30 + $0xdf4] ss:$88 sps:$4 sm:$0xff]   ;;  %v11814_v53 = vld [vmem:[%s13025_s30 + $0xea0] ss:$88 sps:$4 sm:$0xff]  }
  0xfa   : > { %7917 = vmatprep.subr.bf16.mxu0 %v12910_v1 }
  0xfd   : > { %7918 = vmatpush1.bf16.msra.mxu0 %v11850_v62  ;;  %v11827_v62 = vld [vmem:[%s13025_s30 + $0x4d8] ss:$88 sps:$4 sm:$0xff]  }
  0xfe   : > { %7919 = vmatprep.subr.bf16.mxu0 %v12910_v1 }
  0xff   : > { %6085 = vmatmul.mubr.bf16.gmra.mrb[92].mxu1 %v11715_v45  ;;  %7691 = vmatmul.mubr.bf16.gmra.mrb[28].mxu0 %v11716_v46  ;;  %v11805_v45 = vld [vmem:[%s13025_s30 + $0x2c8] ss:$88 sps:$4 sm:$0xff]   ;;  %v11877_v46 = vld [vmem:[%s14676_s1 + $0x138] sm:$0xff]  }
 0x100   : > { %6092 = vmatprep.mubr.bf16.mxu1 %v11717_v47  ;;  %7698 = vmatprep.mubr.bf16.mxu0 %v11719_v48  ;;  %v11806_v47 = vld [vmem:[%s13025_s30 + $0xdf0] ss:$88 sps:$4 sm:$0xff]   ;;  %v11809_v48 = vld [vmem:[%s13025_s30 + $0x37c] ss:$88 sps:$4 sm:$0xff]  }
 0x101   : > { %7920 = vmatpush1.bf16.msra.mxu0 %v11864_v8  ;;  %v11841_v8 = vld [vmem:[%s13025_s30 + $0x638] ss:$88 sps:$4 sm:$0xff]  }
 0x102   : > { %7921 = vmatprep.subr.bf16.mxu0 %v12910_v1 }
 0x105   : > { %7922 = vmatpush1.bf16.msra.mxu0 %v11878_v17  ;;  %v11855_v17 = vld [vmem:[%s13025_s30 + $0x798] ss:$88 sps:$4 sm:$0xff]  }
 0x106   : > { %8180 = vmatprep.subr.bf16.mxu0 %v12910_v1 }
 0x107   : > { %6093 = vmatmul.mubr.bf16.gmra.mrb[96].mxu1 %v11721_v49  ;;  %7699 = vmatmul.mubr.bf16.gmra.mrb[32].mxu0 %v11722_v50  ;;  %v11811_v49 = vld [vmem:[%s13025_s30 + $0xea4] ss:$88 sps:$4 sm:$0xff]  }
 0x108   : > { %6100 = vmatprep.mubr.bf16.mxu1 %v11725_v51  ;;  %7706 = vmatprep.mubr.bf16.mxu0 %v11727_v52  ;;  %v11891_v50 = vld [vmem:[%s14676_s1 + $0x140] sm:$0xff]   ;;  %v11813_v51 = vld [vmem:[%s13025_s30 + $0x378] ss:$88 sps:$4 sm:$0xff]   ;;  %v11905_v52 = vld [vmem:[%s14676_s1 + $0x148] sm:$0xff]  }
 0x10f   : > { %6101 = vmatmul.mubr.bf16.gmra.mrb[100].mxu1 %v11729_v54  ;;  %7707 = vmatmul.mubr.bf16.gmra.mrb[36].mxu0 %v11730_v55  ;;  %v11815_v54 = vld [vmem:[%s13025_s30 + $0x42c] ss:$88 sps:$4 sm:$0xff]  }
 0x110   : > { %6108 = vmatprep.mubr.bf16.mxu1 %v11731_v56  ;;  %7714 = vmatprep.mubr.bf16.mxu0 %v11733_v57  ;;  %v11817_v55 = vld [vmem:[%s13025_s30 + $0xf54] ss:$88 sps:$4 sm:$0xff]   ;;  %v11819_v57 = vld [vmem:[%s13025_s30 + $0x428] ss:$88 sps:$4 sm:$0xff]  }
 0x111   : > { %v11919_v56 = vld [vmem:[%s14676_s1 + $0x150] sm:$0xff]  }
 0x117   : > { %6109 = vmatmul.mubr.bf16.gmra.mrb[104].mxu1 %v11735_v58  ;;  %7715 = vmatmul.mubr.bf16.gmra.mrb[40].mxu0 %v11736_v59  ;;  %v11820_v58 = vld [vmem:[%s13025_s30 + $0xf50] ss:$88 sps:$4 sm:$0xff]   ;;  %v11823_v59 = vld [vmem:[%s13025_s30 + $0x4dc] ss:$88 sps:$4 sm:$0xff]  }
 0x118   : > { %6116 = vmatprep.mubr.bf16.mxu1 %v11739_v60  ;;  %7722 = vmatprep.mubr.bf16.mxu0 %v11741_v61  ;;  %v11825_v60 = vld [vmem:[%s13025_s30 + $0x1004] ss:$88 sps:$4 sm:$0xff]  }
 0x119   : > { %v11933_v61 = vld [vmem:[%s14676_s1 + $0x158] sm:$0xff]  }
 0x11f   : > { %6117 = vmatmul.mubr.bf16.gmra.mrb[108].mxu1 %v11743_v63  ;;  %7723 = vmatmul.mubr.bf16.gmra.mrb[44].mxu0 %v11744_v0  ;;  %v11828_v63 = vld [vmem:[%s13025_s30 + $0x1000] ss:$88 sps:$4 sm:$0xff]   ;;  %v11829_v0 = vld [vmem:[%s13025_s30 + $0x58c] ss:$88 sps:$4 sm:$0xff]  }
 0x120   : > { %6124 = vmatprep.mubr.bf16.mxu1 %v11745_v2  ;;  %7730 = vmatprep.mubr.bf16.mxu0 %v11747_v3  ;;  %v11831_v2 = vld [vmem:[%s13025_s30 + $0x10b4] ss:$88 sps:$4 sm:$0xff]   ;;  %v11833_v3 = vld [vmem:[%s13025_s30 + $0x588] ss:$88 sps:$4 sm:$0xff]  }
 0x127   : > { %6125 = vmatmul.mubr.bf16.gmra.mrb[112].mxu1 %v11749_v4  ;;  %7731 = vmatmul.mubr.bf16.gmra.mrb[48].mxu0 %v11750_v5  ;;  %v11834_v4 = vld [vmem:[%s13025_s30 + $0x10b0] ss:$88 sps:$4 sm:$0xff]   ;;  %v11837_v5 = vld [vmem:[%s13025_s30 + $0x63c] ss:$88 sps:$4 sm:$0xff]  }
 0x128   : > { %6132 = vmatprep.mubr.bf16.mxu1 %v11753_v6  ;;  %7738 = vmatprep.mubr.bf16.mxu0 %v11755_v7  ;;  %v11839_v6 = vld [vmem:[%s13025_s30 + $0x1164] ss:$88 sps:$4 sm:$0xff]  }
 0x129   : > { %v11947_v7 = vld [vmem:[%s14676_s1 + $0x160] sm:$0xff]  }
 0x12f   : > { %6133 = vmatmul.mubr.bf16.gmra.mrb[116].mxu1 %v11757_v9  ;;  %7739 = vmatmul.mubr.bf16.gmra.mrb[52].mxu0 %v11758_v10  ;;  %v11842_v9 = vld [vmem:[%s13025_s30 + $0x1160] ss:$88 sps:$4 sm:$0xff]   ;;  %v11843_v10 = vld [vmem:[%s13025_s30 + $0x6ec] ss:$88 sps:$4 sm:$0xff]  }
 0x130   : > { %6140 = vmatprep.mubr.bf16.mxu1 %v11759_v11  ;;  %7746 = vmatprep.mubr.bf16.mxu0 %v11761_v12  ;;  %v11845_v11 = vld [vmem:[%s13025_s30 + $0x1214] ss:$88 sps:$4 sm:$0xff]   ;;  %v11847_v12 = vld [vmem:[%s13025_s30 + $0x6e8] ss:$88 sps:$4 sm:$0xff]  }
 0x137   : > { %6141 = vmatmul.mubr.bf16.gmra.mrb[120].mxu1 %v11763_v13  ;;  %7747 = vmatmul.mubr.bf16.gmra.mrb[56].mxu0 %v11764_v14  ;;  %v11848_v13 = vld [vmem:[%s13025_s30 + $0x1210] ss:$88 sps:$4 sm:$0xff]   ;;  %v11851_v14 = vld [vmem:[%s13025_s30 + $0x79c] ss:$88 sps:$4 sm:$0xff]  }
 0x138   : > { %6148 = vmatprep.mubr.bf16.mxu1 %v11767_v15  ;;  %7754 = vmatprep.mubr.bf16.mxu0 %v11769_v16  ;;  %v11853_v15 = vld [vmem:[%s13025_s30 + $0x12c4] ss:$88 sps:$4 sm:$0xff]   ;;  %v11961_v16 = vld [vmem:[%s14676_s1 + $0x168] sm:$0xff]  }
 0x13f   : > { %6149 = vmatmul.mubr.bf16.gmra.mrb[124].mxu1 %v11771_v18  ;;  %7755 = vmatmul.mubr.bf16.gmra.mrb[60].mxu0 %v11772_v19  ;;  %v11856_v18 = vld [vmem:[%s13025_s30 + $0x12c0] ss:$88 sps:$4 sm:$0xff]   ;;  %v11857_v19 = vld [vmem:[%s13025_s30 + $0x84c] ss:$88 sps:$4 sm:$0xff]  }
 0x140   : > { %6189 = vmatprep.mubr.bf16.mxu1 %v11775_v20  ;;  %7762 = vmatprep.mubr.bf16.mxu0 %v11776_v21  ;;  %v11859_v20 = vld [vmem:[%s13025_s30 + $0x1374] ss:$88 sps:$4 sm:$0xff]   ;;  %v11861_v21 = vld [vmem:[%s13025_s30 + $0x848] ss:$88 sps:$4 sm:$0xff]  }
 0x147   : > { %6190 = vmatmul.mubr.bf16.vlgmr.msra.gmra.mrb[0].mxu1 %v11773_v22  ;;  %7763 = vmatmul.mubr.bf16.gmra.mrb[64].mxu0 %v11778_v23  ;;  %v11862_v22 = vld [vmem:[%s13025_s30 + $0x1370] ss:$88 sps:$4 sm:$0xff]   ;;  %v11865_v23 = vld [vmem:[%s13025_s30 + $0x8fc] ss:$88 sps:$4 sm:$0xff]  }
 0x148   : > { %6447 = vmatpush1.bf16.msra.mxu1 %v11779_v24  ;;  %6197 = vmatprep.mubr.bf16.mxu1 %v11781_v25  ;;  %v11867_v24 = vld [vmem:[%s13025_s30 + $0x1424] ss:$88 sps:$4 sm:$0xff]   ;;  %v11975_v25 = vld [vmem:[%s14676_s1 + $0x170] sm:$0xff]  }
 0x149   : > { %7770 = vmatprep.mubr.bf16.mxu0 %v11783_v26  ;;  %6448 = vmatprep.subr.bf16.mxu1 %v12910_v1  ;;  %v11869_v26 = vld [vmem:[%s13025_s30 + $0x8f8] ss:$88 sps:$4 sm:$0xff]  }
 0x14c   : > { %6449 = vmatpush1.bf16.msra.mxu1 %v11793_v27  ;;  %v11870_v27 = vld [vmem:[%s13025_s30 + $0x1420] ss:$88 sps:$4 sm:$0xff]  }
 0x14d   : > { %6450 = vmatprep.subr.bf16.mxu1 %v12910_v1 }
 0x14f   : > { %6198 = vmatmul.mubr.bf16.gmra.mrb[4].mxu1 %v11785_v28  ;;  %7771 = vmatmul.mubr.bf16.gmra.mrb[68].mxu0 %v11786_v29  ;;  %v11871_v28 = vld [vmem:[%s13025_s30 + $0x9ac] ss:$88 sps:$4 sm:$0xff]  }
 0x150   : > { %6205 = vmatprep.mubr.bf16.mxu1 %v11787_v30  ;;  %7778 = vmatprep.mubr.bf16.mxu0 %v11789_v31  ;;  %v11873_v29 = vld [vmem:[%s13025_s30 + $0x14d4] ss:$88 sps:$4 sm:$0xff]   ;;  %v11875_v30 = vld [vmem:[%s13025_s30 + $0x9a8] ss:$88 sps:$4 sm:$0xff]  }
 0x151   : > { %6451 = vmatpush1.bf16.msra.mxu1 %v11807_v32  ;;  %v11876_v31 = vld [vmem:[%s13025_s30 + $0x14d0] ss:$88 sps:$4 sm:$0xff]   ;;  %v11879_v32 = vld [vmem:[%s13025_s30 + $0xa5c] ss:$88 sps:$4 sm:$0xff]  }
 0x152   : > { %6452 = vmatprep.subr.bf16.mxu1 %v12910_v1 }
 0x155   : > { %6453 = vmatpush1.bf16.msra.mxu1 %v11821_v34  ;;  %v11989_v34 = vld [vmem:[%s14676_s1 + $0x178] sm:$0xff]  }
 0x156   : > { %6454 = vmatprep.subr.bf16.mxu1 %v12910_v1 }
 0x157   : > { %6206 = vmatmul.mubr.bf16.gmra.mrb[8].mxu1 %v11791_v33  ;;  %7779 = vmatmul.mubr.bf16.gmra.mrb[72].mxu0 %v11792_v35  ;;  %v11881_v33 = vld [vmem:[%s13025_s30 + $0x1584] ss:$88 sps:$4 sm:$0xff]   ;;  %v11883_v35 = vld [vmem:[%s13025_s30 + $0xa58] ss:$88 sps:$4 sm:$0xff]  }
 0x158   : > { %6213 = vmatprep.mubr.bf16.mxu1 %v11795_v36  ;;  %7786 = vmatprep.mubr.bf16.mxu0 %v11797_v37  ;;  %v11884_v36 = vld [vmem:[%s13025_s30 + $0x1580] ss:$88 sps:$4 sm:$0xff]   ;;  %v11885_v37 = vld [vmem:[%s13025_s30 + $0xb0c] ss:$88 sps:$4 sm:$0xff]  }
 0x159   : > { %6455 = vmatpush1.bf16.msra.mxu1 %v11835_v38  ;;  %v11889_v38 = vld [vmem:[%s13025_s30 + $0x3c] ss:$88 sps:$4 sm:$0xff]  }
 0x15a   : > { %6456 = vmatprep.subr.bf16.mxu1 %v12910_v1 }
 0x15d   : > { %6457 = vmatpush1.bf16.msra.mxu1 %v11849_v40  ;;  %v11887_v40 = vld [vmem:[%s13025_s30 + $0x38] ss:$88 sps:$4 sm:$0xff]  }
 0x15e   : > { %6458 = vmatprep.subr.bf16.mxu1 %v12910_v1 }
 0x15f   : > { %6214 = vmatmul.mubr.bf16.gmra.mrb[12].mxu1 %v11799_v39  ;;  %7787 = vmatmul.mubr.bf16.gmra.mrb[76].mxu0 %v11800_v41  ;;  %v11890_v39 = vld [vmem:[%s13025_s30 + $0xb08] ss:$88 sps:$4 sm:$0xff]   ;;  %v11893_v41 = vld [vmem:[%s13025_s30 + $0xbbc] ss:$88 sps:$4 sm:$0xff]  }
 0x160   : > { %6221 = vmatprep.mubr.bf16.mxu1 %v11801_v42  ;;  %7794 = vmatprep.mubr.bf16.mxu0 %v11803_v43  ;;  %v11892_v42 = vld [vmem:[%s14676_s1 + $0x400] sm:$0xff]  }
 0x161   : > { %6459 = vmatpush1.bf16.msra.mxu1 %v11863_v44  ;;  %v11895_v43 = vld [vmem:[%s13025_s30 + $0xec] ss:$88 sps:$4 sm:$0xff]   ;;  %v11897_v44 = vld [vmem:[%s13025_s30 + $0xbb8] ss:$88 sps:$4 sm:$0xff]  }
 0x162   : > { %6460 = vmatprep.subr.bf16.mxu1 %v12910_v1 }
 0x165   : > { %6461 = vmatpush1.bf16.msra.mxu1 %v11877_v46  ;;  %v11898_v46 = vld [vmem:[%s13025_s30 + $0xe8] ss:$88 sps:$4 sm:$0xff]  }
 0x166   : > { %6462 = vmatprep.subr.bf16.mxu1 %v12910_v1 }
 0x167   : > { %6222 = vmatmul.mubr.bf16.gmra.mrb[16].mxu1 %v11805_v45  ;;  %7795 = vmatmul.mubr.bf16.gmra.mrb[80].mxu0 %v11806_v47  ;;  %v11906_v45 = vld [vmem:[%s14676_s1 + $0x408] sm:$0xff]  }
 0x168   : > { %6229 = vmatprep.mubr.bf16.mxu1 %v11809_v48  ;;  %7802 = vmatprep.mubr.bf16.mxu0 %v11811_v49  ;;  %v11899_v47 = vld [vmem:[%s13025_s30 + $0xc6c] ss:$88 sps:$4 sm:$0xff]   ;;  %v11901_v48 = vld [vmem:[%s13025_s30 + $0x19c] ss:$88 sps:$4 sm:$0xff]  }
 0x169   : > { %6463 = vmatpush1.bf16.msra.mxu1 %v11891_v50  ;;  %v11920_v49 = vld [vmem:[%s14676_s1 + $0x410] sm:$0xff]   ;;  %v11903_v50 = vld [vmem:[%s13025_s30 + $0xc68] ss:$88 sps:$4 sm:$0xff]  }
 0x16a   : > { %6464 = vmatprep.subr.bf16.mxu1 %v12910_v1 }
 0x16d   : > { %6465 = vmatpush1.bf16.msra.mxu1 %v11905_v52  ;;  %v11904_v52 = vld [vmem:[%s13025_s30 + $0x198] ss:$88 sps:$4 sm:$0xff]  }
 0x16e   : > { %6466 = vmatprep.subr.bf16.mxu1 %v12910_v1 }
 0x16f   : > { %6230 = vmatmul.mubr.bf16.gmra.mrb[20].mxu1 %v11813_v51  ;;  %7803 = vmatmul.mubr.bf16.gmra.mrb[84].mxu0 %v11814_v53  ;;  %v11934_v51 = vld [vmem:[%s14676_s1 + $0x418] sm:$0xff]  }
 0x170   : > { %6237 = vmatprep.mubr.bf16.mxu1 %v11815_v54  ;;  %7810 = vmatprep.mubr.bf16.mxu0 %v11817_v55  ;;  %v11907_v53 = vld [vmem:[%s13025_s30 + $0xd1c] ss:$88 sps:$4 sm:$0xff]   ;;  %v11909_v54 = vld [vmem:[%s13025_s30 + $0x24c] ss:$88 sps:$4 sm:$0xff]  }
 0x171   : > { %6467 = vmatpush1.bf16.msra.mxu1 %v11919_v56  ;;  %v11948_v55 = vld [vmem:[%s14676_s1 + $0x420] sm:$0xff]   ;;  %v11911_v56 = vld [vmem:[%s13025_s30 + $0xd18] ss:$88 sps:$4 sm:$0xff]  }
 0x172   : > { %6468 = vmatprep.subr.bf16.mxu1 %v12910_v1 }
 0x175   : > { %6469 = vmatpush1.bf16.msra.mxu1 %v11933_v61  ;;  %v11976_v61 = vld [vmem:[%s14676_s1 + $0x430] sm:$0xff]  }
 0x176   : > { %6470 = vmatprep.subr.bf16.mxu1 %v12910_v1 }
 0x177   : > { %6238 = vmatmul.mubr.bf16.gmra.mrb[24].mxu1 %v11819_v57  ;;  %7811 = vmatmul.mubr.bf16.gmra.mrb[88].mxu0 %v11820_v58  ;;  %v11962_v57 = vld [vmem:[%s14676_s1 + $0x428] sm:$0xff]  }
 0x178   : > { %6245 = vmatprep.mubr.bf16.mxu1 %v11823_v59  ;;  %7818 = vmatprep.mubr.bf16.mxu0 %v11825_v60  ;;  %v11912_v58 = vld [vmem:[%s13025_s30 + $0x248] ss:$88 sps:$4 sm:$0xff]   ;;  %v11913_v59 = vld [vmem:[%s13025_s30 + $0xdcc] ss:$88 sps:$4 sm:$0xff]   ;;  %v11915_v60 = vld [vmem:[%s13025_s30 + $0x2fc] ss:$88 sps:$4 sm:$0xff]  }
 0x179   : > { %6471 = vmatpush1.bf16.msra.mxu1 %v11947_v7  ;;  %v11926_v7 = vld [vmem:[%s13025_s30 + $0x3a8] ss:$88 sps:$4 sm:$0xff]  }
 0x17a   : > { %6472 = vmatprep.subr.bf16.mxu1 %v12910_v1 }
 0x17d   : > { %6473 = vmatpush1.bf16.msra.mxu1 %v11961_v16  ;;  %v11939_v16 = vld [vmem:[%s13025_s30 + $0xfd8] ss:$88 sps:$4 sm:$0xff]  }
 0x17e   : > { %6474 = vmatprep.subr.bf16.mxu1 %v12910_v1 }
 0x17f   : > { %6246 = vmatmul.mubr.bf16.gmra.mrb[28].mxu1 %v11827_v62  ;;  %7819 = vmatmul.mubr.bf16.gmra.mrb[92].mxu0 %v11828_v63  ;;  %v11917_v62 = vld [vmem:[%s13025_s30 + $0xdc8] ss:$88 sps:$4 sm:$0xff]   ;;  %v11990_v63 = vld [vmem:[%s14676_s1 + $0x438] sm:$0xff]  }
 0x180   : > { %6253 = vmatprep.mubr.bf16.mxu1 %v11829_v0  ;;  %7826 = vmatprep.mubr.bf16.mxu0 %v11831_v2  ;;  %v11918_v0 = vld [vmem:[%s13025_s30 + $0x2f8] ss:$88 sps:$4 sm:$0xff]   ;;  %v11921_v2 = vld [vmem:[%s13025_s30 + $0xe7c] ss:$88 sps:$4 sm:$0xff]  }
 0x181   : > { %6475 = vmatpush1.bf16.msra.mxu1 %v11975_v25  ;;  %v11953_v25 = vld [vmem:[%s13025_s30 + $0x1138] ss:$88 sps:$4 sm:$0xff]  }
 0x182   : > { %6476 = vmatprep.subr.bf16.mxu1 %v12910_v1 }
 0x185   : > { %6477 = vmatpush1.bf16.msra.mxu1 %v11989_v34  ;;  %v11967_v34 = vld [vmem:[%s13025_s30 + $0x1298] ss:$88 sps:$4 sm:$0xff]  }
 0x186   : > { %6735 = vmatprep.subr.bf16.mxu1 %v12910_v1 }
 0x187   : > { %6254 = vmatmul.mubr.bf16.gmra.mrb[32].mxu1 %v11833_v3  ;;  %7827 = vmatmul.mubr.bf16.gmra.mrb[96].mxu0 %v11834_v4  ;;  %v11923_v3 = vld [vmem:[%s13025_s30 + $0x3ac] ss:$88 sps:$4 sm:$0xff]  }
 0x188   : > { %6261 = vmatprep.mubr.bf16.mxu1 %v11837_v5  ;;  %7834 = vmatprep.mubr.bf16.mxu0 %v11839_v6  ;;  %v12004_v4 = vld [vmem:[%s14676_s1 + $0x440] sm:$0xff]   ;;  %v12018_v5 = vld [vmem:[%s14676_s1 + $0x448] sm:$0xff]   ;;  %v11925_v6 = vld [vmem:[%s13025_s30 + $0xe78] ss:$88 sps:$4 sm:$0xff]  }
 0x18f   : > { %6262 = vmatmul.mubr.bf16.gmra.mrb[36].mxu1 %v11841_v8  ;;  %7835 = vmatmul.mubr.bf16.gmra.mrb[100].mxu0 %v11842_v9  ;;  %v11927_v8 = vld [vmem:[%s13025_s30 + $0xf2c] ss:$88 sps:$4 sm:$0xff]   ;;  %v11929_v9 = vld [vmem:[%s13025_s30 + $0x45c] ss:$88 sps:$4 sm:$0xff]  }
 0x190   : > { %6269 = vmatprep.mubr.bf16.mxu1 %v11843_v10  ;;  %7842 = vmatprep.mubr.bf16.mxu0 %v11845_v11  ;;  %v12032_v10 = vld [vmem:[%s14676_s1 + $0x450] sm:$0xff]   ;;  %v11931_v11 = vld [vmem:[%s13025_s30 + $0xf28] ss:$88 sps:$4 sm:$0xff]  }
 0x197   : > { %6270 = vmatmul.mubr.bf16.gmra.mrb[40].mxu1 %v11847_v12  ;;  %7843 = vmatmul.mubr.bf16.gmra.mrb[104].mxu0 %v11848_v13  ;;  %v11932_v12 = vld [vmem:[%s13025_s30 + $0x458] ss:$88 sps:$4 sm:$0xff]   ;;  %v11935_v13 = vld [vmem:[%s13025_s30 + $0xfdc] ss:$88 sps:$4 sm:$0xff]  }
 0x198   : > { %6277 = vmatprep.mubr.bf16.mxu1 %v11851_v14  ;;  %7850 = vmatprep.mubr.bf16.mxu0 %v11853_v15  ;;  %v11937_v14 = vld [vmem:[%s13025_s30 + $0x50c] ss:$88 sps:$4 sm:$0xff]   ;;  %v12046_v15 = vld [vmem:[%s14676_s1 + $0x458] sm:$0xff]  }
 0x19f   : > { %6278 = vmatmul.mubr.bf16.gmra.mrb[44].mxu1 %v11855_v17  ;;  %7851 = vmatmul.mubr.bf16.gmra.mrb[108].mxu0 %v11856_v18  ;;  %v11940_v17 = vld [vmem:[%s13025_s30 + $0x508] ss:$88 sps:$4 sm:$0xff]   ;;  %v11941_v18 = vld [vmem:[%s13025_s30 + $0x108c] ss:$88 sps:$4 sm:$0xff]  }
 0x1a0   : > { %6285 = vmatprep.mubr.bf16.mxu1 %v11857_v19  ;;  %7858 = vmatprep.mubr.bf16.mxu0 %v11859_v20  ;;  %v11943_v19 = vld [vmem:[%s13025_s30 + $0x5bc] ss:$88 sps:$4 sm:$0xff]   ;;  %v11945_v20 = vld [vmem:[%s13025_s30 + $0x1088] ss:$88 sps:$4 sm:$0xff]  }
 0x1a7   : > { %6286 = vmatmul.mubr.bf16.gmra.mrb[48].mxu1 %v11861_v21  ;;  %7859 = vmatmul.mubr.bf16.gmra.mrb[112].mxu0 %v11862_v22  ;;  %v11946_v21 = vld [vmem:[%s13025_s30 + $0x5b8] ss:$88 sps:$4 sm:$0xff]   ;;  %v11949_v22 = vld [vmem:[%s13025_s30 + $0x113c] ss:$88 sps:$4 sm:$0xff]  }
 0x1a8   : > { %6293 = vmatprep.mubr.bf16.mxu1 %v11865_v23  ;;  %7866 = vmatprep.mubr.bf16.mxu0 %v11867_v24  ;;  %v11951_v23 = vld [vmem:[%s13025_s30 + $0x66c] ss:$88 sps:$4 sm:$0xff]  }
 0x1a9   : > { %v12060_v24 = vld [vmem:[%s14676_s1 + $0x460] sm:$0xff]  }
 0x1af   : > { %6294 = vmatmul.mubr.bf16.gmra.mrb[52].mxu1 %v11869_v26  ;;  %7867 = vmatmul.mubr.bf16.gmra.mrb[116].mxu0 %v11870_v27  ;;  %v11954_v26 = vld [vmem:[%s13025_s30 + $0x668] ss:$88 sps:$4 sm:$0xff]   ;;  %v11955_v27 = vld [vmem:[%s13025_s30 + $0x11ec] ss:$88 sps:$4 sm:$0xff]  }
 0x1b0   : > { %6301 = vmatprep.mubr.bf16.mxu1 %v11871_v28  ;;  %7874 = vmatprep.mubr.bf16.mxu0 %v11873_v29  ;;  %v11957_v28 = vld [vmem:[%s13025_s30 + $0x71c] ss:$88 sps:$4 sm:$0xff]   ;;  %v11959_v29 = vld [vmem:[%s13025_s30 + $0x11e8] ss:$88 sps:$4 sm:$0xff]  }
 0x1b7   : > { %6302 = vmatmul.mubr.bf16.gmra.mrb[56].mxu1 %v11875_v30  ;;  %7875 = vmatmul.mubr.bf16.gmra.mrb[120].mxu0 %v11876_v31  ;;  %v11960_v30 = vld [vmem:[%s13025_s30 + $0x718] ss:$88 sps:$4 sm:$0xff]   ;;  %v11963_v31 = vld [vmem:[%s13025_s30 + $0x129c] ss:$88 sps:$4 sm:$0xff]  }
 0x1b8   : > { %6309 = vmatprep.mubr.bf16.mxu1 %v11879_v32  ;;  %7882 = vmatprep.mubr.bf16.mxu0 %v11881_v33  ;;  %v11965_v32 = vld [vmem:[%s13025_s30 + $0x7cc] ss:$88 sps:$4 sm:$0xff]  }
 0x1b9   : > { %v12074_v33 = vld [vmem:[%s14676_s1 + $0x468] sm:$0xff]  }
 0x1bf   : > { %6310 = vmatmul.mubr.bf16.gmra.mrb[60].mxu1 %v11883_v35  ;;  %7883 = vmatmul.mubr.bf16.gmra.mrb[124].mxu0 %v11884_v36  ;;  %v11968_v35 = vld [vmem:[%s13025_s30 + $0x7c8] ss:$88 sps:$4 sm:$0xff]   ;;  %v11969_v36 = vld [vmem:[%s13025_s30 + $0x134c] ss:$88 sps:$4 sm:$0xff]  }
 0x1c0   : > { %6317 = vmatprep.mubr.bf16.mxu1 %v11885_v37  ;;  %7923 = vmatprep.mubr.bf16.mxu0 %v11889_v38  ;;  %v11971_v37 = vld [vmem:[%s13025_s30 + $0x87c] ss:$88 sps:$4 sm:$0xff]   ;;  %v11973_v38 = vld [vmem:[%s13025_s30 + $0x1348] ss:$88 sps:$4 sm:$0xff]  }
 0x1c7   : > { %6318 = vmatmul.mubr.bf16.gmra.mrb[64].mxu1 %v11890_v39  ;;  %7924 = vmatmul.mubr.bf16.vlgmr.msra.gmra.mrb[0].mxu0 %v11887_v40  ;;  %v11974_v39 = vld [vmem:[%s13025_s30 + $0x878] ss:$88 sps:$4 sm:$0xff]   ;;  %v11977_v40 = vld [vmem:[%s13025_s30 + $0x13fc] ss:$88 sps:$4 sm:$0xff]  }
 0x1c8   : > { %6325 = vmatprep.mubr.bf16.mxu1 %v11893_v41  ;;  %8181 = vmatpush1.bf16.msra.mxu0 %v11892_v42  ;;  %v11979_v41 = vld [vmem:[%s13025_s30 + $0x92c] ss:$88 sps:$4 sm:$0xff]   ;;  %v12088_v42 = vld [vmem:[%s14676_s1 + $0x470] sm:$0xff]  }
 0x1c9   : > { %7931 = vmatprep.mubr.bf16.mxu0 %v11895_v43  ;;  %8182 = vmatprep.subr.bf16.mxu0 %v12910_v1  ;;  %v11981_v43 = vld [vmem:[%s13025_s30 + $0x13f8] ss:$88 sps:$4 sm:$0xff]  }
 0x1cc   : > { %8183 = vmatpush1.bf16.msra.mxu0 %v11906_v45  ;;  %v11983_v45 = vld [vmem:[%s13025_s30 + $0x14ac] ss:$88 sps:$4 sm:$0xff]  }
 0x1cd   : > { %8184 = vmatprep.subr.bf16.mxu0 %v12910_v1 }
 0x1cf   : > { %6326 = vmatmul.mubr.bf16.gmra.mrb[68].mxu1 %v11897_v44  ;;  %7932 = vmatmul.mubr.bf16.gmra.mrb[4].mxu0 %v11898_v46  ;;  %v11982_v44 = vld [vmem:[%s13025_s30 + $0x928] ss:$88 sps:$4 sm:$0xff]   ;;  %v11985_v46 = vld [vmem:[%s13025_s30 + $0x9dc] ss:$88 sps:$4 sm:$0xff]  }
 0x1d0   : > { %6333 = vmatprep.mubr.bf16.mxu1 %v11899_v47  ;;  %7939 = vmatprep.mubr.bf16.mxu0 %v11901_v48  ;;  %v11987_v47 = vld [vmem:[%s13025_s30 + $0x14a8] ss:$88 sps:$4 sm:$0xff]   ;;  %v11988_v48 = vld [vmem:[%s13025_s30 + $0x9d8] ss:$88 sps:$4 sm:$0xff]  }
 0x1d1   : > { %8185 = vmatpush1.bf16.msra.mxu0 %v11920_v49  ;;  %v11991_v49 = vld [vmem:[%s13025_s30 + $0x155c] ss:$88 sps:$4 sm:$0xff]  }
 0x1d2   : > { %8186 = vmatprep.subr.bf16.mxu0 %v12910_v1 }
 0x1d5   : > { %8187 = vmatpush1.bf16.msra.mxu0 %v11934_v51  ;;  %v12102_v51 = vld [vmem:[%s14676_s1 + $0x478] sm:$0xff]  }
 0x1d6   : > { %8188 = vmatprep.subr.bf16.mxu0 %v12910_v1 }
 0x1d7   : > { %6334 = vmatmul.mubr.bf16.gmra.mrb[72].mxu1 %v11903_v50  ;;  %7940 = vmatmul.mubr.bf16.gmra.mrb[8].mxu0 %v11904_v52  ;;  %v11993_v50 = vld [vmem:[%s13025_s30 + $0xa8c] ss:$88 sps:$4 sm:$0xff]   ;;  %v11995_v52 = vld [vmem:[%s13025_s30 + $0x1558] ss:$88 sps:$4 sm:$0xff]  }
 0x1d8   : > { %6341 = vmatprep.mubr.bf16.mxu1 %v11907_v53  ;;  %7947 = vmatprep.mubr.bf16.mxu0 %v11909_v54  ;;  %v11996_v53 = vld [vmem:[%s13025_s30 + $0xa88] ss:$88 sps:$4 sm:$0xff]   ;;  %v11999_v54 = vld [vmem:[%s13025_s30 + $0x14] ss:$88 sps:$4 sm:$0xff]  }
 0x1d9   : > { %8189 = vmatpush1.bf16.msra.mxu0 %v11948_v55  ;;  %v12000_v55 = vld [vmem:[%s13025_s30 + $0xb3c] ss:$88 sps:$4 sm:$0xff]  }
 0x1da   : > { %8190 = vmatprep.subr.bf16.mxu0 %v12910_v1 }
 0x1dd   : > { %8191 = vmatpush1.bf16.msra.mxu0 %v11962_v57  ;;  %v12002_v57 = vld [vmem:[%s13025_s30 + $0xb38] ss:$88 sps:$4 sm:$0xff]  }
 0x1de   : > { %8192 = vmatprep.subr.bf16.mxu0 %v12910_v1 }
 0x1df   : > { %6342 = vmatmul.mubr.bf16.gmra.mrb[76].mxu1 %v11911_v56  ;;  %7948 = vmatmul.mubr.bf16.gmra.mrb[12].mxu0 %v11912_v58  ;;  %v11997_v56 = vld [vmem:[%s13025_s30 + $0x10] ss:$88 sps:$4 sm:$0xff]   ;;  %v12003_v58 = vld [vmem:[%s14676_s1 + $0x180] sm:$0xff]  }
 0x1e0   : > { %6349 = vmatprep.mubr.bf16.mxu1 %v11913_v59  ;;  %7955 = vmatprep.mubr.bf16.mxu0 %v11915_v60  ;;  %v12005_v59 = vld [vmem:[%s13025_s30 + $0xc4] ss:$88 sps:$4 sm:$0xff]  }
 0x1e1   : > { %8193 = vmatpush1.bf16.msra.mxu0 %v11976_v61  ;;  %v12007_v60 = vld [vmem:[%s13025_s30 + $0xbec] ss:$88 sps:$4 sm:$0xff]  }
 0x1e2   : > { %8194 = vmatprep.subr.bf16.mxu0 %v12910_v1  ;;  %v12017_v61 = vld [vmem:[%s14676_s1 + $0x188] sm:$0xff]  }
 0x1e5   : > { %8195 = vmatpush1.bf16.msra.mxu0 %v11990_v63  ;;  %v12010_v63 = vld [vmem:[%s13025_s30 + $0xbe8] ss:$88 sps:$4 sm:$0xff]  }
 0x1e6   : > { %8196 = vmatprep.subr.bf16.mxu0 %v12910_v1 }
 0x1e7   : > { %6350 = vmatmul.mubr.bf16.gmra.mrb[80].mxu1 %v11917_v62  ;;  %7956 = vmatmul.mubr.bf16.gmra.mrb[16].mxu0 %v11918_v0  ;;  %v12009_v62 = vld [vmem:[%s13025_s30 + $0xc0] ss:$88 sps:$4 sm:$0xff]   ;;  %v12011_v0 = vld [vmem:[%s13025_s30 + $0x174] ss:$88 sps:$4 sm:$0xff]  }
 0x1e8   : > { %6357 = vmatprep.mubr.bf16.mxu1 %v11921_v2  ;;  %7963 = vmatprep.mubr.bf16.mxu0 %v11923_v3  ;;  %v12013_v2 = vld [vmem:[%s13025_s30 + $0xc9c] ss:$88 sps:$4 sm:$0xff]  }
 0x1e9   : > { %8197 = vmatpush1.bf16.msra.mxu0 %v12004_v4  ;;  %v12031_v3 = vld [vmem:[%s14676_s1 + $0x190] sm:$0xff]   ;;  %v12045_v4 = vld [vmem:[%s14676_s1 + $0x198] sm:$0xff]  }
 0x1ea   : > { %8198 = vmatprep.subr.bf16.mxu0 %v12910_v1 }
 0x1ed   : > { %8199 = vmatpush1.bf16.msra.mxu0 %v12018_v5  ;;  %v12015_v5 = vld [vmem:[%s13025_s30 + $0x170] ss:$88 sps:$4 sm:$0xff]  }
 0x1ee   : > { %8200 = vmatprep.subr.bf16.mxu0 %v12910_v1 }
 0x1ef   : > { %6358 = vmatmul.mubr.bf16.gmra.mrb[84].mxu1 %v11925_v6  ;;  %7964 = vmatmul.mubr.bf16.gmra.mrb[20].mxu0 %v11926_v7  ;;  %v12016_v6 = vld [vmem:[%s13025_s30 + $0xc98] ss:$88 sps:$4 sm:$0xff]   ;;  %v12019_v7 = vld [vmem:[%s13025_s30 + $0x224] ss:$88 sps:$4 sm:$0xff]  }
 0x1f0   : > { %6365 = vmatprep.mubr.bf16.mxu1 %v11927_v8  ;;  %7971 = vmatprep.mubr.bf16.mxu0 %v11929_v9  ;;  %v12021_v8 = vld [vmem:[%s13025_s30 + $0xd4c] ss:$88 sps:$4 sm:$0xff]  }
 0x1f1   : > { %8201 = vmatpush1.bf16.msra.mxu0 %v12032_v10  ;;  %v12059_v9 = vld [vmem:[%s14676_s1 + $0x1a0] sm:$0xff]   ;;  %v12073_v10 = vld [vmem:[%s14676_s1 + $0x1a8] sm:$0xff]  }
 0x1f2   : > { %8202 = vmatprep.subr.bf16.mxu0 %v12910_v1 }
 0x1f5   : > { %8203 = vmatpush1.bf16.msra.mxu0 %v12046_v15  ;;  %v12087_v15 = vld [vmem:[%s14676_s1 + $0x1b0] sm:$0xff]  }
 0x1f6   : > { %8204 = vmatprep.subr.bf16.mxu0 %v12910_v1 }
 0x1f7   : > { %6366 = vmatmul.mubr.bf16.gmra.mrb[88].mxu1 %v11931_v11  ;;  %7972 = vmatmul.mubr.bf16.gmra.mrb[24].mxu0 %v11932_v12  ;;  %v12023_v11 = vld [vmem:[%s13025_s30 + $0x220] ss:$88 sps:$4 sm:$0xff]  }
 0x1f8   : > { %6373 = vmatprep.mubr.bf16.mxu1 %v11935_v13  ;;  %7979 = vmatprep.mubr.bf16.mxu0 %v11937_v14  ;;  %v12024_v12 = vld [vmem:[%s13025_s30 + $0xd48] ss:$88 sps:$4 sm:$0xff]   ;;  %v12025_v13 = vld [vmem:[%s13025_s30 + $0x2d4] ss:$88 sps:$4 sm:$0xff]  }
 0x1f9   : > { %8205 = vmatpush1.bf16.msra.mxu0 %v12060_v24  ;;  %v12027_v14 = vld [vmem:[%s13025_s30 + $0xdfc] ss:$88 sps:$4 sm:$0xff]   ;;  %v12038_v24 = vld [vmem:[%s13025_s30 + $0xea8] ss:$88 sps:$4 sm:$0xff]  }
 0x1fa   : > { %8206 = vmatprep.subr.bf16.mxu0 %v12910_v1 }
 0x1fd   : > { %8207 = vmatpush1.bf16.msra.mxu0 %v12074_v33  ;;  %v12051_v33 = vld [vmem:[%s13025_s30 + $0x4e0] ss:$88 sps:$4 sm:$0xff]  }
 0x1fe   : > { %8208 = vmatprep.subr.bf16.mxu0 %v12910_v1 }
 0x1ff   : > { %6374 = vmatmul.mubr.bf16.gmra.mrb[92].mxu1 %v11939_v16  ;;  %7980 = vmatmul.mubr.bf16.gmra.mrb[28].mxu0 %v11940_v17  ;;  %v12101_v16 = vld [vmem:[%s14676_s1 + $0x1b8] sm:$0xff]   ;;  %v12029_v17 = vld [vmem:[%s13025_s30 + $0x2d0] ss:$88 sps:$4 sm:$0xff]  }
 0x200   : > { %6381 = vmatprep.mubr.bf16.mxu1 %v11941_v18  ;;  %7987 = vmatprep.mubr.bf16.mxu0 %v11943_v19  ;;  %v12030_v18 = vld [vmem:[%s13025_s30 + $0xdf8] ss:$88 sps:$4 sm:$0xff]   ;;  %v12033_v19 = vld [vmem:[%s13025_s30 + $0x384] ss:$88 sps:$4 sm:$0xff]  }
 0x201   : > { %8209 = vmatpush1.bf16.msra.mxu0 %v12088_v42  ;;  %v12065_v42 = vld [vmem:[%s13025_s30 + $0x640] ss:$88 sps:$4 sm:$0xff]  }
 0x202   : > { %8210 = vmatprep.subr.bf16.mxu0 %v12910_v1 }
 0x205   : > { %8211 = vmatpush1.bf16.msra.mxu0 %v12102_v51  ;;  %v12079_v51 = vld [vmem:[%s13025_s30 + $0x7a0] ss:$88 sps:$4 sm:$0xff]  }
 0x206   : > { %8469 = vmatprep.subr.bf16.mxu0 %v12910_v1 }
 0x207   : > { %6382 = vmatmul.mubr.bf16.gmra.mrb[96].mxu1 %v11945_v20  ;;  %7988 = vmatmul.mubr.bf16.gmra.mrb[32].mxu0 %v11946_v21  ;;  %v12035_v20 = vld [vmem:[%s13025_s30 + $0xeac] ss:$88 sps:$4 sm:$0xff]  }
 0x208   : > { %6389 = vmatprep.mubr.bf16.mxu1 %v11949_v22  ;;  %7995 = vmatprep.mubr.bf16.mxu0 %v11951_v23  ;;  %v12115_v21 = vld [vmem:[%s14676_s1 + $0x1c0] sm:$0xff]   ;;  %v12129_v22 = vld [vmem:[%s14676_s1 + $0x1c8] sm:$0xff]  }
 0x209   : > { %v12037_v23 = vld [vmem:[%s13025_s30 + $0x380] ss:$88 sps:$4 sm:$0xff]  }
 0x20f   : > { %6390 = vmatmul.mubr.bf16.gmra.mrb[100].mxu1 %v11953_v25  ;;  %7996 = vmatmul.mubr.bf16.gmra.mrb[36].mxu0 %v11954_v26  ;;  %v12039_v25 = vld [vmem:[%s13025_s30 + $0x434] ss:$88 sps:$4 sm:$0xff]  }
 0x210   : > { %6397 = vmatprep.mubr.bf16.mxu1 %v11955_v27  ;;  %8003 = vmatprep.mubr.bf16.mxu0 %v11957_v28  ;;  %v12041_v26 = vld [vmem:[%s13025_s30 + $0xf5c] ss:$88 sps:$4 sm:$0xff]   ;;  %v12043_v28 = vld [vmem:[%s13025_s30 + $0x430] ss:$88 sps:$4 sm:$0xff]  }
 0x211   : > { %v12143_v27 = vld [vmem:[%s14676_s1 + $0x1d0] sm:$0xff]  }
 0x217   : > { %6398 = vmatmul.mubr.bf16.gmra.mrb[104].mxu1 %v11959_v29  ;;  %8004 = vmatmul.mubr.bf16.gmra.mrb[40].mxu0 %v11960_v30  ;;  %v12044_v29 = vld [vmem:[%s13025_s30 + $0xf58] ss:$88 sps:$4 sm:$0xff]   ;;  %v12047_v30 = vld [vmem:[%s13025_s30 + $0x4e4] ss:$88 sps:$4 sm:$0xff]  }
 0x218   : > { %6405 = vmatprep.mubr.bf16.mxu1 %v11963_v31  ;;  %8011 = vmatprep.mubr.bf16.mxu0 %v11965_v32  ;;  %v12049_v31 = vld [vmem:[%s13025_s30 + $0x100c] ss:$88 sps:$4 sm:$0xff]   ;;  %v12157_v32 = vld [vmem:[%s14676_s1 + $0x1d8] sm:$0xff]  }
 0x21f   : > { %6406 = vmatmul.mubr.bf16.gmra.mrb[108].mxu1 %v11967_v34  ;;  %8012 = vmatmul.mubr.bf16.gmra.mrb[44].mxu0 %v11968_v35  ;;  %v12052_v34 = vld [vmem:[%s13025_s30 + $0x1008] ss:$88 sps:$4 sm:$0xff]   ;;  %v12053_v35 = vld [vmem:[%s13025_s30 + $0x594] ss:$88 sps:$4 sm:$0xff]  }
 0x220   : > { %6413 = vmatprep.mubr.bf16.mxu1 %v11969_v36  ;;  %8019 = vmatprep.mubr.bf16.mxu0 %v11971_v37  ;;  %v12055_v36 = vld [vmem:[%s13025_s30 + $0x10bc] ss:$88 sps:$4 sm:$0xff]   ;;  %v12057_v37 = vld [vmem:[%s13025_s30 + $0x590] ss:$88 sps:$4 sm:$0xff]  }
 0x227   : > { %6414 = vmatmul.mubr.bf16.gmra.mrb[112].mxu1 %v11973_v38  ;;  %8020 = vmatmul.mubr.bf16.gmra.mrb[48].mxu0 %v11974_v39  ;;  %v12058_v38 = vld [vmem:[%s13025_s30 + $0x10b8] ss:$88 sps:$4 sm:$0xff]   ;;  %v12061_v39 = vld [vmem:[%s13025_s30 + $0x644] ss:$88 sps:$4 sm:$0xff]  }
 0x228   : > { %6421 = vmatprep.mubr.bf16.mxu1 %v11977_v40  ;;  %8027 = vmatprep.mubr.bf16.mxu0 %v11979_v41  ;;  %v12063_v40 = vld [vmem:[%s13025_s30 + $0x116c] ss:$88 sps:$4 sm:$0xff]  }
 0x229   : > { %v12171_v41 = vld [vmem:[%s14676_s1 + $0x1e0] sm:$0xff]  }
 0x22f   : > { %6422 = vmatmul.mubr.bf16.gmra.mrb[116].mxu1 %v11981_v43  ;;  %8028 = vmatmul.mubr.bf16.gmra.mrb[52].mxu0 %v11982_v44  ;;  %v12066_v43 = vld [vmem:[%s13025_s30 + $0x1168] ss:$88 sps:$4 sm:$0xff]   ;;  %v12067_v44 = vld [vmem:[%s13025_s30 + $0x6f4] ss:$88 sps:$4 sm:$0xff]  }
 0x230   : > { %6429 = vmatprep.mubr.bf16.mxu1 %v11983_v45  ;;  %8035 = vmatprep.mubr.bf16.mxu0 %v11985_v46  ;;  %v12069_v45 = vld [vmem:[%s13025_s30 + $0x121c] ss:$88 sps:$4 sm:$0xff]   ;;  %v12071_v46 = vld [vmem:[%s13025_s30 + $0x6f0] ss:$88 sps:$4 sm:$0xff]  }
 0x237   : > { %6430 = vmatmul.mubr.bf16.gmra.mrb[120].mxu1 %v11987_v47  ;;  %8036 = vmatmul.mubr.bf16.gmra.mrb[56].mxu0 %v11988_v48  ;;  %v12072_v47 = vld [vmem:[%s13025_s30 + $0x1218] ss:$88 sps:$4 sm:$0xff]   ;;  %v12075_v48 = vld [vmem:[%s13025_s30 + $0x7a4] ss:$88 sps:$4 sm:$0xff]  }
 0x238   : > { %6437 = vmatprep.mubr.bf16.mxu1 %v11991_v49  ;;  %8043 = vmatprep.mubr.bf16.mxu0 %v11993_v50  ;;  %v12077_v49 = vld [vmem:[%s13025_s30 + $0x12cc] ss:$88 sps:$4 sm:$0xff]  }
 0x239   : > { %v12185_v50 = vld [vmem:[%s14676_s1 + $0x1e8] sm:$0xff]  }
 0x23f   : > { %6438 = vmatmul.mubr.bf16.gmra.mrb[124].mxu1 %v11995_v52  ;;  %8044 = vmatmul.mubr.bf16.gmra.mrb[60].mxu0 %v11996_v53  ;;  %v12080_v52 = vld [vmem:[%s13025_s30 + $0x12c8] ss:$88 sps:$4 sm:$0xff]   ;;  %v12081_v53 = vld [vmem:[%s13025_s30 + $0x854] ss:$88 sps:$4 sm:$0xff]  }
 0x240   : > { %6478 = vmatprep.mubr.bf16.mxu1 %v11999_v54  ;;  %8051 = vmatprep.mubr.bf16.mxu0 %v12000_v55  ;;  %v12083_v54 = vld [vmem:[%s13025_s30 + $0x137c] ss:$88 sps:$4 sm:$0xff]   ;;  %v12085_v55 = vld [vmem:[%s13025_s30 + $0x850] ss:$88 sps:$4 sm:$0xff]  }
 0x247   : > { %6479 = vmatmul.mubr.bf16.vlgmr.msra.gmra.mrb[0].mxu1 %v11997_v56  ;;  %8052 = vmatmul.mubr.bf16.gmra.mrb[64].mxu0 %v12002_v57  ;;  %v12086_v56 = vld [vmem:[%s13025_s30 + $0x1378] ss:$88 sps:$4 sm:$0xff]   ;;  %v12089_v57 = vld [vmem:[%s13025_s30 + $0x904] ss:$88 sps:$4 sm:$0xff]  }
 0x248   : > { %6736 = vmatpush1.bf16.msra.mxu1 %v12003_v58  ;;  %6486 = vmatprep.mubr.bf16.mxu1 %v12005_v59  ;;  %v12091_v58 = vld [vmem:[%s13025_s30 + $0x142c] ss:$88 sps:$4 sm:$0xff]   ;;  %v12199_v59 = vld [vmem:[%s14676_s1 + $0x1f0] sm:$0xff]  }
 0x249   : > { %8059 = vmatprep.mubr.bf16.mxu0 %v12007_v60  ;;  %6737 = vmatprep.subr.bf16.mxu1 %v12910_v1  ;;  %v12093_v60 = vld [vmem:[%s13025_s30 + $0x900] ss:$88 sps:$4 sm:$0xff]  }
 0x24c   : > { %6738 = vmatpush1.bf16.msra.mxu1 %v12017_v61  ;;  %v12094_v61 = vld [vmem:[%s13025_s30 + $0x1428] ss:$88 sps:$4 sm:$0xff]  }
 0x24d   : > { %6739 = vmatprep.subr.bf16.mxu1 %v12910_v1 }
 0x24f   : > { %6487 = vmatmul.mubr.bf16.gmra.mrb[4].mxu1 %v12009_v62  ;;  %8060 = vmatmul.mubr.bf16.gmra.mrb[68].mxu0 %v12010_v63  ;;  %v12095_v62 = vld [vmem:[%s13025_s30 + $0x9b4] ss:$88 sps:$4 sm:$0xff]  }
 0x250   : > { %6494 = vmatprep.mubr.bf16.mxu1 %v12011_v0  ;;  %8067 = vmatprep.mubr.bf16.mxu0 %v12013_v2  ;;  %v12097_v63 = vld [vmem:[%s13025_s30 + $0x14dc] ss:$88 sps:$4 sm:$0xff]   ;;  %v12099_v0 = vld [vmem:[%s13025_s30 + $0x9b0] ss:$88 sps:$4 sm:$0xff]  }
 0x251   : > { %6740 = vmatpush1.bf16.msra.mxu1 %v12031_v3  ;;  %v12100_v2 = vld [vmem:[%s13025_s30 + $0x14d8] ss:$88 sps:$4 sm:$0xff]   ;;  %v12103_v3 = vld [vmem:[%s13025_s30 + $0xa64] ss:$88 sps:$4 sm:$0xff]  }
 0x252   : > { %6741 = vmatprep.subr.bf16.mxu1 %v12910_v1 }
 0x255   : > { %6742 = vmatpush1.bf16.msra.mxu1 %v12045_v4  ;;  %v12105_v4 = vld [vmem:[%s13025_s30 + $0x158c] ss:$88 sps:$4 sm:$0xff]  }
 0x256   : > { %6743 = vmatprep.subr.bf16.mxu1 %v12910_v1 }
 0x257   : > { %6495 = vmatmul.mubr.bf16.gmra.mrb[8].mxu1 %v12015_v5  ;;  %8068 = vmatmul.mubr.bf16.gmra.mrb[72].mxu0 %v12016_v6  ;;  %v12213_v5 = vld [vmem:[%s14676_s1 + $0x1f8] sm:$0xff]  }
 0x258   : > { %6502 = vmatprep.mubr.bf16.mxu1 %v12019_v7  ;;  %8075 = vmatprep.mubr.bf16.mxu0 %v12021_v8  ;;  %v12107_v6 = vld [vmem:[%s13025_s30 + $0xa60] ss:$88 sps:$4 sm:$0xff]   ;;  %v12109_v8 = vld [vmem:[%s13025_s30 + $0xb14] ss:$88 sps:$4 sm:$0xff]  }
 0x259   : > { %6744 = vmatpush1.bf16.msra.mxu1 %v12059_v9  ;;  %v12108_v7 = vld [vmem:[%s13025_s30 + $0x1588] ss:$88 sps:$4 sm:$0xff]   ;;  %v12113_v9 = vld [vmem:[%s13025_s30 + $0x44] ss:$88 sps:$4 sm:$0xff]  }
 0x25a   : > { %6745 = vmatprep.subr.bf16.mxu1 %v12910_v1 }
 0x25d   : > { %6746 = vmatpush1.bf16.msra.mxu1 %v12073_v10  ;;  %v12114_v10 = vld [vmem:[%s13025_s30 + $0xb10] ss:$88 sps:$4 sm:$0xff]  }
 0x25e   : > { %6747 = vmatprep.subr.bf16.mxu1 %v12910_v1 }
 0x25f   : > { %6503 = vmatmul.mubr.bf16.gmra.mrb[12].mxu1 %v12023_v11  ;;  %8076 = vmatmul.mubr.bf16.gmra.mrb[76].mxu0 %v12024_v12  ;;  %v12111_v11 = vld [vmem:[%s13025_s30 + $0x40] ss:$88 sps:$4 sm:$0xff]   ;;  %v12117_v12 = vld [vmem:[%s13025_s30 + $0xbc4] ss:$88 sps:$4 sm:$0xff]  }
 0x260   : > { %6510 = vmatprep.mubr.bf16.mxu1 %v12025_v13  ;;  %8083 = vmatprep.mubr.bf16.mxu0 %v12027_v14  ;;  %v12116_v13 = vld [vmem:[%s14676_s1 + $0x480] sm:$0xff]   ;;  %v12119_v14 = vld [vmem:[%s13025_s30 + $0xf4] ss:$88 sps:$4 sm:$0xff]  }
 0x261   : > { %6748 = vmatpush1.bf16.msra.mxu1 %v12087_v15  ;;  %v12130_v15 = vld [vmem:[%s14676_s1 + $0x488] sm:$0xff]  }
 0x262   : > { %6749 = vmatprep.subr.bf16.mxu1 %v12910_v1 }
 0x265   : > { %6750 = vmatpush1.bf16.msra.mxu1 %v12101_v16  ;;  %v12121_v16 = vld [vmem:[%s13025_s30 + $0xbc0] ss:$88 sps:$4 sm:$0xff]  }
 0x266   : > { %6751 = vmatprep.subr.bf16.mxu1 %v12910_v1 }
 0x267   : > { %6511 = vmatmul.mubr.bf16.gmra.mrb[16].mxu1 %v12029_v17  ;;  %8084 = vmatmul.mubr.bf16.gmra.mrb[80].mxu0 %v12030_v18  ;;  %v12122_v17 = vld [vmem:[%s13025_s30 + $0xf0] ss:$88 sps:$4 sm:$0xff]   ;;  %v12123_v18 = vld [vmem:[%s13025_s30 + $0xc74] ss:$88 sps:$4 sm:$0xff]  }
 0x268   : > { %6518 = vmatprep.mubr.bf16.mxu1 %v12033_v19  ;;  %8091 = vmatprep.mubr.bf16.mxu0 %v12035_v20  ;;  %v12125_v19 = vld [vmem:[%s13025_s30 + $0x1a4] ss:$88 sps:$4 sm:$0xff]   ;;  %v12144_v20 = vld [vmem:[%s14676_s1 + $0x490] sm:$0xff]  }
 0x269   : > { %6752 = vmatpush1.bf16.msra.mxu1 %v12115_v21  ;;  %v12158_v21 = vld [vmem:[%s14676_s1 + $0x498] sm:$0xff]  }
 0x26a   : > { %6753 = vmatprep.subr.bf16.mxu1 %v12910_v1 }
 0x26d   : > { %6754 = vmatpush1.bf16.msra.mxu1 %v12129_v22  ;;  %v12127_v22 = vld [vmem:[%s13025_s30 + $0xc70] ss:$88 sps:$4 sm:$0xff]  }
 0x26e   : > { %6755 = vmatprep.subr.bf16.mxu1 %v12910_v1 }
 0x26f   : > { %6519 = vmatmul.mubr.bf16.gmra.mrb[20].mxu1 %v12037_v23  ;;  %8092 = vmatmul.mubr.bf16.gmra.mrb[84].mxu0 %v12038_v24  ;;  %v12128_v23 = vld [vmem:[%s13025_s30 + $0x1a0] ss:$88 sps:$4 sm:$0xff]   ;;  %v12131_v24 = vld [vmem:[%s13025_s30 + $0xd24] ss:$88 sps:$4 sm:$0xff]  }
 0x270   : > { %6526 = vmatprep.mubr.bf16.mxu1 %v12039_v25  ;;  %8099 = vmatprep.mubr.bf16.mxu0 %v12041_v26  ;;  %v12133_v25 = vld [vmem:[%s13025_s30 + $0x254] ss:$88 sps:$4 sm:$0xff]   ;;  %v12172_v26 = vld [vmem:[%s14676_s1 + $0x4a0] sm:$0xff]  }
 0x271   : > { %6756 = vmatpush1.bf16.msra.mxu1 %v12143_v27  ;;  %v12186_v27 = vld [vmem:[%s14676_s1 + $0x4a8] sm:$0xff]  }
 0x272   : > { %6757 = vmatprep.subr.bf16.mxu1 %v12910_v1 }
 0x275   : > { %6758 = vmatpush1.bf16.msra.mxu1 %v12157_v32  ;;  %v12200_v32 = vld [vmem:[%s14676_s1 + $0x4b0] sm:$0xff]  }
 0x276   : > { %6759 = vmatprep.subr.bf16.mxu1 %v12910_v1 }
 0x277   : > { %6527 = vmatmul.mubr.bf16.gmra.mrb[24].mxu1 %v12043_v28  ;;  %8100 = vmatmul.mubr.bf16.gmra.mrb[88].mxu0 %v12044_v29  ;;  %v12135_v28 = vld [vmem:[%s13025_s30 + $0xd20] ss:$88 sps:$4 sm:$0xff]   ;;  %v12136_v29 = vld [vmem:[%s13025_s30 + $0x250] ss:$88 sps:$4 sm:$0xff]  }
 0x278   : > { %6534 = vmatprep.mubr.bf16.mxu1 %v12047_v30  ;;  %8107 = vmatprep.mubr.bf16.mxu0 %v12049_v31  ;;  %v12137_v30 = vld [vmem:[%s13025_s30 + $0xdd4] ss:$88 sps:$4 sm:$0xff]   ;;  %v12139_v31 = vld [vmem:[%s13025_s30 + $0x304] ss:$88 sps:$4 sm:$0xff]  }
 0x279   : > { %6760 = vmatpush1.bf16.msra.mxu1 %v12171_v41  ;;  %v12150_v41 = vld [vmem:[%s13025_s30 + $0x3b0] ss:$88 sps:$4 sm:$0xff]  }
 0x27a   : > { %6761 = vmatprep.subr.bf16.mxu1 %v12910_v1 }
 0x27d   : > { %6762 = vmatpush1.bf16.msra.mxu1 %v12185_v50  ;;  %v12163_v50 = vld [vmem:[%s13025_s30 + $0xfe0] ss:$88 sps:$4 sm:$0xff]  }
 0x27e   : > { %6763 = vmatprep.subr.bf16.mxu1 %v12910_v1 }
 0x27f   : > { %6535 = vmatmul.mubr.bf16.gmra.mrb[28].mxu1 %v12051_v33  ;;  %8108 = vmatmul.mubr.bf16.gmra.mrb[92].mxu0 %v12052_v34  ;;  %v12214_v33 = vld [vmem:[%s14676_s1 + $0x4b8] sm:$0xff]   ;;  %v12141_v34 = vld [vmem:[%s13025_s30 + $0xdd0] ss:$88 sps:$4 sm:$0xff]  }
 0x280   : > { %6542 = vmatprep.mubr.bf16.mxu1 %v12053_v35  ;;  %8115 = vmatprep.mubr.bf16.mxu0 %v12055_v36  ;;  %v12142_v35 = vld [vmem:[%s13025_s30 + $0x300] ss:$88 sps:$4 sm:$0xff]   ;;  %v12145_v36 = vld [vmem:[%s13025_s30 + $0xe84] ss:$88 sps:$4 sm:$0xff]  }
 0x281   : > { %6764 = vmatpush1.bf16.msra.mxu1 %v12199_v59  ;;  %v12177_v59 = vld [vmem:[%s13025_s30 + $0x1140] ss:$88 sps:$4 sm:$0xff]  }
 0x282   : > { %6765 = vmatprep.subr.bf16.mxu1 %v12910_v1 }
 0x285   : > { %6766 = vmatpush1.bf16.msra.mxu1 %v12213_v5  ;;  %v12191_v5 = vld [vmem:[%s13025_s30 + $0x12a0] ss:$88 sps:$4 sm:$0xff]  }
 0x286   : > { %7024 = vmatprep.subr.bf16.mxu1 %v12910_v1 }
 0x287   : > { %6543 = vmatmul.mubr.bf16.gmra.mrb[32].mxu1 %v12057_v37  ;;  %8116 = vmatmul.mubr.bf16.gmra.mrb[96].mxu0 %v12058_v38  ;;  %v12147_v37 = vld [vmem:[%s13025_s30 + $0x3b4] ss:$88 sps:$4 sm:$0xff]   ;;  %v12228_v38 = vld [vmem:[%s14676_s1 + $0x4c0] sm:$0xff]  }
 0x288   : > { %6550 = vmatprep.mubr.bf16.mxu1 %v12061_v39  ;;  %8123 = vmatprep.mubr.bf16.mxu0 %v12063_v40  ;;  %v12242_v39 = vld [vmem:[%s14676_s1 + $0x4c8] sm:$0xff]   ;;  %v12149_v40 = vld [vmem:[%s13025_s30 + $0xe80] ss:$88 sps:$4 sm:$0xff]  }
 0x28f   : > { %6551 = vmatmul.mubr.bf16.gmra.mrb[36].mxu1 %v12065_v42  ;;  %8124 = vmatmul.mubr.bf16.gmra.mrb[100].mxu0 %v12066_v43  ;;  %v12151_v42 = vld [vmem:[%s13025_s30 + $0xf34] ss:$88 sps:$4 sm:$0xff]   ;;  %v12153_v43 = vld [vmem:[%s13025_s30 + $0x464] ss:$88 sps:$4 sm:$0xff]  }
 0x290   : > { %6558 = vmatprep.mubr.bf16.mxu1 %v12067_v44  ;;  %8131 = vmatprep.mubr.bf16.mxu0 %v12069_v45  ;;  %v12256_v44 = vld [vmem:[%s14676_s1 + $0x4d0] sm:$0xff]  }
 0x291   : > { %v12155_v45 = vld [vmem:[%s13025_s30 + $0xf30] ss:$88 sps:$4 sm:$0xff]  }
 0x297   : > { %6559 = vmatmul.mubr.bf16.gmra.mrb[40].mxu1 %v12071_v46  ;;  %8132 = vmatmul.mubr.bf16.gmra.mrb[104].mxu0 %v12072_v47  ;;  %v12156_v46 = vld [vmem:[%s13025_s30 + $0x460] ss:$88 sps:$4 sm:$0xff]   ;;  %v12159_v47 = vld [vmem:[%s13025_s30 + $0xfe4] ss:$88 sps:$4 sm:$0xff]  }
 0x298   : > { %6566 = vmatprep.mubr.bf16.mxu1 %v12075_v48  ;;  %8139 = vmatprep.mubr.bf16.mxu0 %v12077_v49  ;;  %v12161_v48 = vld [vmem:[%s13025_s30 + $0x514] ss:$88 sps:$4 sm:$0xff]   ;;  %v12270_v49 = vld [vmem:[%s14676_s1 + $0x4d8] sm:$0xff]  }
 0x29f   : > { %6567 = vmatmul.mubr.bf16.gmra.mrb[44].mxu1 %v12079_v51  ;;  %8140 = vmatmul.mubr.bf16.gmra.mrb[108].mxu0 %v12080_v52  ;;  %v12164_v51 = vld [vmem:[%s13025_s30 + $0x510] ss:$88 sps:$4 sm:$0xff]   ;;  %v12165_v52 = vld [vmem:[%s13025_s30 + $0x1094] ss:$88 sps:$4 sm:$0xff]  }
 0x2a0   : > { %6574 = vmatprep.mubr.bf16.mxu1 %v12081_v53  ;;  %8147 = vmatprep.mubr.bf16.mxu0 %v12083_v54  ;;  %v12167_v53 = vld [vmem:[%s13025_s30 + $0x5c4] ss:$88 sps:$4 sm:$0xff]   ;;  %v12169_v54 = vld [vmem:[%s13025_s30 + $0x1090] ss:$88 sps:$4 sm:$0xff]  }
 0x2a7   : > { %6575 = vmatmul.mubr.bf16.gmra.mrb[48].mxu1 %v12085_v55  ;;  %8148 = vmatmul.mubr.bf16.gmra.mrb[112].mxu0 %v12086_v56  ;;  %v12170_v55 = vld [vmem:[%s13025_s30 + $0x5c0] ss:$88 sps:$4 sm:$0xff]   ;;  %v12173_v56 = vld [vmem:[%s13025_s30 + $0x1144] ss:$88 sps:$4 sm:$0xff]  }
 0x2a8   : > { %6582 = vmatprep.mubr.bf16.mxu1 %v12089_v57  ;;  %8155 = vmatprep.mubr.bf16.mxu0 %v12091_v58  ;;  %v12175_v57 = vld [vmem:[%s13025_s30 + $0x674] ss:$88 sps:$4 sm:$0xff]   ;;  %v12284_v58 = vld [vmem:[%s14676_s1 + $0x4e0] sm:$0xff]  }
 0x2af   : > { %6583 = vmatmul.mubr.bf16.gmra.mrb[52].mxu1 %v12093_v60  ;;  %8156 = vmatmul.mubr.bf16.gmra.mrb[116].mxu0 %v12094_v61  ;;  %v12178_v60 = vld [vmem:[%s13025_s30 + $0x670] ss:$88 sps:$4 sm:$0xff]   ;;  %v12179_v61 = vld [vmem:[%s13025_s30 + $0x11f4] ss:$88 sps:$4 sm:$0xff]  }
 0x2b0   : > { %6590 = vmatprep.mubr.bf16.mxu1 %v12095_v62  ;;  %8163 = vmatprep.mubr.bf16.mxu0 %v12097_v63  ;;  %v12181_v62 = vld [vmem:[%s13025_s30 + $0x724] ss:$88 sps:$4 sm:$0xff]   ;;  %v12183_v63 = vld [vmem:[%s13025_s30 + $0x11f0] ss:$88 sps:$4 sm:$0xff]  }
 0x2b7   : > { %6591 = vmatmul.mubr.bf16.gmra.mrb[56].mxu1 %v12099_v0  ;;  %8164 = vmatmul.mubr.bf16.gmra.mrb[120].mxu0 %v12100_v2  ;;  %v12184_v0 = vld [vmem:[%s13025_s30 + $0x720] ss:$88 sps:$4 sm:$0xff]   ;;  %v12187_v2 = vld [vmem:[%s13025_s30 + $0x12a4] ss:$88 sps:$4 sm:$0xff]  }
 0x2b8   : > { %6598 = vmatprep.mubr.bf16.mxu1 %v12103_v3  ;;  %8171 = vmatprep.mubr.bf16.mxu0 %v12105_v4  ;;  %v12189_v3 = vld [vmem:[%s13025_s30 + $0x7d4] ss:$88 sps:$4 sm:$0xff]  }
 0x2b9   : > { %v12298_v4 = vld [vmem:[%s14676_s1 + $0x4e8] sm:$0xff]  }
 0x2bf   : > { %6599 = vmatmul.mubr.bf16.gmra.mrb[60].mxu1 %v12107_v6  ;;  %8172 = vmatmul.mubr.bf16.gmra.mrb[124].mxu0 %v12108_v7  ;;  %v12192_v6 = vld [vmem:[%s13025_s30 + $0x7d0] ss:$88 sps:$4 sm:$0xff]   ;;  %v12193_v7 = vld [vmem:[%s13025_s30 + $0x1354] ss:$88 sps:$4 sm:$0xff]  }
 0x2c0   : > { %6606 = vmatprep.mubr.bf16.mxu1 %v12109_v8  ;;  %8212 = vmatprep.mubr.bf16.mxu0 %v12113_v9  ;;  %v12195_v8 = vld [vmem:[%s13025_s30 + $0x884] ss:$88 sps:$4 sm:$0xff]   ;;  %v12197_v9 = vld [vmem:[%s13025_s30 + $0x1350] ss:$88 sps:$4 sm:$0xff]  }
 0x2c7   : > { %6607 = vmatmul.mubr.bf16.gmra.mrb[64].mxu1 %v12114_v10  ;;  %8213 = vmatmul.mubr.bf16.vlgmr.msra.gmra.mrb[0].mxu0 %v12111_v11  ;;  %v12198_v10 = vld [vmem:[%s13025_s30 + $0x880] ss:$88 sps:$4 sm:$0xff]   ;;  %v12201_v11 = vld [vmem:[%s13025_s30 + $0x1404] ss:$88 sps:$4 sm:$0xff]  }
 0x2c8   : > { %6614 = vmatprep.mubr.bf16.mxu1 %v12117_v12  ;;  %8470 = vmatpush1.bf16.msra.mxu0 %v12116_v13  ;;  %v12203_v12 = vld [vmem:[%s13025_s30 + $0x934] ss:$88 sps:$4 sm:$0xff]  }
 0x2c9   : > { %8220 = vmatprep.mubr.bf16.mxu0 %v12119_v14  ;;  %8471 = vmatprep.subr.bf16.mxu0 %v12910_v1  ;;  %v12312_v13 = vld [vmem:[%s14676_s1 + $0x4f0] sm:$0xff]   ;;  %v12205_v14 = vld [vmem:[%s13025_s30 + $0x1400] ss:$88 sps:$4 sm:$0xff]  }
 0x2cc   : > { %8472 = vmatpush1.bf16.msra.mxu0 %v12130_v15  ;;  %v12206_v15 = vld [vmem:[%s13025_s30 + $0x930] ss:$88 sps:$4 sm:$0xff]  }
 0x2cd   : > { %8473 = vmatprep.subr.bf16.mxu0 %v12910_v1 }
 0x2cf   : > { %6615 = vmatmul.mubr.bf16.gmra.mrb[68].mxu1 %v12121_v16  ;;  %8221 = vmatmul.mubr.bf16.gmra.mrb[4].mxu0 %v12122_v17  ;;  %v12207_v16 = vld [vmem:[%s13025_s30 + $0x14b4] ss:$88 sps:$4 sm:$0xff]   ;;  %v12209_v17 = vld [vmem:[%s13025_s30 + $0x9e4] ss:$88 sps:$4 sm:$0xff]  }
 0x2d0   : > { %6622 = vmatprep.mubr.bf16.mxu1 %v12123_v18  ;;  %8228 = vmatprep.mubr.bf16.mxu0 %v12125_v19  ;;  %v12211_v18 = vld [vmem:[%s13025_s30 + $0x14b0] ss:$88 sps:$4 sm:$0xff]   ;;  %v12212_v19 = vld [vmem:[%s13025_s30 + $0x9e0] ss:$88 sps:$4 sm:$0xff]  }
 0x2d1   : > { %8474 = vmatpush1.bf16.msra.mxu0 %v12144_v20  ;;  %v12215_v20 = vld [vmem:[%s13025_s30 + $0x1564] ss:$88 sps:$4 sm:$0xff]  }
 0x2d2   : > { %8475 = vmatprep.subr.bf16.mxu0 %v12910_v1 }
 0x2d5   : > { %8476 = vmatpush1.bf16.msra.mxu0 %v12158_v21  ;;  %v12217_v21 = vld [vmem:[%s13025_s30 + $0xa94] ss:$88 sps:$4 sm:$0xff]  }
 0x2d6   : > { %8477 = vmatprep.subr.bf16.mxu0 %v12910_v1 }
 0x2d7   : > { %6623 = vmatmul.mubr.bf16.gmra.mrb[72].mxu1 %v12127_v22  ;;  %8229 = vmatmul.mubr.bf16.gmra.mrb[8].mxu0 %v12128_v23  ;;  %v12326_v22 = vld [vmem:[%s14676_s1 + $0x4f8] sm:$0xff]  }
 0x2d8   : > { %6630 = vmatprep.mubr.bf16.mxu1 %v12131_v24  ;;  %8236 = vmatprep.mubr.bf16.mxu0 %v12133_v25  ;;  %v12219_v23 = vld [vmem:[%s13025_s30 + $0x1560] ss:$88 sps:$4 sm:$0xff]   ;;  %v12220_v24 = vld [vmem:[%s13025_s30 + $0xa90] ss:$88 sps:$4 sm:$0xff]   ;;  %v12223_v25 = vld [vmem:[%s13025_s30 + $0x1c] ss:$88 sps:$4 sm:$0xff]  }
 0x2d9   : > { %8478 = vmatpush1.bf16.msra.mxu0 %v12172_v26  ;;  %v12224_v26 = vld [vmem:[%s13025_s30 + $0xb44] ss:$88 sps:$4 sm:$0xff]  }
 0x2da   : > { %8479 = vmatprep.subr.bf16.mxu0 %v12910_v1 }
 0x2dd   : > { %8480 = vmatpush1.bf16.msra.mxu0 %v12186_v27  ;;  %v12221_v27 = vld [vmem:[%s13025_s30 + $0x18] ss:$88 sps:$4 sm:$0xff]  }
 0x2de   : > { %8481 = vmatprep.subr.bf16.mxu0 %v12910_v1 }
 0x2df   : > { %6631 = vmatmul.mubr.bf16.gmra.mrb[76].mxu1 %v12135_v28  ;;  %8237 = vmatmul.mubr.bf16.gmra.mrb[12].mxu0 %v12136_v29  ;;  %v12226_v28 = vld [vmem:[%s13025_s30 + $0xb40] ss:$88 sps:$4 sm:$0xff]  }
 0x2e0   : > { %6638 = vmatprep.mubr.bf16.mxu1 %v12137_v30  ;;  %8244 = vmatprep.mubr.bf16.mxu0 %v12139_v31  ;;  %v12227_v29 = vld [vmem:[%s14676_s1 + $0x200] sm:$0xff]   ;;  %v12231_v31 = vld [vmem:[%s13025_s30 + $0xbf4] ss:$88 sps:$4 sm:$0xff]  }
 0x2e1   : > { %8482 = vmatpush1.bf16.msra.mxu0 %v12200_v32  ;;  %v12229_v30 = vld [vmem:[%s13025_s30 + $0xcc] ss:$88 sps:$4 sm:$0xff]  }
 0x2e2   : > { %8483 = vmatprep.subr.bf16.mxu0 %v12910_v1  ;;  %v12241_v32 = vld [vmem:[%s14676_s1 + $0x208] sm:$0xff]  }
 0x2e5   : > { %8484 = vmatpush1.bf16.msra.mxu0 %v12214_v33  ;;  %v12233_v33 = vld [vmem:[%s13025_s30 + $0xc8] ss:$88 sps:$4 sm:$0xff]  }
 0x2e6   : > { %8485 = vmatprep.subr.bf16.mxu0 %v12910_v1 }
 0x2e7   : > { %6639 = vmatmul.mubr.bf16.gmra.mrb[80].mxu1 %v12141_v34  ;;  %8245 = vmatmul.mubr.bf16.gmra.mrb[16].mxu0 %v12142_v35  ;;  %v12234_v34 = vld [vmem:[%s13025_s30 + $0xbf0] ss:$88 sps:$4 sm:$0xff]   ;;  %v12235_v35 = vld [vmem:[%s13025_s30 + $0x17c] ss:$88 sps:$4 sm:$0xff]  }
 0x2e8   : > { %6646 = vmatprep.mubr.bf16.mxu1 %v12145_v36  ;;  %8252 = vmatprep.mubr.bf16.mxu0 %v12147_v37  ;;  %v12237_v36 = vld [vmem:[%s13025_s30 + $0xca4] ss:$88 sps:$4 sm:$0xff]   ;;  %v12255_v37 = vld [vmem:[%s14676_s1 + $0x210] sm:$0xff]  }
 0x2e9   : > { %8486 = vmatpush1.bf16.msra.mxu0 %v12228_v38  ;;  %v12269_v38 = vld [vmem:[%s14676_s1 + $0x218] sm:$0xff]  }
 0x2ea   : > { %8487 = vmatprep.subr.bf16.mxu0 %v12910_v1 }
 0x2ed   : > { %8488 = vmatpush1.bf16.msra.mxu0 %v12242_v39  ;;  %v12239_v39 = vld [vmem:[%s13025_s30 + $0x178] ss:$88 sps:$4 sm:$0xff]  }
 0x2ee   : > { %8489 = vmatprep.subr.bf16.mxu0 %v12910_v1 }
 0x2ef   : > { %6647 = vmatmul.mubr.bf16.gmra.mrb[84].mxu1 %v12149_v40  ;;  %8253 = vmatmul.mubr.bf16.gmra.mrb[20].mxu0 %v12150_v41  ;;  %v12240_v40 = vld [vmem:[%s13025_s30 + $0xca0] ss:$88 sps:$4 sm:$0xff]   ;;  %v12243_v41 = vld [vmem:[%s13025_s30 + $0x22c] ss:$88 sps:$4 sm:$0xff]  }
 0x2f0   : > { %6654 = vmatprep.mubr.bf16.mxu1 %v12151_v42  ;;  %8260 = vmatprep.mubr.bf16.mxu0 %v12153_v43  ;;  %v12245_v42 = vld [vmem:[%s13025_s30 + $0xd54] ss:$88 sps:$4 sm:$0xff]   ;;  %v12283_v43 = vld [vmem:[%s14676_s1 + $0x220] sm:$0xff]  }
 0x2f1   : > { %8490 = vmatpush1.bf16.msra.mxu0 %v12256_v44  ;;  %v12297_v44 = vld [vmem:[%s14676_s1 + $0x228] sm:$0xff]  }
 0x2f2   : > { %8491 = vmatprep.subr.bf16.mxu0 %v12910_v1 }
 0x2f5   : > { %8492 = vmatpush1.bf16.msra.mxu0 %v12270_v49  ;;  %v12311_v49 = vld [vmem:[%s14676_s1 + $0x230] sm:$0xff]  }
 0x2f6   : > { %8493 = vmatprep.subr.bf16.mxu0 %v12910_v1 }
 0x2f7   : > { %6655 = vmatmul.mubr.bf16.gmra.mrb[88].mxu1 %v12155_v45  ;;  %8261 = vmatmul.mubr.bf16.gmra.mrb[24].mxu0 %v12156_v46  ;;  %v12247_v45 = vld [vmem:[%s13025_s30 + $0x228] ss:$88 sps:$4 sm:$0xff]  }
 0x2f8   : > { %6662 = vmatprep.mubr.bf16.mxu1 %v12159_v47  ;;  %8268 = vmatprep.mubr.bf16.mxu0 %v12161_v48  ;;  %v12248_v46 = vld [vmem:[%s13025_s30 + $0xd50] ss:$88 sps:$4 sm:$0xff]   ;;  %v12249_v47 = vld [vmem:[%s13025_s30 + $0x2dc] ss:$88 sps:$4 sm:$0xff]  }
 0x2f9   : > { %8494 = vmatpush1.bf16.msra.mxu0 %v12284_v58  ;;  %v12251_v48 = vld [vmem:[%s13025_s30 + $0xe04] ss:$88 sps:$4 sm:$0xff]   ;;  %v12262_v58 = vld [vmem:[%s13025_s30 + $0xeb0] ss:$88 sps:$4 sm:$0xff]  }
 0x2fa   : > { %8495 = vmatprep.subr.bf16.mxu0 %v12910_v1 }
 0x2fd   : > { %8496 = vmatpush1.bf16.msra.mxu0 %v12298_v4  ;;  %v12275_v4 = vld [vmem:[%s13025_s30 + $0x4e8] ss:$88 sps:$4 sm:$0xff]  }
 0x2fe   : > { %8497 = vmatprep.subr.bf16.mxu0 %v12910_v1 }
 0x2ff   : > { %6663 = vmatmul.mubr.bf16.gmra.mrb[92].mxu1 %v12163_v50  ;;  %8269 = vmatmul.mubr.bf16.gmra.mrb[28].mxu0 %v12164_v51  ;;  %v12325_v50 = vld [vmem:[%s14676_s1 + $0x238] sm:$0xff]  }
 0x300   : > { %6670 = vmatprep.mubr.bf16.mxu1 %v12165_v52  ;;  %8276 = vmatprep.mubr.bf16.mxu0 %v12167_v53  ;;  %v12253_v51 = vld [vmem:[%s13025_s30 + $0x2d8] ss:$88 sps:$4 sm:$0xff]   ;;  %v12257_v53 = vld [vmem:[%s13025_s30 + $0x38c] ss:$88 sps:$4 sm:$0xff]  }
 0x301   : > { %8498 = vmatpush1.bf16.msra.mxu0 %v12312_v13  ;;  %v12254_v52 = vld [vmem:[%s13025_s30 + $0xe00] ss:$88 sps:$4 sm:$0xff]  }
 0x302   : > { %8499 = vmatprep.subr.bf16.mxu0 %v12910_v1  ;;  %v12289_v13 = vld [vmem:[%s13025_s30 + $0x648] ss:$88 sps:$4 sm:$0xff]  }
 0x305   : > { %8500 = vmatpush1.bf16.msra.mxu0 %v12326_v22  ;;  %v12303_v22 = vld [vmem:[%s13025_s30 + $0x7a8] ss:$88 sps:$4 sm:$0xff]  }
 0x306   : > { %8758 = vmatprep.subr.bf16.mxu0 %v12910_v1 }
 0x307   : > { %6671 = vmatmul.mubr.bf16.gmra.mrb[96].mxu1 %v12169_v54  ;;  %8277 = vmatmul.mubr.bf16.gmra.mrb[32].mxu0 %v12170_v55  ;;  %v12259_v54 = vld [vmem:[%s13025_s30 + $0xeb4] ss:$88 sps:$4 sm:$0xff]   ;;  %v12339_v55 = vld [vmem:[%s14676_s1 + $0x240] sm:$0xff]  }
 0x308   : > { %6678 = vmatprep.mubr.bf16.mxu1 %v12173_v56  ;;  %8284 = vmatprep.mubr.bf16.mxu0 %v12175_v57  ;;  %v12353_v56 = vld [vmem:[%s14676_s1 + $0x248] sm:$0xff]  }
 0x309   : > { %v12261_v57 = vld [vmem:[%s13025_s30 + $0x388] ss:$88 sps:$4 sm:$0xff]  }
 0x30f   : > { %6679 = vmatmul.mubr.bf16.gmra.mrb[100].mxu1 %v12177_v59  ;;  %8285 = vmatmul.mubr.bf16.gmra.mrb[36].mxu0 %v12178_v60  ;;  %v12263_v59 = vld [vmem:[%s13025_s30 + $0x43c] ss:$88 sps:$4 sm:$0xff]  }
 0x310   : > { %6686 = vmatprep.mubr.bf16.mxu1 %v12179_v61  ;;  %8292 = vmatprep.mubr.bf16.mxu0 %v12181_v62  ;;  %v12265_v60 = vld [vmem:[%s13025_s30 + $0xf64] ss:$88 sps:$4 sm:$0xff]   ;;  %v12367_v61 = vld [vmem:[%s14676_s1 + $0x250] sm:$0xff]  }
 0x311   : > { %v12267_v62 = vld [vmem:[%s13025_s30 + $0x438] ss:$88 sps:$4 sm:$0xff]  }
 0x317   : > { %6687 = vmatmul.mubr.bf16.gmra.mrb[104].mxu1 %v12183_v63  ;;  %8293 = vmatmul.mubr.bf16.gmra.mrb[40].mxu0 %v12184_v0  ;;  %v12268_v63 = vld [vmem:[%s13025_s30 + $0xf60] ss:$88 sps:$4 sm:$0xff]   ;;  %v12271_v0 = vld [vmem:[%s13025_s30 + $0x4ec] ss:$88 sps:$4 sm:$0xff]  }
 0x318   : > { %6694 = vmatprep.mubr.bf16.mxu1 %v12187_v2  ;;  %8300 = vmatprep.mubr.bf16.mxu0 %v12189_v3  ;;  %v12273_v2 = vld [vmem:[%s13025_s30 + $0x1014] ss:$88 sps:$4 sm:$0xff]   ;;  %v12381_v3 = vld [vmem:[%s14676_s1 + $0x258] sm:$0xff]  }
 0x31f   : > { %6695 = vmatmul.mubr.bf16.gmra.mrb[108].mxu1 %v12191_v5  ;;  %8301 = vmatmul.mubr.bf16.gmra.mrb[44].mxu0 %v12192_v6  ;;  %v12276_v5 = vld [vmem:[%s13025_s30 + $0x1010] ss:$88 sps:$4 sm:$0xff]   ;;  %v12277_v6 = vld [vmem:[%s13025_s30 + $0x59c] ss:$88 sps:$4 sm:$0xff]  }
 0x320   : > { %6702 = vmatprep.mubr.bf16.mxu1 %v12193_v7  ;;  %8308 = vmatprep.mubr.bf16.mxu0 %v12195_v8  ;;  %v12279_v7 = vld [vmem:[%s13025_s30 + $0x10c4] ss:$88 sps:$4 sm:$0xff]   ;;  %v12281_v8 = vld [vmem:[%s13025_s30 + $0x598] ss:$88 sps:$4 sm:$0xff]  }
 0x327   : > { %6703 = vmatmul.mubr.bf16.gmra.mrb[112].mxu1 %v12197_v9  ;;  %8309 = vmatmul.mubr.bf16.gmra.mrb[48].mxu0 %v12198_v10  ;;  %v12282_v9 = vld [vmem:[%s13025_s30 + $0x10c0] ss:$88 sps:$4 sm:$0xff]   ;;  %v12285_v10 = vld [vmem:[%s13025_s30 + $0x64c] ss:$88 sps:$4 sm:$0xff]  }
 0x328   : > { %6710 = vmatprep.mubr.bf16.mxu1 %v12201_v11  ;;  %8316 = vmatprep.mubr.bf16.mxu0 %v12203_v12  ;;  %v12287_v11 = vld [vmem:[%s13025_s30 + $0x1174] ss:$88 sps:$4 sm:$0xff]   ;;  %v12395_v12 = vld [vmem:[%s14676_s1 + $0x260] sm:$0xff]  }
 0x32f   : > { %6711 = vmatmul.mubr.bf16.gmra.mrb[116].mxu1 %v12205_v14  ;;  %8317 = vmatmul.mubr.bf16.gmra.mrb[52].mxu0 %v12206_v15  ;;  %v12290_v14 = vld [vmem:[%s13025_s30 + $0x1170] ss:$88 sps:$4 sm:$0xff]   ;;  %v12291_v15 = vld [vmem:[%s13025_s30 + $0x6fc] ss:$88 sps:$4 sm:$0xff]  }
 0x330   : > { %6718 = vmatprep.mubr.bf16.mxu1 %v12207_v16  ;;  %8324 = vmatprep.mubr.bf16.mxu0 %v12209_v17  ;;  %v12293_v16 = vld [vmem:[%s13025_s30 + $0x1224] ss:$88 sps:$4 sm:$0xff]   ;;  %v12295_v17 = vld [vmem:[%s13025_s30 + $0x6f8] ss:$88 sps:$4 sm:$0xff]  }
 0x337   : > { %6719 = vmatmul.mubr.bf16.gmra.mrb[120].mxu1 %v12211_v18  ;;  %8325 = vmatmul.mubr.bf16.gmra.mrb[56].mxu0 %v12212_v19  ;;  %v12296_v18 = vld [vmem:[%s13025_s30 + $0x1220] ss:$88 sps:$4 sm:$0xff]   ;;  %v12299_v19 = vld [vmem:[%s13025_s30 + $0x7ac] ss:$88 sps:$4 sm:$0xff]  }
 0x338   : > { %6726 = vmatprep.mubr.bf16.mxu1 %v12215_v20  ;;  %8332 = vmatprep.mubr.bf16.mxu0 %v12217_v21  ;;  %v12301_v20 = vld [vmem:[%s13025_s30 + $0x12d4] ss:$88 sps:$4 sm:$0xff]  }
 0x339   : > { %v12409_v21 = vld [vmem:[%s14676_s1 + $0x268] sm:$0xff]  }
 0x33f   : > { %6727 = vmatmul.mubr.bf16.gmra.mrb[124].mxu1 %v12219_v23  ;;  %8333 = vmatmul.mubr.bf16.gmra.mrb[60].mxu0 %v12220_v24  ;;  %v12304_v23 = vld [vmem:[%s13025_s30 + $0x12d0] ss:$88 sps:$4 sm:$0xff]   ;;  %v12305_v24 = vld [vmem:[%s13025_s30 + $0x85c] ss:$88 sps:$4 sm:$0xff]  }
 0x340   : > { %6767 = vmatprep.mubr.bf16.mxu1 %v12223_v25  ;;  %8340 = vmatprep.mubr.bf16.mxu0 %v12224_v26  ;;  %v12307_v25 = vld [vmem:[%s13025_s30 + $0x1384] ss:$88 sps:$4 sm:$0xff]   ;;  %v12309_v26 = vld [vmem:[%s13025_s30 + $0x858] ss:$88 sps:$4 sm:$0xff]  }
 0x347   : > { %6768 = vmatmul.mubr.bf16.vlgmr.msra.gmra.mrb[0].mxu1 %v12221_v27  ;;  %8341 = vmatmul.mubr.bf16.gmra.mrb[64].mxu0 %v12226_v28  ;;  %v12310_v27 = vld [vmem:[%s13025_s30 + $0x1380] ss:$88 sps:$4 sm:$0xff]   ;;  %v12313_v28 = vld [vmem:[%s13025_s30 + $0x90c] ss:$88 sps:$4 sm:$0xff]  }
 0x348   : > { %7025 = vmatpush1.bf16.msra.mxu1 %v12227_v29  ;;  %6775 = vmatprep.mubr.bf16.mxu1 %v12229_v30  ;;  %v12315_v29 = vld [vmem:[%s13025_s30 + $0x1434] ss:$88 sps:$4 sm:$0xff]  }
 0x349   : > { %8348 = vmatprep.mubr.bf16.mxu0 %v12231_v31  ;;  %7026 = vmatprep.subr.bf16.mxu1 %v12910_v1  ;;  %v12423_v30 = vld [vmem:[%s14676_s1 + $0x270] sm:$0xff]   ;;  %v12317_v31 = vld [vmem:[%s13025_s30 + $0x908] ss:$88 sps:$4 sm:$0xff]  }
 0x34c   : > { %7027 = vmatpush1.bf16.msra.mxu1 %v12241_v32  ;;  %v12318_v32 = vld [vmem:[%s13025_s30 + $0x1430] ss:$88 sps:$4 sm:$0xff]  }
 0x34d   : > { %7028 = vmatprep.subr.bf16.mxu1 %v12910_v1 }
 0x34f   : > { %6776 = vmatmul.mubr.bf16.gmra.mrb[4].mxu1 %v12233_v33  ;;  %8349 = vmatmul.mubr.bf16.gmra.mrb[68].mxu0 %v12234_v34  ;;  %v12319_v33 = vld [vmem:[%s13025_s30 + $0x9bc] ss:$88 sps:$4 sm:$0xff]  }
 0x350   : > { %6783 = vmatprep.mubr.bf16.mxu1 %v12235_v35  ;;  %8356 = vmatprep.mubr.bf16.mxu0 %v12237_v36  ;;  %v12321_v34 = vld [vmem:[%s13025_s30 + $0x14e4] ss:$88 sps:$4 sm:$0xff]   ;;  %v12323_v35 = vld [vmem:[%s13025_s30 + $0x9b8] ss:$88 sps:$4 sm:$0xff]  }
 0x351   : > { %7029 = vmatpush1.bf16.msra.mxu1 %v12255_v37  ;;  %v12324_v36 = vld [vmem:[%s13025_s30 + $0x14e0] ss:$88 sps:$4 sm:$0xff]   ;;  %v12327_v37 = vld [vmem:[%s13025_s30 + $0xa6c] ss:$88 sps:$4 sm:$0xff]  }
 0x352   : > { %7030 = vmatprep.subr.bf16.mxu1 %v12910_v1 }
 0x355   : > { %7031 = vmatpush1.bf16.msra.mxu1 %v12269_v38  ;;  %v12329_v38 = vld [vmem:[%s13025_s30 + $0x1594] ss:$88 sps:$4 sm:$0xff]  }
 0x356   : > { %7032 = vmatprep.subr.bf16.mxu1 %v12910_v1 }
 0x357   : > { %6784 = vmatmul.mubr.bf16.gmra.mrb[8].mxu1 %v12239_v39  ;;  %8357 = vmatmul.mubr.bf16.gmra.mrb[72].mxu0 %v12240_v40  ;;  %v12437_v39 = vld [vmem:[%s14676_s1 + $0x278] sm:$0xff]   ;;  %v12331_v40 = vld [vmem:[%s13025_s30 + $0xa68] ss:$88 sps:$4 sm:$0xff]  }
 0x358   : > { %6791 = vmatprep.mubr.bf16.mxu1 %v12243_v41  ;;  %8364 = vmatprep.mubr.bf16.mxu0 %v12245_v42  ;;  %v12332_v41 = vld [vmem:[%s13025_s30 + $0x1590] ss:$88 sps:$4 sm:$0xff]   ;;  %v12333_v42 = vld [vmem:[%s13025_s30 + $0xb1c] ss:$88 sps:$4 sm:$0xff]  }
 0x359   : > { %7033 = vmatpush1.bf16.msra.mxu1 %v12283_v43  ;;  %v12337_v43 = vld [vmem:[%s13025_s30 + $0x4c] ss:$88 sps:$4 sm:$0xff]  }
 0x35a   : > { %7034 = vmatprep.subr.bf16.mxu1 %v12910_v1 }
 0x35d   : > { %7035 = vmatpush1.bf16.msra.mxu1 %v12297_v44  ;;  %v12338_v44 = vld [vmem:[%s13025_s30 + $0xb18] ss:$88 sps:$4 sm:$0xff]  }
 0x35e   : > { %7036 = vmatprep.subr.bf16.mxu1 %v12910_v1 }
 0x35f   : > { %6792 = vmatmul.mubr.bf16.gmra.mrb[12].mxu1 %v12247_v45  ;;  %8365 = vmatmul.mubr.bf16.gmra.mrb[76].mxu0 %v12248_v46  ;;  %v12335_v45 = vld [vmem:[%s13025_s30 + $0x48] ss:$88 sps:$4 sm:$0xff]   ;;  %v12341_v46 = vld [vmem:[%s13025_s30 + $0xbcc] ss:$88 sps:$4 sm:$0xff]  }
 0x360   : > { %6799 = vmatprep.mubr.bf16.mxu1 %v12249_v47  ;;  %8372 = vmatprep.mubr.bf16.mxu0 %v12251_v48  ;;  %v12340_v47 = vld [vmem:[%s14676_s1 + $0x500] sm:$0xff]   ;;  %v12343_v48 = vld [vmem:[%s13025_s30 + $0xfc] ss:$88 sps:$4 sm:$0xff]  }
 0x361   : > { %7037 = vmatpush1.bf16.msra.mxu1 %v12311_v49  ;;  %v12354_v49 = vld [vmem:[%s14676_s1 + $0x508] sm:$0xff]  }
 0x362   : > { %7038 = vmatprep.subr.bf16.mxu1 %v12910_v1 }
 0x365   : > { %7039 = vmatpush1.bf16.msra.mxu1 %v12325_v50  ;;  %v12345_v50 = vld [vmem:[%s13025_s30 + $0xbc8] ss:$88 sps:$4 sm:$0xff]  }
 0x366   : > { %7040 = vmatprep.subr.bf16.mxu1 %v12910_v1 }
 0x367   : > { %6800 = vmatmul.mubr.bf16.gmra.mrb[16].mxu1 %v12253_v51  ;;  %8373 = vmatmul.mubr.bf16.gmra.mrb[80].mxu0 %v12254_v52  ;;  %v12346_v51 = vld [vmem:[%s13025_s30 + $0xf8] ss:$88 sps:$4 sm:$0xff]   ;;  %v12347_v52 = vld [vmem:[%s13025_s30 + $0xc7c] ss:$88 sps:$4 sm:$0xff]  }
 0x368   : > { %6807 = vmatprep.mubr.bf16.mxu1 %v12257_v53  ;;  %8380 = vmatprep.mubr.bf16.mxu0 %v12259_v54  ;;  %v12349_v53 = vld [vmem:[%s13025_s30 + $0x1ac] ss:$88 sps:$4 sm:$0xff]   ;;  %v12368_v54 = vld [vmem:[%s14676_s1 + $0x510] sm:$0xff]  }
 0x369   : > { %7041 = vmatpush1.bf16.msra.mxu1 %v12339_v55  ;;  %v12382_v55 = vld [vmem:[%s14676_s1 + $0x518] sm:$0xff]  }
 0x36a   : > { %7042 = vmatprep.subr.bf16.mxu1 %v12910_v1 }
 0x36d   : > { %7043 = vmatpush1.bf16.msra.mxu1 %v12353_v56  ;;  %v12351_v56 = vld [vmem:[%s13025_s30 + $0xc78] ss:$88 sps:$4 sm:$0xff]  }
 0x36e   : > { %7044 = vmatprep.subr.bf16.mxu1 %v12910_v1 }
 0x36f   : > { %6808 = vmatmul.mubr.bf16.gmra.mrb[20].mxu1 %v12261_v57  ;;  %8381 = vmatmul.mubr.bf16.gmra.mrb[84].mxu0 %v12262_v58  ;;  %v12352_v57 = vld [vmem:[%s13025_s30 + $0x1a8] ss:$88 sps:$4 sm:$0xff]   ;;  %v12355_v58 = vld [vmem:[%s13025_s30 + $0xd2c] ss:$88 sps:$4 sm:$0xff]  }
 0x370   : > { %6815 = vmatprep.mubr.bf16.mxu1 %v12263_v59  ;;  %8388 = vmatprep.mubr.bf16.mxu0 %v12265_v60  ;;  %v12357_v59 = vld [vmem:[%s13025_s30 + $0x25c] ss:$88 sps:$4 sm:$0xff]   ;;  %v12396_v60 = vld [vmem:[%s14676_s1 + $0x520] sm:$0xff]  }
 0x371   : > { %7045 = vmatpush1.bf16.msra.mxu1 %v12367_v61  ;;  %v12410_v61 = vld [vmem:[%s14676_s1 + $0x528] sm:$0xff]  }
 0x372   : > { %7046 = vmatprep.subr.bf16.mxu1 %v12910_v1 }
 0x375   : > { %7047 = vmatpush1.bf16.msra.mxu1 %v12381_v3  ;;  %v12424_v3 = vld [vmem:[%s14676_s1 + $0x530] sm:$0xff]  }
 0x376   : > { %7048 = vmatprep.subr.bf16.mxu1 %v12910_v1 }
 0x377   : > { %6816 = vmatmul.mubr.bf16.gmra.mrb[24].mxu1 %v12267_v62  ;;  %8389 = vmatmul.mubr.bf16.gmra.mrb[88].mxu0 %v12268_v63  ;;  %v12359_v62 = vld [vmem:[%s13025_s30 + $0xd28] ss:$88 sps:$4 sm:$0xff]   ;;  %v12360_v63 = vld [vmem:[%s13025_s30 + $0x258] ss:$88 sps:$4 sm:$0xff]  }
 0x378   : > { %6823 = vmatprep.mubr.bf16.mxu1 %v12271_v0  ;;  %8396 = vmatprep.mubr.bf16.mxu0 %v12273_v2  ;;  %v12361_v0 = vld [vmem:[%s13025_s30 + $0xddc] ss:$88 sps:$4 sm:$0xff]   ;;  %v12363_v2 = vld [vmem:[%s13025_s30 + $0x30c] ss:$88 sps:$4 sm:$0xff]  }
 0x379   : > { %7049 = vmatpush1.bf16.msra.mxu1 %v12395_v12  ;;  %v12374_v12 = vld [vmem:[%s13025_s30 + $0x3b8] ss:$88 sps:$4 sm:$0xff]  }
 0x37a   : > { %7050 = vmatprep.subr.bf16.mxu1 %v12910_v1 }
 0x37d   : > { %7051 = vmatpush1.bf16.msra.mxu1 %v12409_v21  ;;  %v12387_v21 = vld [vmem:[%s13025_s30 + $0xfe8] ss:$88 sps:$4 sm:$0xff]  }
 0x37e   : > { %7052 = vmatprep.subr.bf16.mxu1 %v12910_v1 }
 0x37f   : > { %6824 = vmatmul.mubr.bf16.gmra.mrb[28].mxu1 %v12275_v4  ;;  %8397 = vmatmul.mubr.bf16.gmra.mrb[92].mxu0 %v12276_v5  ;;  %v12438_v4 = vld [vmem:[%s14676_s1 + $0x538] sm:$0xff]  }
 0x380   : > { %6831 = vmatprep.mubr.bf16.mxu1 %v12277_v6  ;;  %8404 = vmatprep.mubr.bf16.mxu0 %v12279_v7  ;;  %v12365_v5 = vld [vmem:[%s13025_s30 + $0xdd8] ss:$88 sps:$4 sm:$0xff]   ;;  %v12366_v6 = vld [vmem:[%s13025_s30 + $0x308] ss:$88 sps:$4 sm:$0xff]   ;;  %v12369_v7 = vld [vmem:[%s13025_s30 + $0xe8c] ss:$88 sps:$4 sm:$0xff]  }
 0x381   : > { %7053 = vmatpush1.bf16.msra.mxu1 %v12423_v30  ;;  %v12401_v30 = vld [vmem:[%s13025_s30 + $0x1148] ss:$88 sps:$4 sm:$0xff]  }
 0x382   : > { %7054 = vmatprep.subr.bf16.mxu1 %v12910_v1 }
 0x385   : > { %7055 = vmatpush1.bf16.msra.mxu1 %v12437_v39  ;;  %v12415_v39 = vld [vmem:[%s13025_s30 + $0x12a8] ss:$88 sps:$4 sm:$0xff]  }
 0x386   : > { %10171 = vmatprep.subr.bf16.mxu1 %v12910_v1 }
 0x387   : > { %6832 = vmatmul.mubr.bf16.gmra.mrb[32].mxu1 %v12281_v8  ;;  %8405 = vmatmul.mubr.bf16.gmra.mrb[96].mxu0 %v12282_v9  ;;  %v12371_v8 = vld [vmem:[%s13025_s30 + $0x3bc] ss:$88 sps:$4 sm:$0xff]   ;;  %v12451_v9 = vld [vmem:[%s14676_s1 + $0x540] sm:$0xff]  }
 0x388   : > { %6839 = vmatprep.mubr.bf16.mxu1 %v12285_v10  ;;  %8412 = vmatprep.mubr.bf16.mxu0 %v12287_v11  ;;  %v12464_v10 = vld [vmem:[%s14676_s1 + $0x548] sm:$0xff]  }
 0x389   : > { %v12373_v11 = vld [vmem:[%s13025_s30 + $0xe88] ss:$88 sps:$4 sm:$0xff]  }
 0x38f   : > { %6840 = vmatmul.mubr.bf16.gmra.mrb[36].mxu1 %v12289_v13  ;;  %8413 = vmatmul.mubr.bf16.gmra.mrb[100].mxu0 %v12290_v14  ;;  %v12375_v13 = vld [vmem:[%s13025_s30 + $0xf3c] ss:$88 sps:$4 sm:$0xff]   ;;  %v12377_v14 = vld [vmem:[%s13025_s30 + $0x46c] ss:$88 sps:$4 sm:$0xff]  }
 0x390   : > { %6847 = vmatprep.mubr.bf16.mxu1 %v12291_v15  ;;  %8420 = vmatprep.mubr.bf16.mxu0 %v12293_v16  ;;  %v12477_v15 = vld [vmem:[%s14676_s1 + $0x550] sm:$0xff]  }
 0x391   : > { %v12379_v16 = vld [vmem:[%s13025_s30 + $0xf38] ss:$88 sps:$4 sm:$0xff]  }
 0x397   : > { %6848 = vmatmul.mubr.bf16.gmra.mrb[40].mxu1 %v12295_v17  ;;  %8421 = vmatmul.mubr.bf16.gmra.mrb[104].mxu0 %v12296_v18  ;;  %v12380_v17 = vld [vmem:[%s13025_s30 + $0x468] ss:$88 sps:$4 sm:$0xff]   ;;  %v12383_v18 = vld [vmem:[%s13025_s30 + $0xfec] ss:$88 sps:$4 sm:$0xff]  }
 0x398   : > { %6855 = vmatprep.mubr.bf16.mxu1 %v12299_v19  ;;  %8428 = vmatprep.mubr.bf16.mxu0 %v12301_v20  ;;  %v12385_v19 = vld [vmem:[%s13025_s30 + $0x51c] ss:$88 sps:$4 sm:$0xff]  }
 0x399   : > { %v12490_v20 = vld [vmem:[%s14676_s1 + $0x558] sm:$0xff]  }
 0x39f   : > { %6856 = vmatmul.mubr.bf16.gmra.mrb[44].mxu1 %v12303_v22  ;;  %8429 = vmatmul.mubr.bf16.gmra.mrb[108].mxu0 %v12304_v23  ;;  %v12388_v22 = vld [vmem:[%s13025_s30 + $0x518] ss:$88 sps:$4 sm:$0xff]   ;;  %v12389_v23 = vld [vmem:[%s13025_s30 + $0x109c] ss:$88 sps:$4 sm:$0xff]  }
 0x3a0   : > { %6863 = vmatprep.mubr.bf16.mxu1 %v12305_v24  ;;  %8436 = vmatprep.mubr.bf16.mxu0 %v12307_v25  ;;  %v12391_v24 = vld [vmem:[%s13025_s30 + $0x5cc] ss:$88 sps:$4 sm:$0xff]   ;;  %v12393_v25 = vld [vmem:[%s13025_s30 + $0x1098] ss:$88 sps:$4 sm:$0xff]  }
 0x3a7   : > { %6864 = vmatmul.mubr.bf16.gmra.mrb[48].mxu1 %v12309_v26  ;;  %8437 = vmatmul.mubr.bf16.gmra.mrb[112].mxu0 %v12310_v27  ;;  %v12394_v26 = vld [vmem:[%s13025_s30 + $0x5c8] ss:$88 sps:$4 sm:$0xff]   ;;  %v12397_v27 = vld [vmem:[%s13025_s30 + $0x114c] ss:$88 sps:$4 sm:$0xff]  }
 0x3a8   : > { %6871 = vmatprep.mubr.bf16.mxu1 %v12313_v28  ;;  %8444 = vmatprep.mubr.bf16.mxu0 %v12315_v29  ;;  %v12399_v28 = vld [vmem:[%s13025_s30 + $0x67c] ss:$88 sps:$4 sm:$0xff]   ;;  %v12503_v29 = vld [vmem:[%s14676_s1 + $0x560] sm:$0xff]  }
 0x3af   : > { %6872 = vmatmul.mubr.bf16.gmra.mrb[52].mxu1 %v12317_v31  ;;  %8445 = vmatmul.mubr.bf16.gmra.mrb[116].mxu0 %v12318_v32  ;;  %v12402_v31 = vld [vmem:[%s13025_s30 + $0x678] ss:$88 sps:$4 sm:$0xff]   ;;  %v12403_v32 = vld [vmem:[%s13025_s30 + $0x11fc] ss:$88 sps:$4 sm:$0xff]  }
 0x3b0   : > { %6879 = vmatprep.mubr.bf16.mxu1 %v12319_v33  ;;  %8452 = vmatprep.mubr.bf16.mxu0 %v12321_v34  ;;  %v12405_v33 = vld [vmem:[%s13025_s30 + $0x72c] ss:$88 sps:$4 sm:$0xff]   ;;  %v12407_v34 = vld [vmem:[%s13025_s30 + $0x11f8] ss:$88 sps:$4 sm:$0xff]  }
 0x3b7   : > { %6880 = vmatmul.mubr.bf16.gmra.mrb[56].mxu1 %v12323_v35  ;;  %8453 = vmatmul.mubr.bf16.gmra.mrb[120].mxu0 %v12324_v36  ;;  %v12408_v35 = vld [vmem:[%s13025_s30 + $0x728] ss:$88 sps:$4 sm:$0xff]   ;;  %v12411_v36 = vld [vmem:[%s13025_s30 + $0x12ac] ss:$88 sps:$4 sm:$0xff]  }
 0x3b8   : > { %6887 = vmatprep.mubr.bf16.mxu1 %v12327_v37  ;;  %8460 = vmatprep.mubr.bf16.mxu0 %v12329_v38  ;;  %v12413_v37 = vld [vmem:[%s13025_s30 + $0x7dc] ss:$88 sps:$4 sm:$0xff]   ;;  %v12516_v38 = vld [vmem:[%s14676_s1 + $0x568] sm:$0xff]  }
 0x3bf   : > { %6888 = vmatmul.mubr.bf16.gmra.mrb[60].mxu1 %v12331_v40  ;;  %8461 = vmatmul.mubr.bf16.gmra.mrb[124].mxu0 %v12332_v41  ;;  %v12416_v40 = vld [vmem:[%s13025_s30 + $0x7d8] ss:$88 sps:$4 sm:$0xff]   ;;  %v12417_v41 = vld [vmem:[%s13025_s30 + $0x135c] ss:$88 sps:$4 sm:$0xff]  }
 0x3c0   : > { %6895 = vmatprep.mubr.bf16.mxu1 %v12333_v42  ;;  %8501 = vmatprep.mubr.bf16.mxu0 %v12337_v43  ;;  %v12419_v42 = vld [vmem:[%s13025_s30 + $0x88c] ss:$88 sps:$4 sm:$0xff]   ;;  %v12421_v43 = vld [vmem:[%s13025_s30 + $0x1358] ss:$88 sps:$4 sm:$0xff]  }
 0x3c7   : > { %6896 = vmatmul.mubr.bf16.gmra.mrb[64].mxu1 %v12338_v44  ;;  %8502 = vmatmul.mubr.bf16.vlgmr.msra.gmra.mrb[0].mxu0 %v12335_v45  ;;  %v12422_v44 = vld [vmem:[%s13025_s30 + $0x888] ss:$88 sps:$4 sm:$0xff]   ;;  %v12425_v45 = vld [vmem:[%s13025_s30 + $0x140c] ss:$88 sps:$4 sm:$0xff]  }
 0x3c8   : > { %6903 = vmatprep.mubr.bf16.mxu1 %v12341_v46  ;;  %8759 = vmatpush1.bf16.msra.mxu0 %v12340_v47  ;;  %v12427_v46 = vld [vmem:[%s13025_s30 + $0x93c] ss:$88 sps:$4 sm:$0xff]  }
 0x3c9   : > { %8509 = vmatprep.mubr.bf16.mxu0 %v12343_v48  ;;  %8760 = vmatprep.subr.bf16.mxu0 %v12910_v1  ;;  %v12529_v47 = vld [vmem:[%s14676_s1 + $0x570] sm:$0xff]   ;;  %v12429_v48 = vld [vmem:[%s13025_s30 + $0x1408] ss:$88 sps:$4 sm:$0xff]  }
 0x3cc   : > { %8761 = vmatpush1.bf16.msra.mxu0 %v12354_v49  ;;  %v12430_v49 = vld [vmem:[%s13025_s30 + $0x938] ss:$88 sps:$4 sm:$0xff]  }
 0x3cd   : > { %8762 = vmatprep.subr.bf16.mxu0 %v12910_v1 }
 0x3cf   : > { %6904 = vmatmul.mubr.bf16.gmra.mrb[68].mxu1 %v12345_v50  ;;  %8510 = vmatmul.mubr.bf16.gmra.mrb[4].mxu0 %v12346_v51  ;;  %v12431_v50 = vld [vmem:[%s13025_s30 + $0x14bc] ss:$88 sps:$4 sm:$0xff]   ;;  %v12433_v51 = vld [vmem:[%s13025_s30 + $0x9ec] ss:$88 sps:$4 sm:$0xff]  }
 0x3d0   : > { %6911 = vmatprep.mubr.bf16.mxu1 %v12347_v52  ;;  %8517 = vmatprep.mubr.bf16.mxu0 %v12349_v53  ;;  %v12435_v52 = vld [vmem:[%s13025_s30 + $0x14b8] ss:$88 sps:$4 sm:$0xff]   ;;  %v12436_v53 = vld [vmem:[%s13025_s30 + $0x9e8] ss:$88 sps:$4 sm:$0xff]  }
 0x3d1   : > { %8763 = vmatpush1.bf16.msra.mxu0 %v12368_v54  ;;  %v12439_v54 = vld [vmem:[%s13025_s30 + $0x156c] ss:$88 sps:$4 sm:$0xff]  }
 0x3d2   : > { %8764 = vmatprep.subr.bf16.mxu0 %v12910_v1 }
 0x3d5   : > { %8765 = vmatpush1.bf16.msra.mxu0 %v12382_v55  ;;  %v12441_v55 = vld [vmem:[%s13025_s30 + $0xa9c] ss:$88 sps:$4 sm:$0xff]  }
 0x3d6   : > { %8766 = vmatprep.subr.bf16.mxu0 %v12910_v1 }
 0x3d7   : > { %6912 = vmatmul.mubr.bf16.gmra.mrb[72].mxu1 %v12351_v56  ;;  %8518 = vmatmul.mubr.bf16.gmra.mrb[8].mxu0 %v12352_v57  ;;  %v12542_v56 = vld [vmem:[%s14676_s1 + $0x578] sm:$0xff]   ;;  %v12443_v57 = vld [vmem:[%s13025_s30 + $0x1568] ss:$88 sps:$4 sm:$0xff]  }
 0x3d8   : > { %6919 = vmatprep.mubr.bf16.mxu1 %v12355_v58  ;;  %8525 = vmatprep.mubr.bf16.mxu0 %v12357_v59  ;;  %v12444_v58 = vld [vmem:[%s13025_s30 + $0xa98] ss:$88 sps:$4 sm:$0xff]   ;;  %v12447_v59 = vld [vmem:[%s13025_s30 + $0x24] ss:$88 sps:$4 sm:$0xff]  }
 0x3d9   : > { %8767 = vmatpush1.bf16.msra.mxu0 %v12396_v60  ;;  %v12448_v60 = vld [vmem:[%s13025_s30 + $0xb4c] ss:$88 sps:$4 sm:$0xff]  }
 0x3da   : > { %8768 = vmatprep.subr.bf16.mxu0 %v12910_v1 }
 0x3dd   : > { %8769 = vmatpush1.bf16.msra.mxu0 %v12410_v61  ;;  %v12445_v61 = vld [vmem:[%s13025_s30 + $0x20] ss:$88 sps:$4 sm:$0xff]  }
 0x3de   : > { %8770 = vmatprep.subr.bf16.mxu0 %v12910_v1 }
 0x3df   : > { %6920 = vmatmul.mubr.bf16.gmra.mrb[76].mxu1 %v12359_v62  ;;  %8526 = vmatmul.mubr.bf16.gmra.mrb[12].mxu0 %v12360_v63  ;;  %v12450_v62 = vld [vmem:[%s13025_s30 + $0xb48] ss:$88 sps:$4 sm:$0xff]   ;;  %v12452_v63 = vld [vmem:[%s13025_s30 + $0xd4] ss:$88 sps:$4 sm:$0xff]  }
 0x3e0   : > { %6927 = vmatprep.mubr.bf16.mxu1 %v12361_v0  ;;  %8533 = vmatprep.mubr.bf16.mxu0 %v12363_v2  ;;  %v12454_v0 = vld [vmem:[%s13025_s30 + $0xbfc] ss:$88 sps:$4 sm:$0xff]   ;;  %v12869_v2 = vld [vmem:[%s14676_s1 + $0x280] sm:$0xff]  }
 0x3e1   : > { %8771 = vmatpush1.bf16.msra.mxu0 %v12424_v3  ;;  %v12456_v3 = vld [vmem:[%s13025_s30 + $0xd0] ss:$88 sps:$4 sm:$0xff]  }
 0x3e2   : > { %8772 = vmatprep.subr.bf16.mxu0 %v12910_v1 }
 0x3e5   : > { %8773 = vmatpush1.bf16.msra.mxu0 %v12438_v4  ;;  %v12457_v4 = vld [vmem:[%s13025_s30 + $0xbf8] ss:$88 sps:$4 sm:$0xff]  }
 0x3e6   : > { %8774 = vmatprep.subr.bf16.mxu0 %v12910_v1 }
 0x3e7   : > { %6928 = vmatmul.mubr.bf16.gmra.mrb[80].mxu1 %v12365_v5  ;;  %8534 = vmatmul.mubr.bf16.gmra.mrb[16].mxu0 %v12366_v6  ;;  %v12458_v5 = vld [vmem:[%s13025_s30 + $0x184] ss:$88 sps:$4 sm:$0xff]   ;;  %v12870_v6 = vld [vmem:[%s14676_s1 + $0x288] sm:$0xff]  }
 0x3e8   : > { %6935 = vmatprep.mubr.bf16.mxu1 %v12369_v7  ;;  %8541 = vmatprep.mubr.bf16.mxu0 %v12371_v8  ;;  %v12460_v7 = vld [vmem:[%s13025_s30 + $0xcac] ss:$88 sps:$4 sm:$0xff]   ;;  %v12871_v8 = vld [vmem:[%s14676_s1 + $0x290] sm:$0xff]  }
 0x3e9   : > { %8775 = vmatpush1.bf16.msra.mxu0 %v12451_v9  ;;  %v12462_v9 = vld [vmem:[%s13025_s30 + $0x180] ss:$88 sps:$4 sm:$0xff]  }
 0x3ea   : > { %8776 = vmatprep.subr.bf16.mxu0 %v12910_v1 }
 0x3ed   : > { %8777 = vmatpush1.bf16.msra.mxu0 %v12464_v10  ;;  %v12463_v10 = vld [vmem:[%s13025_s30 + $0xca8] ss:$88 sps:$4 sm:$0xff]  }
 0x3ee   : > { %8778 = vmatprep.subr.bf16.mxu0 %v12910_v1 }
 0x3ef   : > { %6936 = vmatmul.mubr.bf16.gmra.mrb[84].mxu1 %v12373_v11  ;;  %8542 = vmatmul.mubr.bf16.gmra.mrb[20].mxu0 %v12374_v12  ;;  %v12465_v11 = vld [vmem:[%s13025_s30 + $0x234] ss:$88 sps:$4 sm:$0xff]  }
 0x3f0   : > { %6943 = vmatprep.mubr.bf16.mxu1 %v12375_v13  ;;  %8549 = vmatprep.mubr.bf16.mxu0 %v12377_v14  ;;  %v12467_v12 = vld [vmem:[%s13025_s30 + $0xd5c] ss:$88 sps:$4 sm:$0xff]   ;;  %v12873_v14 = vld [vmem:[%s14676_s1 + $0x2a0] sm:$0xff]  }
 0x3f1   : > { %8779 = vmatpush1.bf16.msra.mxu0 %v12477_v15  ;;  %v12872_v13 = vld [vmem:[%s14676_s1 + $0x298] sm:$0xff]   ;;  %v12469_v15 = vld [vmem:[%s13025_s30 + $0x230] ss:$88 sps:$4 sm:$0xff]  }
 0x3f2   : > { %8780 = vmatprep.subr.bf16.mxu0 %v12910_v1 }
 0x3f5   : > { %8781 = vmatpush1.bf16.msra.mxu0 %v12490_v20  ;;  %v12875_v20 = vld [vmem:[%s14676_s1 + $0x2b0] sm:$0xff]  }
 0x3f6   : > { %8782 = vmatprep.subr.bf16.mxu0 %v12910_v1 }
 0x3f7   : > { %6944 = vmatmul.mubr.bf16.gmra.mrb[88].mxu1 %v12379_v16  ;;  %8550 = vmatmul.mubr.bf16.gmra.mrb[24].mxu0 %v12380_v17  ;;  %v12470_v16 = vld [vmem:[%s13025_s30 + $0xd58] ss:$88 sps:$4 sm:$0xff]   ;;  %v12471_v17 = vld [vmem:[%s13025_s30 + $0x2e4] ss:$88 sps:$4 sm:$0xff]  }
 0x3f8   : > { %6951 = vmatprep.mubr.bf16.mxu1 %v12383_v18  ;;  %8557 = vmatprep.mubr.bf16.mxu0 %v12385_v19  ;;  %v12473_v18 = vld [vmem:[%s13025_s30 + $0xe0c] ss:$88 sps:$4 sm:$0xff]  }
 0x3f9   : > { %8783 = vmatpush1.bf16.msra.mxu0 %v12503_v29  ;;  %v12874_v19 = vld [vmem:[%s14676_s1 + $0x2a8] sm:$0xff]   ;;  %v12484_v29 = vld [vmem:[%s13025_s30 + $0x444] ss:$88 sps:$4 sm:$0xff]  }
 0x3fa   : > { %8784 = vmatprep.subr.bf16.mxu0 %v12910_v1 }
 0x3fd   : > { %8785 = vmatpush1.bf16.msra.mxu0 %v12516_v38  ;;  %v12881_v38 = vld [vmem:[%s14676_s1 + $0x2e0] sm:$0xff]  }
 0x3fe   : > { %8786 = vmatprep.subr.bf16.mxu0 %v12910_v1 }
 0x3ff   : > { %6952 = vmatmul.mubr.bf16.gmra.mrb[92].mxu1 %v12387_v21  ;;  %8558 = vmatmul.mubr.bf16.gmra.mrb[28].mxu0 %v12388_v22  ;;  %v12475_v21 = vld [vmem:[%s13025_s30 + $0x2e0] ss:$88 sps:$4 sm:$0xff]  }
 0x400   : > { %6959 = vmatprep.mubr.bf16.mxu1 %v12389_v23  ;;  %8565 = vmatprep.mubr.bf16.mxu0 %v12391_v24  ;;  %v12476_v22 = vld [vmem:[%s13025_s30 + $0xe08] ss:$88 sps:$4 sm:$0xff]   ;;  %v12478_v23 = vld [vmem:[%s13025_s30 + $0x394] ss:$88 sps:$4 sm:$0xff]  }
 0x401   : > { %8787 = vmatpush1.bf16.msra.mxu0 %v12529_v47  ;;  %v12480_v24 = vld [vmem:[%s13025_s30 + $0xebc] ss:$88 sps:$4 sm:$0xff]  }
 0x402   : > { %8788 = vmatprep.subr.bf16.mxu0 %v12910_v1  ;;  %v12504_v47 = vld [vmem:[%s13025_s30 + $0x654] ss:$88 sps:$4 sm:$0xff]  }
 0x405   : > { %8789 = vmatpush1.bf16.msra.mxu0 %v12542_v56  ;;  %v12519_v56 = vld [vmem:[%s13025_s30 + $0x12dc] ss:$88 sps:$4 sm:$0xff]  }
 0x407   : > { %6960 = vmatmul.mubr.bf16.gmra.mrb[96].mxu1 %v12393_v25  ;;  %8566 = vmatmul.mubr.bf16.gmra.mrb[32].mxu0 %v12394_v26  ;;  %v12876_v25 = vld [vmem:[%s14676_s1 + $0x2b8] sm:$0xff]   ;;  %v12877_v26 = vld [vmem:[%s14676_s1 + $0x2c0] sm:$0xff]  }
 0x408   : > { %6967 = vmatprep.mubr.bf16.mxu1 %v12397_v27  ;;  %8573 = vmatprep.mubr.bf16.mxu0 %v12399_v28  ;;  %v12482_v27 = vld [vmem:[%s13025_s30 + $0x390] ss:$88 sps:$4 sm:$0xff]  }
 0x409   : > { %v12483_v28 = vld [vmem:[%s13025_s30 + $0xeb8] ss:$88 sps:$4 sm:$0xff]  }
 0x40f   : > { %6968 = vmatmul.mubr.bf16.gmra.mrb[100].mxu1 %v12401_v30  ;;  %8574 = vmatmul.mubr.bf16.gmra.mrb[36].mxu0 %v12402_v31  ;;  %v12486_v30 = vld [vmem:[%s13025_s30 + $0xf6c] ss:$88 sps:$4 sm:$0xff]  }
 0x410   : > { %6975 = vmatprep.mubr.bf16.mxu1 %v12403_v32  ;;  %8581 = vmatprep.mubr.bf16.mxu0 %v12405_v33  ;;  %v12878_v31 = vld [vmem:[%s14676_s1 + $0x2c8] sm:$0xff]   ;;  %v12879_v32 = vld [vmem:[%s14676_s1 + $0x2d0] sm:$0xff]   ;;  %v12488_v33 = vld [vmem:[%s13025_s30 + $0x440] ss:$88 sps:$4 sm:$0xff]  }
 0x417   : > { %6976 = vmatmul.mubr.bf16.gmra.mrb[104].mxu1 %v12407_v34  ;;  %8582 = vmatmul.mubr.bf16.gmra.mrb[40].mxu0 %v12408_v35  ;;  %v12489_v34 = vld [vmem:[%s13025_s30 + $0xf68] ss:$88 sps:$4 sm:$0xff]   ;;  %v12491_v35 = vld [vmem:[%s13025_s30 + $0x4f4] ss:$88 sps:$4 sm:$0xff]  }
 0x418   : > { %6983 = vmatprep.mubr.bf16.mxu1 %v12411_v36  ;;  %8589 = vmatprep.mubr.bf16.mxu0 %v12413_v37  ;;  %v12493_v36 = vld [vmem:[%s13025_s30 + $0x101c] ss:$88 sps:$4 sm:$0xff]  }
 0x419   : > { %v12880_v37 = vld [vmem:[%s14676_s1 + $0x2d8] sm:$0xff]  }
 0x41f   : > { %6984 = vmatmul.mubr.bf16.gmra.mrb[108].mxu1 %v12415_v39  ;;  %8590 = vmatmul.mubr.bf16.gmra.mrb[44].mxu0 %v12416_v40  ;;  %v12495_v39 = vld [vmem:[%s13025_s30 + $0x4f0] ss:$88 sps:$4 sm:$0xff]  }
 0x420   : > { %6991 = vmatprep.mubr.bf16.mxu1 %v12417_v41  ;;  %8597 = vmatprep.mubr.bf16.mxu0 %v12419_v42  ;;  %v12496_v40 = vld [vmem:[%s13025_s30 + $0x1018] ss:$88 sps:$4 sm:$0xff]   ;;  %v12497_v41 = vld [vmem:[%s13025_s30 + $0x5a4] ss:$88 sps:$4 sm:$0xff]  }
 0x421   : > { %v12499_v42 = vld [vmem:[%s13025_s30 + $0x10cc] ss:$88 sps:$4 sm:$0xff]  }
 0x427   : > { %6992 = vmatmul.mubr.bf16.gmra.mrb[112].mxu1 %v12421_v43  ;;  %8598 = vmatmul.mubr.bf16.gmra.mrb[48].mxu0 %v12422_v44  ;;  %v12882_v43 = vld [vmem:[%s14676_s1 + $0x2e8] sm:$0xff]   ;;  %v12883_v44 = vld [vmem:[%s14676_s1 + $0x2f0] sm:$0xff]  }
 0x428   : > { %6999 = vmatprep.mubr.bf16.mxu1 %v12425_v45  ;;  %8605 = vmatprep.mubr.bf16.mxu0 %v12427_v46  ;;  %v12501_v45 = vld [vmem:[%s13025_s30 + $0x5a0] ss:$88 sps:$4 sm:$0xff]  }
 0x429   : > { %v12502_v46 = vld [vmem:[%s13025_s30 + $0x10c8] ss:$88 sps:$4 sm:$0xff]  }
 0x42f   : > { %7000 = vmatmul.mubr.bf16.gmra.mrb[116].mxu1 %v12429_v48  ;;  %8606 = vmatmul.mubr.bf16.gmra.mrb[52].mxu0 %v12430_v49  ;;  %v12506_v48 = vld [vmem:[%s13025_s30 + $0x117c] ss:$88 sps:$4 sm:$0xff]  }
 0x430   : > { %7007 = vmatprep.mubr.bf16.mxu1 %v12431_v50  ;;  %8613 = vmatprep.mubr.bf16.mxu0 %v12433_v51  ;;  %v12884_v49 = vld [vmem:[%s14676_s1 + $0x2f8] sm:$0xff]   ;;  %v12508_v50 = vld [vmem:[%s13025_s30 + $0x650] ss:$88 sps:$4 sm:$0xff]  }
 0x431   : > { %v12510_v51 = vld [vmem:[%s13025_s30 + $0x704] ss:$88 sps:$4 sm:$0xff]  }
 0x437   : > { %7008 = vmatmul.mubr.bf16.gmra.mrb[120].mxu1 %v12435_v52  ;;  %8614 = vmatmul.mubr.bf16.gmra.mrb[56].mxu0 %v12436_v53  ;;  %v12512_v52 = vld [vmem:[%s13025_s30 + $0x122c] ss:$88 sps:$4 sm:$0xff]   ;;  %v12514_v53 = vld [vmem:[%s13025_s30 + $0x700] ss:$88 sps:$4 sm:$0xff]  }
 0x438   : > { %7015 = vmatprep.mubr.bf16.mxu1 %v12439_v54  ;;  %8621 = vmatprep.mubr.bf16.mxu0 %v12441_v55  ;;  %v12515_v54 = vld [vmem:[%s13025_s30 + $0x1228] ss:$88 sps:$4 sm:$0xff]   ;;  %v12517_v55 = vld [vmem:[%s13025_s30 + $0x7b4] ss:$88 sps:$4 sm:$0xff]  }
 0x43f   : > { %7016 = vmatmul.mubr.bf16.gmra.mrb[124].mxu1 %v12443_v57  ;;  %8622 = vmatmul.mubr.bf16.gmra.mrb[60].mxu0 %v12444_v58  ;;  %v12521_v57 = vld [vmem:[%s13025_s30 + $0x7b0] ss:$88 sps:$4 sm:$0xff]  }
 0x440   : > { %7056 = vmatprep.mubr.bf16.mxu1 %v12447_v59  ;;  %8629 = vmatprep.mubr.bf16.mxu0 %v12448_v60  ;;  %v12522_v58 = vld [vmem:[%s13025_s30 + $0x12d8] ss:$88 sps:$4 sm:$0xff]   ;;  %v12523_v59 = vld [vmem:[%s13025_s30 + $0x864] ss:$88 sps:$4 sm:$0xff]  }
 0x441   : > { %v12525_v60 = vld [vmem:[%s13025_s30 + $0x138c] ss:$88 sps:$4 sm:$0xff]  }
 0x447   : > { %7057 = vmatmul.mubr.bf16.vlgmr.msra.gmra.mrb[0].mxu1 %v12445_v61  ;;  %8630 = vmatmul.mubr.bf16.gmra.mrb[64].mxu0 %v12450_v62  ;;  %v12527_v61 = vld [vmem:[%s13025_s30 + $0x860] ss:$88 sps:$4 sm:$0xff]  }
 0x448   : > { %10187 = vmatpush1.bf16.msra.mxu1 %v12869_v2  ;;  %7064 = vmatprep.mubr.bf16.mxu1 %v12452_v63  ;;  %v12528_v62 = vld [vmem:[%s13025_s30 + $0x1388] ss:$88 sps:$4 sm:$0xff]   ;;  %v12530_v63 = vld [vmem:[%s13025_s30 + $0x914] ss:$88 sps:$4 sm:$0xff]  }
 0x449   : > { %8637 = vmatprep.mubr.bf16.mxu0 %v12454_v0  ;;  %10172 = vmatprep.subr.bf16.mxu1 %v12910_v1  ;;  %v12532_v0 = vld [vmem:[%s13025_s30 + $0x143c] ss:$88 sps:$4 sm:$0xff]   ;;  %v12534_v2 = vld [vmem:[%s13025_s30 + $0x910] ss:$88 sps:$4 sm:$0xff]  }
 0x44c   : > { %10188 = vmatpush1.bf16.msra.mxu1 %v12870_v6  ;;  %v12540_v6 = vld [vmem:[%s13025_s30 + $0x9c0] ss:$88 sps:$4 sm:$0xff]  }
 0x44d   : > { %10173 = vmatprep.subr.bf16.mxu1 %v12910_v1 }
 0x44f   : > { %7065 = vmatmul.mubr.bf16.gmra.mrb[4].mxu1 %v12456_v3  ;;  %8638 = vmatmul.mubr.bf16.gmra.mrb[68].mxu0 %v12457_v4  ;;  %v12535_v3 = vld [vmem:[%s13025_s30 + $0x1438] ss:$88 sps:$4 sm:$0xff]   ;;  %v12536_v4 = vld [vmem:[%s13025_s30 + $0x9c4] ss:$88 sps:$4 sm:$0xff]  }
 0x450   : > { %7072 = vmatprep.mubr.bf16.mxu1 %v12458_v5  ;;  %8645 = vmatprep.mubr.bf16.mxu0 %v12460_v7  ;;  %v12538_v5 = vld [vmem:[%s13025_s30 + $0x14ec] ss:$88 sps:$4 sm:$0xff]   ;;  %v12541_v7 = vld [vmem:[%s13025_s30 + $0x14e8] ss:$88 sps:$4 sm:$0xff]  }
 0x451   : > { %10189 = vmatpush1.bf16.msra.mxu1 %v12871_v8  ;;  %v12543_v8 = vld [vmem:[%s13025_s30 + $0xa74] ss:$88 sps:$4 sm:$0xff]  }
 0x452   : > { %10174 = vmatprep.subr.bf16.mxu1 %v12910_v1 }
 0x455   : > { %10190 = vmatpush1.bf16.msra.mxu1 %v12872_v13  ;;  %v12553_v13 = vld [vmem:[%s13025_s30 + $0x54] ss:$88 sps:$4 sm:$0xff]  }
 0x456   : > { %10175 = vmatprep.subr.bf16.mxu1 %v12910_v1 }
 0x457   : > { %7073 = vmatmul.mubr.bf16.gmra.mrb[8].mxu1 %v12462_v9  ;;  %8646 = vmatmul.mubr.bf16.gmra.mrb[72].mxu0 %v12463_v10  ;;  %v12545_v9 = vld [vmem:[%s13025_s30 + $0x159c] ss:$88 sps:$4 sm:$0xff]   ;;  %v12547_v10 = vld [vmem:[%s13025_s30 + $0xa70] ss:$88 sps:$4 sm:$0xff]  }
 0x458   : > { %7080 = vmatprep.mubr.bf16.mxu1 %v12465_v11  ;;  %8653 = vmatprep.mubr.bf16.mxu0 %v12467_v12  ;;  %v12548_v11 = vld [vmem:[%s13025_s30 + $0x1598] ss:$88 sps:$4 sm:$0xff]   ;;  %v12549_v12 = vld [vmem:[%s13025_s30 + $0xb24] ss:$88 sps:$4 sm:$0xff]  }
 0x459   : > { %10191 = vmatpush1.bf16.msra.mxu1 %v12873_v14  ;;  %v12554_v14 = vld [vmem:[%s13025_s30 + $0xb20] ss:$88 sps:$4 sm:$0xff]  }
 0x45a   : > { %10176 = vmatprep.subr.bf16.mxu1 %v12910_v1 }
 0x45d   : > { %10192 = vmatpush1.bf16.msra.mxu1 %v12874_v19  ;;  %v12560_v19 = vld [vmem:[%s13025_s30 + $0x100] ss:$88 sps:$4 sm:$0xff]  }
 0x45e   : > { %10177 = vmatprep.subr.bf16.mxu1 %v12910_v1 }
 0x45f   : > { %7081 = vmatmul.mubr.bf16.gmra.mrb[12].mxu1 %v12469_v15  ;;  %8654 = vmatmul.mubr.bf16.gmra.mrb[76].mxu0 %v12470_v16  ;;  %v12551_v15 = vld [vmem:[%s13025_s30 + $0x50] ss:$88 sps:$4 sm:$0xff]   ;;  %v12555_v16 = vld [vmem:[%s13025_s30 + $0xbd4] ss:$88 sps:$4 sm:$0xff]  }
 0x460   : > { %7088 = vmatprep.mubr.bf16.mxu1 %v12471_v17  ;;  %8661 = vmatprep.mubr.bf16.mxu0 %v12473_v18  ;;  %v12557_v17 = vld [vmem:[%s13025_s30 + $0x104] ss:$88 sps:$4 sm:$0xff]   ;;  %v12559_v18 = vld [vmem:[%s13025_s30 + $0xbd0] ss:$88 sps:$4 sm:$0xff]  }
 0x461   : > { %10193 = vmatpush1.bf16.msra.mxu1 %v12875_v20  ;;  %v12561_v20 = vld [vmem:[%s13025_s30 + $0xc84] ss:$88 sps:$4 sm:$0xff]  }
 0x462   : > { %10178 = vmatprep.subr.bf16.mxu1 %v12910_v1 }
 0x465   : > { %10194 = vmatpush1.bf16.msra.mxu1 %v12876_v25  ;;  %v12569_v25 = vld [vmem:[%s13025_s30 + $0x264] ss:$88 sps:$4 sm:$0xff]  }
 0x466   : > { %10179 = vmatprep.subr.bf16.mxu1 %v12910_v1 }
 0x467   : > { %7089 = vmatmul.mubr.bf16.gmra.mrb[16].mxu1 %v12475_v21  ;;  %8662 = vmatmul.mubr.bf16.gmra.mrb[80].mxu0 %v12476_v22  ;;  %v12563_v21 = vld [vmem:[%s13025_s30 + $0x1b4] ss:$88 sps:$4 sm:$0xff]   ;;  %v12565_v22 = vld [vmem:[%s13025_s30 + $0xc80] ss:$88 sps:$4 sm:$0xff]  }
 0x468   : > { %7096 = vmatprep.mubr.bf16.mxu1 %v12478_v23  ;;  %8669 = vmatprep.mubr.bf16.mxu0 %v12480_v24  ;;  %v12566_v23 = vld [vmem:[%s13025_s30 + $0x1b0] ss:$88 sps:$4 sm:$0xff]   ;;  %v12567_v24 = vld [vmem:[%s13025_s30 + $0xd34] ss:$88 sps:$4 sm:$0xff]  }
 0x469   : > { %10195 = vmatpush1.bf16.msra.mxu1 %v12877_v26  ;;  %v12571_v26 = vld [vmem:[%s13025_s30 + $0xd30] ss:$88 sps:$4 sm:$0xff]  }
 0x46a   : > { %10180 = vmatprep.subr.bf16.mxu1 %v12910_v1 }
 0x46d   : > { %10196 = vmatpush1.bf16.msra.mxu1 %v12878_v31  ;;  %v12578_v31 = vld [vmem:[%s13025_s30 + $0x310] ss:$88 sps:$4 sm:$0xff]  }
 0x46e   : > { %10181 = vmatprep.subr.bf16.mxu1 %v12910_v1 }
 0x46f   : > { %7097 = vmatmul.mubr.bf16.gmra.mrb[20].mxu1 %v12482_v27  ;;  %8670 = vmatmul.mubr.bf16.gmra.mrb[84].mxu0 %v12483_v28  ;;  %v12572_v27 = vld [vmem:[%s13025_s30 + $0x260] ss:$88 sps:$4 sm:$0xff]   ;;  %v12573_v28 = vld [vmem:[%s13025_s30 + $0xde4] ss:$88 sps:$4 sm:$0xff]  }
 0x470   : > { %7104 = vmatprep.mubr.bf16.mxu1 %v12484_v29  ;;  %8677 = vmatprep.mubr.bf16.mxu0 %v12486_v30  ;;  %v12575_v29 = vld [vmem:[%s13025_s30 + $0x314] ss:$88 sps:$4 sm:$0xff]   ;;  %v12577_v30 = vld [vmem:[%s13025_s30 + $0xde0] ss:$88 sps:$4 sm:$0xff]  }
 0x471   : > { %10197 = vmatpush1.bf16.msra.mxu1 %v12879_v32  ;;  %v12579_v32 = vld [vmem:[%s13025_s30 + $0xe94] ss:$88 sps:$4 sm:$0xff]  }
 0x472   : > { %10182 = vmatprep.subr.bf16.mxu1 %v12910_v1 }
 0x475   : > { %10198 = vmatpush1.bf16.msra.mxu1 %v12880_v37  ;;  %v12587_v37 = vld [vmem:[%s13025_s30 + $0x474] ss:$88 sps:$4 sm:$0xff]  }
 0x476   : > { %10183 = vmatprep.subr.bf16.mxu1 %v12910_v1 }
 0x477   : > { %7105 = vmatmul.mubr.bf16.gmra.mrb[24].mxu1 %v12488_v33  ;;  %8678 = vmatmul.mubr.bf16.gmra.mrb[88].mxu0 %v12489_v34  ;;  %v12581_v33 = vld [vmem:[%s13025_s30 + $0x3c4] ss:$88 sps:$4 sm:$0xff]   ;;  %v12583_v34 = vld [vmem:[%s13025_s30 + $0xe90] ss:$88 sps:$4 sm:$0xff]  }
 0x478   : > { %7112 = vmatprep.mubr.bf16.mxu1 %v12491_v35  ;;  %8685 = vmatprep.mubr.bf16.mxu0 %v12493_v36  ;;  %v12584_v35 = vld [vmem:[%s13025_s30 + $0x3c0] ss:$88 sps:$4 sm:$0xff]   ;;  %v12585_v36 = vld [vmem:[%s13025_s30 + $0xf44] ss:$88 sps:$4 sm:$0xff]  }
 0x479   : > { %10199 = vmatpush1.bf16.msra.mxu1 %v12881_v38  ;;  %v12589_v38 = vld [vmem:[%s13025_s30 + $0xf40] ss:$88 sps:$4 sm:$0xff]  }
 0x47a   : > { %10184 = vmatprep.subr.bf16.mxu1 %v12910_v1 }
 0x47d   : > { %10200 = vmatpush1.bf16.msra.mxu1 %v12882_v43  ;;  %v12596_v43 = vld [vmem:[%s13025_s30 + $0x520] ss:$88 sps:$4 sm:$0xff]  }
 0x47e   : > { %10185 = vmatprep.subr.bf16.mxu1 %v12910_v1 }
 0x47f   : > { %7113 = vmatmul.mubr.bf16.gmra.mrb[28].mxu1 %v12495_v39  ;;  %8686 = vmatmul.mubr.bf16.gmra.mrb[92].mxu0 %v12496_v40  ;;  %v12590_v39 = vld [vmem:[%s13025_s30 + $0x470] ss:$88 sps:$4 sm:$0xff]   ;;  %v12591_v40 = vld [vmem:[%s13025_s30 + $0xff4] ss:$88 sps:$4 sm:$0xff]  }
 0x480   : > { %7120 = vmatprep.mubr.bf16.mxu1 %v12497_v41  ;;  %8693 = vmatprep.mubr.bf16.mxu0 %v12499_v42  ;;  %v12593_v41 = vld [vmem:[%s13025_s30 + $0x524] ss:$88 sps:$4 sm:$0xff]   ;;  %v12595_v42 = vld [vmem:[%s13025_s30 + $0xff0] ss:$88 sps:$4 sm:$0xff]  }
 0x481   : > { %10201 = vmatpush1.bf16.msra.mxu1 %v12883_v44  ;;  %v12597_v44 = vld [vmem:[%s13025_s30 + $0x10a4] ss:$88 sps:$4 sm:$0xff]  }
 0x482   : > { %10186 = vmatprep.subr.bf16.mxu1 %v12910_v1  ;;  %v12509_v1 = vld [vmem:[%s13025_s30 + $0x1178] ss:$88 sps:$4 sm:$0xff]  }
 0x485   : > { %10202 = vmatpush1.bf16.msra.mxu1 %v12884_v49  ;;  %v12605_v49 = vld [vmem:[%s13025_s30 + $0x684] ss:$88 sps:$4 sm:$0xff]  }
 0x487   : > { %7121 = vmatmul.mubr.bf16.gmra.mrb[32].mxu1 %v12501_v45  ;;  %8694 = vmatmul.mubr.bf16.gmra.mrb[96].mxu0 %v12502_v46  ;;  %v12599_v45 = vld [vmem:[%s13025_s30 + $0x5d4] ss:$88 sps:$4 sm:$0xff]   ;;  %v12601_v46 = vld [vmem:[%s13025_s30 + $0x10a0] ss:$88 sps:$4 sm:$0xff]  }
 0x488   : > { %7128 = vmatprep.mubr.bf16.mxu1 %v12504_v47  ;;  %8701 = vmatprep.mubr.bf16.mxu0 %v12506_v48  ;;  %v12602_v47 = vld [vmem:[%s13025_s30 + $0x5d0] ss:$88 sps:$4 sm:$0xff]   ;;  %v12603_v48 = vld [vmem:[%s13025_s30 + $0x1154] ss:$88 sps:$4 sm:$0xff]  }
 0x48f   : > { %7129 = vmatmul.mubr.bf16.gmra.mrb[36].mxu1 %v12508_v50  ;;  %8702 = vmatmul.mubr.bf16.gmra.mrb[100].mxu0 %v12509_v1  ;;  %v12607_v50 = vld [vmem:[%s13025_s30 + $0x1150] ss:$88 sps:$4 sm:$0xff]   ;;  %v12608_v1 = vld [vmem:[%s13025_s30 + $0x680] ss:$88 sps:$4 sm:$0xff]  }
 0x490   : > { %7136 = vmatprep.mubr.bf16.mxu1 %v12510_v51  ;;  %8709 = vmatprep.mubr.bf16.mxu0 %v12512_v52  ;;  %v12609_v51 = vld [vmem:[%s13025_s30 + $0x1204] ss:$88 sps:$4 sm:$0xff]   ;;  %v12611_v52 = vld [vmem:[%s13025_s30 + $0x734] ss:$88 sps:$4 sm:$0xff]  }
 0x497   : > { %7137 = vmatmul.mubr.bf16.gmra.mrb[40].mxu1 %v12514_v53  ;;  %8710 = vmatmul.mubr.bf16.gmra.mrb[104].mxu0 %v12515_v54  ;;  %v12613_v53 = vld [vmem:[%s13025_s30 + $0x1200] ss:$88 sps:$4 sm:$0xff]   ;;  %v12614_v54 = vld [vmem:[%s13025_s30 + $0x730] ss:$88 sps:$4 sm:$0xff]  }
 0x498   : > { %7144 = vmatprep.mubr.bf16.mxu1 %v12517_v55  ;;  %8717 = vmatprep.mubr.bf16.mxu0 %v12519_v56  ;;  %v12615_v55 = vld [vmem:[%s13025_s30 + $0x12b4] ss:$88 sps:$4 sm:$0xff]   ;;  %v12617_v56 = vld [vmem:[%s13025_s30 + $0x7e4] ss:$88 sps:$4 sm:$0xff]  }
 0x49f   : > { %7145 = vmatmul.mubr.bf16.gmra.mrb[44].mxu1 %v12521_v57  ;;  %8718 = vmatmul.mubr.bf16.gmra.mrb[108].mxu0 %v12522_v58 }
 0x4a0   : > { %7152 = vmatprep.mubr.bf16.mxu1 %v12523_v59  ;;  %8725 = vmatprep.mubr.bf16.mxu0 %v12525_v60  ;;  %v12619_v59 = vld [vmem:[%s13025_s30 + $0x12b0] ss:$88 sps:$4 sm:$0xff]  }
 0x4a7   : > { %7153 = vmatmul.mubr.bf16.gmra.mrb[48].mxu1 %v12527_v61  ;;  %8726 = vmatmul.mubr.bf16.gmra.mrb[112].mxu0 %v12528_v62  ;;  %v12620_v61 = vld [vmem:[%s13025_s30 + $0x7e0] ss:$88 sps:$4 sm:$0xff]   ;;  %v12621_v62 = vld [vmem:[%s13025_s30 + $0x1364] ss:$88 sps:$4 sm:$0xff]  }
 0x4a8   : > { %7160 = vmatprep.mubr.bf16.mxu1 %v12530_v63  ;;  %8733 = vmatprep.mubr.bf16.mxu0 %v12532_v0  ;;  %v12623_v0 = vld [vmem:[%s13025_s30 + $0x894] ss:$88 sps:$4 sm:$0xff]  }
 0x4af   : > { %7161 = vmatmul.mubr.bf16.gmra.mrb[52].mxu1 %v12534_v2  ;;  %8734 = vmatmul.mubr.bf16.gmra.mrb[116].mxu0 %v12535_v3 }
 0x4b0   : > { %7168 = vmatprep.mubr.bf16.mxu1 %v12536_v4  ;;  %8741 = vmatprep.mubr.bf16.mxu0 %v12538_v5  ;;  %v12625_v4 = vld [vmem:[%s13025_s30 + $0x1360] ss:$88 sps:$4 sm:$0xff]  }
 0x4b7   : > { %7169 = vmatmul.mubr.bf16.gmra.mrb[56].mxu1 %v12540_v6  ;;  %8742 = vmatmul.mubr.bf16.gmra.mrb[120].mxu0 %v12541_v7  ;;  %v12626_v6 = vld [vmem:[%s13025_s30 + $0x890] ss:$88 sps:$4 sm:$0xff]   ;;  %v12627_v7 = vld [vmem:[%s13025_s30 + $0x1414] ss:$88 sps:$4 sm:$0xff]  }
 0x4b8   : > { %7176 = vmatprep.mubr.bf16.mxu1 %v12543_v8  ;;  %8749 = vmatprep.mubr.bf16.mxu0 %v12545_v9  ;;  %v12629_v9 = vld [vmem:[%s13025_s30 + $0x944] ss:$88 sps:$4 sm:$0xff]  }
 0x4bf   : > { %7177 = vmatmul.mubr.bf16.gmra.mrb[60].mxu1 %v12547_v10  ;;  %8750 = vmatmul.mubr.bf16.gmra.mrb[124].mxu0 %v12548_v11 }
 0x4c0   : > { %7184 = vmatprep.mubr.bf16.mxu1 %v12549_v12  ;;  %8790 = vmatprep.mubr.bf16.mxu0 %v12553_v13  ;;  %v12631_v12 = vld [vmem:[%s13025_s30 + $0x1410] ss:$88 sps:$4 sm:$0xff]  }
 0x4c7   : > { %7185 = vmatmul.mubr.bf16.gmra.mrb[64].mxu1 %v12554_v14  ;;  %8791 = vmatmul.mubr.bf16.vlgmr.msra.gmra.mrb[0].mxu0 %v12551_v15  ;;  %v12632_v14 = vld [vmem:[%s13025_s30 + $0x940] ss:$88 sps:$4 sm:$0xff]   ;;  %v12633_v15 = vld [vmem:[%s13025_s30 + $0x14c4] ss:$88 sps:$4 sm:$0xff]  }
 0x4c8   : > { %7192 = vmatprep.mubr.bf16.mxu1 %v12555_v16  ;;  %8798 = vmatprep.mubr.bf16.mxu0 %v12557_v17  ;;  %v12635_v17 = vld [vmem:[%s13025_s30 + $0x9f4] ss:$88 sps:$4 sm:$0xff]  }
 0x4cf   : > { %7193 = vmatmul.mubr.bf16.gmra.mrb[68].mxu1 %v12559_v18  ;;  %8799 = vmatmul.mubr.bf16.gmra.mrb[4].mxu0 %v12560_v19 }
 0x4d0   : > { %7200 = vmatprep.mubr.bf16.mxu1 %v12561_v20  ;;  %8806 = vmatprep.mubr.bf16.mxu0 %v12563_v21  ;;  %v12637_v20 = vld [vmem:[%s13025_s30 + $0x14c0] ss:$88 sps:$4 sm:$0xff]  }
 0x4d7   : > { %7201 = vmatmul.mubr.bf16.gmra.mrb[72].mxu1 %v12565_v22  ;;  %8807 = vmatmul.mubr.bf16.gmra.mrb[8].mxu0 %v12566_v23  ;;  %v12638_v22 = vld [vmem:[%s13025_s30 + $0x9f0] ss:$88 sps:$4 sm:$0xff]   ;;  %v12639_v23 = vld [vmem:[%s13025_s30 + $0x1574] ss:$88 sps:$4 sm:$0xff]  }
 0x4d8   : > { %7208 = vmatprep.mubr.bf16.mxu1 %v12567_v24  ;;  %8814 = vmatprep.mubr.bf16.mxu0 %v12569_v25  ;;  %v12641_v25 = vld [vmem:[%s13025_s30 + $0xaa4] ss:$88 sps:$4 sm:$0xff]  }
 0x4df   : > { %7209 = vmatmul.mubr.bf16.gmra.mrb[76].mxu1 %v12571_v26  ;;  %8815 = vmatmul.mubr.bf16.gmra.mrb[12].mxu0 %v12572_v27 }
 0x4e0   : > { %7216 = vmatprep.mubr.bf16.mxu1 %v12573_v28  ;;  %8822 = vmatprep.mubr.bf16.mxu0 %v12575_v29  ;;  %v12643_v28 = vld [vmem:[%s13025_s30 + $0x1570] ss:$88 sps:$4 sm:$0xff]  }
 0x4e7   : > { %7217 = vmatmul.mubr.bf16.gmra.mrb[80].mxu1 %v12577_v30  ;;  %8823 = vmatmul.mubr.bf16.gmra.mrb[16].mxu0 %v12578_v31  ;;  %v12644_v30 = vld [vmem:[%s13025_s30 + $0xaa0] ss:$88 sps:$4 sm:$0xff]   ;;  %v12647_v31 = vld [vmem:[%s13025_s30 + $0xb2c] ss:$88 sps:$4 sm:$0xff]  }
 0x4e8   : > { %7224 = vmatprep.mubr.bf16.mxu1 %v12579_v32  ;;  %8830 = vmatprep.mubr.bf16.mxu0 %v12581_v33  ;;  %v12648_v33 = vld [vmem:[%s13025_s30 + $0xb54] ss:$88 sps:$4 sm:$0xff]  }
 0x4ef   : > { %7225 = vmatmul.mubr.bf16.gmra.mrb[84].mxu1 %v12583_v34  ;;  %8831 = vmatmul.mubr.bf16.gmra.mrb[20].mxu0 %v12584_v35 }
 0x4f0   : > { %7232 = vmatprep.mubr.bf16.mxu1 %v12585_v36  ;;  %8838 = vmatprep.mubr.bf16.mxu0 %v12587_v37  ;;  %v12645_v36 = vld [vmem:[%s13025_s30 + $0xb28] ss:$88 sps:$4 sm:$0xff]  }
 0x4f7   : > { %7233 = vmatmul.mubr.bf16.gmra.mrb[88].mxu1 %v12589_v38  ;;  %8839 = vmatmul.mubr.bf16.gmra.mrb[24].mxu0 %v12590_v39  ;;  %v12650_v38 = vld [vmem:[%s13025_s30 + $0xb50] ss:$88 sps:$4 sm:$0xff]   ;;  %v12651_v39 = vld [vmem:[%s13025_s30 + $0xbdc] ss:$88 sps:$4 sm:$0xff]  }
 0x4f8   : > { %7240 = vmatprep.mubr.bf16.mxu1 %v12591_v40  ;;  %8846 = vmatprep.mubr.bf16.mxu0 %v12593_v41  ;;  %v12653_v41 = vld [vmem:[%s13025_s30 + $0xc04] ss:$88 sps:$4 sm:$0xff]  }
 0x4ff   : > { %7241 = vmatmul.mubr.bf16.gmra.mrb[92].mxu1 %v12595_v42  ;;  %8847 = vmatmul.mubr.bf16.gmra.mrb[28].mxu0 %v12596_v43 }
 0x500   : > { %7248 = vmatprep.mubr.bf16.mxu1 %v12597_v44  ;;  %8854 = vmatprep.mubr.bf16.mxu0 %v12599_v45  ;;  %v12655_v44 = vld [vmem:[%s13025_s30 + $0xbd8] ss:$88 sps:$4 sm:$0xff]  }
 0x507   : > { %7249 = vmatmul.mubr.bf16.gmra.mrb[96].mxu1 %v12601_v46  ;;  %8855 = vmatmul.mubr.bf16.gmra.mrb[32].mxu0 %v12602_v47  ;;  %v12656_v46 = vld [vmem:[%s13025_s30 + $0xc00] ss:$88 sps:$4 sm:$0xff]   ;;  %v12657_v47 = vld [vmem:[%s13025_s30 + $0xc8c] ss:$88 sps:$4 sm:$0xff]  }
 0x508   : > { %7256 = vmatprep.mubr.bf16.mxu1 %v12603_v48  ;;  %8862 = vmatprep.mubr.bf16.mxu0 %v12605_v49  ;;  %v12659_v49 = vld [vmem:[%s13025_s30 + $0xcb4] ss:$88 sps:$4 sm:$0xff]  }
 0x50f   : > { %7257 = vmatmul.mubr.bf16.gmra.mrb[100].mxu1 %v12607_v50  ;;  %8863 = vmatmul.mubr.bf16.gmra.mrb[36].mxu0 %v12608_v1 }
 0x510   : > { %7264 = vmatprep.mubr.bf16.mxu1 %v12609_v51  ;;  %8870 = vmatprep.mubr.bf16.mxu0 %v12611_v52  ;;  %v12661_v51 = vld [vmem:[%s13025_s30 + $0xc88] ss:$88 sps:$4 sm:$0xff]  }
 0x517   : > { %7265 = vmatmul.mubr.bf16.gmra.mrb[104].mxu1 %v12613_v53  ;;  %8871 = vmatmul.mubr.bf16.gmra.mrb[40].mxu0 %v12614_v54  ;;  %v12662_v53 = vld [vmem:[%s13025_s30 + $0xcb0] ss:$88 sps:$4 sm:$0xff]   ;;  %v12663_v54 = vld [vmem:[%s13025_s30 + $0xd3c] ss:$88 sps:$4 sm:$0xff]  }
 0x518   : > { %7272 = vmatprep.mubr.bf16.mxu1 %v12615_v55  ;;  %8878 = vmatprep.mubr.bf16.mxu0 %v12617_v56  ;;  %v12665_v56 = vld [vmem:[%s13025_s30 + $0xd64] ss:$88 sps:$4 sm:$0xff]  }
 0x51a   : > { %v14350_v57 = vpop.f32.mrb[0].mxu1 }
 0x51b   : > { %v7060_v58 = vpop.f32.mrb[1].mxu1 }
 0x51c   : > { %v14353_v60 = vpop.f32.mrb[2].mxu1 }
 0x51d   : > { %v7063_v63 = vpop.f32.mrb[3].mxu1 }
 0x51e   : > { %v12668_v63 = vld [vmem:[%s13025_s30 + $0xd60] ss:$88 sps:$4 sm:$0xff]  }
 0x51f   : > { %7273 = vmatmul.mubr.bf16.gmra.mrb[108].mxu1 %v12619_v59  ;;  %8879 = vmatmul.mubr.bf16.gmra.mrb[44].mxu0 %v12620_v61  ;;  %v12667_v61 = vld [vmem:[%s13025_s30 + $0xd38] ss:$88 sps:$4 sm:$0xff]  }
 0x520   : > { %7280 = vmatprep.mubr.bf16.mxu1 %v12621_v62  ;;  %8886 = vmatprep.mubr.bf16.mxu0 %v12623_v0  ;;  %v12669_v0 = vld [vmem:[%s13025_s30 + $0xdec] ss:$88 sps:$4 sm:$0xff]  }
 0x522   : > { %v14358_v2 = vpop.f32.mrb[4].mxu1 }
 0x523   : > { %v7068_v3 = vpop.f32.mrb[5].mxu1 }
 0x524   : > { %v14361_v5 = vpop.f32.mrb[6].mxu1 }
 0x525   : > { %v7071_v8 = vpop.f32.mrb[7].mxu1 }
 0x526   : > { %v12673_v8 = vld [vmem:[%s13025_s30 + $0xde8] ss:$88 sps:$4 sm:$0xff]  }
 0x527   : > { %7281 = vmatmul.mubr.bf16.gmra.mrb[112].mxu1 %v12625_v4  ;;  %8887 = vmatmul.mubr.bf16.gmra.mrb[48].mxu0 %v12626_v6  ;;  %v12671_v4 = vld [vmem:[%s13025_s30 + $0xe14] ss:$88 sps:$4 sm:$0xff]  }
 0x528   : > { %7288 = vmatprep.mubr.bf16.mxu1 %v12627_v7  ;;  %8894 = vmatprep.mubr.bf16.mxu0 %v12629_v9 }
 0x52a   : > { %v14366_v10 = vpop.f32.mrb[8].mxu1 }
 0x52b   : > { %v7076_v11 = vpop.f32.mrb[9].mxu1 }
 0x52c   : > { %v14369_v13 = vpop.f32.mrb[10].mxu1  ;;  %v12674_v11 = vld [vmem:[%s13025_s30 + $0xe10] ss:$88 sps:$4 sm:$0xff]  }
 0x52d   : > { %v7079_v16 = vpop.f32.mrb[11].mxu1 }
 0x52f   : > { %7289 = vmatmul.mubr.bf16.gmra.mrb[116].mxu1 %v12631_v12  ;;  %8895 = vmatmul.mubr.bf16.gmra.mrb[52].mxu0 %v12632_v14  ;;  %v12675_v12 = vld [vmem:[%s13025_s30 + $0xe9c] ss:$88 sps:$4 sm:$0xff]  }
 0x530   : > { %7296 = vmatprep.mubr.bf16.mxu1 %v12633_v15  ;;  %8902 = vmatprep.mubr.bf16.mxu0 %v12635_v17  ;;  %v12677_v15 = vld [vmem:[%s13025_s30 + $0xec4] ss:$88 sps:$4 sm:$0xff]  }
 0x532   : > { %v14374_v18 = vpop.f32.mrb[12].mxu1 }
 0x533   : > { %v7084_v19 = vpop.f32.mrb[13].mxu1 }
 0x534   : > { %v14377_v21 = vpop.f32.mrb[14].mxu1  ;;  %v12679_v19 = vld [vmem:[%s13025_s30 + $0xe98] ss:$88 sps:$4 sm:$0xff]  }
 0x535   : > { %v7087_v24 = vpop.f32.mrb[15].mxu1 }
 0x537   : > { %7297 = vmatmul.mubr.bf16.gmra.mrb[120].mxu1 %v12637_v20  ;;  %8903 = vmatmul.mubr.bf16.gmra.mrb[56].mxu0 %v12638_v22  ;;  %v12680_v22 = vld [vmem:[%s13025_s30 + $0xec0] ss:$88 sps:$4 sm:$0xff]  }
 0x538   : > { %7304 = vmatprep.mubr.bf16.mxu1 %v12639_v23  ;;  %8910 = vmatprep.mubr.bf16.mxu0 %v12641_v25  ;;  %v12681_v23 = vld [vmem:[%s13025_s30 + $0xf4c] ss:$88 sps:$4 sm:$0xff]  }
 0x539   : > { %v12683_v25 = vld [vmem:[%s13025_s30 + $0xf74] ss:$88 sps:$4 sm:$0xff]  }
 0x53a   : > { %v14382_v26 = vpop.f32.mrb[16].mxu1 }
 0x53b   : > { %v7092_v27 = vpop.f32.mrb[17].mxu1 }
 0x53c   : > { %v14385_v29 = vpop.f32.mrb[18].mxu1 }
 0x53d   : > { %v7095_v32 = vpop.f32.mrb[19].mxu1 }
 0x53e   : > { %v12686_v32 = vld [vmem:[%s13025_s30 + $0xf70] ss:$88 sps:$4 sm:$0xff]  }
 0x53f   : > { %7305 = vmatmul.mubr.bf16.gmra.mrb[124].mxu1 %v12643_v28  ;;  %8911 = vmatmul.mubr.bf16.gmra.mrb[60].mxu0 %v12644_v30  ;;  %v12685_v30 = vld [vmem:[%s13025_s30 + $0xf48] ss:$88 sps:$4 sm:$0xff]  }
 0x540   : > { %7473 = vmatprep.mubr.bf16.mxu1 %v12647_v31  ;;  %8918 = vmatprep.mubr.bf16.mxu0 %v12648_v33  ;;  %v12687_v33 = vld [vmem:[%s13025_s30 + $0xffc] ss:$88 sps:$4 sm:$0xff]  }
 0x542   : > { %v14390_v34 = vpop.f32.mrb[20].mxu1 }
 0x543   : > { %v7100_v35 = vpop.f32.mrb[21].mxu1 }
 0x544   : > { %v14393_v37 = vpop.f32.mrb[22].mxu1 }
 0x545   : > { %v7103_v40 = vpop.f32.mrb[23].mxu1 }
 0x546   : > { %v12691_v40 = vld [vmem:[%s13025_s30 + $0xff8] ss:$88 sps:$4 sm:$0xff]  }
 0x547   : > { %7474 = vmatmul.mubr.bf16.vlgmr.msra.gmra.mrb[64].mxu1 %v12645_v36  ;;  %8919 = vmatmul.mubr.bf16.gmra.mrb[64].mxu0 %v12650_v38  ;;  %v12689_v36 = vld [vmem:[%s13025_s30 + $0x1024] ss:$88 sps:$4 sm:$0xff]  }
 0x548   : > { %7481 = vmatprep.mubr.bf16.mxu1 %v12651_v39  ;;  %8926 = vmatprep.mubr.bf16.mxu0 %v12653_v41 }
 0x54a   : > { %v14398_v42 = vpop.f32.mrb[24].mxu1 }
 0x54b   : > { %v7108_v43 = vpop.f32.mrb[25].mxu1 }
 0x54c   : > { %v14401_v45 = vpop.f32.mrb[26].mxu1  ;;  %v12692_v43 = vld [vmem:[%s13025_s30 + $0x1020] ss:$88 sps:$4 sm:$0xff]  }
 0x54d   : > { %v7111_v48 = vpop.f32.mrb[27].mxu1 }
 0x54f   : > { %7482 = vmatmul.mubr.bf16.gmra.mrb[68].mxu1 %v12655_v44  ;;  %8927 = vmatmul.mubr.bf16.gmra.mrb[68].mxu0 %v12656_v46  ;;  %v12693_v44 = vld [vmem:[%s13025_s30 + $0x10ac] ss:$88 sps:$4 sm:$0xff]  }
 0x550   : > { %7489 = vmatprep.mubr.bf16.mxu1 %v12657_v47  ;;  %8934 = vmatprep.mubr.bf16.mxu0 %v12659_v49  ;;  %v12695_v47 = vld [vmem:[%s13025_s30 + $0x10d4] ss:$88 sps:$4 sm:$0xff]  }
 0x552   : > { %v14406_v50 = vpop.f32.mrb[28].mxu1 }
 0x553   : > { %v7116_v1 = vpop.f32.mrb[29].mxu1 }
 0x554   : > { %v14409_v52 = vpop.f32.mrb[30].mxu1  ;;  %v12697_v1 = vld [vmem:[%s13025_s30 + $0x10a8] ss:$88 sps:$4 sm:$0xff]  }
 0x555   : > { %v7119_v55 = vpop.f32.mrb[31].mxu1 }
 0x557   : > { %7490 = vmatmul.mubr.bf16.gmra.mrb[72].mxu1 %v12661_v51  ;;  %8935 = vmatmul.mubr.bf16.gmra.mrb[72].mxu0 %v12662_v53  ;;  %v12698_v53 = vld [vmem:[%s13025_s30 + $0x10d0] ss:$88 sps:$4 sm:$0xff]  }
 0x558   : > { %7497 = vmatprep.mubr.bf16.mxu1 %v12663_v54  ;;  %8942 = vmatprep.mubr.bf16.mxu0 %v12665_v56  ;;  %v12699_v54 = vld [vmem:[%s13025_s30 + $0x115c] ss:$88 sps:$4 sm:$0xff]  }
 0x559   : > { %v12701_v56 = vld [vmem:[%s13025_s30 + $0x1184] ss:$88 sps:$4 sm:$0xff]  }
 0x55a   : > { %v14414_v58 = vpop.f32.mrb[32].mxu1 }
 0x55b   : > { %v7124_v59 = vpop.f32.mrb[33].mxu1 }
 0x55c   : > { %v14417_v62 = vpop.f32.mrb[34].mxu1 }
 0x55d   : > { %v7127_v3 = vpop.f32.mrb[35].mxu1 }
 0x55e   : > { %v12704_v3 = vld [vmem:[%s13025_s30 + $0x1180] ss:$88 sps:$4 sm:$0xff]  }
 0x55f   : > { %7498 = vmatmul.mubr.bf16.gmra.mrb[76].mxu1 %v12667_v61  ;;  %8943 = vmatmul.mubr.bf16.gmra.mrb[76].mxu0 %v12668_v63  ;;  %v12703_v63 = vld [vmem:[%s13025_s30 + $0x1158] ss:$88 sps:$4 sm:$0xff]  }
 0x560   : > { %7505 = vmatprep.mubr.bf16.mxu1 %v12669_v0  ;;  %8950 = vmatprep.mubr.bf16.mxu0 %v12671_v4  ;;  %v12705_v4 = vld [vmem:[%s13025_s30 + $0x120c] ss:$88 sps:$4 sm:$0xff]  }
 0x562   : > { %v14422_v6 = vpop.f32.mrb[36].mxu1 }
 0x563   : > { %v7132_v7 = vpop.f32.mrb[37].mxu1 }
 0x564   : > { %v14425_v9 = vpop.f32.mrb[38].mxu1 }
 0x565   : > { %v7135_v14 = vpop.f32.mrb[39].mxu1 }
 0x566   : > { %v12709_v14 = vld [vmem:[%s13025_s30 + $0x1208] ss:$88 sps:$4 sm:$0xff]  }
 0x567   : > { %7506 = vmatmul.mubr.bf16.gmra.mrb[80].mxu1 %v12673_v8  ;;  %8951 = vmatmul.mubr.bf16.gmra.mrb[80].mxu0 %v12674_v11  ;;  %v12707_v8 = vld [vmem:[%s13025_s30 + $0x1234] ss:$88 sps:$4 sm:$0xff]  }
 0x568   : > { %7513 = vmatprep.mubr.bf16.mxu1 %v12675_v12  ;;  %8958 = vmatprep.mubr.bf16.mxu0 %v12677_v15 }
 0x56a   : > { %v14430_v16 = vpop.f32.mrb[40].mxu1 }
 0x56b   : > { %v7140_v17 = vpop.f32.mrb[41].mxu1 }
 0x56c   : > { %v14433_v20 = vpop.f32.mrb[42].mxu1  ;;  %v12710_v17 = vld [vmem:[%s13025_s30 + $0x1230] ss:$88 sps:$4 sm:$0xff]  }
 0x56d   : > { %v7143_v24 = vpop.f32.mrb[43].mxu1 }
 0x56e   : > { %v14481_v24 = vld [vmem:[%s14677_s2] ss:$0 sm:$0xff] }
 0x56f   : > { %7514 = vmatmul.mubr.bf16.gmra.mrb[84].mxu1 %v12679_v19  ;;  %8959 = vmatmul.mubr.bf16.gmra.mrb[84].mxu0 %v12680_v22  ;;  %v12711_v19 = vld [vmem:[%s13025_s30 + $0x12bc] ss:$88 sps:$4 sm:$0xff]  }
 0x570   : > { %7521 = vmatprep.mubr.bf16.mxu1 %v12681_v23  ;;  %8966 = vmatprep.mubr.bf16.mxu0 %v12683_v25  ;;  %v12713_v23 = vld [vmem:[%s13025_s30 + $0x12e4] ss:$88 sps:$4 sm:$0xff]   ;;  %v10203_v25 = vadd.f32 %v14481_v24, %v14350_v57  ;;  %v10207_v57 = vadd.f32 %v14481_v24, %v14358_v2 }
 0x572   : > { %v14438_v27 = vpop.f32.mrb[44].mxu1 }
 0x573   : > { %v7148_v28 = vpop.f32.mrb[45].mxu1 }
 0x574   : > { %v14441_v31 = vpop.f32.mrb[46].mxu1 }
 0x575   : > { %v7151_v35 = vpop.f32.mrb[47].mxu1 }
 0x577   : > { %7522 = vmatmul.mubr.bf16.gmra.mrb[88].mxu1 %v12685_v30  ;;  %8967 = vmatmul.mubr.bf16.gmra.mrb[88].mxu0 %v12686_v32  ;;  %v12715_v30 = vld [vmem:[%s13025_s30 + $0x12b8] ss:$88 sps:$4 sm:$0xff]   ;;  %v10205_v32 = vadd.f32 %v14481_v24, %v14353_v60 }
 0x578   : > { %7529 = vmatprep.mubr.bf16.mxu1 %v12687_v33  ;;  %8974 = vmatprep.mubr.bf16.mxu0 %v12689_v36  ;;  %v12716_v36 = vld [vmem:[%s13025_s30 + $0x12e0] ss:$88 sps:$4 sm:$0xff]  }
 0x57a   : > { %v14446_v38 = vpop.f32.mrb[48].mxu1 }
 0x57b   : > { %v7156_v39 = vpop.f32.mrb[49].mxu1 }
 0x57c   : > { %v14449_v41 = vpop.f32.mrb[50].mxu1  ;;  %v12717_v39 = vld [vmem:[%s13025_s30 + $0x136c] ss:$88 sps:$4 sm:$0xff]  }
 0x57d   : > { %v7159_v46 = vpop.f32.mrb[51].mxu1 }
 0x57f   : > { %7530 = vmatmul.mubr.bf16.gmra.mrb[92].mxu1 %v12691_v40  ;;  %8975 = vmatmul.mubr.bf16.gmra.mrb[92].mxu0 %v12692_v43  ;;  %v12719_v43 = vld [vmem:[%s13025_s30 + $0x1394] ss:$88 sps:$4 sm:$0xff]  }
 0x580   : > { %7537 = vmatprep.mubr.bf16.mxu1 %v12693_v44  ;;  %8982 = vmatprep.mubr.bf16.mxu0 %v12695_v47  ;;  %v12721_v47 = vld [vmem:[%s13025_s30 + $0x1368] ss:$88 sps:$4 sm:$0xff]  }
 0x582   : > { %v14454_v48 = vpop.f32.mrb[52].mxu1 }
 0x583   : > { %v7164_v49 = vpop.f32.mrb[53].mxu1 }
 0x584   : > { %v14457_v51 = vpop.f32.mrb[54].mxu1  ;;  %v10209_v49 = vadd.f32 %v14481_v24, %v14361_v5 }
 0x585   : > { %v7167_v55 = vpop.f32.mrb[55].mxu1 }
 0x586   : > { %v12723_v55 = vld [vmem:[%s13025_s30 + $0x141c] ss:$88 sps:$4 sm:$0xff]  }
 0x587   : > { %7538 = vmatmul.mubr.bf16.gmra.mrb[96].mxu1 %v12697_v1  ;;  %8983 = vmatmul.mubr.bf16.gmra.mrb[96].mxu0 %v12698_v53 }
 0x588   : > { %7545 = vmatprep.mubr.bf16.mxu1 %v12699_v54  ;;  %8990 = vmatprep.mubr.bf16.mxu0 %v12701_v56  ;;  %v12722_v54 = vld [vmem:[%s13025_s30 + $0x1390] ss:$88 sps:$4 sm:$0xff]  }
 0x58a   : > { %v14462_v59 = vpop.f32.mrb[56].mxu1 }
 0x58b   : > { %v7172_v61 = vpop.f32.mrb[57].mxu1 }
 0x58c   : > { %v14465_v0 = vpop.f32.mrb[58].mxu1  ;;  %v12725_v61 = vld [vmem:[%s13025_s30 + $0x1444] ss:$88 sps:$4 sm:$0xff]  }
 0x58d   : > { %v7175_v7 = vpop.f32.mrb[59].mxu1 }
 0x58f   : > { %7546 = vmatmul.mubr.bf16.gmra.mrb[100].mxu1 %v12703_v63  ;;  %8991 = vmatmul.mubr.bf16.gmra.mrb[100].mxu0 %v12704_v3 }
 0x590   : > { %7553 = vmatprep.mubr.bf16.mxu1 %v12705_v4  ;;  %8998 = vmatprep.mubr.bf16.mxu0 %v12707_v8  ;;  %v10211_v4 = vadd.f32 %v14481_v24, %v14366_v10  ;;  %v12727_v8 = vld [vmem:[%s13025_s30 + $0x1418] ss:$88 sps:$4 sm:$0xff]  }
 0x592   : > { %v14470_v11 = vpop.f32.mrb[60].mxu1 }
 0x593   : > { %v7180_v12 = vpop.f32.mrb[61].mxu1 }
 0x594   : > { %v14473_v15 = vpop.f32.mrb[62].mxu1  ;;  %v10213_v12 = vadd.f32 %v14481_v24, %v14369_v13 }
 0x595   : > { %v7183_v22 = vpop.f32.mrb[63].mxu1 }
 0x596   : > { %v12729_v22 = vld [vmem:[%s13025_s30 + $0x14cc] ss:$88 sps:$4 sm:$0xff]  }
 0x597   : > { %7554 = vmatmul.mubr.bf16.gmra.mrb[104].mxu1 %v12709_v14  ;;  %8999 = vmatmul.mubr.bf16.gmra.mrb[104].mxu0 %v12710_v17 }
 0x598   : > { %7561 = vmatprep.mubr.bf16.mxu1 %v12711_v19  ;;  %9006 = vmatprep.mubr.bf16.mxu0 %v12713_v23  ;;  %v12728_v19 = vld [vmem:[%s13025_s30 + $0x1440] ss:$88 sps:$4 sm:$0xff]  }
 0x59a   : > { %v8792_v28 = vpop.f32.mrb[0].mxu0 }
 0x59b   : > { %v10204_v33 = vadd.f32 %v10203_v25, %v8792_v28  ;;  %v8794_v35 = vpop.f32.mrb[1].mxu0  ;;  %v12731_v25 = vld [vmem:[%s13025_s30 + $0x14f4] ss:$88 sps:$4 sm:$0xff]  }
 0x59c   : > { %v8795_v40 = vpop.f32.mrb[2].mxu0  ;;  %v12733_v35 = vld [vmem:[%s13025_s30 + $0x14c8] ss:$88 sps:$4 sm:$0xff]  }
 0x59d   : > { %12741 = vtanh.f32 %v10204_v33  ;;  %v10206_v44 = vadd.f32 %v10205_v32, %v8795_v40  ;;  %v8797_v46 = vpop.f32.mrb[3].mxu0  ;;  %v10215_v32 = vadd.f32 %v14481_v24, %v14374_v18 }
 0x59f   : > { %7562 = vmatmul.mubr.bf16.gmra.mrb[108].mxu1 %v12715_v30  ;;  %12743 = vtanh.f32 %v10206_v44  ;;  %9007 = vmatmul.mubr.bf16.gmra.mrb[108].mxu0 %v12716_v36  ;;  %v10217_v36 = vadd.f32 %v14481_v24, %v14377_v21  ;;  %v12735_v44 = vld [vmem:[%s13025_s30 + $0x157c] ss:$88 sps:$4 sm:$0xff]  }
 0x5a0   : > { %7569 = vmatprep.mubr.bf16.mxu1 %v12717_v39  ;;  %9014 = vmatprep.mubr.bf16.mxu0 %v12719_v43  ;;  %v12734_v43 = vld [vmem:[%s13025_s30 + $0x14f0] ss:$88 sps:$4 sm:$0xff]  }
 0x5a2   : > { %v8800_v60 = vpop.f32.mrb[4].mxu0 }
 0x5a3   : > { %v10208_v1 = vadd.f32 %v10207_v57, %v8800_v60  ;;  %v8802_v53 = vpop.f32.mrb[5].mxu0  ;;  %v12737_v57 = vld [vmem:[%s13025_s30 + $0x15a4] ss:$88 sps:$4 sm:$0xff]  }
 0x5a4   : > { %v8803_v56 = vpop.f32.mrb[6].mxu0  ;;  %v12739_v53 = vld [vmem:[%s13025_s30 + $0x1578] ss:$88 sps:$4 sm:$0xff]  }
 0x5a5   : > { %12745 = vtanh.f32 %v10208_v1  ;;  %v10210_v2 = vadd.f32 %v10209_v49, %v8803_v56  ;;  %v8805_v63 = vpop.f32.mrb[7].mxu0  ;;  %v10219_v49 = vadd.f32 %v14481_v24, %v14382_v26 }
 0x5a7   : > { %7570 = vmatmul.mubr.bf16.gmra.mrb[112].mxu1 %v12721_v47  ;;  %v12742_v5 = vpop.eup %12741  ;;  %12747 = vtanh.f32 %v10210_v2  ;;  %9015 = vmatmul.mubr.bf16.gmra.mrb[112].mxu0 %v12722_v54  ;;  %v10221_v54 = vadd.f32 %v14481_v24, %v14385_v29 }
 0x5a8   : > { %7577 = vmatprep.mubr.bf16.mxu1 %v12723_v55  ;;  %9111 = vst [vmem:[%s14503_s7] sm:$0xff] %v12742_v5  ;;  %9022 = vmatprep.mubr.bf16.mxu0 %v12725_v61  ;;  %v12740_v61 = vld [vmem:[%s13025_s30 + $0x15a0] ss:$88 sps:$4 sm:$0xff]  }
 0x5a9   : > { %v12744_v3 = vpop.eup %12743 }
 0x5aa   : > { %9112 = vst [vmem:[%s14503_s7 + $0x8] sm:$0xff] %v12744_v3  ;;  %v8808_v7 = vpop.f32.mrb[8].mxu0 }
 0x5ab   : > { %v10212_v14 = vadd.f32 %v10211_v4, %v8808_v7  ;;  %v8810_v17 = vpop.f32.mrb[9].mxu0  ;;  %v10223_v4 = vadd.f32 %v14481_v24, %v14390_v34  ;;  %v10225_v7 = vadd.f32 %v14481_v24, %v14393_v37  ;;  %v10227_v34 = vadd.f32 %v14481_v24, %v14398_v42 }
 0x5ac   : > { %v8811_v23 = vpop.f32.mrb[10].mxu0  ;;  %v10229_v37 = vadd.f32 %v14481_v24, %v14401_v45  ;;  %v10231_v42 = vadd.f32 %v14481_v24, %v14406_v50  ;;  %v10233_v45 = vadd.f32 %v14481_v24, %v14409_v52  ;;  %v10235_v50 = vadd.f32 %v14481_v24, %v14414_v58 }
 0x5ad   : > { %12749 = vtanh.f32 %v10212_v14  ;;  %v10214_v28 = vadd.f32 %v10213_v12, %v8811_v23  ;;  %v8813_v30 = vpop.f32.mrb[11].mxu0  ;;  %v10237_v52 = vadd.f32 %v14481_v24, %v14417_v62  ;;  %v10239_v58 = vadd.f32 %v14481_v24, %v14422_v6 }
 0x5ae   : > { %v10241_v62 = vadd.f32 %v14481_v24, %v14425_v9  ;;  %v10243_v6 = vadd.f32 %v14481_v24, %v14430_v16  ;;  %v10245_v9 = vadd.f32 %v14481_v24, %v14433_v20  ;;  %v10247_v16 = vadd.f32 %v14481_v24, %v14438_v27 }
 0x5af   : > { %7578 = vmatmul.mubr.bf16.gmra.mrb[116].mxu1 %v12727_v8  ;;  %v12746_v10 = vpop.eup %12745  ;;  %12751 = vtanh.f32 %v10214_v28  ;;  %9023 = vmatmul.mubr.bf16.gmra.mrb[116].mxu0 %v12728_v19  ;;  %v10249_v20 = vadd.f32 %v14481_v24, %v14441_v31  ;;  %v10251_v27 = vadd.f32 %v14481_v24, %v14446_v38  ;;  %v10253_v31 = vadd.f32 %v14481_v24, %v14449_v41 }
 0x5b0   : > { %7585 = vmatprep.mubr.bf16.mxu1 %v12729_v22  ;;  %9113 = vst [vmem:[%s14503_s7 + $0x10] sm:$0xff] %v12746_v10  ;;  %9030 = vmatprep.mubr.bf16.mxu0 %v12731_v25  ;;  %v10255_v38 = vadd.f32 %v14481_v24, %v14454_v48  ;;  %v10257_v41 = vadd.f32 %v14481_v24, %v14457_v51 }
 0x5b1   : > { %v12748_v13 = vpop.eup %12747  ;;  %v10259_v48 = vadd.f32 %v14481_v24, %v14462_v59  ;;  %v10261_v51 = vadd.f32 %v14481_v24, %v14465_v0  ;;  %v10263_v59 = vadd.f32 %v14481_v24, %v14470_v11  ;;  %v10265_v0 = vadd.f32 %v14481_v24, %v14473_v15 }
 0x5b2   : > { %9114 = vst [vmem:[%s14503_s7 + $0x18] sm:$0xff] %v12748_v13  ;;  %v8816_v33 = vpop.f32.mrb[12].mxu0 }
 0x5b3   : > { %v10216_v39 = vadd.f32 %v10215_v32, %v8816_v33  ;;  %v8818_v40 = vpop.f32.mrb[13].mxu0 }
 0x5b4   : > { %v8819_v46 = vpop.f32.mrb[14].mxu0 }
 0x5b5   : > { %12753 = vtanh.f32 %v10216_v39  ;;  %v10218_v60 = vadd.f32 %v10217_v36, %v8819_v46  ;;  %v8821_v47 = vpop.f32.mrb[15].mxu0 }
 0x5b7   : > { %7586 = vmatmul.mubr.bf16.gmra.mrb[120].mxu1 %v12733_v35  ;;  %v12750_v18 = vpop.eup %12749  ;;  %12755 = vtanh.f32 %v10218_v60  ;;  %9031 = vmatmul.mubr.bf16.gmra.mrb[120].mxu0 %v12734_v43 }
 0x5b8   : > { %7593 = vmatprep.mubr.bf16.mxu1 %v12735_v44  ;;  %9115 = vst [vmem:[%s14503_s7 + $0x20] sm:$0xff] %v12750_v18  ;;  %9038 = vmatprep.mubr.bf16.mxu0 %v12737_v57 }
 0x5b9   : > { %v12752_v21 = vpop.eup %12751 }
 0x5ba   : > { %9116 = vst [vmem:[%s14503_s7 + $0x28] sm:$0xff] %v12752_v21  ;;  %v8824_v1 = vpop.f32.mrb[16].mxu0 }
 0x5bb   : > { %v10220_v55 = vadd.f32 %v10219_v49, %v8824_v1  ;;  %v8826_v56 = vpop.f32.mrb[17].mxu0 }
 0x5bc   : > { %v8827_v2 = vpop.f32.mrb[18].mxu0 }
 0x5bd   : > { %12757 = vtanh.f32 %v10220_v55  ;;  %v10222_v63 = vadd.f32 %v10221_v54, %v8827_v2  ;;  %v8829_v5 = vpop.f32.mrb[19].mxu0 }
 0x5bf   : > { %7594 = vmatmul.mubr.bf16.gmra.mrb[124].mxu1 %v12739_v53  ;;  %v12754_v3 = vpop.eup %12753  ;;  %12759 = vtanh.f32 %v10222_v63  ;;  %9039 = vmatmul.mubr.bf16.gmra.mrb[124].mxu0 %v12740_v61 }
 0x5c0   : > { %9117 = vst [vmem:[%s14503_s7 + $0x30] sm:$0xff] %v12754_v3 }
 0x5c1   : > { %v12756_v26 = vpop.eup %12755 }
 0x5c2   : > { %9118 = vst [vmem:[%s14503_s7 + $0x38] sm:$0xff] %v12756_v26  ;;  %v8832_v29 = vpop.f32.mrb[20].mxu0 }
 0x5c3   : > { %v10224_v8 = vadd.f32 %v10223_v4, %v8832_v29  ;;  %v8834_v12 = vpop.f32.mrb[21].mxu0 }
 0x5c4   : > { %v8835_v14 = vpop.f32.mrb[22].mxu0 }
 0x5c5   : > { %12761 = vtanh.f32 %v10224_v8  ;;  %v10226_v17 = vadd.f32 %v10225_v7, %v8835_v14  ;;  %v8837_v19 = vpop.f32.mrb[23].mxu0 }
 0x5c7   : > { %v12758_v22 = vpop.eup %12757  ;;  %12763 = vtanh.f32 %v10226_v17 }
 0x5c8   : > { %9119 = vst [vmem:[%s14503_s7 + $0x40] sm:$0xff] %v12758_v22 }
 0x5c9   : > { %v12760_v23 = vpop.eup %12759 }
 0x5ca   : > { %9120 = vst [vmem:[%s14503_s7 + $0x48] sm:$0xff] %v12760_v23  ;;  %v8840_v25 = vpop.f32.mrb[24].mxu0 }
 0x5cb   : > { %v10228_v28 = vadd.f32 %v10227_v34, %v8840_v25  ;;  %v8842_v30 = vpop.f32.mrb[25].mxu0 }
 0x5cc   : > { %v8843_v10 = vpop.f32.mrb[26].mxu0 }
 0x5cd   : > { %12765 = vtanh.f32 %v10228_v28  ;;  %v10230_v13 = vadd.f32 %v10229_v37, %v8843_v10  ;;  %v8845_v32 = vpop.f32.mrb[27].mxu0 }
 0x5cf   : > { %v12762_v33 = vpop.eup %12761  ;;  %12767 = vtanh.f32 %v10230_v13 }
 0x5d0   : > { %9121 = vst [vmem:[%s14503_s7 + $0x50] sm:$0xff] %v12762_v33 }
 0x5d1   : > { %v12764_v35 = vpop.eup %12763 }
 0x5d2   : > { %9122 = vst [vmem:[%s14503_s7 + $0x58] sm:$0xff] %v12764_v35  ;;  %v8848_v36 = vpop.f32.mrb[28].mxu0 }
 0x5d3   : > { %v10232_v39 = vadd.f32 %v10231_v42, %v8848_v36  ;;  %v8850_v40 = vpop.f32.mrb[29].mxu0 }
 0x5d4   : > { %v8851_v43 = vpop.f32.mrb[30].mxu0 }
 0x5d5   : > { %12769 = vtanh.f32 %v10232_v39  ;;  %v10234_v44 = vadd.f32 %v10233_v45, %v8851_v43  ;;  %v8853_v46 = vpop.f32.mrb[31].mxu0 }
 0x5d7   : > { %v12766_v57 = vpop.eup %12765  ;;  %12771 = vtanh.f32 %v10234_v44 }
 0x5d8   : > { %9123 = vst [vmem:[%s14503_s7 + $0x60] sm:$0xff] %v12766_v57 }
 0x5d9   : > { %v12768_v60 = vpop.eup %12767 }
 0x5da   : > { %9124 = vst [vmem:[%s14503_s7 + $0x68] sm:$0xff] %v12768_v60  ;;  %v8856_v47 = vpop.f32.mrb[32].mxu0 }
 0x5db   : > { %v10236_v18 = vadd.f32 %v10235_v50, %v8856_v47  ;;  %v8858_v21 = vpop.f32.mrb[33].mxu0 }
 0x5dc   : > { %v8859_v49 = vpop.f32.mrb[34].mxu0 }
 0x5dd   : > { %12773 = vtanh.f32 %v10236_v18  ;;  %v10238_v1 = vadd.f32 %v10237_v52, %v8859_v49  ;;  %v8861_v53 = vpop.f32.mrb[35].mxu0 }
 0x5df   : > { %v12770_v54 = vpop.eup %12769  ;;  %12775 = vtanh.f32 %v10238_v1 }
 0x5e0   : > { %9125 = vst [vmem:[%s14503_s7 + $0x70] sm:$0xff] %v12770_v54 }
 0x5e1   : > { %v12772_v55 = vpop.eup %12771 }
 0x5e2   : > { %9126 = vst [vmem:[%s14503_s7 + $0x78] sm:$0xff] %v12772_v55  ;;  %v8864_v56 = vpop.f32.mrb[36].mxu0 }
 0x5e3   : > { %v10240_v61 = vadd.f32 %v10239_v58, %v8864_v56  ;;  %v8866_v2 = vpop.f32.mrb[37].mxu0 }
 0x5e4   : > { %v8867_v63 = vpop.f32.mrb[38].mxu0 }
 0x5e5   : > { %12777 = vtanh.f32 %v10240_v61  ;;  %v10242_v5 = vadd.f32 %v10241_v62, %v8867_v63  ;;  %v8869_v3 = vpop.f32.mrb[39].mxu0 }
 0x5e7   : > { %v12774_v26 = vpop.eup %12773  ;;  %12779 = vtanh.f32 %v10242_v5 }
 0x5e8   : > { %9127 = vst [vmem:[%s14503_s7 + $0x80] sm:$0xff] %v12774_v26 }
 0x5e9   : > { %v12776_v4 = vpop.eup %12775 }
 0x5ea   : > { %9128 = vst [vmem:[%s14503_s7 + $0x88] sm:$0xff] %v12776_v4  ;;  %v8872_v29 = vpop.f32.mrb[40].mxu0 }
 0x5eb   : > { %v10244_v7 = vadd.f32 %v10243_v6, %v8872_v29  ;;  %v8874_v8 = vpop.f32.mrb[41].mxu0 }
 0x5ec   : > { %v8875_v12 = vpop.f32.mrb[42].mxu0 }
 0x5ed   : > { %12781 = vtanh.f32 %v10244_v7  ;;  %v10246_v14 = vadd.f32 %v10245_v9, %v8875_v12  ;;  %v8877_v17 = vpop.f32.mrb[43].mxu0 }
 0x5ef   : > { %v12778_v19 = vpop.eup %12777  ;;  %12783 = vtanh.f32 %v10246_v14 }
 0x5f0   : > { %9129 = vst [vmem:[%s14503_s7 + $0x90] sm:$0xff] %v12778_v19 }
 0x5f1   : > { %v12780_v22 = vpop.eup %12779 }
 0x5f2   : > { %9130 = vst [vmem:[%s14503_s7 + $0x98] sm:$0xff] %v12780_v22  ;;  %v8880_v23 = vpop.f32.mrb[44].mxu0 }
 0x5f3   : > { %v10248_v34 = vadd.f32 %v10247_v16, %v8880_v23  ;;  %v8882_v25 = vpop.f32.mrb[45].mxu0 }
 0x5f4   : > { %v8883_v37 = vpop.f32.mrb[46].mxu0 }
 0x5f5   : > { %12785 = vtanh.f32 %v10248_v34  ;;  %v10250_v28 = vadd.f32 %v10249_v20, %v8883_v37  ;;  %v8885_v30 = vpop.f32.mrb[47].mxu0 }
 0x5f7   : > { %v12782_v10 = vpop.eup %12781  ;;  %12787 = vtanh.f32 %v10250_v28 }
 0x5f8   : > { %9131 = vst [vmem:[%s14503_s7 + $0xa0] sm:$0xff] %v12782_v10 }
 0x5f9   : > { %v12784_v13 = vpop.eup %12783 }
 0x5fa   : > { %9132 = vst [vmem:[%s14503_s7 + $0xa8] sm:$0xff] %v12784_v13  ;;  %v8888_v32 = vpop.f32.mrb[48].mxu0 }
 0x5fb   : > { %v10252_v33 = vadd.f32 %v10251_v27, %v8888_v32  ;;  %v8890_v35 = vpop.f32.mrb[49].mxu0 }
 0x5fc   : > { %v8891_v42 = vpop.f32.mrb[50].mxu0 }
 0x5fd   : > { %12789 = vtanh.f32 %v10252_v33  ;;  %v10254_v36 = vadd.f32 %v10253_v31, %v8891_v42  ;;  %v8893_v45 = vpop.f32.mrb[51].mxu0 }
 0x5ff   : > { %v12786_v39 = vpop.eup %12785  ;;  %12791 = vtanh.f32 %v10254_v36 }
 0x600   : > { %9133 = vst [vmem:[%s14503_s7 + $0xb0] sm:$0xff] %v12786_v39 }
 0x601   : > { %v12788_v40 = vpop.eup %12787 }
 0x602   : > { %9134 = vst [vmem:[%s14503_s7 + $0xb8] sm:$0xff] %v12788_v40  ;;  %v8896_v43 = vpop.f32.mrb[52].mxu0 }
 0x603   : > { %v10256_v44 = vadd.f32 %v10255_v38, %v8896_v43  ;;  %v8898_v46 = vpop.f32.mrb[53].mxu0 }
 0x604   : > { %v8899_v57 = vpop.f32.mrb[54].mxu0 }
 0x605   : > { %12793 = vtanh.f32 %v10256_v44  ;;  %v10258_v60 = vadd.f32 %v10257_v41, %v8899_v57  ;;  %v8901_v50 = vpop.f32.mrb[55].mxu0 }
 0x607   : > { %v12790_v47 = vpop.eup %12789  ;;  %12795 = vtanh.f32 %v10258_v60 }
 0x608   : > { %9135 = vst [vmem:[%s14503_s7 + $0xc0] sm:$0xff] %v12790_v47 }
 0x609   : > { %v12792_v52 = vpop.eup %12791 }
 0x60a   : > { %9136 = vst [vmem:[%s14503_s7 + $0xc8] sm:$0xff] %v12792_v52  ;;  %v8904_v18 = vpop.f32.mrb[56].mxu0 }
 0x60b   : > { %v10260_v21 = vadd.f32 %v10259_v48, %v8904_v18  ;;  %v8906_v49 = vpop.f32.mrb[57].mxu0 }
 0x60c   : > { %v8907_v1 = vpop.f32.mrb[58].mxu0 }
 0x60d   : > { %12797 = vtanh.f32 %v10260_v21  ;;  %v10262_v53 = vadd.f32 %v10261_v51, %v8907_v1  ;;  %v8909_v54 = vpop.f32.mrb[59].mxu0 }
 0x60f   : > { %v12794_v55 = vpop.eup %12793  ;;  %12799 = vtanh.f32 %v10262_v53 }
 0x610   : > { %9137 = vst [vmem:[%s14503_s7 + $0xd0] sm:$0xff] %v12794_v55 }
 0x611   : > { %v12796_v58 = vpop.eup %12795 }
 0x612   : > { %9138 = vst [vmem:[%s14503_s7 + $0xd8] sm:$0xff] %v12796_v58  ;;  %v8912_v56 = vpop.f32.mrb[60].mxu0 }
 0x613   : > { %v10264_v62 = vadd.f32 %v10263_v59, %v8912_v56  ;;  %v8914_v61 = vpop.f32.mrb[61].mxu0 }
 0x614   : > { %v8915_v2 = vpop.f32.mrb[62].mxu0 }
 0x615   : > { %12801 = vtanh.f32 %v10264_v62  ;;  %v10266_v63 = vadd.f32 %v10265_v0, %v8915_v2  ;;  %v8917_v5 = vpop.f32.mrb[63].mxu0 }
 0x617   : > { %v12798_v3 = vpop.eup %12797  ;;  %12803 = vtanh.f32 %v10266_v63 }
 0x618   : > { %9139 = vst [vmem:[%s14503_s7 + $0xe0] sm:$0xff] %v12798_v3 }
 0x619   : > { %v12800_v26 = vpop.eup %12799 }
 0x61a   : > { %v7475_v4 = vpop.f32.mrb[64].mxu1  ;;  %9140 = vst [vmem:[%s14503_s7 + $0xe8] sm:$0xff] %v12800_v26  ;;  %v8920_v6 = vpop.f32.mrb[64].mxu0 }
 0x61b   : > { %v10267_v11 = vadd.f32 %v14481_v24, %v7475_v4  ;;  %v7477_v29 = vpop.f32.mrb[65].mxu1  ;;  %v8922_v9 = vpop.f32.mrb[65].mxu0 }
 0x61c   : > { %v7478_v15 = vpop.f32.mrb[66].mxu1  ;;  %v8923_v12 = vpop.f32.mrb[66].mxu0 }
 0x61d   : > { %v10268_v7 = vadd.f32 %v10267_v11, %v8920_v6  ;;  %v10269_v8 = vadd.f32 %v14481_v24, %v7478_v15  ;;  %v7480_v14 = vpop.f32.mrb[67].mxu1  ;;  %v8925_v17 = vpop.f32.mrb[67].mxu0 }
 0x61f   : > { %12805 = vtanh.f32 %v10268_v7  ;;  %v10270_v19 = vadd.f32 %v10269_v8, %v8923_v12  ;;  %v12802_v22 = vpop.eup %12801 }
 0x620   : > { %9141 = vst [vmem:[%s14503_s7 + $0xf0] sm:$0xff] %v12802_v22 }
 0x621   : > { %12807 = vtanh.f32 %v10270_v19  ;;  %v12804_v16 = vpop.eup %12803 }
 0x622   : > { %v7483_v23 = vpop.f32.mrb[68].mxu1  ;;  %9142 = vst [vmem:[%s14503_s7 + $0xf8] sm:$0xff] %v12804_v16  ;;  %v8928_v34 = vpop.f32.mrb[68].mxu0 }
 0x623   : > { %v10271_v20 = vadd.f32 %v14481_v24, %v7483_v23  ;;  %v7485_v25 = vpop.f32.mrb[69].mxu1  ;;  %v8930_v37 = vpop.f32.mrb[69].mxu0 }
 0x624   : > { %v7486_v28 = vpop.f32.mrb[70].mxu1  ;;  %v8931_v13 = vpop.f32.mrb[70].mxu0 }
 0x625   : > { %v10272_v30 = vadd.f32 %v10271_v20, %v8928_v34  ;;  %v10273_v10 = vadd.f32 %v14481_v24, %v7486_v28  ;;  %v7488_v27 = vpop.f32.mrb[71].mxu1  ;;  %v8933_v32 = vpop.f32.mrb[71].mxu0 }
 0x627   : > { %12809 = vtanh.f32 %v10272_v30  ;;  %v10274_v31 = vadd.f32 %v10273_v10, %v8931_v13 }
 0x629   : > { %v12806_v33 = vpop.eup %12805  ;;  %12811 = vtanh.f32 %v10274_v31 }
 0x62a   : > { %9143 = vst [vmem:[%s14503_s7 + $0x100] sm:$0xff] %v12806_v33  ;;  %v7491_v35 = vpop.f32.mrb[72].mxu1  ;;  %v8936_v45 = vpop.f32.mrb[72].mxu0 }
 0x62b   : > { %v12808_v42 = vpop.eup %12807  ;;  %v10275_v36 = vadd.f32 %v14481_v24, %v7491_v35  ;;  %v7493_v39 = vpop.f32.mrb[73].mxu1 }
 0x62c   : > { %9144 = vst [vmem:[%s14503_s7 + $0x108] sm:$0xff] %v12808_v42  ;;  %v8938_v40 = vpop.f32.mrb[73].mxu0  ;;  %v7494_v38 = vpop.f32.mrb[74].mxu1 }
 0x62d   : > { %v10276_v43 = vadd.f32 %v10275_v36, %v8936_v45  ;;  %v10277_v41 = vadd.f32 %v14481_v24, %v7494_v38  ;;  %v8939_v44 = vpop.f32.mrb[74].mxu0  ;;  %v7496_v46 = vpop.f32.mrb[75].mxu1 }
 0x62e   : > { %v8941_v57 = vpop.f32.mrb[75].mxu0 }
 0x62f   : > { %12813 = vtanh.f32 %v10276_v43  ;;  %v10278_v60 = vadd.f32 %v10277_v41, %v8939_v44 }
 0x631   : > { %v12810_v50 = vpop.eup %12809  ;;  %12815 = vtanh.f32 %v10278_v60 }
 0x632   : > { %9145 = vst [vmem:[%s14503_s7 + $0x110] sm:$0xff] %v12810_v50  ;;  %v7499_v47 = vpop.f32.mrb[76].mxu1  ;;  %v8944_v18 = vpop.f32.mrb[76].mxu0 }
 0x633   : > { %v12812_v52 = vpop.eup %12811  ;;  %v10279_v48 = vadd.f32 %v14481_v24, %v7499_v47  ;;  %v7501_v51 = vpop.f32.mrb[77].mxu1 }
 0x634   : > { %9146 = vst [vmem:[%s14503_s7 + $0x118] sm:$0xff] %v12812_v52  ;;  %v8946_v21 = vpop.f32.mrb[77].mxu0  ;;  %v7502_v49 = vpop.f32.mrb[78].mxu1 }
 0x635   : > { %v10280_v1 = vadd.f32 %v10279_v48, %v8944_v18  ;;  %v10281_v53 = vadd.f32 %v14481_v24, %v7502_v49  ;;  %v8947_v54 = vpop.f32.mrb[78].mxu0  ;;  %v7504_v55 = vpop.f32.mrb[79].mxu1 }
 0x636   : > { %v8949_v58 = vpop.f32.mrb[79].mxu0 }
 0x637   : > { %12817 = vtanh.f32 %v10280_v1  ;;  %v10282_v59 = vadd.f32 %v10281_v53, %v8947_v54 }
 0x639   : > { %v12814_v56 = vpop.eup %12813  ;;  %12819 = vtanh.f32 %v10282_v59 }
 0x63a   : > { %9147 = vst [vmem:[%s14503_s7 + $0x120] sm:$0xff] %v12814_v56  ;;  %v7507_v0 = vpop.f32.mrb[80].mxu1  ;;  %v8952_v2 = vpop.f32.mrb[80].mxu0 }
 0x63b   : > { %v12816_v62 = vpop.eup %12815  ;;  %v10283_v61 = vadd.f32 %v14481_v24, %v7507_v0  ;;  %v7509_v63 = vpop.f32.mrb[81].mxu1 }
 0x63c   : > { %9148 = vst [vmem:[%s14503_s7 + $0x128] sm:$0xff] %v12816_v62  ;;  %v8954_v5 = vpop.f32.mrb[81].mxu0  ;;  %v7510_v3 = vpop.f32.mrb[82].mxu1 }
 0x63d   : > { %v10284_v26 = vadd.f32 %v10283_v61, %v8952_v2  ;;  %v10285_v4 = vadd.f32 %v14481_v24, %v7510_v3  ;;  %v8955_v11 = vpop.f32.mrb[82].mxu0  ;;  %v7512_v6 = vpop.f32.mrb[83].mxu1 }
 0x63e   : > { %v8957_v29 = vpop.f32.mrb[83].mxu0 }
 0x63f   : > { %12821 = vtanh.f32 %v10284_v26  ;;  %v10286_v9 = vadd.f32 %v10285_v4, %v8955_v11 }
 0x641   : > { %v12818_v15 = vpop.eup %12817  ;;  %12823 = vtanh.f32 %v10286_v9 }
 0x642   : > { %9149 = vst [vmem:[%s14503_s7 + $0x130] sm:$0xff] %v12818_v15  ;;  %v7515_v7 = vpop.f32.mrb[84].mxu1  ;;  %v8960_v14 = vpop.f32.mrb[84].mxu0 }
 0x643   : > { %v12820_v8 = vpop.eup %12819  ;;  %v10287_v12 = vadd.f32 %v14481_v24, %v7515_v7  ;;  %v7517_v17 = vpop.f32.mrb[85].mxu1 }
 0x644   : > { %9150 = vst [vmem:[%s14503_s7 + $0x138] sm:$0xff] %v12820_v8  ;;  %v8962_v19 = vpop.f32.mrb[85].mxu0  ;;  %v7518_v22 = vpop.f32.mrb[86].mxu1 }
 0x645   : > { %v10288_v16 = vadd.f32 %v10287_v12, %v8960_v14  ;;  %v10289_v23 = vadd.f32 %v14481_v24, %v7518_v22  ;;  %v8963_v20 = vpop.f32.mrb[86].mxu0  ;;  %v7520_v34 = vpop.f32.mrb[87].mxu1 }
 0x646   : > { %v8965_v25 = vpop.f32.mrb[87].mxu0 }
 0x647   : > { %12825 = vtanh.f32 %v10288_v16  ;;  %v10290_v37 = vadd.f32 %v10289_v23, %v8963_v20 }
 0x649   : > { %v12822_v28 = vpop.eup %12821  ;;  %12827 = vtanh.f32 %v10290_v37 }
 0x64a   : > { %9151 = vst [vmem:[%s14503_s7 + $0x140] sm:$0xff] %v12822_v28  ;;  %v7523_v30 = vpop.f32.mrb[88].mxu1  ;;  %v8968_v27 = vpop.f32.mrb[88].mxu0 }
 0x64b   : > { %v12824_v10 = vpop.eup %12823  ;;  %v10291_v13 = vadd.f32 %v14481_v24, %v7523_v30  ;;  %v7525_v32 = vpop.f32.mrb[89].mxu1 }
 0x64c   : > { %9152 = vst [vmem:[%s14503_s7 + $0x148] sm:$0xff] %v12824_v10  ;;  %v8970_v31 = vpop.f32.mrb[89].mxu0  ;;  %v7526_v33 = vpop.f32.mrb[90].mxu1 }
 0x64d   : > { %v10292_v35 = vadd.f32 %v10291_v13, %v8968_v27  ;;  %v10293_v42 = vadd.f32 %v14481_v24, %v7526_v33  ;;  %v8971_v36 = vpop.f32.mrb[90].mxu0  ;;  %v7528_v45 = vpop.f32.mrb[91].mxu1 }
 0x64e   : > { %v8973_v39 = vpop.f32.mrb[91].mxu0 }
 0x64f   : > { %12829 = vtanh.f32 %v10292_v35  ;;  %v10294_v40 = vadd.f32 %v10293_v42, %v8971_v36 }
 0x651   : > { %v12826_v38 = vpop.eup %12825  ;;  %12831 = vtanh.f32 %v10294_v40 }
 0x652   : > { %9153 = vst [vmem:[%s14503_s7 + $0x150] sm:$0xff] %v12826_v38  ;;  %v7531_v43 = vpop.f32.mrb[92].mxu1  ;;  %v8976_v46 = vpop.f32.mrb[92].mxu0 }
 0x653   : > { %v12828_v41 = vpop.eup %12827  ;;  %v10295_v44 = vadd.f32 %v14481_v24, %v7531_v43  ;;  %v7533_v57 = vpop.f32.mrb[93].mxu1 }
 0x654   : > { %9154 = vst [vmem:[%s14503_s7 + $0x158] sm:$0xff] %v12828_v41  ;;  %v8978_v60 = vpop.f32.mrb[93].mxu0  ;;  %v7534_v50 = vpop.f32.mrb[94].mxu1 }
 0x655   : > { %v10296_v47 = vadd.f32 %v10295_v44, %v8976_v46  ;;  %v10297_v52 = vadd.f32 %v14481_v24, %v7534_v50  ;;  %v8979_v48 = vpop.f32.mrb[94].mxu0  ;;  %v7536_v18 = vpop.f32.mrb[95].mxu1 }
 0x656   : > { %v8981_v51 = vpop.f32.mrb[95].mxu0 }
 0x657   : > { %12833 = vtanh.f32 %v10296_v47  ;;  %v10298_v21 = vadd.f32 %v10297_v52, %v8979_v48 }
 0x659   : > { %v12830_v49 = vpop.eup %12829  ;;  %12835 = vtanh.f32 %v10298_v21 }
 0x65a   : > { %9155 = vst [vmem:[%s14503_s7 + $0x160] sm:$0xff] %v12830_v49  ;;  %v7539_v1 = vpop.f32.mrb[96].mxu1  ;;  %v8984_v55 = vpop.f32.mrb[96].mxu0 }
 0x65b   : > { %v12832_v53 = vpop.eup %12831  ;;  %v10299_v54 = vadd.f32 %v14481_v24, %v7539_v1  ;;  %v7541_v58 = vpop.f32.mrb[97].mxu1 }
 0x65c   : > { %9156 = vst [vmem:[%s14503_s7 + $0x168] sm:$0xff] %v12832_v53  ;;  %v8986_v59 = vpop.f32.mrb[97].mxu0  ;;  %v7542_v56 = vpop.f32.mrb[98].mxu1 }
 0x65d   : > { %v10300_v0 = vadd.f32 %v10299_v54, %v8984_v55  ;;  %v10301_v62 = vadd.f32 %v14481_v24, %v7542_v56  ;;  %v8987_v61 = vpop.f32.mrb[98].mxu0  ;;  %v7544_v2 = vpop.f32.mrb[99].mxu1 }
 0x65e   : > { %v8989_v63 = vpop.f32.mrb[99].mxu0 }
 0x65f   : > { %12837 = vtanh.f32 %v10300_v0  ;;  %v10302_v5 = vadd.f32 %v10301_v62, %v8987_v61 }
 0x661   : > { %v12834_v3 = vpop.eup %12833  ;;  %12839 = vtanh.f32 %v10302_v5 }
 0x662   : > { %9157 = vst [vmem:[%s14503_s7 + $0x170] sm:$0xff] %v12834_v3  ;;  %v7547_v26 = vpop.f32.mrb[100].mxu1  ;;  %v8992_v6 = vpop.f32.mrb[100].mxu0 }
 0x663   : > { %v12836_v4 = vpop.eup %12835  ;;  %v10303_v11 = vadd.f32 %v14481_v24, %v7547_v26  ;;  %v7549_v29 = vpop.f32.mrb[101].mxu1 }
 0x664   : > { %9158 = vst [vmem:[%s14503_s7 + $0x178] sm:$0xff] %v12836_v4  ;;  %v8994_v9 = vpop.f32.mrb[101].mxu0  ;;  %v7550_v15 = vpop.f32.mrb[102].mxu1 }
 0x665   : > { %v10304_v7 = vadd.f32 %v10303_v11, %v8992_v6  ;;  %v10305_v8 = vadd.f32 %v14481_v24, %v7550_v15  ;;  %v8995_v12 = vpop.f32.mrb[102].mxu0  ;;  %v7552_v14 = vpop.f32.mrb[103].mxu1 }
 0x666   : > { %v8997_v17 = vpop.f32.mrb[103].mxu0 }
 0x667   : > { %12841 = vtanh.f32 %v10304_v7  ;;  %v10306_v19 = vadd.f32 %v10305_v8, %v8995_v12  ;;  %v12885_v12 = vld [vmem:[%s14677_s2] ss:$0 sm:$0xff] }
 0x669   : > { %v12838_v22 = vpop.eup %12837  ;;  %12843 = vtanh.f32 %v10306_v19 }
 0x66a   : > { %9159 = vst [vmem:[%s14503_s7 + $0x180] sm:$0xff] %v12838_v22  ;;  %v7555_v16 = vpop.f32.mrb[104].mxu1  ;;  %v9000_v34 = vpop.f32.mrb[104].mxu0 }
 0x66b   : > { %v12840_v23 = vpop.eup %12839  ;;  %v10307_v20 = vadd.f32 %v14481_v24, %v7555_v16  ;;  %v7557_v25 = vpop.f32.mrb[105].mxu1 }
 0x66c   : > { %9160 = vst [vmem:[%s14503_s7 + $0x188] sm:$0xff] %v12840_v23  ;;  %v9002_v37 = vpop.f32.mrb[105].mxu0  ;;  %v7558_v28 = vpop.f32.mrb[106].mxu1 }
 0x66d   : > { %v10308_v30 = vadd.f32 %v10307_v20, %v9000_v34  ;;  %v10309_v10 = vadd.f32 %v14481_v24, %v7558_v28  ;;  %v9003_v13 = vpop.f32.mrb[106].mxu0  ;;  %v7560_v27 = vpop.f32.mrb[107].mxu1 }
 0x66e   : > { %v9005_v32 = vpop.f32.mrb[107].mxu0 }
 0x66f   : > { %12845 = vtanh.f32 %v10308_v30  ;;  %v10310_v31 = vadd.f32 %v10309_v10, %v9003_v13 }
 0x671   : > { %v12842_v33 = vpop.eup %12841  ;;  %12847 = vtanh.f32 %v10310_v31 }
 0x672   : > { %9161 = vst [vmem:[%s14503_s7 + $0x190] sm:$0xff] %v12842_v33  ;;  %v7563_v35 = vpop.f32.mrb[108].mxu1  ;;  %v9008_v45 = vpop.f32.mrb[108].mxu0 }
 0x673   : > { %v12844_v42 = vpop.eup %12843  ;;  %v10311_v36 = vadd.f32 %v14481_v24, %v7563_v35  ;;  %v7565_v39 = vpop.f32.mrb[109].mxu1 }
 0x674   : > { %9162 = vst [vmem:[%s14503_s7 + $0x198] sm:$0xff] %v12844_v42  ;;  %v9010_v40 = vpop.f32.mrb[109].mxu0  ;;  %v7566_v38 = vpop.f32.mrb[110].mxu1 }
 0x675   : > { %v10312_v43 = vadd.f32 %v10311_v36, %v9008_v45  ;;  %v10313_v41 = vadd.f32 %v14481_v24, %v7566_v38  ;;  %v9011_v44 = vpop.f32.mrb[110].mxu0  ;;  %v7568_v46 = vpop.f32.mrb[111].mxu1 }
 0x676   : > { %v9013_v57 = vpop.f32.mrb[111].mxu0 }
 0x677   : > { %12849 = vtanh.f32 %v10312_v43  ;;  %v10314_v60 = vadd.f32 %v10313_v41, %v9011_v44 }
 0x679   : > { %v12846_v50 = vpop.eup %12845  ;;  %12851 = vtanh.f32 %v10314_v60 }
 0x67a   : > { %9163 = vst [vmem:[%s14503_s7 + $0x1a0] sm:$0xff] %v12846_v50  ;;  %v7571_v47 = vpop.f32.mrb[112].mxu1  ;;  %v9016_v18 = vpop.f32.mrb[112].mxu0 }
 0x67b   : > { %v12848_v52 = vpop.eup %12847  ;;  %v10315_v48 = vadd.f32 %v14481_v24, %v7571_v47  ;;  %v7573_v51 = vpop.f32.mrb[113].mxu1 }
 0x67c   : > { %9164 = vst [vmem:[%s14503_s7 + $0x1a8] sm:$0xff] %v12848_v52  ;;  %v9018_v21 = vpop.f32.mrb[113].mxu0  ;;  %v7574_v49 = vpop.f32.mrb[114].mxu1 }
 0x67d   : > { %v10316_v1 = vadd.f32 %v10315_v48, %v9016_v18  ;;  %v10317_v53 = vadd.f32 %v14481_v24, %v7574_v49  ;;  %v9019_v54 = vpop.f32.mrb[114].mxu0  ;;  %v7576_v55 = vpop.f32.mrb[115].mxu1 }
 0x67e   : > { %v9021_v58 = vpop.f32.mrb[115].mxu0 }
 0x67f   : > { %12853 = vtanh.f32 %v10316_v1  ;;  %v10318_v59 = vadd.f32 %v10317_v53, %v9019_v54 }
 0x681   : > { %v12850_v56 = vpop.eup %12849  ;;  %12855 = vtanh.f32 %v10318_v59 }
 0x682   : > { %9165 = vst [vmem:[%s14503_s7 + $0x1b0] sm:$0xff] %v12850_v56  ;;  %v7579_v0 = vpop.f32.mrb[116].mxu1  ;;  %v9024_v2 = vpop.f32.mrb[116].mxu0 }
 0x683   : > { %v12852_v62 = vpop.eup %12851  ;;  %v10319_v61 = vadd.f32 %v14481_v24, %v7579_v0  ;;  %v7581_v63 = vpop.f32.mrb[117].mxu1 }
 0x684   : > { %9166 = vst [vmem:[%s14503_s7 + $0x1b8] sm:$0xff] %v12852_v62  ;;  %v9026_v5 = vpop.f32.mrb[117].mxu0  ;;  %v7582_v3 = vpop.f32.mrb[118].mxu1 }
 0x685   : > { %v10320_v26 = vadd.f32 %v10319_v61, %v9024_v2  ;;  %v10321_v4 = vadd.f32 %v14481_v24, %v7582_v3  ;;  %v9027_v11 = vpop.f32.mrb[118].mxu0  ;;  %v7584_v6 = vpop.f32.mrb[119].mxu1 }
 0x686   : > { %v9029_v29 = vpop.f32.mrb[119].mxu0 }
 0x687   : > { %12857 = vtanh.f32 %v10320_v26  ;;  %v10322_v9 = vadd.f32 %v10321_v4, %v9027_v11 }
 0x689   : > { %v12854_v15 = vpop.eup %12853  ;;  %12859 = vtanh.f32 %v10322_v9 }
 0x68a   : > { %9167 = vst [vmem:[%s14503_s7 + $0x1c0] sm:$0xff] %v12854_v15  ;;  %v7587_v7 = vpop.f32.mrb[120].mxu1  ;;  %v9032_v17 = vpop.f32.mrb[120].mxu0 }
 0x68b   : > { %v12856_v8 = vpop.eup %12855  ;;  %v10323_v14 = vadd.f32 %v12885_v12, %v7587_v7  ;;  %v7589_v19 = vpop.f32.mrb[121].mxu1 }
 0x68c   : > { %9168 = vst [vmem:[%s14503_s7 + $0x1c8] sm:$0xff] %v12856_v8  ;;  %v9034_v24 = vpop.f32.mrb[121].mxu0  ;;  %v7590_v22 = vpop.f32.mrb[122].mxu1 }
 0x68d   : > { %v10324_v16 = vadd.f32 %v10323_v14, %v9032_v17  ;;  %v10325_v23 = vadd.f32 %v12885_v12, %v7590_v22  ;;  %v9035_v20 = vpop.f32.mrb[122].mxu0  ;;  %v7592_v34 = vpop.f32.mrb[123].mxu1 }
 0x68e   : > { %v9037_v25 = vpop.f32.mrb[123].mxu0 }
 0x68f   : > { %12861 = vtanh.f32 %v10324_v16  ;;  %v10326_v37 = vadd.f32 %v10325_v23, %v9035_v20 }
 0x691   : > { %v12858_v28 = vpop.eup %12857  ;;  %12863 = vtanh.f32 %v10326_v37 }
 0x692   : > { %9169 = vst [vmem:[%s14503_s7 + $0x1d0] sm:$0xff] %v12858_v28  ;;  %v7595_v30 = vpop.f32.mrb[124].mxu1  ;;  %v9040_v27 = vpop.f32.mrb[124].mxu0 }
 0x693   : > { %v12860_v10 = vpop.eup %12859  ;;  %v10327_v13 = vadd.f32 %v12885_v12, %v7595_v30  ;;  %v7597_v32 = vpop.f32.mrb[125].mxu1 }
 0x694   : > { %9170 = vst [vmem:[%s14503_s7 + $0x1d8] sm:$0xff] %v12860_v10  ;;  %v9042_v31 = vpop.f32.mrb[125].mxu0  ;;  %v7598_v33 = vpop.f32.mrb[126].mxu1 }
 0x695   : > { %v10328_v35 = vadd.f32 %v10327_v13, %v9040_v27  ;;  %v10329_v42 = vadd.f32 %v12885_v12, %v7598_v33  ;;  %v9043_v36 = vpop.f32.mrb[126].mxu0  ;;  %v7600_v45 = vpop.f32.mrb[127].mxu1 }
 0x696   : > { %v9045_v39 = vpop.f32.mrb[127].mxu0 }
 0x697   : > { %12865 = vtanh.f32 %v10328_v35  ;;  %v10330_v40 = vadd.f32 %v10329_v42, %v9043_v36 }
 0x699   : > { %v12862_v38 = vpop.eup %12861  ;;  %12867 = vtanh.f32 %v10330_v40 }
 0x69a   : > { %9171 = vst [vmem:[%s14503_s7 + $0x1e0] sm:$0xff] %v12862_v38 }
 0x69b   : > { %v12864_v43 = vpop.eup %12863 }
 0x69c   : > { %9172 = vst [vmem:[%s14503_s7 + $0x1e8] sm:$0xff] %v12864_v43 }
 0x6a1   : > { %v12866_v41 = vpop.eup %12865 }
 0x6a2   : > { %9173 = vst [vmem:[%s14503_s7 + $0x1f0] sm:$0xff] %v12866_v41 }
 0x6a3   : > { %v12868_v44 = vpop.eup %12867 }
 0x6a4   : > { %9174 = vst [vmem:[%s14503_s7 + $0x1f8] sm:$0xff] %v12868_v44 }
 0x6a5 PF: > { %s13_s14 = sadd.s32 1, %s12908_s14   ;;  %s14679_s12 = smov %s12904_s13 }
 0x6a6   : > { %p10_p5 = scmp.ge.s32.totalorder %s13_s14, 10   ;;  %s14680_s13 = smov %s14682_s15 }
 0x6a8   :  { %12 = sbr.rel (!%p10_p5) target bundleno = 2 (0x2), region = 68 }

</bundles_post_ra>
